<compile_context>
chip_gen: v7x
topology: tpu7x:2x2x1
jax: 0.10.0
libtpu: 0.0.40
codegen_flags: <defaults>
</compile_context>

<pallas_src>
import functools
import math

import jax
import jax.numpy as jnp
import numpy as np
from jax.experimental import pallas as pl
from jax.experimental.pallas import tpu as pltpu


def _sublane_rows(dtype):
    # Rows in one sublane tile for this dtype: f32 -> 8, bf16 -> 16.
    return 8 * (4 // jnp.dtype(dtype).itemsize)


def _lcm(a, b):
    return a * b // math.gcd(a, b)


def _im2col_plan(ksize, cin, compute_dtype, k_multiple):
    """Row layout of the packed patch matrix for one conv.

    Rows are (tap, cin)-major.  Taps are padded with zero taps so that
      * each store covers whole sublane tiles (`group_taps` taps per store), and
      * total K is a multiple of `k_multiple` (MXU cadence),
    with matching zero columns in the packed weights.
    """
    taps = ksize * ksize
    sub = _sublane_rows(compute_dtype)
    group_taps = sub // math.gcd(sub, cin)          # smallest g with g*cin % sub == 0
    group_rows = group_taps * cin
    k_align = _lcm(group_rows, k_multiple)
    k_padded = ((taps * cin + k_align - 1) // k_align) * k_align
    return dict(ksize=ksize, cin=cin, taps=taps, taps_padded=k_padded // cin,
                group_taps=group_taps, k_padded=k_padded)


def _srcnn_kernel(x_ref, w1_ref, b1_ref, w2_ref, b2_ref, w3_ref, b3_ref,
                  o_ref, p1_ref, p3_ref, *, H, W, C, Nb, plan1, plan3):
    """Fused SRCNN forward for Nb images (one grid step).

    x_ref  : (1, Nb*C, H*W)   input images, spatially flattened (f32)
    w*_ref : (Cout, Kpad)     pre-packed conv weights (compute dtype)
    b*_ref : (Cout, 1)        biases (f32)
    o_ref  : (1, Nb*C, H*W)   output images
    p1_ref : (K1pad, Nb*H*W)  VMEM scratch: conv1 im2col patches (compute dtype)
    p3_ref : (K3pad, Nb*H*W)  VMEM scratch: conv3 im2col patches (compute dtype)
    """
    HW = H * W
    cdt = w1_ref.dtype                                  # MXU compute dtype (bf16/f32)

    # [review #2] Per-dw horizontal boundary masks, built ONCE per grid step and
    # already broadcast to the patch shape (used as multiplicands: one vmul/tap).
    col = jax.lax.broadcasted_iota(jnp.int32, (1, HW), 1) % W

    def make_masks(ksize, cin):
        r = ksize // 2
        m = {}
        for dw in range(-r, r + 1):
            if dw == 0:
                continue
            valid = (col + dw >= 0) & (col + dw < W)
            m[dw] = jnp.broadcast_to(valid, (cin, HW)).astype(cdt)
        return m

    masks1 = make_masks(plan1["ksize"], plan1["cin"])
    masks3 = make_masks(plan3["ksize"], plan3["cin"])

    def shift_flat(a, delta):
        # s[:, p] = a[:, p + delta] if 0 <= p + delta < HW else 0  (static delta).
        # Pure lane-axis slice + zero fill; the zero fill realizes the conv's
        # vertical zero padding, the masks above handle the horizontal padding.
        if delta == 0:
            return a
        pad = jnp.zeros((a.shape[0], abs(delta)), a.dtype)
        if delta > 0:
            return jnp.concatenate([a[:, delta:], pad], axis=1)
        return jnp.concatenate([pad, a[:, :HW + delta]], axis=1)

    def im2col(a, plan, masks, p_ref, col0):
        # a: (cin, HW) in compute dtype.  Writes this image's (k_padded, HW) patch
        # matrix into columns [col0, col0+HW) of p_ref; row order (kh, kw, cin)
        # matches the packed weights.  [review #1] taps are concatenated in
        # registers into sublane-aligned groups -> every store is unmasked.
        ksize, cin = plan["ksize"], plan["cin"]
        taps, taps_padded, group_taps = plan["taps"], plan["taps_padded"], plan["group_taps"]
        r = ksize // 2
        offs = [(dh, dw) for dh in range(-r, r + 1) for dw in range(-r, r + 1)]
        zero_patch = jnp.zeros((cin, HW), a.dtype)
        for g in range(taps_padded // group_taps):
            lo, hi = g * group_taps, (g + 1) * group_taps
            parts = []
            for t in range(lo, hi):
                if t < taps:
                    dh, dw = offs[t]
                    patch = shift_flat(a, dh * W + dw)
                    if dw != 0:
                        patch = patch * masks[dw]
                    parts.append(patch)
                else:
                    parts.append(zero_patch)           # zero pad taps (zero weight cols)
            blk = parts[0] if len(parts) == 1 else jnp.concatenate(parts, axis=0)
            p_ref[lo * cin:hi * cin, col0:col0 + HW] = blk

    # [review #3] cast the whole input block to the compute dtype once, so the
    # conv1 tap loop runs packed.
    x_blk = x_ref[0].astype(cdt)                        # (Nb*C, HW)

    # conv1 im2col: per image (vertical zero padding stays per-image), each image
    # writing its own 256-lane column band of the shared patch matrix.
    for img in range(Nb):
        a = x_blk[img * C:(img + 1) * C, :]             # (C, HW)
        im2col(a, plan1, masks1, p1_ref, img * HW)

    # conv1: 9x9, C -> 64, pad 4, ReLU.  ONE MXU matmul for all Nb images.
    h1 = jnp.dot(w1_ref[...], p1_ref[...], preferred_element_type=jnp.float32)
    h1 = jnp.maximum(h1 + b1_ref[...], 0.0)             # (64, Nb*HW), f32 epilogue

    # conv2: 1x1, 64 -> 32, ReLU  (plain matmul, already fused across images).
    h2 = jnp.dot(w2_ref[...], h1.astype(cdt), preferred_element_type=jnp.float32)
    h2 = jnp.maximum(h2 + b2_ref[...], 0.0)             # (32, Nb*HW), f32
    h2c = h2.astype(cdt)                                # cast ONCE before conv3 im2col

    # conv3: 5x5, 32 -> C, pad 2.
    for img in range(Nb):
        im2col(h2c[:, img * HW:(img + 1) * HW], plan3, masks3, p3_ref, img * HW)
    y = jnp.dot(w3_ref[...], p3_ref[...], preferred_element_type=jnp.float32)
    y = y + b3_ref[...]                                 # (C, Nb*HW), f32

    # [review #4] re-pack (C, Nb*HW) -> (Nb*C, HW) in registers (aligned 256-lane
    # slices) so the single output store is an unmasked >=8-sublane vst.
    o_blk = jnp.concatenate([y[:, i * HW:(i + 1) * HW] for i in range(Nb)], axis=0)
    o_ref[0] = o_blk.astype(o_ref.dtype)


def _pack_weight(w, dtype, k_padded=None):
    # PyTorch (Cout, Cin, KH, KW) -> (Cout, KH*KW*Cin), row order (kh, kw, cin),
    # zero-padded along K to k_padded (matches the zero pad rows of the patches).
    co, ci, kh, kw = w.shape
    wp = jnp.transpose(w, (0, 2, 3, 1)).reshape(co, kh * kw * ci)
    if k_padded is not None and k_padded > kh * kw * ci:
        wp = jnp.pad(wp, ((0, 0), (0, k_padded - kh * kw * ci)))
    return wp.astype(dtype)


@functools.partial(jax.jit, static_argnames=("compute_dtype", "images_per_step"))
def srcnn_forward(x_nchw, params, *, compute_dtype=jnp.bfloat16, images_per_step=None):
    """SRCNN forward: relu(conv1 9x9) -> relu(conv2 1x1) -> conv3 5x5.

    x_nchw: (N, C, H, W) float32 (PyTorch convention).  Returns (N, C, H, W).
    All three convolutions run fused in a single Pallas kernel.  `compute_dtype`
    selects the MXU input dtype (bf16 default; use f32 on v5e); accumulation f32.
    """
    (w1, b1), (w2, b2), (w3, b3) = params
    N, C, H, W = x_nchw.shape
    HW = H * W

    # [review #4] images per grid step: amortize the per-step overhead / weight
    # pushes and make the (Nb*C, HW) output store sublane-aligned when possible.
    if images_per_step is None:
        divs = [d for d in range(1, min(N, 8) + 1) if N % d == 0]
        aligned = [d for d in divs if (d * C) % 8 == 0]
        Nb = max(aligned) if aligned else max(divs)
    else:
        Nb = images_per_step
    assert N % Nb == 0, "images_per_step must divide the batch"

    plan1 = _im2col_plan(9, C, compute_dtype, k_multiple=128)   # [review #8]
    plan3 = _im2col_plan(5, 32, compute_dtype, k_multiple=1)
    K1, K3 = plan1["k_padded"], plan3["k_padded"]

    w1p = _pack_weight(w1, compute_dtype, K1)           # (64, K1)
    w2p = _pack_weight(w2, compute_dtype)               # (32, 64)
    w3p = _pack_weight(w3, compute_dtype, K3)           # (C, K3)
    b1c = b1.reshape(-1, 1).astype(jnp.float32)
    b2c = b2.reshape(-1, 1).astype(jnp.float32)
    b3c = b3.reshape(-1, 1).astype(jnp.float32)

    # Free reshapes (adjacent-axis merges only, no transpose).
    x_blk = x_nchw.reshape(N // Nb, Nb * C, HW)

    kernel = functools.partial(_srcnn_kernel, H=H, W=W, C=C, Nb=Nb,
                               plan1=plan1, plan3=plan3)
    const = lambda n: (0, 0)
    out = pl.pallas_call(
        kernel,
        out_shape=jax.ShapeDtypeStruct((N // Nb, Nb * C, HW), x_nchw.dtype),
        grid=(N // Nb,),
        in_specs=[
            pl.BlockSpec((1, Nb * C, HW), lambda n: (n, 0, 0)),
            pl.BlockSpec((64, K1), const),
            pl.BlockSpec((64, 1), const),
            pl.BlockSpec((32, 64), const),
            pl.BlockSpec((32, 1), const),
            pl.BlockSpec((C, K3), const),
            pl.BlockSpec((C, 1), const),
        ],
        out_specs=pl.BlockSpec((1, Nb * C, HW), lambda n: (n, 0, 0)),
        scratch_shapes=[
            pltpu.VMEM((K1, Nb * HW), compute_dtype),   # conv1 im2col patches
            pltpu.VMEM((K3, Nb * HW), compute_dtype),   # conv3 im2col patches
        ],
        compiler_params=pltpu.CompilerParams(
            dimension_semantics=("parallel",)),         # v7x: steps split across TCs
    )(x_blk, w1p, b1c, w2p, b2c, w3p, b3c)
    return out.reshape(N, C, H, W)


def init_srcnn_params(key, num_channels):
    """Matches SRCNN._initialize_weights: normal(std=0.001) weights, zero biases.
    Weights are stored in the PyTorch (Cout, Cin, KH, KW) layout."""
    k1, k2, k3 = jax.random.split(key, 3)
    std = 0.001
    w1 = std * jax.random.normal(k1, (64, num_channels, 9, 9), jnp.float32)
    w2 = std * jax.random.normal(k2, (32, 64, 1, 1), jnp.float32)
    w3 = std * jax.random.normal(k3, (num_channels, 32, 5, 5), jnp.float32)
    zeros = lambda c: jnp.zeros((c,), jnp.float32)
    return (w1, zeros(64)), (w2, zeros(32)), (w3, zeros(num_channels))


def _reference_forward(x_nchw, params):
    """Pure-JAX reference (lax.conv) for correctness checking."""
    (w1, b1), (w2, b2), (w3, b3) = params

    def conv(x, w, b, pad):
        y = jax.lax.conv_general_dilated(
            x, w, window_strides=(1, 1), padding=((pad, pad), (pad, pad)),
            dimension_numbers=("NCHW", "OIHW", "NCHW"))
        return y + b[None, :, None, None]

    h = jnp.maximum(conv(x_nchw, w1, b1, 4), 0.0)
    h = jnp.maximum(conv(h, w2, b2, 0), 0.0)
    return conv(h, w3, b3, 2)


if __name__ == "__main__":
    num_channels = 4
    N, H, W = 2, 16, 16

    key = jax.random.PRNGKey(0)
    kx, kp, kb1, kb2, kb3 = jax.random.split(key, 5)
    x = jax.random.normal(kx, (N, num_channels, H, W), jnp.float32)  # NCHW
    (w1, _), (w2, _), (w3, _) = init_srcnn_params(kp, num_channels)
    # Test-only: non-zero biases so the bias-add path is actually exercised
    # (the module's init zeroes them, which would make bias bugs invisible).
    params = ((w1, 1e-3 * jax.random.normal(kb1, (64,), jnp.float32)),
              (w2, 1e-3 * jax.random.normal(kb2, (32,), jnp.float32)),
              (w3, 1e-3 * jax.random.normal(kb3, (num_channels,), jnp.float32)))

    ref = _reference_forward(x, params)

    # f32 compute path: tight match with the lax.conv reference.
    out_f32 = jax.block_until_ready(srcnn_forward(x, params, compute_dtype=jnp.float32))
    assert out_f32.shape == (N, num_channels, H, W)
    np.testing.assert_allclose(np.asarray(out_f32), np.asarray(ref), rtol=1e-3, atol=1e-6)

    # Default bf16-MXU path (f32 accumulation): looser tolerance.
    out = jax.block_until_ready(srcnn_forward(x, params))
    assert out.shape == (N, num_channels, H, W)
    np.testing.assert_allclose(np.asarray(out), np.asarray(ref), rtol=5e-2, atol=2e-6)

    # Also exercise the single-image-per-step path (grid=2, both TCs on v7x).
    out_1 = jax.block_until_ready(srcnn_forward(x, params, images_per_step=1))
    np.testing.assert_allclose(np.asarray(out_1), np.asarray(ref), rtol=5e-2, atol=2e-6)

    print("KERNEL_OK")
</pallas_src>

<mosaic_0001>
module attributes {stable_mosaic.version = 11 : i64} {
  func.func @_srcnn_kernel(%arg0: i32, %arg1: memref<1x8x256xf32, #tpu.memory_space<vmem>>, %arg2: memref<64x384xf32, #tpu.memory_space<vmem>>, %arg3: memref<64x1xf32, #tpu.memory_space<vmem>>, %arg4: memref<32x64xf32, #tpu.memory_space<vmem>>, %arg5: memref<32x1xf32, #tpu.memory_space<vmem>>, %arg6: memref<4x800xf32, #tpu.memory_space<vmem>>, %arg7: memref<4x1xf32, #tpu.memory_space<vmem>>, %arg8: memref<1x8x256xf32, #tpu.memory_space<vmem>>, %arg9: memref<384x512xf32, #tpu.memory_space<vmem>>, %arg10: memref<800x512xf32, #tpu.memory_space<vmem>>) attributes {dimension_semantics = [#tpu.dimension_semantics<parallel>], iteration_bounds = array<i64: 1>, scalar_prefetch = 0 : i64, scratch_operands = 2 : i64, tpu.core_type = #tpu.core_type<tc>, window_params = [{transform_indices = @transform_0, window_bounds = array<i64: 1, 8, 256>}, {pipeline_mode = #tpu.pipeline_mode<synchronous>, transform_indices = @transform_1, window_bounds = array<i64: 64, 384>}, {pipeline_mode = #tpu.pipeline_mode<synchronous>, transform_indices = @transform_2, window_bounds = array<i64: 64, 1>}, {pipeline_mode = #tpu.pipeline_mode<synchronous>, transform_indices = @transform_3, window_bounds = array<i64: 32, 64>}, {pipeline_mode = #tpu.pipeline_mode<synchronous>, transform_indices = @transform_4, window_bounds = array<i64: 32, 1>}, {pipeline_mode = #tpu.pipeline_mode<synchronous>, transform_indices = @transform_5, window_bounds = array<i64: 4, 800>}, {pipeline_mode = #tpu.pipeline_mode<synchronous>, transform_indices = @transform_6, window_bounds = array<i64: 4, 1>}, {transform_indices = @transform_7, window_bounds = array<i64: 1, 8, 256>}]} {
    %0 = tpu.iota {dimensions = array<i32: 1>} : vector<1x256xi32>
    %c16_i32 = arith.constant 16 : i32
    %c0_i32 = arith.constant 0 : i32
    %1 = arith.cmpi eq, %c16_i32, %c0_i32 : i32
    %c1_i32 = arith.constant 1 : i32
    %2 = arith.select %1, %c1_i32, %c16_i32 : i32
    %3 = vector.broadcast %2 : i32 to vector<1x256xi32>
    %4 = arith.remsi %0, %3 : vector<1x256xi32>
    %c0_i32_0 = arith.constant 0 : i32
    %5 = vector.broadcast %c0_i32_0 : i32 to vector<1x256xi32>
    %6 = arith.cmpi ne, %4, %5 : vector<1x256xi32>
    %c0_i32_1 = arith.constant 0 : i32
    %7 = vector.broadcast %c0_i32_1 : i32 to vector<1x256xi32>
    %8 = arith.cmpi slt, %4, %7 : vector<1x256xi32>
    %c0_i32_2 = arith.constant 0 : i32
    %9 = arith.cmpi slt, %2, %c0_i32_2 : i32
    %10 = vector.broadcast %9 : i1 to vector<1x256xi1>
    %11 = vector.broadcast %10 : vector<1x256xi1> to vector<1x256xi1>
    %12 = arith.xori %8, %11 : vector<1x256xi1>
    %13 = arith.andi %12, %6 : vector<1x256xi1>
    %14 = vector.broadcast %2 : i32 to vector<1x256xi32>
    %15 = arith.addi %4, %14 : vector<1x256xi32>
    %16 = arith.select %13, %15, %4 : vector<1x256xi1>, vector<1x256xi32>
    %c-4_i32 = arith.constant -4 : i32
    %17 = vector.broadcast %c-4_i32 : i32 to vector<1x256xi32>
    %18 = arith.addi %16, %17 : vector<1x256xi32>
    %c0_i32_3 = arith.constant 0 : i32
    %19 = vector.broadcast %c0_i32_3 : i32 to vector<1x256xi32>
    %20 = arith.cmpi sge, %18, %19 : vector<1x256xi32>
    %c-4_i32_4 = arith.constant -4 : i32
    %21 = vector.broadcast %c-4_i32_4 : i32 to vector<1x256xi32>
    %22 = arith.addi %16, %21 : vector<1x256xi32>
    %c16_i32_5 = arith.constant 16 : i32
    %23 = vector.broadcast %c16_i32_5 : i32 to vector<1x256xi32>
    %24 = arith.cmpi slt, %22, %23 : vector<1x256xi32>
    %25 = arith.andi %20, %24 : vector<1x256xi1>
    %26 = vector.shape_cast %25 : vector<1x256xi1> to vector<1x256xi1>
    %27 = vector.broadcast %26 : vector<1x256xi1> to vector<4x256xi1>
    %28 = arith.extui %27 : vector<4x256xi1> to vector<4x256xi32>
    %29 = arith.sitofp %28 : vector<4x256xi32> to vector<4x256xf32>
    %c-3_i32 = arith.constant -3 : i32
    %30 = vector.broadcast %c-3_i32 : i32 to vector<1x256xi32>
    %31 = arith.addi %16, %30 : vector<1x256xi32>
    %c0_i32_6 = arith.constant 0 : i32
    %32 = vector.broadcast %c0_i32_6 : i32 to vector<1x256xi32>
    %33 = arith.cmpi sge, %31, %32 : vector<1x256xi32>
    %c-3_i32_7 = arith.constant -3 : i32
    %34 = vector.broadcast %c-3_i32_7 : i32 to vector<1x256xi32>
    %35 = arith.addi %16, %34 : vector<1x256xi32>
    %c16_i32_8 = arith.constant 16 : i32
    %36 = vector.broadcast %c16_i32_8 : i32 to vector<1x256xi32>
    %37 = arith.cmpi slt, %35, %36 : vector<1x256xi32>
    %38 = arith.andi %33, %37 : vector<1x256xi1>
    %39 = vector.shape_cast %38 : vector<1x256xi1> to vector<1x256xi1>
    %40 = vector.broadcast %39 : vector<1x256xi1> to vector<4x256xi1>
    %41 = arith.extui %40 : vector<4x256xi1> to vector<4x256xi32>
    %42 = arith.sitofp %41 : vector<4x256xi32> to vector<4x256xf32>
    %c-2_i32 = arith.constant -2 : i32
    %43 = vector.broadcast %c-2_i32 : i32 to vector<1x256xi32>
    %44 = arith.addi %16, %43 : vector<1x256xi32>
    %c0_i32_9 = arith.constant 0 : i32
    %45 = vector.broadcast %c0_i32_9 : i32 to vector<1x256xi32>
    %46 = arith.cmpi sge, %44, %45 : vector<1x256xi32>
    %c-2_i32_10 = arith.constant -2 : i32
    %47 = vector.broadcast %c-2_i32_10 : i32 to vector<1x256xi32>
    %48 = arith.addi %16, %47 : vector<1x256xi32>
    %c16_i32_11 = arith.constant 16 : i32
    %49 = vector.broadcast %c16_i32_11 : i32 to vector<1x256xi32>
    %50 = arith.cmpi slt, %48, %49 : vector<1x256xi32>
    %51 = arith.andi %46, %50 : vector<1x256xi1>
    %52 = vector.shape_cast %51 : vector<1x256xi1> to vector<1x256xi1>
    %53 = vector.broadcast %52 : vector<1x256xi1> to vector<4x256xi1>
    %54 = arith.extui %53 : vector<4x256xi1> to vector<4x256xi32>
    %55 = arith.sitofp %54 : vector<4x256xi32> to vector<4x256xf32>
    %c-1_i32 = arith.constant -1 : i32
    %56 = vector.broadcast %c-1_i32 : i32 to vector<1x256xi32>
    %57 = arith.addi %16, %56 : vector<1x256xi32>
    %c0_i32_12 = arith.constant 0 : i32
    %58 = vector.broadcast %c0_i32_12 : i32 to vector<1x256xi32>
    %59 = arith.cmpi sge, %57, %58 : vector<1x256xi32>
    %c-1_i32_13 = arith.constant -1 : i32
    %60 = vector.broadcast %c-1_i32_13 : i32 to vector<1x256xi32>
    %61 = arith.addi %16, %60 : vector<1x256xi32>
    %c16_i32_14 = arith.constant 16 : i32
    %62 = vector.broadcast %c16_i32_14 : i32 to vector<1x256xi32>
    %63 = arith.cmpi slt, %61, %62 : vector<1x256xi32>
    %64 = arith.andi %59, %63 : vector<1x256xi1>
    %65 = vector.shape_cast %64 : vector<1x256xi1> to vector<1x256xi1>
    %66 = vector.broadcast %65 : vector<1x256xi1> to vector<4x256xi1>
    %67 = arith.extui %66 : vector<4x256xi1> to vector<4x256xi32>
    %68 = arith.sitofp %67 : vector<4x256xi32> to vector<4x256xf32>
    %c1_i32_15 = arith.constant 1 : i32
    %69 = vector.broadcast %c1_i32_15 : i32 to vector<1x256xi32>
    %70 = arith.addi %16, %69 : vector<1x256xi32>
    %c0_i32_16 = arith.constant 0 : i32
    %71 = vector.broadcast %c0_i32_16 : i32 to vector<1x256xi32>
    %72 = arith.cmpi sge, %70, %71 : vector<1x256xi32>
    %c1_i32_17 = arith.constant 1 : i32
    %73 = vector.broadcast %c1_i32_17 : i32 to vector<1x256xi32>
    %74 = arith.addi %16, %73 : vector<1x256xi32>
    %c16_i32_18 = arith.constant 16 : i32
    %75 = vector.broadcast %c16_i32_18 : i32 to vector<1x256xi32>
    %76 = arith.cmpi slt, %74, %75 : vector<1x256xi32>
    %77 = arith.andi %72, %76 : vector<1x256xi1>
    %78 = vector.shape_cast %77 : vector<1x256xi1> to vector<1x256xi1>
    %79 = vector.broadcast %78 : vector<1x256xi1> to vector<4x256xi1>
    %80 = arith.extui %79 : vector<4x256xi1> to vector<4x256xi32>
    %81 = arith.sitofp %80 : vector<4x256xi32> to vector<4x256xf32>
    %c2_i32 = arith.constant 2 : i32
    %82 = vector.broadcast %c2_i32 : i32 to vector<1x256xi32>
    %83 = arith.addi %16, %82 : vector<1x256xi32>
    %c0_i32_19 = arith.constant 0 : i32
    %84 = vector.broadcast %c0_i32_19 : i32 to vector<1x256xi32>
    %85 = arith.cmpi sge, %83, %84 : vector<1x256xi32>
    %c2_i32_20 = arith.constant 2 : i32
    %86 = vector.broadcast %c2_i32_20 : i32 to vector<1x256xi32>
    %87 = arith.addi %16, %86 : vector<1x256xi32>
    %c16_i32_21 = arith.constant 16 : i32
    %88 = vector.broadcast %c16_i32_21 : i32 to vector<1x256xi32>
    %89 = arith.cmpi slt, %87, %88 : vector<1x256xi32>
    %90 = arith.andi %85, %89 : vector<1x256xi1>
    %91 = vector.shape_cast %90 : vector<1x256xi1> to vector<1x256xi1>
    %92 = vector.broadcast %91 : vector<1x256xi1> to vector<4x256xi1>
    %93 = arith.extui %92 : vector<4x256xi1> to vector<4x256xi32>
    %94 = arith.sitofp %93 : vector<4x256xi32> to vector<4x256xf32>
    %c3_i32 = arith.constant 3 : i32
    %95 = vector.broadcast %c3_i32 : i32 to vector<1x256xi32>
    %96 = arith.addi %16, %95 : vector<1x256xi32>
    %c0_i32_22 = arith.constant 0 : i32
    %97 = vector.broadcast %c0_i32_22 : i32 to vector<1x256xi32>
    %98 = arith.cmpi sge, %96, %97 : vector<1x256xi32>
    %c3_i32_23 = arith.constant 3 : i32
    %99 = vector.broadcast %c3_i32_23 : i32 to vector<1x256xi32>
    %100 = arith.addi %16, %99 : vector<1x256xi32>
    %c16_i32_24 = arith.constant 16 : i32
    %101 = vector.broadcast %c16_i32_24 : i32 to vector<1x256xi32>
    %102 = arith.cmpi slt, %100, %101 : vector<1x256xi32>
    %103 = arith.andi %98, %102 : vector<1x256xi1>
    %104 = vector.shape_cast %103 : vector<1x256xi1> to vector<1x256xi1>
    %105 = vector.broadcast %104 : vector<1x256xi1> to vector<4x256xi1>
    %106 = arith.extui %105 : vector<4x256xi1> to vector<4x256xi32>
    %107 = arith.sitofp %106 : vector<4x256xi32> to vector<4x256xf32>
    %c4_i32 = arith.constant 4 : i32
    %108 = vector.broadcast %c4_i32 : i32 to vector<1x256xi32>
    %109 = arith.addi %16, %108 : vector<1x256xi32>
    %c0_i32_25 = arith.constant 0 : i32
    %110 = vector.broadcast %c0_i32_25 : i32 to vector<1x256xi32>
    %111 = arith.cmpi sge, %109, %110 : vector<1x256xi32>
    %c4_i32_26 = arith.constant 4 : i32
    %112 = vector.broadcast %c4_i32_26 : i32 to vector<1x256xi32>
    %113 = arith.addi %16, %112 : vector<1x256xi32>
    %c16_i32_27 = arith.constant 16 : i32
    %114 = vector.broadcast %c16_i32_27 : i32 to vector<1x256xi32>
    %115 = arith.cmpi slt, %113, %114 : vector<1x256xi32>
    %116 = arith.andi %111, %115 : vector<1x256xi1>
    %117 = vector.shape_cast %116 : vector<1x256xi1> to vector<1x256xi1>
    %118 = vector.broadcast %117 : vector<1x256xi1> to vector<4x256xi1>
    %119 = arith.extui %118 : vector<4x256xi1> to vector<4x256xi32>
    %120 = arith.sitofp %119 : vector<4x256xi32> to vector<4x256xf32>
    %c-2_i32_28 = arith.constant -2 : i32
    %121 = vector.broadcast %c-2_i32_28 : i32 to vector<1x256xi32>
    %122 = arith.addi %16, %121 : vector<1x256xi32>
    %c0_i32_29 = arith.constant 0 : i32
    %123 = vector.broadcast %c0_i32_29 : i32 to vector<1x256xi32>
    %124 = arith.cmpi sge, %122, %123 : vector<1x256xi32>
    %c-2_i32_30 = arith.constant -2 : i32
    %125 = vector.broadcast %c-2_i32_30 : i32 to vector<1x256xi32>
    %126 = arith.addi %16, %125 : vector<1x256xi32>
    %c16_i32_31 = arith.constant 16 : i32
    %127 = vector.broadcast %c16_i32_31 : i32 to vector<1x256xi32>
    %128 = arith.cmpi slt, %126, %127 : vector<1x256xi32>
    %129 = arith.andi %124, %128 : vector<1x256xi1>
    %130 = vector.shape_cast %129 : vector<1x256xi1> to vector<1x256xi1>
    %131 = vector.broadcast %130 : vector<1x256xi1> to vector<32x256xi1>
    %132 = arith.extui %131 : vector<32x256xi1> to vector<32x256xi32>
    %133 = arith.sitofp %132 : vector<32x256xi32> to vector<32x256xf32>
    %c-1_i32_32 = arith.constant -1 : i32
    %134 = vector.broadcast %c-1_i32_32 : i32 to vector<1x256xi32>
    %135 = arith.addi %16, %134 : vector<1x256xi32>
    %c0_i32_33 = arith.constant 0 : i32
    %136 = vector.broadcast %c0_i32_33 : i32 to vector<1x256xi32>
    %137 = arith.cmpi sge, %135, %136 : vector<1x256xi32>
    %c-1_i32_34 = arith.constant -1 : i32
    %138 = vector.broadcast %c-1_i32_34 : i32 to vector<1x256xi32>
    %139 = arith.addi %16, %138 : vector<1x256xi32>
    %c16_i32_35 = arith.constant 16 : i32
    %140 = vector.broadcast %c16_i32_35 : i32 to vector<1x256xi32>
    %141 = arith.cmpi slt, %139, %140 : vector<1x256xi32>
    %142 = arith.andi %137, %141 : vector<1x256xi1>
    %143 = vector.shape_cast %142 : vector<1x256xi1> to vector<1x256xi1>
    %144 = vector.broadcast %143 : vector<1x256xi1> to vector<32x256xi1>
    %145 = arith.extui %144 : vector<32x256xi1> to vector<32x256xi32>
    %146 = arith.sitofp %145 : vector<32x256xi32> to vector<32x256xf32>
    %c1_i32_36 = arith.constant 1 : i32
    %147 = vector.broadcast %c1_i32_36 : i32 to vector<1x256xi32>
    %148 = arith.addi %16, %147 : vector<1x256xi32>
    %c0_i32_37 = arith.constant 0 : i32
    %149 = vector.broadcast %c0_i32_37 : i32 to vector<1x256xi32>
    %150 = arith.cmpi sge, %148, %149 : vector<1x256xi32>
    %c1_i32_38 = arith.constant 1 : i32
    %151 = vector.broadcast %c1_i32_38 : i32 to vector<1x256xi32>
    %152 = arith.addi %16, %151 : vector<1x256xi32>
    %c16_i32_39 = arith.constant 16 : i32
    %153 = vector.broadcast %c16_i32_39 : i32 to vector<1x256xi32>
    %154 = arith.cmpi slt, %152, %153 : vector<1x256xi32>
    %155 = arith.andi %150, %154 : vector<1x256xi1>
    %156 = vector.shape_cast %155 : vector<1x256xi1> to vector<1x256xi1>
    %157 = vector.broadcast %156 : vector<1x256xi1> to vector<32x256xi1>
    %158 = arith.extui %157 : vector<32x256xi1> to vector<32x256xi32>
    %159 = arith.sitofp %158 : vector<32x256xi32> to vector<32x256xf32>
    %c2_i32_40 = arith.constant 2 : i32
    %160 = vector.broadcast %c2_i32_40 : i32 to vector<1x256xi32>
    %161 = arith.addi %16, %160 : vector<1x256xi32>
    %c0_i32_41 = arith.constant 0 : i32
    %162 = vector.broadcast %c0_i32_41 : i32 to vector<1x256xi32>
    %163 = arith.cmpi sge, %161, %162 : vector<1x256xi32>
    %c2_i32_42 = arith.constant 2 : i32
    %164 = vector.broadcast %c2_i32_42 : i32 to vector<1x256xi32>
    %165 = arith.addi %16, %164 : vector<1x256xi32>
    %c16_i32_43 = arith.constant 16 : i32
    %166 = vector.broadcast %c16_i32_43 : i32 to vector<1x256xi32>
    %167 = arith.cmpi slt, %165, %166 : vector<1x256xi32>
    %168 = arith.andi %163, %167 : vector<1x256xi1>
    %169 = vector.shape_cast %168 : vector<1x256xi1> to vector<1x256xi1>
    %170 = vector.broadcast %169 : vector<1x256xi1> to vector<32x256xi1>
    %171 = arith.extui %170 : vector<32x256xi1> to vector<32x256xi32>
    %172 = arith.sitofp %171 : vector<32x256xi32> to vector<32x256xf32>
    %c0 = arith.constant 0 : index
    %c0_44 = arith.constant 0 : index
    %c0_45 = arith.constant 0 : index
    %173 = vector.load %arg1[%c0, %c0_44, %c0_45] : memref<1x8x256xf32, #tpu.memory_space<vmem>>, vector<1x8x256xf32>
    %174 = vector.shape_cast %173 : vector<1x8x256xf32> to vector<8x256xf32>
    %175 = vector.extract_strided_slice %174 {offsets = [0, 0], sizes = [4, 256], strides = [1, 1]} : vector<8x256xf32> to vector<4x256xf32>
    %cst = arith.constant 0.000000e+00 : f32
    %176 = vector.broadcast %cst : f32 to vector<4x256xf32>
    %cst_46 = arith.constant 0.000000e+00 : f32
    %177 = vector.broadcast %cst_46 : f32 to vector<4x68xf32>
    %178 = vector.extract_strided_slice %175 {offsets = [0, 0], sizes = [4, 188], strides = [1, 1]} : vector<4x256xf32> to vector<4x188xf32>
    %179 = tpu.concatenate %177, %178 in 1 : vector<4x68xf32>, vector<4x188xf32> -> vector<4x256xf32>
    %180 = arith.mulf %179, %29 : vector<4x256xf32>
    %cst_47 = arith.constant 0.000000e+00 : f32
    %181 = vector.broadcast %cst_47 : f32 to vector<4x67xf32>
    %182 = vector.extract_strided_slice %175 {offsets = [0, 0], sizes = [4, 189], strides = [1, 1]} : vector<4x256xf32> to vector<4x189xf32>
    %183 = tpu.concatenate %181, %182 in 1 : vector<4x67xf32>, vector<4x189xf32> -> vector<4x256xf32>
    %184 = arith.mulf %183, %42 : vector<4x256xf32>
    %185 = tpu.concatenate %180, %184 in 0 : vector<4x256xf32>, vector<4x256xf32> -> vector<8x256xf32>
    %c0_48 = arith.constant 0 : index
    %c0_49 = arith.constant 0 : index
    %186 = vector.load %arg9[%c0_48, %c0_49] : memref<384x512xf32, #tpu.memory_space<vmem>>, vector<8x256xf32>
    tpu.vector_store %arg9[%c0_48, %c0_49], %185 {strides = array<i32>} : memref<384x512xf32, #tpu.memory_space<vmem>>, vector<8x256xf32>,
    %cst_50 = arith.constant 0.000000e+00 : f32
    %187 = vector.broadcast %cst_50 : f32 to vector<4x66xf32>
    %188 = vector.extract_strided_slice %175 {offsets = [0, 0], sizes = [4, 190], strides = [1, 1]} : vector<4x256xf32> to vector<4x190xf32>
    %189 = tpu.concatenate %187, %188 in 1 : vector<4x66xf32>, vector<4x190xf32> -> vector<4x256xf32>
    %190 = arith.mulf %189, %55 : vector<4x256xf32>
    %cst_51 = arith.constant 0.000000e+00 : f32
    %191 = vector.broadcast %cst_51 : f32 to vector<4x65xf32>
    %192 = vector.extract_strided_slice %175 {offsets = [0, 0], sizes = [4, 191], strides = [1, 1]} : vector<4x256xf32> to vector<4x191xf32>
    %193 = tpu.concatenate %191, %192 in 1 : vector<4x65xf32>, vector<4x191xf32> -> vector<4x256xf32>
    %194 = arith.mulf %193, %68 : vector<4x256xf32>
    %195 = tpu.concatenate %190, %194 in 0 : vector<4x256xf32>, vector<4x256xf32> -> vector<8x256xf32>
    %c8 = arith.constant 8 : index
    %c0_52 = arith.constant 0 : index
    %196 = vector.load %arg9[%c8, %c0_52] : memref<384x512xf32, #tpu.memory_space<vmem>>, vector<8x256xf32>
    tpu.vector_store %arg9[%c8, %c0_52], %195 {strides = array<i32>} : memref<384x512xf32, #tpu.memory_space<vmem>>, vector<8x256xf32>,
    %cst_53 = arith.constant 0.000000e+00 : f32
    %197 = vector.broadcast %cst_53 : f32 to vector<4x64xf32>
    %198 = vector.extract_strided_slice %175 {offsets = [0, 0], sizes = [4, 192], strides = [1, 1]} : vector<4x256xf32> to vector<4x192xf32>
    %199 = tpu.concatenate %197, %198 in 1 : vector<4x64xf32>, vector<4x192xf32> -> vector<4x256xf32>
    %cst_54 = arith.constant 0.000000e+00 : f32
    %200 = vector.broadcast %cst_54 : f32 to vector<4x63xf32>
    %201 = vector.extract_strided_slice %175 {offsets = [0, 0], sizes = [4, 193], strides = [1, 1]} : vector<4x256xf32> to vector<4x193xf32>
    %202 = tpu.concatenate %200, %201 in 1 : vector<4x63xf32>, vector<4x193xf32> -> vector<4x256xf32>
    %203 = arith.mulf %202, %81 : vector<4x256xf32>
    %204 = tpu.concatenate %199, %203 in 0 : vector<4x256xf32>, vector<4x256xf32> -> vector<8x256xf32>
    %c16 = arith.constant 16 : index
    %c0_55 = arith.constant 0 : index
    %205 = vector.load %arg9[%c16, %c0_55] : memref<384x512xf32, #tpu.memory_space<vmem>>, vector<8x256xf32>
    tpu.vector_store %arg9[%c16, %c0_55], %204 {strides = array<i32>} : memref<384x512xf32, #tpu.memory_space<vmem>>, vector<8x256xf32>,
    %cst_56 = arith.constant 0.000000e+00 : f32
    %206 = vector.broadcast %cst_56 : f32 to vector<4x62xf32>
    %207 = vector.extract_strided_slice %175 {offsets = [0, 0], sizes = [4, 194], strides = [1, 1]} : vector<4x256xf32> to vector<4x194xf32>
    %208 = tpu.concatenate %206, %207 in 1 : vector<4x62xf32>, vector<4x194xf32> -> vector<4x256xf32>
    %209 = arith.mulf %208, %94 : vector<4x256xf32>
    %cst_57 = arith.constant 0.000000e+00 : f32
    %210 = vector.broadcast %cst_57 : f32 to vector<4x61xf32>
    %211 = vector.extract_strided_slice %175 {offsets = [0, 0], sizes = [4, 195], strides = [1, 1]} : vector<4x256xf32> to vector<4x195xf32>
    %212 = tpu.concatenate %210, %211 in 1 : vector<4x61xf32>, vector<4x195xf32> -> vector<4x256xf32>
    %213 = arith.mulf %212, %107 : vector<4x256xf32>
    %214 = tpu.concatenate %209, %213 in 0 : vector<4x256xf32>, vector<4x256xf32> -> vector<8x256xf32>
    %c24 = arith.constant 24 : index
    %c0_58 = arith.constant 0 : index
    %215 = vector.load %arg9[%c24, %c0_58] : memref<384x512xf32, #tpu.memory_space<vmem>>, vector<8x256xf32>
    tpu.vector_store %arg9[%c24, %c0_58], %214 {strides = array<i32>} : memref<384x512xf32, #tpu.memory_space<vmem>>, vector<8x256xf32>,
    %cst_59 = arith.constant 0.000000e+00 : f32
    %216 = vector.broadcast %cst_59 : f32 to vector<4x60xf32>
    %217 = vector.extract_strided_slice %175 {offsets = [0, 0], sizes = [4, 196], strides = [1, 1]} : vector<4x256xf32> to vector<4x196xf32>
    %218 = tpu.concatenate %216, %217 in 1 : vector<4x60xf32>, vector<4x196xf32> -> vector<4x256xf32>
    %219 = arith.mulf %218, %120 : vector<4x256xf32>
    %cst_60 = arith.constant 0.000000e+00 : f32
    %220 = vector.broadcast %cst_60 : f32 to vector<4x52xf32>
    %221 = vector.extract_strided_slice %175 {offsets = [0, 0], sizes = [4, 204], strides = [1, 1]} : vector<4x256xf32> to vector<4x204xf32>
    %222 = tpu.concatenate %220, %221 in 1 : vector<4x52xf32>, vector<4x204xf32> -> vector<4x256xf32>
    %223 = arith.mulf %222, %29 : vector<4x256xf32>
    %224 = tpu.concatenate %219, %223 in 0 : vector<4x256xf32>, vector<4x256xf32> -> vector<8x256xf32>
    %c32 = arith.constant 32 : index
    %c0_61 = arith.constant 0 : index
    %225 = vector.load %arg9[%c32, %c0_61] : memref<384x512xf32, #tpu.memory_space<vmem>>, vector<8x256xf32>
    tpu.vector_store %arg9[%c32, %c0_61], %224 {strides = array<i32>} : memref<384x512xf32, #tpu.memory_space<vmem>>, vector<8x256xf32>,
    %cst_62 = arith.constant 0.000000e+00 : f32
    %226 = vector.broadcast %cst_62 : f32 to vector<4x51xf32>
    %227 = vector.extract_strided_slice %175 {offsets = [0, 0], sizes = [4, 205], strides = [1, 1]} : vector<4x256xf32> to vector<4x205xf32>
    %228 = tpu.concatenate %226, %227 in 1 : vector<4x51xf32>, vector<4x205xf32> -> vector<4x256xf32>
    %229 = arith.mulf %228, %42 : vector<4x256xf32>
    %cst_63 = arith.constant 0.000000e+00 : f32
    %230 = vector.broadcast %cst_63 : f32 to vector<4x50xf32>
    %231 = vector.extract_strided_slice %175 {offsets = [0, 0], sizes = [4, 206], strides = [1, 1]} : vector<4x256xf32> to vector<4x206xf32>
    %232 = tpu.concatenate %230, %231 in 1 : vector<4x50xf32>, vector<4x206xf32> -> vector<4x256xf32>
    %233 = arith.mulf %232, %55 : vector<4x256xf32>
    %234 = tpu.concatenate %229, %233 in 0 : vector<4x256xf32>, vector<4x256xf32> -> vector<8x256xf32>
    %c40 = arith.constant 40 : index
    %c0_64 = arith.constant 0 : index
    %235 = vector.load %arg9[%c40, %c0_64] : memref<384x512xf32, #tpu.memory_space<vmem>>, vector<8x256xf32>
    tpu.vector_store %arg9[%c40, %c0_64], %234 {strides = array<i32>} : memref<384x512xf32, #tpu.memory_space<vmem>>, vector<8x256xf32>,
    %cst_65 = arith.constant 0.000000e+00 : f32
    %236 = vector.broadcast %cst_65 : f32 to vector<4x49xf32>
    %237 = vector.extract_strided_slice %175 {offsets = [0, 0], sizes = [4, 207], strides = [1, 1]} : vector<4x256xf32> to vector<4x207xf32>
    %238 = tpu.concatenate %236, %237 in 1 : vector<4x49xf32>, vector<4x207xf32> -> vector<4x256xf32>
    %239 = arith.mulf %238, %68 : vector<4x256xf32>
    %cst_66 = arith.constant 0.000000e+00 : f32
    %240 = vector.broadcast %cst_66 : f32 to vector<4x48xf32>
    %241 = vector.extract_strided_slice %175 {offsets = [0, 0], sizes = [4, 208], strides = [1, 1]} : vector<4x256xf32> to vector<4x208xf32>
    %242 = tpu.concatenate %240, %241 in 1 : vector<4x48xf32>, vector<4x208xf32> -> vector<4x256xf32>
    %243 = tpu.concatenate %239, %242 in 0 : vector<4x256xf32>, vector<4x256xf32> -> vector<8x256xf32>
    %c48 = arith.constant 48 : index
    %c0_67 = arith.constant 0 : index
    %244 = vector.load %arg9[%c48, %c0_67] : memref<384x512xf32, #tpu.memory_space<vmem>>, vector<8x256xf32>
    tpu.vector_store %arg9[%c48, %c0_67], %243 {strides = array<i32>} : memref<384x512xf32, #tpu.memory_space<vmem>>, vector<8x256xf32>,
    %cst_68 = arith.constant 0.000000e+00 : f32
    %245 = vector.broadcast %cst_68 : f32 to vector<4x47xf32>
    %246 = vector.extract_strided_slice %175 {offsets = [0, 0], sizes = [4, 209], strides = [1, 1]} : vector<4x256xf32> to vector<4x209xf32>
    %247 = tpu.concatenate %245, %246 in 1 : vector<4x47xf32>, vector<4x209xf32> -> vector<4x256xf32>
    %248 = arith.mulf %247, %81 : vector<4x256xf32>
    %cst_69 = arith.constant 0.000000e+00 : f32
    %249 = vector.broadcast %cst_69 : f32 to vector<4x46xf32>
    %250 = vector.extract_strided_slice %175 {offsets = [0, 0], sizes = [4, 210], strides = [1, 1]} : vector<4x256xf32> to vector<4x210xf32>
    %251 = tpu.concatenate %249, %250 in 1 : vector<4x46xf32>, vector<4x210xf32> -> vector<4x256xf32>
    %252 = arith.mulf %251, %94 : vector<4x256xf32>
    %253 = tpu.concatenate %248, %252 in 0 : vector<4x256xf32>, vector<4x256xf32> -> vector<8x256xf32>
    %c56 = arith.constant 56 : index
    %c0_70 = arith.constant 0 : index
    %254 = vector.load %arg9[%c56, %c0_70] : memref<384x512xf32, #tpu.memory_space<vmem>>, vector<8x256xf32>
    tpu.vector_store %arg9[%c56, %c0_70], %253 {strides = array<i32>} : memref<384x512xf32, #tpu.memory_space<vmem>>, vector<8x256xf32>,
    %cst_71 = arith.constant 0.000000e+00 : f32
    %255 = vector.broadcast %cst_71 : f32 to vector<4x45xf32>
    %256 = vector.extract_strided_slice %175 {offsets = [0, 0], sizes = [4, 211], strides = [1, 1]} : vector<4x256xf32> to vector<4x211xf32>
    %257 = tpu.concatenate %255, %256 in 1 : vector<4x45xf32>, vector<4x211xf32> -> vector<4x256xf32>
    %258 = arith.mulf %257, %107 : vector<4x256xf32>
    %cst_72 = arith.constant 0.000000e+00 : f32
    %259 = vector.broadcast %cst_72 : f32 to vector<4x44xf32>
    %260 = vector.extract_strided_slice %175 {offsets = [0, 0], sizes = [4, 212], strides = [1, 1]} : vector<4x256xf32> to vector<4x212xf32>
    %261 = tpu.concatenate %259, %260 in 1 : vector<4x44xf32>, vector<4x212xf32> -> vector<4x256xf32>
    %262 = arith.mulf %261, %120 : vector<4x256xf32>
    %263 = tpu.concatenate %258, %262 in 0 : vector<4x256xf32>, vector<4x256xf32> -> vector<8x256xf32>
    %c64 = arith.constant 64 : index
    %c0_73 = arith.constant 0 : index
    %264 = vector.load %arg9[%c64, %c0_73] : memref<384x512xf32, #tpu.memory_space<vmem>>, vector<8x256xf32>
    tpu.vector_store %arg9[%c64, %c0_73], %263 {strides = array<i32>} : memref<384x512xf32, #tpu.memory_space<vmem>>, vector<8x256xf32>,
    %cst_74 = arith.constant 0.000000e+00 : f32
    %265 = vector.broadcast %cst_74 : f32 to vector<4x36xf32>
    %266 = vector.extract_strided_slice %175 {offsets = [0, 0], sizes = [4, 220], strides = [1, 1]} : vector<4x256xf32> to vector<4x220xf32>
    %267 = tpu.concatenate %265, %266 in 1 : vector<4x36xf32>, vector<4x220xf32> -> vector<4x256xf32>
    %268 = arith.mulf %267, %29 : vector<4x256xf32>
    %cst_75 = arith.constant 0.000000e+00 : f32
    %269 = vector.broadcast %cst_75 : f32 to vector<4x35xf32>
    %270 = vector.extract_strided_slice %175 {offsets = [0, 0], sizes = [4, 221], strides = [1, 1]} : vector<4x256xf32> to vector<4x221xf32>
    %271 = tpu.concatenate %269, %270 in 1 : vector<4x35xf32>, vector<4x221xf32> -> vector<4x256xf32>
    %272 = arith.mulf %271, %42 : vector<4x256xf32>
    %273 = tpu.concatenate %268, %272 in 0 : vector<4x256xf32>, vector<4x256xf32> -> vector<8x256xf32>
    %c72 = arith.constant 72 : index
    %c0_76 = arith.constant 0 : index
    %274 = vector.load %arg9[%c72, %c0_76] : memref<384x512xf32, #tpu.memory_space<vmem>>, vector<8x256xf32>
    tpu.vector_store %arg9[%c72, %c0_76], %273 {strides = array<i32>} : memref<384x512xf32, #tpu.memory_space<vmem>>, vector<8x256xf32>,
    %cst_77 = arith.constant 0.000000e+00 : f32
    %275 = vector.broadcast %cst_77 : f32 to vector<4x34xf32>
    %276 = vector.extract_strided_slice %175 {offsets = [0, 0], sizes = [4, 222], strides = [1, 1]} : vector<4x256xf32> to vector<4x222xf32>
    %277 = tpu.concatenate %275, %276 in 1 : vector<4x34xf32>, vector<4x222xf32> -> vector<4x256xf32>
    %278 = arith.mulf %277, %55 : vector<4x256xf32>
    %cst_78 = arith.constant 0.000000e+00 : f32
    %279 = vector.broadcast %cst_78 : f32 to vector<4x33xf32>
    %280 = vector.extract_strided_slice %175 {offsets = [0, 0], sizes = [4, 223], strides = [1, 1]} : vector<4x256xf32> to vector<4x223xf32>
    %281 = tpu.concatenate %279, %280 in 1 : vector<4x33xf32>, vector<4x223xf32> -> vector<4x256xf32>
    %282 = arith.mulf %281, %68 : vector<4x256xf32>
    %283 = tpu.concatenate %278, %282 in 0 : vector<4x256xf32>, vector<4x256xf32> -> vector<8x256xf32>
    %c80 = arith.constant 80 : index
    %c0_79 = arith.constant 0 : index
    %284 = vector.load %arg9[%c80, %c0_79] : memref<384x512xf32, #tpu.memory_space<vmem>>, vector<8x256xf32>
    tpu.vector_store %arg9[%c80, %c0_79], %283 {strides = array<i32>} : memref<384x512xf32, #tpu.memory_space<vmem>>, vector<8x256xf32>,
    %cst_80 = arith.constant 0.000000e+00 : f32
    %285 = vector.broadcast %cst_80 : f32 to vector<4x32xf32>
    %286 = vector.extract_strided_slice %175 {offsets = [0, 0], sizes = [4, 224], strides = [1, 1]} : vector<4x256xf32> to vector<4x224xf32>
    %287 = tpu.concatenate %285, %286 in 1 : vector<4x32xf32>, vector<4x224xf32> -> vector<4x256xf32>
    %cst_81 = arith.constant 0.000000e+00 : f32
    %288 = vector.broadcast %cst_81 : f32 to vector<4x31xf32>
    %289 = vector.extract_strided_slice %175 {offsets = [0, 0], sizes = [4, 225], strides = [1, 1]} : vector<4x256xf32> to vector<4x225xf32>
    %290 = tpu.concatenate %288, %289 in 1 : vector<4x31xf32>, vector<4x225xf32> -> vector<4x256xf32>
    %291 = arith.mulf %290, %81 : vector<4x256xf32>
    %292 = tpu.concatenate %287, %291 in 0 : vector<4x256xf32>, vector<4x256xf32> -> vector<8x256xf32>
    %c88 = arith.constant 88 : index
    %c0_82 = arith.constant 0 : index
    %293 = vector.load %arg9[%c88, %c0_82] : memref<384x512xf32, #tpu.memory_space<vmem>>, vector<8x256xf32>
    tpu.vector_store %arg9[%c88, %c0_82], %292 {strides = array<i32>} : memref<384x512xf32, #tpu.memory_space<vmem>>, vector<8x256xf32>,
    %cst_83 = arith.constant 0.000000e+00 : f32
    %294 = vector.broadcast %cst_83 : f32 to vector<4x30xf32>
    %295 = vector.extract_strided_slice %175 {offsets = [0, 0], sizes = [4, 226], strides = [1, 1]} : vector<4x256xf32> to vector<4x226xf32>
    %296 = tpu.concatenate %294, %295 in 1 : vector<4x30xf32>, vector<4x226xf32> -> vector<4x256xf32>
    %297 = arith.mulf %296, %94 : vector<4x256xf32>
    %cst_84 = arith.constant 0.000000e+00 : f32
    %298 = vector.broadcast %cst_84 : f32 to vector<4x29xf32>
    %299 = vector.extract_strided_slice %175 {offsets = [0, 0], sizes = [4, 227], strides = [1, 1]} : vector<4x256xf32> to vector<4x227xf32>
    %300 = tpu.concatenate %298, %299 in 1 : vector<4x29xf32>, vector<4x227xf32> -> vector<4x256xf32>
    %301 = arith.mulf %300, %107 : vector<4x256xf32>
    %302 = tpu.concatenate %297, %301 in 0 : vector<4x256xf32>, vector<4x256xf32> -> vector<8x256xf32>
    %c96 = arith.constant 96 : index
    %c0_85 = arith.constant 0 : index
    %303 = vector.load %arg9[%c96, %c0_85] : memref<384x512xf32, #tpu.memory_space<vmem>>, vector<8x256xf32>
    tpu.vector_store %arg9[%c96, %c0_85], %302 {strides = array<i32>} : memref<384x512xf32, #tpu.memory_space<vmem>>, vector<8x256xf32>,
    %cst_86 = arith.constant 0.000000e+00 : f32
    %304 = vector.broadcast %cst_86 : f32 to vector<4x28xf32>
    %305 = vector.extract_strided_slice %175 {offsets = [0, 0], sizes = [4, 228], strides = [1, 1]} : vector<4x256xf32> to vector<4x228xf32>
    %306 = tpu.concatenate %304, %305 in 1 : vector<4x28xf32>, vector<4x228xf32> -> vector<4x256xf32>
    %307 = arith.mulf %306, %120 : vector<4x256xf32>
    %cst_87 = arith.constant 0.000000e+00 : f32
    %308 = vector.broadcast %cst_87 : f32 to vector<4x20xf32>
    %309 = vector.extract_strided_slice %175 {offsets = [0, 0], sizes = [4, 236], strides = [1, 1]} : vector<4x256xf32> to vector<4x236xf32>
    %310 = tpu.concatenate %308, %309 in 1 : vector<4x20xf32>, vector<4x236xf32> -> vector<4x256xf32>
    %311 = arith.mulf %310, %29 : vector<4x256xf32>
    %312 = tpu.concatenate %307, %311 in 0 : vector<4x256xf32>, vector<4x256xf32> -> vector<8x256xf32>
    %c104 = arith.constant 104 : index
    %c0_88 = arith.constant 0 : index
    %313 = vector.load %arg9[%c104, %c0_88] : memref<384x512xf32, #tpu.memory_space<vmem>>, vector<8x256xf32>
    tpu.vector_store %arg9[%c104, %c0_88], %312 {strides = array<i32>} : memref<384x512xf32, #tpu.memory_space<vmem>>, vector<8x256xf32>,
    %cst_89 = arith.constant 0.000000e+00 : f32
    %314 = vector.broadcast %cst_89 : f32 to vector<4x19xf32>
    %315 = vector.extract_strided_slice %175 {offsets = [0, 0], sizes = [4, 237], strides = [1, 1]} : vector<4x256xf32> to vector<4x237xf32>
    %316 = tpu.concatenate %314, %315 in 1 : vector<4x19xf32>, vector<4x237xf32> -> vector<4x256xf32>
    %317 = arith.mulf %316, %42 : vector<4x256xf32>
    %cst_90 = arith.constant 0.000000e+00 : f32
    %318 = vector.broadcast %cst_90 : f32 to vector<4x18xf32>
    %319 = vector.extract_strided_slice %175 {offsets = [0, 0], sizes = [4, 238], strides = [1, 1]} : vector<4x256xf32> to vector<4x238xf32>
    %320 = tpu.concatenate %318, %319 in 1 : vector<4x18xf32>, vector<4x238xf32> -> vector<4x256xf32>
    %321 = arith.mulf %320, %55 : vector<4x256xf32>
    %322 = tpu.concatenate %317, %321 in 0 : vector<4x256xf32>, vector<4x256xf32> -> vector<8x256xf32>
    %c112 = arith.constant 112 : index
    %c0_91 = arith.constant 0 : index
    %323 = vector.load %arg9[%c112, %c0_91] : memref<384x512xf32, #tpu.memory_space<vmem>>, vector<8x256xf32>
    tpu.vector_store %arg9[%c112, %c0_91], %322 {strides = array<i32>} : memref<384x512xf32, #tpu.memory_space<vmem>>, vector<8x256xf32>,
    %cst_92 = arith.constant 0.000000e+00 : f32
    %324 = vector.broadcast %cst_92 : f32 to vector<4x17xf32>
    %325 = vector.extract_strided_slice %175 {offsets = [0, 0], sizes = [4, 239], strides = [1, 1]} : vector<4x256xf32> to vector<4x239xf32>
    %326 = tpu.concatenate %324, %325 in 1 : vector<4x17xf32>, vector<4x239xf32> -> vector<4x256xf32>
    %327 = arith.mulf %326, %68 : vector<4x256xf32>
    %cst_93 = arith.constant 0.000000e+00 : f32
    %328 = vector.broadcast %cst_93 : f32 to vector<4x16xf32>
    %329 = vector.extract_strided_slice %175 {offsets = [0, 0], sizes = [4, 240], strides = [1, 1]} : vector<4x256xf32> to vector<4x240xf32>
    %330 = tpu.concatenate %328, %329 in 1 : vector<4x16xf32>, vector<4x240xf32> -> vector<4x256xf32>
    %331 = tpu.concatenate %327, %330 in 0 : vector<4x256xf32>, vector<4x256xf32> -> vector<8x256xf32>
    %c120 = arith.constant 120 : index
    %c0_94 = arith.constant 0 : index
    %332 = vector.load %arg9[%c120, %c0_94] : memref<384x512xf32, #tpu.memory_space<vmem>>, vector<8x256xf32>
    tpu.vector_store %arg9[%c120, %c0_94], %331 {strides = array<i32>} : memref<384x512xf32, #tpu.memory_space<vmem>>, vector<8x256xf32>,
    %cst_95 = arith.constant 0.000000e+00 : f32
    %333 = vector.broadcast %cst_95 : f32 to vector<4x15xf32>
    %334 = vector.extract_strided_slice %175 {offsets = [0, 0], sizes = [4, 241], strides = [1, 1]} : vector<4x256xf32> to vector<4x241xf32>
    %335 = tpu.concatenate %333, %334 in 1 : vector<4x15xf32>, vector<4x241xf32> -> vector<4x256xf32>
    %336 = arith.mulf %335, %81 : vector<4x256xf32>
    %cst_96 = arith.constant 0.000000e+00 : f32
    %337 = vector.broadcast %cst_96 : f32 to vector<4x14xf32>
    %338 = vector.extract_strided_slice %175 {offsets = [0, 0], sizes = [4, 242], strides = [1, 1]} : vector<4x256xf32> to vector<4x242xf32>
    %339 = tpu.concatenate %337, %338 in 1 : vector<4x14xf32>, vector<4x242xf32> -> vector<4x256xf32>
    %340 = arith.mulf %339, %94 : vector<4x256xf32>
    %341 = tpu.concatenate %336, %340 in 0 : vector<4x256xf32>, vector<4x256xf32> -> vector<8x256xf32>
    %c128 = arith.constant 128 : index
    %c0_97 = arith.constant 0 : index
    %342 = vector.load %arg9[%c128, %c0_97] : memref<384x512xf32, #tpu.memory_space<vmem>>, vector<8x256xf32>
    tpu.vector_store %arg9[%c128, %c0_97], %341 {strides = array<i32>} : memref<384x512xf32, #tpu.memory_space<vmem>>, vector<8x256xf32>,
    %cst_98 = arith.constant 0.000000e+00 : f32
    %343 = vector.broadcast %cst_98 : f32 to vector<4x13xf32>
    %344 = vector.extract_strided_slice %175 {offsets = [0, 0], sizes = [4, 243], strides = [1, 1]} : vector<4x256xf32> to vector<4x243xf32>
    %345 = tpu.concatenate %343, %344 in 1 : vector<4x13xf32>, vector<4x243xf32> -> vector<4x256xf32>
    %346 = arith.mulf %345, %107 : vector<4x256xf32>
    %cst_99 = arith.constant 0.000000e+00 : f32
    %347 = vector.broadcast %cst_99 : f32 to vector<4x12xf32>
    %348 = vector.extract_strided_slice %175 {offsets = [0, 0], sizes = [4, 244], strides = [1, 1]} : vector<4x256xf32> to vector<4x244xf32>
    %349 = tpu.concatenate %347, %348 in 1 : vector<4x12xf32>, vector<4x244xf32> -> vector<4x256xf32>
    %350 = arith.mulf %349, %120 : vector<4x256xf32>
    %351 = tpu.concatenate %346, %350 in 0 : vector<4x256xf32>, vector<4x256xf32> -> vector<8x256xf32>
    %c136 = arith.constant 136 : index
    %c0_100 = arith.constant 0 : index
    %352 = vector.load %arg9[%c136, %c0_100] : memref<384x512xf32, #tpu.memory_space<vmem>>, vector<8x256xf32>
    tpu.vector_store %arg9[%c136, %c0_100], %351 {strides = array<i32>} : memref<384x512xf32, #tpu.memory_space<vmem>>, vector<8x256xf32>,
    %cst_101 = arith.constant 0.000000e+00 : f32
    %353 = vector.broadcast %cst_101 : f32 to vector<4x4xf32>
    %354 = vector.extract_strided_slice %175 {offsets = [0, 0], sizes = [4, 252], strides = [1, 1]} : vector<4x256xf32> to vector<4x252xf32>
    %355 = tpu.concatenate %353, %354 in 1 : vector<4x4xf32>, vector<4x252xf32> -> vector<4x256xf32>
    %356 = arith.mulf %355, %29 : vector<4x256xf32>
    %cst_102 = arith.constant 0.000000e+00 : f32
    %357 = vector.broadcast %cst_102 : f32 to vector<4x3xf32>
    %358 = vector.extract_strided_slice %175 {offsets = [0, 0], sizes = [4, 253], strides = [1, 1]} : vector<4x256xf32> to vector<4x253xf32>
    %359 = tpu.concatenate %357, %358 in 1 : vector<4x3xf32>, vector<4x253xf32> -> vector<4x256xf32>
    %360 = arith.mulf %359, %42 : vector<4x256xf32>
    %361 = tpu.concatenate %356, %360 in 0 : vector<4x256xf32>, vector<4x256xf32> -> vector<8x256xf32>
    %c144 = arith.constant 144 : index
    %c0_103 = arith.constant 0 : index
    %362 = vector.load %arg9[%c144, %c0_103] : memref<384x512xf32, #tpu.memory_space<vmem>>, vector<8x256xf32>
    tpu.vector_store %arg9[%c144, %c0_103], %361 {strides = array<i32>} : memref<384x512xf32, #tpu.memory_space<vmem>>, vector<8x256xf32>,
    %cst_104 = arith.constant 0.000000e+00 : f32
    %363 = vector.broadcast %cst_104 : f32 to vector<4x2xf32>
    %364 = vector.extract_strided_slice %175 {offsets = [0, 0], sizes = [4, 254], strides = [1, 1]} : vector<4x256xf32> to vector<4x254xf32>
    %365 = tpu.concatenate %363, %364 in 1 : vector<4x2xf32>, vector<4x254xf32> -> vector<4x256xf32>
    %366 = arith.mulf %365, %55 : vector<4x256xf32>
    %cst_105 = arith.constant 0.000000e+00 : f32
    %367 = vector.broadcast %cst_105 : f32 to vector<4x1xf32>
    %368 = vector.extract_strided_slice %175 {offsets = [0, 0], sizes = [4, 255], strides = [1, 1]} : vector<4x256xf32> to vector<4x255xf32>
    %369 = tpu.concatenate %367, %368 in 1 : vector<4x1xf32>, vector<4x255xf32> -> vector<4x256xf32>
    %370 = arith.mulf %369, %68 : vector<4x256xf32>
    %371 = tpu.concatenate %366, %370 in 0 : vector<4x256xf32>, vector<4x256xf32> -> vector<8x256xf32>
    %c152 = arith.constant 152 : index
    %c0_106 = arith.constant 0 : index
    %372 = vector.load %arg9[%c152, %c0_106] : memref<384x512xf32, #tpu.memory_space<vmem>>, vector<8x256xf32>
    tpu.vector_store %arg9[%c152, %c0_106], %371 {strides = array<i32>} : memref<384x512xf32, #tpu.memory_space<vmem>>, vector<8x256xf32>,
    %cst_107 = arith.constant 0.000000e+00 : f32
    %373 = vector.broadcast %cst_107 : f32 to vector<4x1xf32>
    %374 = vector.extract_strided_slice %175 {offsets = [0, 1], sizes = [4, 255], strides = [1, 1]} : vector<4x256xf32> to vector<4x255xf32>
    %375 = tpu.concatenate %374, %373 in 1 : vector<4x255xf32>, vector<4x1xf32> -> vector<4x256xf32>
    %376 = arith.mulf %375, %81 : vector<4x256xf32>
    %377 = tpu.concatenate %175, %376 in 0 : vector<4x256xf32>, vector<4x256xf32> -> vector<8x256xf32>
    %c160 = arith.constant 160 : index
    %c0_108 = arith.constant 0 : index
    %378 = vector.load %arg9[%c160, %c0_108] : memref<384x512xf32, #tpu.memory_space<vmem>>, vector<8x256xf32>
    tpu.vector_store %arg9[%c160, %c0_108], %377 {strides = array<i32>} : memref<384x512xf32, #tpu.memory_space<vmem>>, vector<8x256xf32>,
    %cst_109 = arith.constant 0.000000e+00 : f32
    %379 = vector.broadcast %cst_109 : f32 to vector<4x2xf32>
    %380 = vector.extract_strided_slice %175 {offsets = [0, 2], sizes = [4, 254], strides = [1, 1]} : vector<4x256xf32> to vector<4x254xf32>
    %381 = tpu.concatenate %380, %379 in 1 : vector<4x254xf32>, vector<4x2xf32> -> vector<4x256xf32>
    %382 = arith.mulf %381, %94 : vector<4x256xf32>
    %cst_110 = arith.constant 0.000000e+00 : f32
    %383 = vector.broadcast %cst_110 : f32 to vector<4x3xf32>
    %384 = vector.extract_strided_slice %175 {offsets = [0, 3], sizes = [4, 253], strides = [1, 1]} : vector<4x256xf32> to vector<4x253xf32>
    %385 = tpu.concatenate %384, %383 in 1 : vector<4x253xf32>, vector<4x3xf32> -> vector<4x256xf32>
    %386 = arith.mulf %385, %107 : vector<4x256xf32>
    %387 = tpu.concatenate %382, %386 in 0 : vector<4x256xf32>, vector<4x256xf32> -> vector<8x256xf32>
    %c168 = arith.constant 168 : index
    %c0_111 = arith.constant 0 : index
    %388 = vector.load %arg9[%c168, %c0_111] : memref<384x512xf32, #tpu.memory_space<vmem>>, vector<8x256xf32>
    tpu.vector_store %arg9[%c168, %c0_111], %387 {strides = array<i32>} : memref<384x512xf32, #tpu.memory_space<vmem>>, vector<8x256xf32>,
    %cst_112 = arith.constant 0.000000e+00 : f32
    %389 = vector.broadcast %cst_112 : f32 to vector<4x4xf32>
    %390 = vector.extract_strided_slice %175 {offsets = [0, 4], sizes = [4, 252], strides = [1, 1]} : vector<4x256xf32> to vector<4x252xf32>
    %391 = tpu.concatenate %390, %389 in 1 : vector<4x252xf32>, vector<4x4xf32> -> vector<4x256xf32>
    %392 = arith.mulf %391, %120 : vector<4x256xf32>
    %cst_113 = arith.constant 0.000000e+00 : f32
    %393 = vector.broadcast %cst_113 : f32 to vector<4x12xf32>
    %394 = vector.extract_strided_slice %175 {offsets = [0, 12], sizes = [4, 244], strides = [1, 1]} : vector<4x256xf32> to vector<4x244xf32>
    %395 = tpu.concatenate %394, %393 in 1 : vector<4x244xf32>, vector<4x12xf32> -> vector<4x256xf32>
    %396 = arith.mulf %395, %29 : vector<4x256xf32>
    %397 = tpu.concatenate %392, %396 in 0 : vector<4x256xf32>, vector<4x256xf32> -> vector<8x256xf32>
    %c176 = arith.constant 176 : index
    %c0_114 = arith.constant 0 : index
    %398 = vector.load %arg9[%c176, %c0_114] : memref<384x512xf32, #tpu.memory_space<vmem>>, vector<8x256xf32>
    tpu.vector_store %arg9[%c176, %c0_114], %397 {strides = array<i32>} : memref<384x512xf32, #tpu.memory_space<vmem>>, vector<8x256xf32>,
    %cst_115 = arith.constant 0.000000e+00 : f32
    %399 = vector.broadcast %cst_115 : f32 to vector<4x13xf32>
    %400 = vector.extract_strided_slice %175 {offsets = [0, 13], sizes = [4, 243], strides = [1, 1]} : vector<4x256xf32> to vector<4x243xf32>
    %401 = tpu.concatenate %400, %399 in 1 : vector<4x243xf32>, vector<4x13xf32> -> vector<4x256xf32>
    %402 = arith.mulf %401, %42 : vector<4x256xf32>
    %cst_116 = arith.constant 0.000000e+00 : f32
    %403 = vector.broadcast %cst_116 : f32 to vector<4x14xf32>
    %404 = vector.extract_strided_slice %175 {offsets = [0, 14], sizes = [4, 242], strides = [1, 1]} : vector<4x256xf32> to vector<4x242xf32>
    %405 = tpu.concatenate %404, %403 in 1 : vector<4x242xf32>, vector<4x14xf32> -> vector<4x256xf32>
    %406 = arith.mulf %405, %55 : vector<4x256xf32>
    %407 = tpu.concatenate %402, %406 in 0 : vector<4x256xf32>, vector<4x256xf32> -> vector<8x256xf32>
    %c184 = arith.constant 184 : index
    %c0_117 = arith.constant 0 : index
    %408 = vector.load %arg9[%c184, %c0_117] : memref<384x512xf32, #tpu.memory_space<vmem>>, vector<8x256xf32>
    tpu.vector_store %arg9[%c184, %c0_117], %407 {strides = array<i32>} : memref<384x512xf32, #tpu.memory_space<vmem>>, vector<8x256xf32>,
    %cst_118 = arith.constant 0.000000e+00 : f32
    %409 = vector.broadcast %cst_118 : f32 to vector<4x15xf32>
    %410 = vector.extract_strided_slice %175 {offsets = [0, 15], sizes = [4, 241], strides = [1, 1]} : vector<4x256xf32> to vector<4x241xf32>
    %411 = tpu.concatenate %410, %409 in 1 : vector<4x241xf32>, vector<4x15xf32> -> vector<4x256xf32>
    %412 = arith.mulf %411, %68 : vector<4x256xf32>
    %cst_119 = arith.constant 0.000000e+00 : f32
    %413 = vector.broadcast %cst_119 : f32 to vector<4x16xf32>
    %414 = vector.extract_strided_slice %175 {offsets = [0, 16], sizes = [4, 240], strides = [1, 1]} : vector<4x256xf32> to vector<4x240xf32>
    %415 = tpu.concatenate %414, %413 in 1 : vector<4x240xf32>, vector<4x16xf32> -> vector<4x256xf32>
    %416 = tpu.concatenate %412, %415 in 0 : vector<4x256xf32>, vector<4x256xf32> -> vector<8x256xf32>
    %c192 = arith.constant 192 : index
    %c0_120 = arith.constant 0 : index
    %417 = vector.load %arg9[%c192, %c0_120] : memref<384x512xf32, #tpu.memory_space<vmem>>, vector<8x256xf32>
    tpu.vector_store %arg9[%c192, %c0_120], %416 {strides = array<i32>} : memref<384x512xf32, #tpu.memory_space<vmem>>, vector<8x256xf32>,
    %cst_121 = arith.constant 0.000000e+00 : f32
    %418 = vector.broadcast %cst_121 : f32 to vector<4x17xf32>
    %419 = vector.extract_strided_slice %175 {offsets = [0, 17], sizes = [4, 239], strides = [1, 1]} : vector<4x256xf32> to vector<4x239xf32>
    %420 = tpu.concatenate %419, %418 in 1 : vector<4x239xf32>, vector<4x17xf32> -> vector<4x256xf32>
    %421 = arith.mulf %420, %81 : vector<4x256xf32>
    %cst_122 = arith.constant 0.000000e+00 : f32
    %422 = vector.broadcast %cst_122 : f32 to vector<4x18xf32>
    %423 = vector.extract_strided_slice %175 {offsets = [0, 18], sizes = [4, 238], strides = [1, 1]} : vector<4x256xf32> to vector<4x238xf32>
    %424 = tpu.concatenate %423, %422 in 1 : vector<4x238xf32>, vector<4x18xf32> -> vector<4x256xf32>
    %425 = arith.mulf %424, %94 : vector<4x256xf32>
    %426 = tpu.concatenate %421, %425 in 0 : vector<4x256xf32>, vector<4x256xf32> -> vector<8x256xf32>
    %c200 = arith.constant 200 : index
    %c0_123 = arith.constant 0 : index
    %427 = vector.load %arg9[%c200, %c0_123] : memref<384x512xf32, #tpu.memory_space<vmem>>, vector<8x256xf32>
    tpu.vector_store %arg9[%c200, %c0_123], %426 {strides = array<i32>} : memref<384x512xf32, #tpu.memory_space<vmem>>, vector<8x256xf32>,
    %cst_124 = arith.constant 0.000000e+00 : f32
    %428 = vector.broadcast %cst_124 : f32 to vector<4x19xf32>
    %429 = vector.extract_strided_slice %175 {offsets = [0, 19], sizes = [4, 237], strides = [1, 1]} : vector<4x256xf32> to vector<4x237xf32>
    %430 = tpu.concatenate %429, %428 in 1 : vector<4x237xf32>, vector<4x19xf32> -> vector<4x256xf32>
    %431 = arith.mulf %430, %107 : vector<4x256xf32>
    %cst_125 = arith.constant 0.000000e+00 : f32
    %432 = vector.broadcast %cst_125 : f32 to vector<4x20xf32>
    %433 = vector.extract_strided_slice %175 {offsets = [0, 20], sizes = [4, 236], strides = [1, 1]} : vector<4x256xf32> to vector<4x236xf32>
    %434 = tpu.concatenate %433, %432 in 1 : vector<4x236xf32>, vector<4x20xf32> -> vector<4x256xf32>
    %435 = arith.mulf %434, %120 : vector<4x256xf32>
    %436 = tpu.concatenate %431, %435 in 0 : vector<4x256xf32>, vector<4x256xf32> -> vector<8x256xf32>
    %c208 = arith.constant 208 : index
    %c0_126 = arith.constant 0 : index
    %437 = vector.load %arg9[%c208, %c0_126] : memref<384x512xf32, #tpu.memory_space<vmem>>, vector<8x256xf32>
    tpu.vector_store %arg9[%c208, %c0_126], %436 {strides = array<i32>} : memref<384x512xf32, #tpu.memory_space<vmem>>, vector<8x256xf32>,
    %cst_127 = arith.constant 0.000000e+00 : f32
    %438 = vector.broadcast %cst_127 : f32 to vector<4x28xf32>
    %439 = vector.extract_strided_slice %175 {offsets = [0, 28], sizes = [4, 228], strides = [1, 1]} : vector<4x256xf32> to vector<4x228xf32>
    %440 = tpu.concatenate %439, %438 in 1 : vector<4x228xf32>, vector<4x28xf32> -> vector<4x256xf32>
    %441 = arith.mulf %440, %29 : vector<4x256xf32>
    %cst_128 = arith.constant 0.000000e+00 : f32
    %442 = vector.broadcast %cst_128 : f32 to vector<4x29xf32>
    %443 = vector.extract_strided_slice %175 {offsets = [0, 29], sizes = [4, 227], strides = [1, 1]} : vector<4x256xf32> to vector<4x227xf32>
    %444 = tpu.concatenate %443, %442 in 1 : vector<4x227xf32>, vector<4x29xf32> -> vector<4x256xf32>
    %445 = arith.mulf %444, %42 : vector<4x256xf32>
    %446 = tpu.concatenate %441, %445 in 0 : vector<4x256xf32>, vector<4x256xf32> -> vector<8x256xf32>
    %c216 = arith.constant 216 : index
    %c0_129 = arith.constant 0 : index
    %447 = vector.load %arg9[%c216, %c0_129] : memref<384x512xf32, #tpu.memory_space<vmem>>, vector<8x256xf32>
    tpu.vector_store %arg9[%c216, %c0_129], %446 {strides = array<i32>} : memref<384x512xf32, #tpu.memory_space<vmem>>, vector<8x256xf32>,
    %cst_130 = arith.constant 0.000000e+00 : f32
    %448 = vector.broadcast %cst_130 : f32 to vector<4x30xf32>
    %449 = vector.extract_strided_slice %175 {offsets = [0, 30], sizes = [4, 226], strides = [1, 1]} : vector<4x256xf32> to vector<4x226xf32>
    %450 = tpu.concatenate %449, %448 in 1 : vector<4x226xf32>, vector<4x30xf32> -> vector<4x256xf32>
    %451 = arith.mulf %450, %55 : vector<4x256xf32>
    %cst_131 = arith.constant 0.000000e+00 : f32
    %452 = vector.broadcast %cst_131 : f32 to vector<4x31xf32>
    %453 = vector.extract_strided_slice %175 {offsets = [0, 31], sizes = [4, 225], strides = [1, 1]} : vector<4x256xf32> to vector<4x225xf32>
    %454 = tpu.concatenate %453, %452 in 1 : vector<4x225xf32>, vector<4x31xf32> -> vector<4x256xf32>
    %455 = arith.mulf %454, %68 : vector<4x256xf32>
    %456 = tpu.concatenate %451, %455 in 0 : vector<4x256xf32>, vector<4x256xf32> -> vector<8x256xf32>
    %c224 = arith.constant 224 : index
    %c0_132 = arith.constant 0 : index
    %457 = vector.load %arg9[%c224, %c0_132] : memref<384x512xf32, #tpu.memory_space<vmem>>, vector<8x256xf32>
    tpu.vector_store %arg9[%c224, %c0_132], %456 {strides = array<i32>} : memref<384x512xf32, #tpu.memory_space<vmem>>, vector<8x256xf32>,
    %cst_133 = arith.constant 0.000000e+00 : f32
    %458 = vector.broadcast %cst_133 : f32 to vector<4x32xf32>
    %459 = vector.extract_strided_slice %175 {offsets = [0, 32], sizes = [4, 224], strides = [1, 1]} : vector<4x256xf32> to vector<4x224xf32>
    %460 = tpu.concatenate %459, %458 in 1 : vector<4x224xf32>, vector<4x32xf32> -> vector<4x256xf32>
    %cst_134 = arith.constant 0.000000e+00 : f32
    %461 = vector.broadcast %cst_134 : f32 to vector<4x33xf32>
    %462 = vector.extract_strided_slice %175 {offsets = [0, 33], sizes = [4, 223], strides = [1, 1]} : vector<4x256xf32> to vector<4x223xf32>
    %463 = tpu.concatenate %462, %461 in 1 : vector<4x223xf32>, vector<4x33xf32> -> vector<4x256xf32>
    %464 = arith.mulf %463, %81 : vector<4x256xf32>
    %465 = tpu.concatenate %460, %464 in 0 : vector<4x256xf32>, vector<4x256xf32> -> vector<8x256xf32>
    %c232 = arith.constant 232 : index
    %c0_135 = arith.constant 0 : index
    %466 = vector.load %arg9[%c232, %c0_135] : memref<384x512xf32, #tpu.memory_space<vmem>>, vector<8x256xf32>
    tpu.vector_store %arg9[%c232, %c0_135], %465 {strides = array<i32>} : memref<384x512xf32, #tpu.memory_space<vmem>>, vector<8x256xf32>,
    %cst_136 = arith.constant 0.000000e+00 : f32
    %467 = vector.broadcast %cst_136 : f32 to vector<4x34xf32>
    %468 = vector.extract_strided_slice %175 {offsets = [0, 34], sizes = [4, 222], strides = [1, 1]} : vector<4x256xf32> to vector<4x222xf32>
    %469 = tpu.concatenate %468, %467 in 1 : vector<4x222xf32>, vector<4x34xf32> -> vector<4x256xf32>
    %470 = arith.mulf %469, %94 : vector<4x256xf32>
    %cst_137 = arith.constant 0.000000e+00 : f32
    %471 = vector.broadcast %cst_137 : f32 to vector<4x35xf32>
    %472 = vector.extract_strided_slice %175 {offsets = [0, 35], sizes = [4, 221], strides = [1, 1]} : vector<4x256xf32> to vector<4x221xf32>
    %473 = tpu.concatenate %472, %471 in 1 : vector<4x221xf32>, vector<4x35xf32> -> vector<4x256xf32>
    %474 = arith.mulf %473, %107 : vector<4x256xf32>
    %475 = tpu.concatenate %470, %474 in 0 : vector<4x256xf32>, vector<4x256xf32> -> vector<8x256xf32>
    %c240 = arith.constant 240 : index
    %c0_138 = arith.constant 0 : index
    %476 = vector.load %arg9[%c240, %c0_138] : memref<384x512xf32, #tpu.memory_space<vmem>>, vector<8x256xf32>
    tpu.vector_store %arg9[%c240, %c0_138], %475 {strides = array<i32>} : memref<384x512xf32, #tpu.memory_space<vmem>>, vector<8x256xf32>,
    %cst_139 = arith.constant 0.000000e+00 : f32
    %477 = vector.broadcast %cst_139 : f32 to vector<4x36xf32>
    %478 = vector.extract_strided_slice %175 {offsets = [0, 36], sizes = [4, 220], strides = [1, 1]} : vector<4x256xf32> to vector<4x220xf32>
    %479 = tpu.concatenate %478, %477 in 1 : vector<4x220xf32>, vector<4x36xf32> -> vector<4x256xf32>
    %480 = arith.mulf %479, %120 : vector<4x256xf32>
    %cst_140 = arith.constant 0.000000e+00 : f32
    %481 = vector.broadcast %cst_140 : f32 to vector<4x44xf32>
    %482 = vector.extract_strided_slice %175 {offsets = [0, 44], sizes = [4, 212], strides = [1, 1]} : vector<4x256xf32> to vector<4x212xf32>
    %483 = tpu.concatenate %482, %481 in 1 : vector<4x212xf32>, vector<4x44xf32> -> vector<4x256xf32>
    %484 = arith.mulf %483, %29 : vector<4x256xf32>
    %485 = tpu.concatenate %480, %484 in 0 : vector<4x256xf32>, vector<4x256xf32> -> vector<8x256xf32>
    %c248 = arith.constant 248 : index
    %c0_141 = arith.constant 0 : index
    %486 = vector.load %arg9[%c248, %c0_141] : memref<384x512xf32, #tpu.memory_space<vmem>>, vector<8x256xf32>
    tpu.vector_store %arg9[%c248, %c0_141], %485 {strides = array<i32>} : memref<384x512xf32, #tpu.memory_space<vmem>>, vector<8x256xf32>,
    %cst_142 = arith.constant 0.000000e+00 : f32
    %487 = vector.broadcast %cst_142 : f32 to vector<4x45xf32>
    %488 = vector.extract_strided_slice %175 {offsets = [0, 45], sizes = [4, 211], strides = [1, 1]} : vector<4x256xf32> to vector<4x211xf32>
    %489 = tpu.concatenate %488, %487 in 1 : vector<4x211xf32>, vector<4x45xf32> -> vector<4x256xf32>
    %490 = arith.mulf %489, %42 : vector<4x256xf32>
    %cst_143 = arith.constant 0.000000e+00 : f32
    %491 = vector.broadcast %cst_143 : f32 to vector<4x46xf32>
    %492 = vector.extract_strided_slice %175 {offsets = [0, 46], sizes = [4, 210], strides = [1, 1]} : vector<4x256xf32> to vector<4x210xf32>
    %493 = tpu.concatenate %492, %491 in 1 : vector<4x210xf32>, vector<4x46xf32> -> vector<4x256xf32>
    %494 = arith.mulf %493, %55 : vector<4x256xf32>
    %495 = tpu.concatenate %490, %494 in 0 : vector<4x256xf32>, vector<4x256xf32> -> vector<8x256xf32>
    %c256 = arith.constant 256 : index
    %c0_144 = arith.constant 0 : index
    %496 = vector.load %arg9[%c256, %c0_144] : memref<384x512xf32, #tpu.memory_space<vmem>>, vector<8x256xf32>
    tpu.vector_store %arg9[%c256, %c0_144], %495 {strides = array<i32>} : memref<384x512xf32, #tpu.memory_space<vmem>>, vector<8x256xf32>,
    %cst_145 = arith.constant 0.000000e+00 : f32
    %497 = vector.broadcast %cst_145 : f32 to vector<4x47xf32>
    %498 = vector.extract_strided_slice %175 {offsets = [0, 47], sizes = [4, 209], strides = [1, 1]} : vector<4x256xf32> to vector<4x209xf32>
    %499 = tpu.concatenate %498, %497 in 1 : vector<4x209xf32>, vector<4x47xf32> -> vector<4x256xf32>
    %500 = arith.mulf %499, %68 : vector<4x256xf32>
    %cst_146 = arith.constant 0.000000e+00 : f32
    %501 = vector.broadcast %cst_146 : f32 to vector<4x48xf32>
    %502 = vector.extract_strided_slice %175 {offsets = [0, 48], sizes = [4, 208], strides = [1, 1]} : vector<4x256xf32> to vector<4x208xf32>
    %503 = tpu.concatenate %502, %501 in 1 : vector<4x208xf32>, vector<4x48xf32> -> vector<4x256xf32>
    %504 = tpu.concatenate %500, %503 in 0 : vector<4x256xf32>, vector<4x256xf32> -> vector<8x256xf32>
    %c264 = arith.constant 264 : index
    %c0_147 = arith.constant 0 : index
    %505 = vector.load %arg9[%c264, %c0_147] : memref<384x512xf32, #tpu.memory_space<vmem>>, vector<8x256xf32>
    tpu.vector_store %arg9[%c264, %c0_147], %504 {strides = array<i32>} : memref<384x512xf32, #tpu.memory_space<vmem>>, vector<8x256xf32>,
    %cst_148 = arith.constant 0.000000e+00 : f32
    %506 = vector.broadcast %cst_148 : f32 to vector<4x49xf32>
    %507 = vector.extract_strided_slice %175 {offsets = [0, 49], sizes = [4, 207], strides = [1, 1]} : vector<4x256xf32> to vector<4x207xf32>
    %508 = tpu.concatenate %507, %506 in 1 : vector<4x207xf32>, vector<4x49xf32> -> vector<4x256xf32>
    %509 = arith.mulf %508, %81 : vector<4x256xf32>
    %cst_149 = arith.constant 0.000000e+00 : f32
    %510 = vector.broadcast %cst_149 : f32 to vector<4x50xf32>
    %511 = vector.extract_strided_slice %175 {offsets = [0, 50], sizes = [4, 206], strides = [1, 1]} : vector<4x256xf32> to vector<4x206xf32>
    %512 = tpu.concatenate %511, %510 in 1 : vector<4x206xf32>, vector<4x50xf32> -> vector<4x256xf32>
    %513 = arith.mulf %512, %94 : vector<4x256xf32>
    %514 = tpu.concatenate %509, %513 in 0 : vector<4x256xf32>, vector<4x256xf32> -> vector<8x256xf32>
    %c272 = arith.constant 272 : index
    %c0_150 = arith.constant 0 : index
    %515 = vector.load %arg9[%c272, %c0_150] : memref<384x512xf32, #tpu.memory_space<vmem>>, vector<8x256xf32>
    tpu.vector_store %arg9[%c272, %c0_150], %514 {strides = array<i32>} : memref<384x512xf32, #tpu.memory_space<vmem>>, vector<8x256xf32>,
    %cst_151 = arith.constant 0.000000e+00 : f32
    %516 = vector.broadcast %cst_151 : f32 to vector<4x51xf32>
    %517 = vector.extract_strided_slice %175 {offsets = [0, 51], sizes = [4, 205], strides = [1, 1]} : vector<4x256xf32> to vector<4x205xf32>
    %518 = tpu.concatenate %517, %516 in 1 : vector<4x205xf32>, vector<4x51xf32> -> vector<4x256xf32>
    %519 = arith.mulf %518, %107 : vector<4x256xf32>
    %cst_152 = arith.constant 0.000000e+00 : f32
    %520 = vector.broadcast %cst_152 : f32 to vector<4x52xf32>
    %521 = vector.extract_strided_slice %175 {offsets = [0, 52], sizes = [4, 204], strides = [1, 1]} : vector<4x256xf32> to vector<4x204xf32>
    %522 = tpu.concatenate %521, %520 in 1 : vector<4x204xf32>, vector<4x52xf32> -> vector<4x256xf32>
    %523 = arith.mulf %522, %120 : vector<4x256xf32>
    %524 = tpu.concatenate %519, %523 in 0 : vector<4x256xf32>, vector<4x256xf32> -> vector<8x256xf32>
    %c280 = arith.constant 280 : index
    %c0_153 = arith.constant 0 : index
    %525 = vector.load %arg9[%c280, %c0_153] : memref<384x512xf32, #tpu.memory_space<vmem>>, vector<8x256xf32>
    tpu.vector_store %arg9[%c280, %c0_153], %524 {strides = array<i32>} : memref<384x512xf32, #tpu.memory_space<vmem>>, vector<8x256xf32>,
    %cst_154 = arith.constant 0.000000e+00 : f32
    %526 = vector.broadcast %cst_154 : f32 to vector<4x60xf32>
    %527 = vector.extract_strided_slice %175 {offsets = [0, 60], sizes = [4, 196], strides = [1, 1]} : vector<4x256xf32> to vector<4x196xf32>
    %528 = tpu.concatenate %527, %526 in 1 : vector<4x196xf32>, vector<4x60xf32> -> vector<4x256xf32>
    %529 = arith.mulf %528, %29 : vector<4x256xf32>
    %cst_155 = arith.constant 0.000000e+00 : f32
    %530 = vector.broadcast %cst_155 : f32 to vector<4x61xf32>
    %531 = vector.extract_strided_slice %175 {offsets = [0, 61], sizes = [4, 195], strides = [1, 1]} : vector<4x256xf32> to vector<4x195xf32>
    %532 = tpu.concatenate %531, %530 in 1 : vector<4x195xf32>, vector<4x61xf32> -> vector<4x256xf32>
    %533 = arith.mulf %532, %42 : vector<4x256xf32>
    %534 = tpu.concatenate %529, %533 in 0 : vector<4x256xf32>, vector<4x256xf32> -> vector<8x256xf32>
    %c288 = arith.constant 288 : index
    %c0_156 = arith.constant 0 : index
    %535 = vector.load %arg9[%c288, %c0_156] : memref<384x512xf32, #tpu.memory_space<vmem>>, vector<8x256xf32>
    tpu.vector_store %arg9[%c288, %c0_156], %534 {strides = array<i32>} : memref<384x512xf32, #tpu.memory_space<vmem>>, vector<8x256xf32>,
    %cst_157 = arith.constant 0.000000e+00 : f32
    %536 = vector.broadcast %cst_157 : f32 to vector<4x62xf32>
    %537 = vector.extract_strided_slice %175 {offsets = [0, 62], sizes = [4, 194], strides = [1, 1]} : vector<4x256xf32> to vector<4x194xf32>
    %538 = tpu.concatenate %537, %536 in 1 : vector<4x194xf32>, vector<4x62xf32> -> vector<4x256xf32>
    %539 = arith.mulf %538, %55 : vector<4x256xf32>
    %cst_158 = arith.constant 0.000000e+00 : f32
    %540 = vector.broadcast %cst_158 : f32 to vector<4x63xf32>
    %541 = vector.extract_strided_slice %175 {offsets = [0, 63], sizes = [4, 193], strides = [1, 1]} : vector<4x256xf32> to vector<4x193xf32>
    %542 = tpu.concatenate %541, %540 in 1 : vector<4x193xf32>, vector<4x63xf32> -> vector<4x256xf32>
    %543 = arith.mulf %542, %68 : vector<4x256xf32>
    %544 = tpu.concatenate %539, %543 in 0 : vector<4x256xf32>, vector<4x256xf32> -> vector<8x256xf32>
    %c296 = arith.constant 296 : index
    %c0_159 = arith.constant 0 : index
    %545 = vector.load %arg9[%c296, %c0_159] : memref<384x512xf32, #tpu.memory_space<vmem>>, vector<8x256xf32>
    tpu.vector_store %arg9[%c296, %c0_159], %544 {strides = array<i32>} : memref<384x512xf32, #tpu.memory_space<vmem>>, vector<8x256xf32>,
    %cst_160 = arith.constant 0.000000e+00 : f32
    %546 = vector.broadcast %cst_160 : f32 to vector<4x64xf32>
    %547 = vector.extract_strided_slice %175 {offsets = [0, 64], sizes = [4, 192], strides = [1, 1]} : vector<4x256xf32> to vector<4x192xf32>
    %548 = tpu.concatenate %547, %546 in 1 : vector<4x192xf32>, vector<4x64xf32> -> vector<4x256xf32>
    %cst_161 = arith.constant 0.000000e+00 : f32
    %549 = vector.broadcast %cst_161 : f32 to vector<4x65xf32>
    %550 = vector.extract_strided_slice %175 {offsets = [0, 65], sizes = [4, 191], strides = [1, 1]} : vector<4x256xf32> to vector<4x191xf32>
    %551 = tpu.concatenate %550, %549 in 1 : vector<4x191xf32>, vector<4x65xf32> -> vector<4x256xf32>
    %552 = arith.mulf %551, %81 : vector<4x256xf32>
    %553 = tpu.concatenate %548, %552 in 0 : vector<4x256xf32>, vector<4x256xf32> -> vector<8x256xf32>
    %c304 = arith.constant 304 : index
    %c0_162 = arith.constant 0 : index
    %554 = vector.load %arg9[%c304, %c0_162] : memref<384x512xf32, #tpu.memory_space<vmem>>, vector<8x256xf32>
    tpu.vector_store %arg9[%c304, %c0_162], %553 {strides = array<i32>} : memref<384x512xf32, #tpu.memory_space<vmem>>, vector<8x256xf32>,
    %cst_163 = arith.constant 0.000000e+00 : f32
    %555 = vector.broadcast %cst_163 : f32 to vector<4x66xf32>
    %556 = vector.extract_strided_slice %175 {offsets = [0, 66], sizes = [4, 190], strides = [1, 1]} : vector<4x256xf32> to vector<4x190xf32>
    %557 = tpu.concatenate %556, %555 in 1 : vector<4x190xf32>, vector<4x66xf32> -> vector<4x256xf32>
    %558 = arith.mulf %557, %94 : vector<4x256xf32>
    %cst_164 = arith.constant 0.000000e+00 : f32
    %559 = vector.broadcast %cst_164 : f32 to vector<4x67xf32>
    %560 = vector.extract_strided_slice %175 {offsets = [0, 67], sizes = [4, 189], strides = [1, 1]} : vector<4x256xf32> to vector<4x189xf32>
    %561 = tpu.concatenate %560, %559 in 1 : vector<4x189xf32>, vector<4x67xf32> -> vector<4x256xf32>
    %562 = arith.mulf %561, %107 : vector<4x256xf32>
    %563 = tpu.concatenate %558, %562 in 0 : vector<4x256xf32>, vector<4x256xf32> -> vector<8x256xf32>
    %c312 = arith.constant 312 : index
    %c0_165 = arith.constant 0 : index
    %564 = vector.load %arg9[%c312, %c0_165] : memref<384x512xf32, #tpu.memory_space<vmem>>, vector<8x256xf32>
    tpu.vector_store %arg9[%c312, %c0_165], %563 {strides = array<i32>} : memref<384x512xf32, #tpu.memory_space<vmem>>, vector<8x256xf32>,
    %cst_166 = arith.constant 0.000000e+00 : f32
    %565 = vector.broadcast %cst_166 : f32 to vector<4x68xf32>
    %566 = vector.extract_strided_slice %175 {offsets = [0, 68], sizes = [4, 188], strides = [1, 1]} : vector<4x256xf32> to vector<4x188xf32>
    %567 = tpu.concatenate %566, %565 in 1 : vector<4x188xf32>, vector<4x68xf32> -> vector<4x256xf32>
    %568 = arith.mulf %567, %120 : vector<4x256xf32>
    %569 = tpu.concatenate %568, %176 in 0 : vector<4x256xf32>, vector<4x256xf32> -> vector<8x256xf32>
    %c320 = arith.constant 320 : index
    %c0_167 = arith.constant 0 : index
    %570 = vector.load %arg9[%c320, %c0_167] : memref<384x512xf32, #tpu.memory_space<vmem>>, vector<8x256xf32>
    tpu.vector_store %arg9[%c320, %c0_167], %569 {strides = array<i32>} : memref<384x512xf32, #tpu.memory_space<vmem>>, vector<8x256xf32>,
    %571 = tpu.concatenate %176, %176 in 0 : vector<4x256xf32>, vector<4x256xf32> -> vector<8x256xf32>
    %c328 = arith.constant 328 : index
    %c0_168 = arith.constant 0 : index
    %572 = vector.load %arg9[%c328, %c0_168] : memref<384x512xf32, #tpu.memory_space<vmem>>, vector<8x256xf32>
    tpu.vector_store %arg9[%c328, %c0_168], %571 {strides = array<i32>} : memref<384x512xf32, #tpu.memory_space<vmem>>, vector<8x256xf32>,
    %573 = tpu.concatenate %176, %176 in 0 : vector<4x256xf32>, vector<4x256xf32> -> vector<8x256xf32>
    %c336 = arith.constant 336 : index
    %c0_169 = arith.constant 0 : index
    %574 = vector.load %arg9[%c336, %c0_169] : memref<384x512xf32, #tpu.memory_space<vmem>>, vector<8x256xf32>
    tpu.vector_store %arg9[%c336, %c0_169], %573 {strides = array<i32>} : memref<384x512xf32, #tpu.memory_space<vmem>>, vector<8x256xf32>,
    %575 = tpu.concatenate %176, %176 in 0 : vector<4x256xf32>, vector<4x256xf32> -> vector<8x256xf32>
    %c344 = arith.constant 344 : index
    %c0_170 = arith.constant 0 : index
    %576 = vector.load %arg9[%c344, %c0_170] : memref<384x512xf32, #tpu.memory_space<vmem>>, vector<8x256xf32>
    tpu.vector_store %arg9[%c344, %c0_170], %575 {strides = array<i32>} : memref<384x512xf32, #tpu.memory_space<vmem>>, vector<8x256xf32>,
    %577 = tpu.concatenate %176, %176 in 0 : vector<4x256xf32>, vector<4x256xf32> -> vector<8x256xf32>
    %c352 = arith.constant 352 : index
    %c0_171 = arith.constant 0 : index
    %578 = vector.load %arg9[%c352, %c0_171] : memref<384x512xf32, #tpu.memory_space<vmem>>, vector<8x256xf32>
    tpu.vector_store %arg9[%c352, %c0_171], %577 {strides = array<i32>} : memref<384x512xf32, #tpu.memory_space<vmem>>, vector<8x256xf32>,
    %579 = tpu.concatenate %176, %176 in 0 : vector<4x256xf32>, vector<4x256xf32> -> vector<8x256xf32>
    %c360 = arith.constant 360 : index
    %c0_172 = arith.constant 0 : index
    %580 = vector.load %arg9[%c360, %c0_172] : memref<384x512xf32, #tpu.memory_space<vmem>>, vector<8x256xf32>
    tpu.vector_store %arg9[%c360, %c0_172], %579 {strides = array<i32>} : memref<384x512xf32, #tpu.memory_space<vmem>>, vector<8x256xf32>,
    %581 = tpu.concatenate %176, %176 in 0 : vector<4x256xf32>, vector<4x256xf32> -> vector<8x256xf32>
    %c368 = arith.constant 368 : index
    %c0_173 = arith.constant 0 : index
    %582 = vector.load %arg9[%c368, %c0_173] : memref<384x512xf32, #tpu.memory_space<vmem>>, vector<8x256xf32>
    tpu.vector_store %arg9[%c368, %c0_173], %581 {strides = array<i32>} : memref<384x512xf32, #tpu.memory_space<vmem>>, vector<8x256xf32>,
    %583 = tpu.concatenate %176, %176 in 0 : vector<4x256xf32>, vector<4x256xf32> -> vector<8x256xf32>
    %c376 = arith.constant 376 : index
    %c0_174 = arith.constant 0 : index
    %584 = vector.load %arg9[%c376, %c0_174] : memref<384x512xf32, #tpu.memory_space<vmem>>, vector<8x256xf32>
    tpu.vector_store %arg9[%c376, %c0_174], %583 {strides = array<i32>} : memref<384x512xf32, #tpu.memory_space<vmem>>, vector<8x256xf32>,
    %585 = vector.extract_strided_slice %174 {offsets = [4, 0], sizes = [4, 256], strides = [1, 1]} : vector<8x256xf32> to vector<4x256xf32>
    %cst_175 = arith.constant 0.000000e+00 : f32
    %586 = vector.broadcast %cst_175 : f32 to vector<4x256xf32>
    %cst_176 = arith.constant 0.000000e+00 : f32
    %587 = vector.broadcast %cst_176 : f32 to vector<4x68xf32>
    %588 = vector.extract_strided_slice %585 {offsets = [0, 0], sizes = [4, 188], strides = [1, 1]} : vector<4x256xf32> to vector<4x188xf32>
    %589 = tpu.concatenate %587, %588 in 1 : vector<4x68xf32>, vector<4x188xf32> -> vector<4x256xf32>
    %590 = arith.mulf %589, %29 : vector<4x256xf32>
    %cst_177 = arith.constant 0.000000e+00 : f32
    %591 = vector.broadcast %cst_177 : f32 to vector<4x67xf32>
    %592 = vector.extract_strided_slice %585 {offsets = [0, 0], sizes = [4, 189], strides = [1, 1]} : vector<4x256xf32> to vector<4x189xf32>
    %593 = tpu.concatenate %591, %592 in 1 : vector<4x67xf32>, vector<4x189xf32> -> vector<4x256xf32>
    %594 = arith.mulf %593, %42 : vector<4x256xf32>
    %595 = tpu.concatenate %590, %594 in 0 : vector<4x256xf32>, vector<4x256xf32> -> vector<8x256xf32>
    %c0_178 = arith.constant 0 : index
    %c256_179 = arith.constant 256 : index
    %596 = vector.load %arg9[%c0_178, %c256_179] : memref<384x512xf32, #tpu.memory_space<vmem>>, vector<8x256xf32>
    tpu.vector_store %arg9[%c0_178, %c256_179], %595 {strides = array<i32>} : memref<384x512xf32, #tpu.memory_space<vmem>>, vector<8x256xf32>,
    %cst_180 = arith.constant 0.000000e+00 : f32
    %597 = vector.broadcast %cst_180 : f32 to vector<4x66xf32>
    %598 = vector.extract_strided_slice %585 {offsets = [0, 0], sizes = [4, 190], strides = [1, 1]} : vector<4x256xf32> to vector<4x190xf32>
    %599 = tpu.concatenate %597, %598 in 1 : vector<4x66xf32>, vector<4x190xf32> -> vector<4x256xf32>
    %600 = arith.mulf %599, %55 : vector<4x256xf32>
    %cst_181 = arith.constant 0.000000e+00 : f32
    %601 = vector.broadcast %cst_181 : f32 to vector<4x65xf32>
    %602 = vector.extract_strided_slice %585 {offsets = [0, 0], sizes = [4, 191], strides = [1, 1]} : vector<4x256xf32> to vector<4x191xf32>
    %603 = tpu.concatenate %601, %602 in 1 : vector<4x65xf32>, vector<4x191xf32> -> vector<4x256xf32>
    %604 = arith.mulf %603, %68 : vector<4x256xf32>
    %605 = tpu.concatenate %600, %604 in 0 : vector<4x256xf32>, vector<4x256xf32> -> vector<8x256xf32>
    %c8_182 = arith.constant 8 : index
    %c256_183 = arith.constant 256 : index
    %606 = vector.load %arg9[%c8_182, %c256_183] : memref<384x512xf32, #tpu.memory_space<vmem>>, vector<8x256xf32>
    tpu.vector_store %arg9[%c8_182, %c256_183], %605 {strides = array<i32>} : memref<384x512xf32, #tpu.memory_space<vmem>>, vector<8x256xf32>,
    %cst_184 = arith.constant 0.000000e+00 : f32
    %607 = vector.broadcast %cst_184 : f32 to vector<4x64xf32>
    %608 = vector.extract_strided_slice %585 {offsets = [0, 0], sizes = [4, 192], strides = [1, 1]} : vector<4x256xf32> to vector<4x192xf32>
    %609 = tpu.concatenate %607, %608 in 1 : vector<4x64xf32>, vector<4x192xf32> -> vector<4x256xf32>
    %cst_185 = arith.constant 0.000000e+00 : f32
    %610 = vector.broadcast %cst_185 : f32 to vector<4x63xf32>
    %611 = vector.extract_strided_slice %585 {offsets = [0, 0], sizes = [4, 193], strides = [1, 1]} : vector<4x256xf32> to vector<4x193xf32>
    %612 = tpu.concatenate %610, %611 in 1 : vector<4x63xf32>, vector<4x193xf32> -> vector<4x256xf32>
    %613 = arith.mulf %612, %81 : vector<4x256xf32>
    %614 = tpu.concatenate %609, %613 in 0 : vector<4x256xf32>, vector<4x256xf32> -> vector<8x256xf32>
    %c16_186 = arith.constant 16 : index
    %c256_187 = arith.constant 256 : index
    %615 = vector.load %arg9[%c16_186, %c256_187] : memref<384x512xf32, #tpu.memory_space<vmem>>, vector<8x256xf32>
    tpu.vector_store %arg9[%c16_186, %c256_187], %614 {strides = array<i32>} : memref<384x512xf32, #tpu.memory_space<vmem>>, vector<8x256xf32>,
    %cst_188 = arith.constant 0.000000e+00 : f32
    %616 = vector.broadcast %cst_188 : f32 to vector<4x62xf32>
    %617 = vector.extract_strided_slice %585 {offsets = [0, 0], sizes = [4, 194], strides = [1, 1]} : vector<4x256xf32> to vector<4x194xf32>
    %618 = tpu.concatenate %616, %617 in 1 : vector<4x62xf32>, vector<4x194xf32> -> vector<4x256xf32>
    %619 = arith.mulf %618, %94 : vector<4x256xf32>
    %cst_189 = arith.constant 0.000000e+00 : f32
    %620 = vector.broadcast %cst_189 : f32 to vector<4x61xf32>
    %621 = vector.extract_strided_slice %585 {offsets = [0, 0], sizes = [4, 195], strides = [1, 1]} : vector<4x256xf32> to vector<4x195xf32>
    %622 = tpu.concatenate %620, %621 in 1 : vector<4x61xf32>, vector<4x195xf32> -> vector<4x256xf32>
    %623 = arith.mulf %622, %107 : vector<4x256xf32>
    %624 = tpu.concatenate %619, %623 in 0 : vector<4x256xf32>, vector<4x256xf32> -> vector<8x256xf32>
    %c24_190 = arith.constant 24 : index
    %c256_191 = arith.constant 256 : index
    %625 = vector.load %arg9[%c24_190, %c256_191] : memref<384x512xf32, #tpu.memory_space<vmem>>, vector<8x256xf32>
    tpu.vector_store %arg9[%c24_190, %c256_191], %624 {strides = array<i32>} : memref<384x512xf32, #tpu.memory_space<vmem>>, vector<8x256xf32>,
    %cst_192 = arith.constant 0.000000e+00 : f32
    %626 = vector.broadcast %cst_192 : f32 to vector<4x60xf32>
    %627 = vector.extract_strided_slice %585 {offsets = [0, 0], sizes = [4, 196], strides = [1, 1]} : vector<4x256xf32> to vector<4x196xf32>
    %628 = tpu.concatenate %626, %627 in 1 : vector<4x60xf32>, vector<4x196xf32> -> vector<4x256xf32>
    %629 = arith.mulf %628, %120 : vector<4x256xf32>
    %cst_193 = arith.constant 0.000000e+00 : f32
    %630 = vector.broadcast %cst_193 : f32 to vector<4x52xf32>
    %631 = vector.extract_strided_slice %585 {offsets = [0, 0], sizes = [4, 204], strides = [1, 1]} : vector<4x256xf32> to vector<4x204xf32>
    %632 = tpu.concatenate %630, %631 in 1 : vector<4x52xf32>, vector<4x204xf32> -> vector<4x256xf32>
    %633 = arith.mulf %632, %29 : vector<4x256xf32>
    %634 = tpu.concatenate %629, %633 in 0 : vector<4x256xf32>, vector<4x256xf32> -> vector<8x256xf32>
    %c32_194 = arith.constant 32 : index
    %c256_195 = arith.constant 256 : index
    %635 = vector.load %arg9[%c32_194, %c256_195] : memref<384x512xf32, #tpu.memory_space<vmem>>, vector<8x256xf32>
    tpu.vector_store %arg9[%c32_194, %c256_195], %634 {strides = array<i32>} : memref<384x512xf32, #tpu.memory_space<vmem>>, vector<8x256xf32>,
    %cst_196 = arith.constant 0.000000e+00 : f32
    %636 = vector.broadcast %cst_196 : f32 to vector<4x51xf32>
    %637 = vector.extract_strided_slice %585 {offsets = [0, 0], sizes = [4, 205], strides = [1, 1]} : vector<4x256xf32> to vector<4x205xf32>
    %638 = tpu.concatenate %636, %637 in 1 : vector<4x51xf32>, vector<4x205xf32> -> vector<4x256xf32>
    %639 = arith.mulf %638, %42 : vector<4x256xf32>
    %cst_197 = arith.constant 0.000000e+00 : f32
    %640 = vector.broadcast %cst_197 : f32 to vector<4x50xf32>
    %641 = vector.extract_strided_slice %585 {offsets = [0, 0], sizes = [4, 206], strides = [1, 1]} : vector<4x256xf32> to vector<4x206xf32>
    %642 = tpu.concatenate %640, %641 in 1 : vector<4x50xf32>, vector<4x206xf32> -> vector<4x256xf32>
    %643 = arith.mulf %642, %55 : vector<4x256xf32>
    %644 = tpu.concatenate %639, %643 in 0 : vector<4x256xf32>, vector<4x256xf32> -> vector<8x256xf32>
    %c40_198 = arith.constant 40 : index
    %c256_199 = arith.constant 256 : index
    %645 = vector.load %arg9[%c40_198, %c256_199] : memref<384x512xf32, #tpu.memory_space<vmem>>, vector<8x256xf32>
    tpu.vector_store %arg9[%c40_198, %c256_199], %644 {strides = array<i32>} : memref<384x512xf32, #tpu.memory_space<vmem>>, vector<8x256xf32>,
    %cst_200 = arith.constant 0.000000e+00 : f32
    %646 = vector.broadcast %cst_200 : f32 to vector<4x49xf32>
    %647 = vector.extract_strided_slice %585 {offsets = [0, 0], sizes = [4, 207], strides = [1, 1]} : vector<4x256xf32> to vector<4x207xf32>
    %648 = tpu.concatenate %646, %647 in 1 : vector<4x49xf32>, vector<4x207xf32> -> vector<4x256xf32>
    %649 = arith.mulf %648, %68 : vector<4x256xf32>
    %cst_201 = arith.constant 0.000000e+00 : f32
    %650 = vector.broadcast %cst_201 : f32 to vector<4x48xf32>
    %651 = vector.extract_strided_slice %585 {offsets = [0, 0], sizes = [4, 208], strides = [1, 1]} : vector<4x256xf32> to vector<4x208xf32>
    %652 = tpu.concatenate %650, %651 in 1 : vector<4x48xf32>, vector<4x208xf32> -> vector<4x256xf32>
    %653 = tpu.concatenate %649, %652 in 0 : vector<4x256xf32>, vector<4x256xf32> -> vector<8x256xf32>
    %c48_202 = arith.constant 48 : index
    %c256_203 = arith.constant 256 : index
    %654 = vector.load %arg9[%c48_202, %c256_203] : memref<384x512xf32, #tpu.memory_space<vmem>>, vector<8x256xf32>
    tpu.vector_store %arg9[%c48_202, %c256_203], %653 {strides = array<i32>} : memref<384x512xf32, #tpu.memory_space<vmem>>, vector<8x256xf32>,
    %cst_204 = arith.constant 0.000000e+00 : f32
    %655 = vector.broadcast %cst_204 : f32 to vector<4x47xf32>
    %656 = vector.extract_strided_slice %585 {offsets = [0, 0], sizes = [4, 209], strides = [1, 1]} : vector<4x256xf32> to vector<4x209xf32>
    %657 = tpu.concatenate %655, %656 in 1 : vector<4x47xf32>, vector<4x209xf32> -> vector<4x256xf32>
    %658 = arith.mulf %657, %81 : vector<4x256xf32>
    %cst_205 = arith.constant 0.000000e+00 : f32
    %659 = vector.broadcast %cst_205 : f32 to vector<4x46xf32>
    %660 = vector.extract_strided_slice %585 {offsets = [0, 0], sizes = [4, 210], strides = [1, 1]} : vector<4x256xf32> to vector<4x210xf32>
    %661 = tpu.concatenate %659, %660 in 1 : vector<4x46xf32>, vector<4x210xf32> -> vector<4x256xf32>
    %662 = arith.mulf %661, %94 : vector<4x256xf32>
    %663 = tpu.concatenate %658, %662 in 0 : vector<4x256xf32>, vector<4x256xf32> -> vector<8x256xf32>
    %c56_206 = arith.constant 56 : index
    %c256_207 = arith.constant 256 : index
    %664 = vector.load %arg9[%c56_206, %c256_207] : memref<384x512xf32, #tpu.memory_space<vmem>>, vector<8x256xf32>
    tpu.vector_store %arg9[%c56_206, %c256_207], %663 {strides = array<i32>} : memref<384x512xf32, #tpu.memory_space<vmem>>, vector<8x256xf32>,
    %cst_208 = arith.constant 0.000000e+00 : f32
    %665 = vector.broadcast %cst_208 : f32 to vector<4x45xf32>
    %666 = vector.extract_strided_slice %585 {offsets = [0, 0], sizes = [4, 211], strides = [1, 1]} : vector<4x256xf32> to vector<4x211xf32>
    %667 = tpu.concatenate %665, %666 in 1 : vector<4x45xf32>, vector<4x211xf32> -> vector<4x256xf32>
    %668 = arith.mulf %667, %107 : vector<4x256xf32>
    %cst_209 = arith.constant 0.000000e+00 : f32
    %669 = vector.broadcast %cst_209 : f32 to vector<4x44xf32>
    %670 = vector.extract_strided_slice %585 {offsets = [0, 0], sizes = [4, 212], strides = [1, 1]} : vector<4x256xf32> to vector<4x212xf32>
    %671 = tpu.concatenate %669, %670 in 1 : vector<4x44xf32>, vector<4x212xf32> -> vector<4x256xf32>
    %672 = arith.mulf %671, %120 : vector<4x256xf32>
    %673 = tpu.concatenate %668, %672 in 0 : vector<4x256xf32>, vector<4x256xf32> -> vector<8x256xf32>
    %c64_210 = arith.constant 64 : index
    %c256_211 = arith.constant 256 : index
    %674 = vector.load %arg9[%c64_210, %c256_211] : memref<384x512xf32, #tpu.memory_space<vmem>>, vector<8x256xf32>
    tpu.vector_store %arg9[%c64_210, %c256_211], %673 {strides = array<i32>} : memref<384x512xf32, #tpu.memory_space<vmem>>, vector<8x256xf32>,
    %cst_212 = arith.constant 0.000000e+00 : f32
    %675 = vector.broadcast %cst_212 : f32 to vector<4x36xf32>
    %676 = vector.extract_strided_slice %585 {offsets = [0, 0], sizes = [4, 220], strides = [1, 1]} : vector<4x256xf32> to vector<4x220xf32>
    %677 = tpu.concatenate %675, %676 in 1 : vector<4x36xf32>, vector<4x220xf32> -> vector<4x256xf32>
    %678 = arith.mulf %677, %29 : vector<4x256xf32>
    %cst_213 = arith.constant 0.000000e+00 : f32
    %679 = vector.broadcast %cst_213 : f32 to vector<4x35xf32>
    %680 = vector.extract_strided_slice %585 {offsets = [0, 0], sizes = [4, 221], strides = [1, 1]} : vector<4x256xf32> to vector<4x221xf32>
    %681 = tpu.concatenate %679, %680 in 1 : vector<4x35xf32>, vector<4x221xf32> -> vector<4x256xf32>
    %682 = arith.mulf %681, %42 : vector<4x256xf32>
    %683 = tpu.concatenate %678, %682 in 0 : vector<4x256xf32>, vector<4x256xf32> -> vector<8x256xf32>
    %c72_214 = arith.constant 72 : index
    %c256_215 = arith.constant 256 : index
    %684 = vector.load %arg9[%c72_214, %c256_215] : memref<384x512xf32, #tpu.memory_space<vmem>>, vector<8x256xf32>
    tpu.vector_store %arg9[%c72_214, %c256_215], %683 {strides = array<i32>} : memref<384x512xf32, #tpu.memory_space<vmem>>, vector<8x256xf32>,
    %cst_216 = arith.constant 0.000000e+00 : f32
    %685 = vector.broadcast %cst_216 : f32 to vector<4x34xf32>
    %686 = vector.extract_strided_slice %585 {offsets = [0, 0], sizes = [4, 222], strides = [1, 1]} : vector<4x256xf32> to vector<4x222xf32>
    %687 = tpu.concatenate %685, %686 in 1 : vector<4x34xf32>, vector<4x222xf32> -> vector<4x256xf32>
    %688 = arith.mulf %687, %55 : vector<4x256xf32>
    %cst_217 = arith.constant 0.000000e+00 : f32
    %689 = vector.broadcast %cst_217 : f32 to vector<4x33xf32>
    %690 = vector.extract_strided_slice %585 {offsets = [0, 0], sizes = [4, 223], strides = [1, 1]} : vector<4x256xf32> to vector<4x223xf32>
    %691 = tpu.concatenate %689, %690 in 1 : vector<4x33xf32>, vector<4x223xf32> -> vector<4x256xf32>
    %692 = arith.mulf %691, %68 : vector<4x256xf32>
    %693 = tpu.concatenate %688, %692 in 0 : vector<4x256xf32>, vector<4x256xf32> -> vector<8x256xf32>
    %c80_218 = arith.constant 80 : index
    %c256_219 = arith.constant 256 : index
    %694 = vector.load %arg9[%c80_218, %c256_219] : memref<384x512xf32, #tpu.memory_space<vmem>>, vector<8x256xf32>
    tpu.vector_store %arg9[%c80_218, %c256_219], %693 {strides = array<i32>} : memref<384x512xf32, #tpu.memory_space<vmem>>, vector<8x256xf32>,
    %cst_220 = arith.constant 0.000000e+00 : f32
    %695 = vector.broadcast %cst_220 : f32 to vector<4x32xf32>
    %696 = vector.extract_strided_slice %585 {offsets = [0, 0], sizes = [4, 224], strides = [1, 1]} : vector<4x256xf32> to vector<4x224xf32>
    %697 = tpu.concatenate %695, %696 in 1 : vector<4x32xf32>, vector<4x224xf32> -> vector<4x256xf32>
    %cst_221 = arith.constant 0.000000e+00 : f32
    %698 = vector.broadcast %cst_221 : f32 to vector<4x31xf32>
    %699 = vector.extract_strided_slice %585 {offsets = [0, 0], sizes = [4, 225], strides = [1, 1]} : vector<4x256xf32> to vector<4x225xf32>
    %700 = tpu.concatenate %698, %699 in 1 : vector<4x31xf32>, vector<4x225xf32> -> vector<4x256xf32>
    %701 = arith.mulf %700, %81 : vector<4x256xf32>
    %702 = tpu.concatenate %697, %701 in 0 : vector<4x256xf32>, vector<4x256xf32> -> vector<8x256xf32>
    %c88_222 = arith.constant 88 : index
    %c256_223 = arith.constant 256 : index
    %703 = vector.load %arg9[%c88_222, %c256_223] : memref<384x512xf32, #tpu.memory_space<vmem>>, vector<8x256xf32>
    tpu.vector_store %arg9[%c88_222, %c256_223], %702 {strides = array<i32>} : memref<384x512xf32, #tpu.memory_space<vmem>>, vector<8x256xf32>,
    %cst_224 = arith.constant 0.000000e+00 : f32
    %704 = vector.broadcast %cst_224 : f32 to vector<4x30xf32>
    %705 = vector.extract_strided_slice %585 {offsets = [0, 0], sizes = [4, 226], strides = [1, 1]} : vector<4x256xf32> to vector<4x226xf32>
    %706 = tpu.concatenate %704, %705 in 1 : vector<4x30xf32>, vector<4x226xf32> -> vector<4x256xf32>
    %707 = arith.mulf %706, %94 : vector<4x256xf32>
    %cst_225 = arith.constant 0.000000e+00 : f32
    %708 = vector.broadcast %cst_225 : f32 to vector<4x29xf32>
    %709 = vector.extract_strided_slice %585 {offsets = [0, 0], sizes = [4, 227], strides = [1, 1]} : vector<4x256xf32> to vector<4x227xf32>
    %710 = tpu.concatenate %708, %709 in 1 : vector<4x29xf32>, vector<4x227xf32> -> vector<4x256xf32>
    %711 = arith.mulf %710, %107 : vector<4x256xf32>
    %712 = tpu.concatenate %707, %711 in 0 : vector<4x256xf32>, vector<4x256xf32> -> vector<8x256xf32>
    %c96_226 = arith.constant 96 : index
    %c256_227 = arith.constant 256 : index
    %713 = vector.load %arg9[%c96_226, %c256_227] : memref<384x512xf32, #tpu.memory_space<vmem>>, vector<8x256xf32>
    tpu.vector_store %arg9[%c96_226, %c256_227], %712 {strides = array<i32>} : memref<384x512xf32, #tpu.memory_space<vmem>>, vector<8x256xf32>,
    %cst_228 = arith.constant 0.000000e+00 : f32
    %714 = vector.broadcast %cst_228 : f32 to vector<4x28xf32>
    %715 = vector.extract_strided_slice %585 {offsets = [0, 0], sizes = [4, 228], strides = [1, 1]} : vector<4x256xf32> to vector<4x228xf32>
    %716 = tpu.concatenate %714, %715 in 1 : vector<4x28xf32>, vector<4x228xf32> -> vector<4x256xf32>
    %717 = arith.mulf %716, %120 : vector<4x256xf32>
    %cst_229 = arith.constant 0.000000e+00 : f32
    %718 = vector.broadcast %cst_229 : f32 to vector<4x20xf32>
    %719 = vector.extract_strided_slice %585 {offsets = [0, 0], sizes = [4, 236], strides = [1, 1]} : vector<4x256xf32> to vector<4x236xf32>
    %720 = tpu.concatenate %718, %719 in 1 : vector<4x20xf32>, vector<4x236xf32> -> vector<4x256xf32>
    %721 = arith.mulf %720, %29 : vector<4x256xf32>
    %722 = tpu.concatenate %717, %721 in 0 : vector<4x256xf32>, vector<4x256xf32> -> vector<8x256xf32>
    %c104_230 = arith.constant 104 : index
    %c256_231 = arith.constant 256 : index
    %723 = vector.load %arg9[%c104_230, %c256_231] : memref<384x512xf32, #tpu.memory_space<vmem>>, vector<8x256xf32>
    tpu.vector_store %arg9[%c104_230, %c256_231], %722 {strides = array<i32>} : memref<384x512xf32, #tpu.memory_space<vmem>>, vector<8x256xf32>,
    %cst_232 = arith.constant 0.000000e+00 : f32
    %724 = vector.broadcast %cst_232 : f32 to vector<4x19xf32>
    %725 = vector.extract_strided_slice %585 {offsets = [0, 0], sizes = [4, 237], strides = [1, 1]} : vector<4x256xf32> to vector<4x237xf32>
    %726 = tpu.concatenate %724, %725 in 1 : vector<4x19xf32>, vector<4x237xf32> -> vector<4x256xf32>
    %727 = arith.mulf %726, %42 : vector<4x256xf32>
    %cst_233 = arith.constant 0.000000e+00 : f32
    %728 = vector.broadcast %cst_233 : f32 to vector<4x18xf32>
    %729 = vector.extract_strided_slice %585 {offsets = [0, 0], sizes = [4, 238], strides = [1, 1]} : vector<4x256xf32> to vector<4x238xf32>
    %730 = tpu.concatenate %728, %729 in 1 : vector<4x18xf32>, vector<4x238xf32> -> vector<4x256xf32>
    %731 = arith.mulf %730, %55 : vector<4x256xf32>
    %732 = tpu.concatenate %727, %731 in 0 : vector<4x256xf32>, vector<4x256xf32> -> vector<8x256xf32>
    %c112_234 = arith.constant 112 : index
    %c256_235 = arith.constant 256 : index
    %733 = vector.load %arg9[%c112_234, %c256_235] : memref<384x512xf32, #tpu.memory_space<vmem>>, vector<8x256xf32>
    tpu.vector_store %arg9[%c112_234, %c256_235], %732 {strides = array<i32>} : memref<384x512xf32, #tpu.memory_space<vmem>>, vector<8x256xf32>,
    %cst_236 = arith.constant 0.000000e+00 : f32
    %734 = vector.broadcast %cst_236 : f32 to vector<4x17xf32>
    %735 = vector.extract_strided_slice %585 {offsets = [0, 0], sizes = [4, 239], strides = [1, 1]} : vector<4x256xf32> to vector<4x239xf32>
    %736 = tpu.concatenate %734, %735 in 1 : vector<4x17xf32>, vector<4x239xf32> -> vector<4x256xf32>
    %737 = arith.mulf %736, %68 : vector<4x256xf32>
    %cst_237 = arith.constant 0.000000e+00 : f32
    %738 = vector.broadcast %cst_237 : f32 to vector<4x16xf32>
    %739 = vector.extract_strided_slice %585 {offsets = [0, 0], sizes = [4, 240], strides = [1, 1]} : vector<4x256xf32> to vector<4x240xf32>
    %740 = tpu.concatenate %738, %739 in 1 : vector<4x16xf32>, vector<4x240xf32> -> vector<4x256xf32>
    %741 = tpu.concatenate %737, %740 in 0 : vector<4x256xf32>, vector<4x256xf32> -> vector<8x256xf32>
    %c120_238 = arith.constant 120 : index
    %c256_239 = arith.constant 256 : index
    %742 = vector.load %arg9[%c120_238, %c256_239] : memref<384x512xf32, #tpu.memory_space<vmem>>, vector<8x256xf32>
    tpu.vector_store %arg9[%c120_238, %c256_239], %741 {strides = array<i32>} : memref<384x512xf32, #tpu.memory_space<vmem>>, vector<8x256xf32>,
    %cst_240 = arith.constant 0.000000e+00 : f32
    %743 = vector.broadcast %cst_240 : f32 to vector<4x15xf32>
    %744 = vector.extract_strided_slice %585 {offsets = [0, 0], sizes = [4, 241], strides = [1, 1]} : vector<4x256xf32> to vector<4x241xf32>
    %745 = tpu.concatenate %743, %744 in 1 : vector<4x15xf32>, vector<4x241xf32> -> vector<4x256xf32>
    %746 = arith.mulf %745, %81 : vector<4x256xf32>
    %cst_241 = arith.constant 0.000000e+00 : f32
    %747 = vector.broadcast %cst_241 : f32 to vector<4x14xf32>
    %748 = vector.extract_strided_slice %585 {offsets = [0, 0], sizes = [4, 242], strides = [1, 1]} : vector<4x256xf32> to vector<4x242xf32>
    %749 = tpu.concatenate %747, %748 in 1 : vector<4x14xf32>, vector<4x242xf32> -> vector<4x256xf32>
    %750 = arith.mulf %749, %94 : vector<4x256xf32>
    %751 = tpu.concatenate %746, %750 in 0 : vector<4x256xf32>, vector<4x256xf32> -> vector<8x256xf32>
    %c128_242 = arith.constant 128 : index
    %c256_243 = arith.constant 256 : index
    %752 = vector.load %arg9[%c128_242, %c256_243] : memref<384x512xf32, #tpu.memory_space<vmem>>, vector<8x256xf32>
    tpu.vector_store %arg9[%c128_242, %c256_243], %751 {strides = array<i32>} : memref<384x512xf32, #tpu.memory_space<vmem>>, vector<8x256xf32>,
    %cst_244 = arith.constant 0.000000e+00 : f32
    %753 = vector.broadcast %cst_244 : f32 to vector<4x13xf32>
    %754 = vector.extract_strided_slice %585 {offsets = [0, 0], sizes = [4, 243], strides = [1, 1]} : vector<4x256xf32> to vector<4x243xf32>
    %755 = tpu.concatenate %753, %754 in 1 : vector<4x13xf32>, vector<4x243xf32> -> vector<4x256xf32>
    %756 = arith.mulf %755, %107 : vector<4x256xf32>
    %cst_245 = arith.constant 0.000000e+00 : f32
    %757 = vector.broadcast %cst_245 : f32 to vector<4x12xf32>
    %758 = vector.extract_strided_slice %585 {offsets = [0, 0], sizes = [4, 244], strides = [1, 1]} : vector<4x256xf32> to vector<4x244xf32>
    %759 = tpu.concatenate %757, %758 in 1 : vector<4x12xf32>, vector<4x244xf32> -> vector<4x256xf32>
    %760 = arith.mulf %759, %120 : vector<4x256xf32>
    %761 = tpu.concatenate %756, %760 in 0 : vector<4x256xf32>, vector<4x256xf32> -> vector<8x256xf32>
    %c136_246 = arith.constant 136 : index
    %c256_247 = arith.constant 256 : index
    %762 = vector.load %arg9[%c136_246, %c256_247] : memref<384x512xf32, #tpu.memory_space<vmem>>, vector<8x256xf32>
    tpu.vector_store %arg9[%c136_246, %c256_247], %761 {strides = array<i32>} : memref<384x512xf32, #tpu.memory_space<vmem>>, vector<8x256xf32>,
    %cst_248 = arith.constant 0.000000e+00 : f32
    %763 = vector.broadcast %cst_248 : f32 to vector<4x4xf32>
    %764 = vector.extract_strided_slice %585 {offsets = [0, 0], sizes = [4, 252], strides = [1, 1]} : vector<4x256xf32> to vector<4x252xf32>
    %765 = tpu.concatenate %763, %764 in 1 : vector<4x4xf32>, vector<4x252xf32> -> vector<4x256xf32>
    %766 = arith.mulf %765, %29 : vector<4x256xf32>
    %cst_249 = arith.constant 0.000000e+00 : f32
    %767 = vector.broadcast %cst_249 : f32 to vector<4x3xf32>
    %768 = vector.extract_strided_slice %585 {offsets = [0, 0], sizes = [4, 253], strides = [1, 1]} : vector<4x256xf32> to vector<4x253xf32>
    %769 = tpu.concatenate %767, %768 in 1 : vector<4x3xf32>, vector<4x253xf32> -> vector<4x256xf32>
    %770 = arith.mulf %769, %42 : vector<4x256xf32>
    %771 = tpu.concatenate %766, %770 in 0 : vector<4x256xf32>, vector<4x256xf32> -> vector<8x256xf32>
    %c144_250 = arith.constant 144 : index
    %c256_251 = arith.constant 256 : index
    %772 = vector.load %arg9[%c144_250, %c256_251] : memref<384x512xf32, #tpu.memory_space<vmem>>, vector<8x256xf32>
    tpu.vector_store %arg9[%c144_250, %c256_251], %771 {strides = array<i32>} : memref<384x512xf32, #tpu.memory_space<vmem>>, vector<8x256xf32>,
    %cst_252 = arith.constant 0.000000e+00 : f32
    %773 = vector.broadcast %cst_252 : f32 to vector<4x2xf32>
    %774 = vector.extract_strided_slice %585 {offsets = [0, 0], sizes = [4, 254], strides = [1, 1]} : vector<4x256xf32> to vector<4x254xf32>
    %775 = tpu.concatenate %773, %774 in 1 : vector<4x2xf32>, vector<4x254xf32> -> vector<4x256xf32>
    %776 = arith.mulf %775, %55 : vector<4x256xf32>
    %cst_253 = arith.constant 0.000000e+00 : f32
    %777 = vector.broadcast %cst_253 : f32 to vector<4x1xf32>
    %778 = vector.extract_strided_slice %585 {offsets = [0, 0], sizes = [4, 255], strides = [1, 1]} : vector<4x256xf32> to vector<4x255xf32>
    %779 = tpu.concatenate %777, %778 in 1 : vector<4x1xf32>, vector<4x255xf32> -> vector<4x256xf32>
    %780 = arith.mulf %779, %68 : vector<4x256xf32>
    %781 = tpu.concatenate %776, %780 in 0 : vector<4x256xf32>, vector<4x256xf32> -> vector<8x256xf32>
    %c152_254 = arith.constant 152 : index
    %c256_255 = arith.constant 256 : index
    %782 = vector.load %arg9[%c152_254, %c256_255] : memref<384x512xf32, #tpu.memory_space<vmem>>, vector<8x256xf32>
    tpu.vector_store %arg9[%c152_254, %c256_255], %781 {strides = array<i32>} : memref<384x512xf32, #tpu.memory_space<vmem>>, vector<8x256xf32>,
    %cst_256 = arith.constant 0.000000e+00 : f32
    %783 = vector.broadcast %cst_256 : f32 to vector<4x1xf32>
    %784 = vector.extract_strided_slice %585 {offsets = [0, 1], sizes = [4, 255], strides = [1, 1]} : vector<4x256xf32> to vector<4x255xf32>
    %785 = tpu.concatenate %784, %783 in 1 : vector<4x255xf32>, vector<4x1xf32> -> vector<4x256xf32>
    %786 = arith.mulf %785, %81 : vector<4x256xf32>
    %787 = tpu.concatenate %585, %786 in 0 : vector<4x256xf32>, vector<4x256xf32> -> vector<8x256xf32>
    %c160_257 = arith.constant 160 : index
    %c256_258 = arith.constant 256 : index
    %788 = vector.load %arg9[%c160_257, %c256_258] : memref<384x512xf32, #tpu.memory_space<vmem>>, vector<8x256xf32>
    tpu.vector_store %arg9[%c160_257, %c256_258], %787 {strides = array<i32>} : memref<384x512xf32, #tpu.memory_space<vmem>>, vector<8x256xf32>,
    %cst_259 = arith.constant 0.000000e+00 : f32
    %789 = vector.broadcast %cst_259 : f32 to vector<4x2xf32>
    %790 = vector.extract_strided_slice %585 {offsets = [0, 2], sizes = [4, 254], strides = [1, 1]} : vector<4x256xf32> to vector<4x254xf32>
    %791 = tpu.concatenate %790, %789 in 1 : vector<4x254xf32>, vector<4x2xf32> -> vector<4x256xf32>
    %792 = arith.mulf %791, %94 : vector<4x256xf32>
    %cst_260 = arith.constant 0.000000e+00 : f32
    %793 = vector.broadcast %cst_260 : f32 to vector<4x3xf32>
    %794 = vector.extract_strided_slice %585 {offsets = [0, 3], sizes = [4, 253], strides = [1, 1]} : vector<4x256xf32> to vector<4x253xf32>
    %795 = tpu.concatenate %794, %793 in 1 : vector<4x253xf32>, vector<4x3xf32> -> vector<4x256xf32>
    %796 = arith.mulf %795, %107 : vector<4x256xf32>
    %797 = tpu.concatenate %792, %796 in 0 : vector<4x256xf32>, vector<4x256xf32> -> vector<8x256xf32>
    %c168_261 = arith.constant 168 : index
    %c256_262 = arith.constant 256 : index
    %798 = vector.load %arg9[%c168_261, %c256_262] : memref<384x512xf32, #tpu.memory_space<vmem>>, vector<8x256xf32>
    tpu.vector_store %arg9[%c168_261, %c256_262], %797 {strides = array<i32>} : memref<384x512xf32, #tpu.memory_space<vmem>>, vector<8x256xf32>,
    %cst_263 = arith.constant 0.000000e+00 : f32
    %799 = vector.broadcast %cst_263 : f32 to vector<4x4xf32>
    %800 = vector.extract_strided_slice %585 {offsets = [0, 4], sizes = [4, 252], strides = [1, 1]} : vector<4x256xf32> to vector<4x252xf32>
    %801 = tpu.concatenate %800, %799 in 1 : vector<4x252xf32>, vector<4x4xf32> -> vector<4x256xf32>
    %802 = arith.mulf %801, %120 : vector<4x256xf32>
    %cst_264 = arith.constant 0.000000e+00 : f32
    %803 = vector.broadcast %cst_264 : f32 to vector<4x12xf32>
    %804 = vector.extract_strided_slice %585 {offsets = [0, 12], sizes = [4, 244], strides = [1, 1]} : vector<4x256xf32> to vector<4x244xf32>
    %805 = tpu.concatenate %804, %803 in 1 : vector<4x244xf32>, vector<4x12xf32> -> vector<4x256xf32>
    %806 = arith.mulf %805, %29 : vector<4x256xf32>
    %807 = tpu.concatenate %802, %806 in 0 : vector<4x256xf32>, vector<4x256xf32> -> vector<8x256xf32>
    %c176_265 = arith.constant 176 : index
    %c256_266 = arith.constant 256 : index
    %808 = vector.load %arg9[%c176_265, %c256_266] : memref<384x512xf32, #tpu.memory_space<vmem>>, vector<8x256xf32>
    tpu.vector_store %arg9[%c176_265, %c256_266], %807 {strides = array<i32>} : memref<384x512xf32, #tpu.memory_space<vmem>>, vector<8x256xf32>,
    %cst_267 = arith.constant 0.000000e+00 : f32
    %809 = vector.broadcast %cst_267 : f32 to vector<4x13xf32>
    %810 = vector.extract_strided_slice %585 {offsets = [0, 13], sizes = [4, 243], strides = [1, 1]} : vector<4x256xf32> to vector<4x243xf32>
    %811 = tpu.concatenate %810, %809 in 1 : vector<4x243xf32>, vector<4x13xf32> -> vector<4x256xf32>
    %812 = arith.mulf %811, %42 : vector<4x256xf32>
    %cst_268 = arith.constant 0.000000e+00 : f32
    %813 = vector.broadcast %cst_268 : f32 to vector<4x14xf32>
    %814 = vector.extract_strided_slice %585 {offsets = [0, 14], sizes = [4, 242], strides = [1, 1]} : vector<4x256xf32> to vector<4x242xf32>
    %815 = tpu.concatenate %814, %813 in 1 : vector<4x242xf32>, vector<4x14xf32> -> vector<4x256xf32>
    %816 = arith.mulf %815, %55 : vector<4x256xf32>
    %817 = tpu.concatenate %812, %816 in 0 : vector<4x256xf32>, vector<4x256xf32> -> vector<8x256xf32>
    %c184_269 = arith.constant 184 : index
    %c256_270 = arith.constant 256 : index
    %818 = vector.load %arg9[%c184_269, %c256_270] : memref<384x512xf32, #tpu.memory_space<vmem>>, vector<8x256xf32>
    tpu.vector_store %arg9[%c184_269, %c256_270], %817 {strides = array<i32>} : memref<384x512xf32, #tpu.memory_space<vmem>>, vector<8x256xf32>,
    %cst_271 = arith.constant 0.000000e+00 : f32
    %819 = vector.broadcast %cst_271 : f32 to vector<4x15xf32>
    %820 = vector.extract_strided_slice %585 {offsets = [0, 15], sizes = [4, 241], strides = [1, 1]} : vector<4x256xf32> to vector<4x241xf32>
    %821 = tpu.concatenate %820, %819 in 1 : vector<4x241xf32>, vector<4x15xf32> -> vector<4x256xf32>
    %822 = arith.mulf %821, %68 : vector<4x256xf32>
    %cst_272 = arith.constant 0.000000e+00 : f32
    %823 = vector.broadcast %cst_272 : f32 to vector<4x16xf32>
    %824 = vector.extract_strided_slice %585 {offsets = [0, 16], sizes = [4, 240], strides = [1, 1]} : vector<4x256xf32> to vector<4x240xf32>
    %825 = tpu.concatenate %824, %823 in 1 : vector<4x240xf32>, vector<4x16xf32> -> vector<4x256xf32>
    %826 = tpu.concatenate %822, %825 in 0 : vector<4x256xf32>, vector<4x256xf32> -> vector<8x256xf32>
    %c192_273 = arith.constant 192 : index
    %c256_274 = arith.constant 256 : index
    %827 = vector.load %arg9[%c192_273, %c256_274] : memref<384x512xf32, #tpu.memory_space<vmem>>, vector<8x256xf32>
    tpu.vector_store %arg9[%c192_273, %c256_274], %826 {strides = array<i32>} : memref<384x512xf32, #tpu.memory_space<vmem>>, vector<8x256xf32>,
    %cst_275 = arith.constant 0.000000e+00 : f32
    %828 = vector.broadcast %cst_275 : f32 to vector<4x17xf32>
    %829 = vector.extract_strided_slice %585 {offsets = [0, 17], sizes = [4, 239], strides = [1, 1]} : vector<4x256xf32> to vector<4x239xf32>
    %830 = tpu.concatenate %829, %828 in 1 : vector<4x239xf32>, vector<4x17xf32> -> vector<4x256xf32>
    %831 = arith.mulf %830, %81 : vector<4x256xf32>
    %cst_276 = arith.constant 0.000000e+00 : f32
    %832 = vector.broadcast %cst_276 : f32 to vector<4x18xf32>
    %833 = vector.extract_strided_slice %585 {offsets = [0, 18], sizes = [4, 238], strides = [1, 1]} : vector<4x256xf32> to vector<4x238xf32>
    %834 = tpu.concatenate %833, %832 in 1 : vector<4x238xf32>, vector<4x18xf32> -> vector<4x256xf32>
    %835 = arith.mulf %834, %94 : vector<4x256xf32>
    %836 = tpu.concatenate %831, %835 in 0 : vector<4x256xf32>, vector<4x256xf32> -> vector<8x256xf32>
    %c200_277 = arith.constant 200 : index
    %c256_278 = arith.constant 256 : index
    %837 = vector.load %arg9[%c200_277, %c256_278] : memref<384x512xf32, #tpu.memory_space<vmem>>, vector<8x256xf32>
    tpu.vector_store %arg9[%c200_277, %c256_278], %836 {strides = array<i32>} : memref<384x512xf32, #tpu.memory_space<vmem>>, vector<8x256xf32>,
    %cst_279 = arith.constant 0.000000e+00 : f32
    %838 = vector.broadcast %cst_279 : f32 to vector<4x19xf32>
    %839 = vector.extract_strided_slice %585 {offsets = [0, 19], sizes = [4, 237], strides = [1, 1]} : vector<4x256xf32> to vector<4x237xf32>
    %840 = tpu.concatenate %839, %838 in 1 : vector<4x237xf32>, vector<4x19xf32> -> vector<4x256xf32>
    %841 = arith.mulf %840, %107 : vector<4x256xf32>
    %cst_280 = arith.constant 0.000000e+00 : f32
    %842 = vector.broadcast %cst_280 : f32 to vector<4x20xf32>
    %843 = vector.extract_strided_slice %585 {offsets = [0, 20], sizes = [4, 236], strides = [1, 1]} : vector<4x256xf32> to vector<4x236xf32>
    %844 = tpu.concatenate %843, %842 in 1 : vector<4x236xf32>, vector<4x20xf32> -> vector<4x256xf32>
    %845 = arith.mulf %844, %120 : vector<4x256xf32>
    %846 = tpu.concatenate %841, %845 in 0 : vector<4x256xf32>, vector<4x256xf32> -> vector<8x256xf32>
    %c208_281 = arith.constant 208 : index
    %c256_282 = arith.constant 256 : index
    %847 = vector.load %arg9[%c208_281, %c256_282] : memref<384x512xf32, #tpu.memory_space<vmem>>, vector<8x256xf32>
    tpu.vector_store %arg9[%c208_281, %c256_282], %846 {strides = array<i32>} : memref<384x512xf32, #tpu.memory_space<vmem>>, vector<8x256xf32>,
    %cst_283 = arith.constant 0.000000e+00 : f32
    %848 = vector.broadcast %cst_283 : f32 to vector<4x28xf32>
    %849 = vector.extract_strided_slice %585 {offsets = [0, 28], sizes = [4, 228], strides = [1, 1]} : vector<4x256xf32> to vector<4x228xf32>
    %850 = tpu.concatenate %849, %848 in 1 : vector<4x228xf32>, vector<4x28xf32> -> vector<4x256xf32>
    %851 = arith.mulf %850, %29 : vector<4x256xf32>
    %cst_284 = arith.constant 0.000000e+00 : f32
    %852 = vector.broadcast %cst_284 : f32 to vector<4x29xf32>
    %853 = vector.extract_strided_slice %585 {offsets = [0, 29], sizes = [4, 227], strides = [1, 1]} : vector<4x256xf32> to vector<4x227xf32>
    %854 = tpu.concatenate %853, %852 in 1 : vector<4x227xf32>, vector<4x29xf32> -> vector<4x256xf32>
    %855 = arith.mulf %854, %42 : vector<4x256xf32>
    %856 = tpu.concatenate %851, %855 in 0 : vector<4x256xf32>, vector<4x256xf32> -> vector<8x256xf32>
    %c216_285 = arith.constant 216 : index
    %c256_286 = arith.constant 256 : index
    %857 = vector.load %arg9[%c216_285, %c256_286] : memref<384x512xf32, #tpu.memory_space<vmem>>, vector<8x256xf32>
    tpu.vector_store %arg9[%c216_285, %c256_286], %856 {strides = array<i32>} : memref<384x512xf32, #tpu.memory_space<vmem>>, vector<8x256xf32>,
    %cst_287 = arith.constant 0.000000e+00 : f32
    %858 = vector.broadcast %cst_287 : f32 to vector<4x30xf32>
    %859 = vector.extract_strided_slice %585 {offsets = [0, 30], sizes = [4, 226], strides = [1, 1]} : vector<4x256xf32> to vector<4x226xf32>
    %860 = tpu.concatenate %859, %858 in 1 : vector<4x226xf32>, vector<4x30xf32> -> vector<4x256xf32>
    %861 = arith.mulf %860, %55 : vector<4x256xf32>
    %cst_288 = arith.constant 0.000000e+00 : f32
    %862 = vector.broadcast %cst_288 : f32 to vector<4x31xf32>
    %863 = vector.extract_strided_slice %585 {offsets = [0, 31], sizes = [4, 225], strides = [1, 1]} : vector<4x256xf32> to vector<4x225xf32>
    %864 = tpu.concatenate %863, %862 in 1 : vector<4x225xf32>, vector<4x31xf32> -> vector<4x256xf32>
    %865 = arith.mulf %864, %68 : vector<4x256xf32>
    %866 = tpu.concatenate %861, %865 in 0 : vector<4x256xf32>, vector<4x256xf32> -> vector<8x256xf32>
    %c224_289 = arith.constant 224 : index
    %c256_290 = arith.constant 256 : index
    %867 = vector.load %arg9[%c224_289, %c256_290] : memref<384x512xf32, #tpu.memory_space<vmem>>, vector<8x256xf32>
    tpu.vector_store %arg9[%c224_289, %c256_290], %866 {strides = array<i32>} : memref<384x512xf32, #tpu.memory_space<vmem>>, vector<8x256xf32>,
    %cst_291 = arith.constant 0.000000e+00 : f32
    %868 = vector.broadcast %cst_291 : f32 to vector<4x32xf32>
    %869 = vector.extract_strided_slice %585 {offsets = [0, 32], sizes = [4, 224], strides = [1, 1]} : vector<4x256xf32> to vector<4x224xf32>
    %870 = tpu.concatenate %869, %868 in 1 : vector<4x224xf32>, vector<4x32xf32> -> vector<4x256xf32>
    %cst_292 = arith.constant 0.000000e+00 : f32
    %871 = vector.broadcast %cst_292 : f32 to vector<4x33xf32>
    %872 = vector.extract_strided_slice %585 {offsets = [0, 33], sizes = [4, 223], strides = [1, 1]} : vector<4x256xf32> to vector<4x223xf32>
    %873 = tpu.concatenate %872, %871 in 1 : vector<4x223xf32>, vector<4x33xf32> -> vector<4x256xf32>
    %874 = arith.mulf %873, %81 : vector<4x256xf32>
    %875 = tpu.concatenate %870, %874 in 0 : vector<4x256xf32>, vector<4x256xf32> -> vector<8x256xf32>
    %c232_293 = arith.constant 232 : index
    %c256_294 = arith.constant 256 : index
    %876 = vector.load %arg9[%c232_293, %c256_294] : memref<384x512xf32, #tpu.memory_space<vmem>>, vector<8x256xf32>
    tpu.vector_store %arg9[%c232_293, %c256_294], %875 {strides = array<i32>} : memref<384x512xf32, #tpu.memory_space<vmem>>, vector<8x256xf32>,
    %cst_295 = arith.constant 0.000000e+00 : f32
    %877 = vector.broadcast %cst_295 : f32 to vector<4x34xf32>
    %878 = vector.extract_strided_slice %585 {offsets = [0, 34], sizes = [4, 222], strides = [1, 1]} : vector<4x256xf32> to vector<4x222xf32>
    %879 = tpu.concatenate %878, %877 in 1 : vector<4x222xf32>, vector<4x34xf32> -> vector<4x256xf32>
    %880 = arith.mulf %879, %94 : vector<4x256xf32>
    %cst_296 = arith.constant 0.000000e+00 : f32
    %881 = vector.broadcast %cst_296 : f32 to vector<4x35xf32>
    %882 = vector.extract_strided_slice %585 {offsets = [0, 35], sizes = [4, 221], strides = [1, 1]} : vector<4x256xf32> to vector<4x221xf32>
    %883 = tpu.concatenate %882, %881 in 1 : vector<4x221xf32>, vector<4x35xf32> -> vector<4x256xf32>
    %884 = arith.mulf %883, %107 : vector<4x256xf32>
    %885 = tpu.concatenate %880, %884 in 0 : vector<4x256xf32>, vector<4x256xf32> -> vector<8x256xf32>
    %c240_297 = arith.constant 240 : index
    %c256_298 = arith.constant 256 : index
    %886 = vector.load %arg9[%c240_297, %c256_298] : memref<384x512xf32, #tpu.memory_space<vmem>>, vector<8x256xf32>
    tpu.vector_store %arg9[%c240_297, %c256_298], %885 {strides = array<i32>} : memref<384x512xf32, #tpu.memory_space<vmem>>, vector<8x256xf32>,
    %cst_299 = arith.constant 0.000000e+00 : f32
    %887 = vector.broadcast %cst_299 : f32 to vector<4x36xf32>
    %888 = vector.extract_strided_slice %585 {offsets = [0, 36], sizes = [4, 220], strides = [1, 1]} : vector<4x256xf32> to vector<4x220xf32>
    %889 = tpu.concatenate %888, %887 in 1 : vector<4x220xf32>, vector<4x36xf32> -> vector<4x256xf32>
    %890 = arith.mulf %889, %120 : vector<4x256xf32>
    %cst_300 = arith.constant 0.000000e+00 : f32
    %891 = vector.broadcast %cst_300 : f32 to vector<4x44xf32>
    %892 = vector.extract_strided_slice %585 {offsets = [0, 44], sizes = [4, 212], strides = [1, 1]} : vector<4x256xf32> to vector<4x212xf32>
    %893 = tpu.concatenate %892, %891 in 1 : vector<4x212xf32>, vector<4x44xf32> -> vector<4x256xf32>
    %894 = arith.mulf %893, %29 : vector<4x256xf32>
    %895 = tpu.concatenate %890, %894 in 0 : vector<4x256xf32>, vector<4x256xf32> -> vector<8x256xf32>
    %c248_301 = arith.constant 248 : index
    %c256_302 = arith.constant 256 : index
    %896 = vector.load %arg9[%c248_301, %c256_302] : memref<384x512xf32, #tpu.memory_space<vmem>>, vector<8x256xf32>
    tpu.vector_store %arg9[%c248_301, %c256_302], %895 {strides = array<i32>} : memref<384x512xf32, #tpu.memory_space<vmem>>, vector<8x256xf32>,
    %cst_303 = arith.constant 0.000000e+00 : f32
    %897 = vector.broadcast %cst_303 : f32 to vector<4x45xf32>
    %898 = vector.extract_strided_slice %585 {offsets = [0, 45], sizes = [4, 211], strides = [1, 1]} : vector<4x256xf32> to vector<4x211xf32>
    %899 = tpu.concatenate %898, %897 in 1 : vector<4x211xf32>, vector<4x45xf32> -> vector<4x256xf32>
    %900 = arith.mulf %899, %42 : vector<4x256xf32>
    %cst_304 = arith.constant 0.000000e+00 : f32
    %901 = vector.broadcast %cst_304 : f32 to vector<4x46xf32>
    %902 = vector.extract_strided_slice %585 {offsets = [0, 46], sizes = [4, 210], strides = [1, 1]} : vector<4x256xf32> to vector<4x210xf32>
    %903 = tpu.concatenate %902, %901 in 1 : vector<4x210xf32>, vector<4x46xf32> -> vector<4x256xf32>
    %904 = arith.mulf %903, %55 : vector<4x256xf32>
    %905 = tpu.concatenate %900, %904 in 0 : vector<4x256xf32>, vector<4x256xf32> -> vector<8x256xf32>
    %c256_305 = arith.constant 256 : index
    %c256_306 = arith.constant 256 : index
    %906 = vector.load %arg9[%c256_305, %c256_306] : memref<384x512xf32, #tpu.memory_space<vmem>>, vector<8x256xf32>
    tpu.vector_store %arg9[%c256_305, %c256_306], %905 {strides = array<i32>} : memref<384x512xf32, #tpu.memory_space<vmem>>, vector<8x256xf32>,
    %cst_307 = arith.constant 0.000000e+00 : f32
    %907 = vector.broadcast %cst_307 : f32 to vector<4x47xf32>
    %908 = vector.extract_strided_slice %585 {offsets = [0, 47], sizes = [4, 209], strides = [1, 1]} : vector<4x256xf32> to vector<4x209xf32>
    %909 = tpu.concatenate %908, %907 in 1 : vector<4x209xf32>, vector<4x47xf32> -> vector<4x256xf32>
    %910 = arith.mulf %909, %68 : vector<4x256xf32>
    %cst_308 = arith.constant 0.000000e+00 : f32
    %911 = vector.broadcast %cst_308 : f32 to vector<4x48xf32>
    %912 = vector.extract_strided_slice %585 {offsets = [0, 48], sizes = [4, 208], strides = [1, 1]} : vector<4x256xf32> to vector<4x208xf32>
    %913 = tpu.concatenate %912, %911 in 1 : vector<4x208xf32>, vector<4x48xf32> -> vector<4x256xf32>
    %914 = tpu.concatenate %910, %913 in 0 : vector<4x256xf32>, vector<4x256xf32> -> vector<8x256xf32>
    %c264_309 = arith.constant 264 : index
    %c256_310 = arith.constant 256 : index
    %915 = vector.load %arg9[%c264_309, %c256_310] : memref<384x512xf32, #tpu.memory_space<vmem>>, vector<8x256xf32>
    tpu.vector_store %arg9[%c264_309, %c256_310], %914 {strides = array<i32>} : memref<384x512xf32, #tpu.memory_space<vmem>>, vector<8x256xf32>,
    %cst_311 = arith.constant 0.000000e+00 : f32
    %916 = vector.broadcast %cst_311 : f32 to vector<4x49xf32>
    %917 = vector.extract_strided_slice %585 {offsets = [0, 49], sizes = [4, 207], strides = [1, 1]} : vector<4x256xf32> to vector<4x207xf32>
    %918 = tpu.concatenate %917, %916 in 1 : vector<4x207xf32>, vector<4x49xf32> -> vector<4x256xf32>
    %919 = arith.mulf %918, %81 : vector<4x256xf32>
    %cst_312 = arith.constant 0.000000e+00 : f32
    %920 = vector.broadcast %cst_312 : f32 to vector<4x50xf32>
    %921 = vector.extract_strided_slice %585 {offsets = [0, 50], sizes = [4, 206], strides = [1, 1]} : vector<4x256xf32> to vector<4x206xf32>
    %922 = tpu.concatenate %921, %920 in 1 : vector<4x206xf32>, vector<4x50xf32> -> vector<4x256xf32>
    %923 = arith.mulf %922, %94 : vector<4x256xf32>
    %924 = tpu.concatenate %919, %923 in 0 : vector<4x256xf32>, vector<4x256xf32> -> vector<8x256xf32>
    %c272_313 = arith.constant 272 : index
    %c256_314 = arith.constant 256 : index
    %925 = vector.load %arg9[%c272_313, %c256_314] : memref<384x512xf32, #tpu.memory_space<vmem>>, vector<8x256xf32>
    tpu.vector_store %arg9[%c272_313, %c256_314], %924 {strides = array<i32>} : memref<384x512xf32, #tpu.memory_space<vmem>>, vector<8x256xf32>,
    %cst_315 = arith.constant 0.000000e+00 : f32
    %926 = vector.broadcast %cst_315 : f32 to vector<4x51xf32>
    %927 = vector.extract_strided_slice %585 {offsets = [0, 51], sizes = [4, 205], strides = [1, 1]} : vector<4x256xf32> to vector<4x205xf32>
    %928 = tpu.concatenate %927, %926 in 1 : vector<4x205xf32>, vector<4x51xf32> -> vector<4x256xf32>
    %929 = arith.mulf %928, %107 : vector<4x256xf32>
    %cst_316 = arith.constant 0.000000e+00 : f32
    %930 = vector.broadcast %cst_316 : f32 to vector<4x52xf32>
    %931 = vector.extract_strided_slice %585 {offsets = [0, 52], sizes = [4, 204], strides = [1, 1]} : vector<4x256xf32> to vector<4x204xf32>
    %932 = tpu.concatenate %931, %930 in 1 : vector<4x204xf32>, vector<4x52xf32> -> vector<4x256xf32>
    %933 = arith.mulf %932, %120 : vector<4x256xf32>
    %934 = tpu.concatenate %929, %933 in 0 : vector<4x256xf32>, vector<4x256xf32> -> vector<8x256xf32>
    %c280_317 = arith.constant 280 : index
    %c256_318 = arith.constant 256 : index
    %935 = vector.load %arg9[%c280_317, %c256_318] : memref<384x512xf32, #tpu.memory_space<vmem>>, vector<8x256xf32>
    tpu.vector_store %arg9[%c280_317, %c256_318], %934 {strides = array<i32>} : memref<384x512xf32, #tpu.memory_space<vmem>>, vector<8x256xf32>,
    %cst_319 = arith.constant 0.000000e+00 : f32
    %936 = vector.broadcast %cst_319 : f32 to vector<4x60xf32>
    %937 = vector.extract_strided_slice %585 {offsets = [0, 60], sizes = [4, 196], strides = [1, 1]} : vector<4x256xf32> to vector<4x196xf32>
    %938 = tpu.concatenate %937, %936 in 1 : vector<4x196xf32>, vector<4x60xf32> -> vector<4x256xf32>
    %939 = arith.mulf %938, %29 : vector<4x256xf32>
    %cst_320 = arith.constant 0.000000e+00 : f32
    %940 = vector.broadcast %cst_320 : f32 to vector<4x61xf32>
    %941 = vector.extract_strided_slice %585 {offsets = [0, 61], sizes = [4, 195], strides = [1, 1]} : vector<4x256xf32> to vector<4x195xf32>
    %942 = tpu.concatenate %941, %940 in 1 : vector<4x195xf32>, vector<4x61xf32> -> vector<4x256xf32>
    %943 = arith.mulf %942, %42 : vector<4x256xf32>
    %944 = tpu.concatenate %939, %943 in 0 : vector<4x256xf32>, vector<4x256xf32> -> vector<8x256xf32>
    %c288_321 = arith.constant 288 : index
    %c256_322 = arith.constant 256 : index
    %945 = vector.load %arg9[%c288_321, %c256_322] : memref<384x512xf32, #tpu.memory_space<vmem>>, vector<8x256xf32>
    tpu.vector_store %arg9[%c288_321, %c256_322], %944 {strides = array<i32>} : memref<384x512xf32, #tpu.memory_space<vmem>>, vector<8x256xf32>,
    %cst_323 = arith.constant 0.000000e+00 : f32
    %946 = vector.broadcast %cst_323 : f32 to vector<4x62xf32>
    %947 = vector.extract_strided_slice %585 {offsets = [0, 62], sizes = [4, 194], strides = [1, 1]} : vector<4x256xf32> to vector<4x194xf32>
    %948 = tpu.concatenate %947, %946 in 1 : vector<4x194xf32>, vector<4x62xf32> -> vector<4x256xf32>
    %949 = arith.mulf %948, %55 : vector<4x256xf32>
    %cst_324 = arith.constant 0.000000e+00 : f32
    %950 = vector.broadcast %cst_324 : f32 to vector<4x63xf32>
    %951 = vector.extract_strided_slice %585 {offsets = [0, 63], sizes = [4, 193], strides = [1, 1]} : vector<4x256xf32> to vector<4x193xf32>
    %952 = tpu.concatenate %951, %950 in 1 : vector<4x193xf32>, vector<4x63xf32> -> vector<4x256xf32>
    %953 = arith.mulf %952, %68 : vector<4x256xf32>
    %954 = tpu.concatenate %949, %953 in 0 : vector<4x256xf32>, vector<4x256xf32> -> vector<8x256xf32>
    %c296_325 = arith.constant 296 : index
    %c256_326 = arith.constant 256 : index
    %955 = vector.load %arg9[%c296_325, %c256_326] : memref<384x512xf32, #tpu.memory_space<vmem>>, vector<8x256xf32>
    tpu.vector_store %arg9[%c296_325, %c256_326], %954 {strides = array<i32>} : memref<384x512xf32, #tpu.memory_space<vmem>>, vector<8x256xf32>,
    %cst_327 = arith.constant 0.000000e+00 : f32
    %956 = vector.broadcast %cst_327 : f32 to vector<4x64xf32>
    %957 = vector.extract_strided_slice %585 {offsets = [0, 64], sizes = [4, 192], strides = [1, 1]} : vector<4x256xf32> to vector<4x192xf32>
    %958 = tpu.concatenate %957, %956 in 1 : vector<4x192xf32>, vector<4x64xf32> -> vector<4x256xf32>
    %cst_328 = arith.constant 0.000000e+00 : f32
    %959 = vector.broadcast %cst_328 : f32 to vector<4x65xf32>
    %960 = vector.extract_strided_slice %585 {offsets = [0, 65], sizes = [4, 191], strides = [1, 1]} : vector<4x256xf32> to vector<4x191xf32>
    %961 = tpu.concatenate %960, %959 in 1 : vector<4x191xf32>, vector<4x65xf32> -> vector<4x256xf32>
    %962 = arith.mulf %961, %81 : vector<4x256xf32>
    %963 = tpu.concatenate %958, %962 in 0 : vector<4x256xf32>, vector<4x256xf32> -> vector<8x256xf32>
    %c304_329 = arith.constant 304 : index
    %c256_330 = arith.constant 256 : index
    %964 = vector.load %arg9[%c304_329, %c256_330] : memref<384x512xf32, #tpu.memory_space<vmem>>, vector<8x256xf32>
    tpu.vector_store %arg9[%c304_329, %c256_330], %963 {strides = array<i32>} : memref<384x512xf32, #tpu.memory_space<vmem>>, vector<8x256xf32>,
    %cst_331 = arith.constant 0.000000e+00 : f32
    %965 = vector.broadcast %cst_331 : f32 to vector<4x66xf32>
    %966 = vector.extract_strided_slice %585 {offsets = [0, 66], sizes = [4, 190], strides = [1, 1]} : vector<4x256xf32> to vector<4x190xf32>
    %967 = tpu.concatenate %966, %965 in 1 : vector<4x190xf32>, vector<4x66xf32> -> vector<4x256xf32>
    %968 = arith.mulf %967, %94 : vector<4x256xf32>
    %cst_332 = arith.constant 0.000000e+00 : f32
    %969 = vector.broadcast %cst_332 : f32 to vector<4x67xf32>
    %970 = vector.extract_strided_slice %585 {offsets = [0, 67], sizes = [4, 189], strides = [1, 1]} : vector<4x256xf32> to vector<4x189xf32>
    %971 = tpu.concatenate %970, %969 in 1 : vector<4x189xf32>, vector<4x67xf32> -> vector<4x256xf32>
    %972 = arith.mulf %971, %107 : vector<4x256xf32>
    %973 = tpu.concatenate %968, %972 in 0 : vector<4x256xf32>, vector<4x256xf32> -> vector<8x256xf32>
    %c312_333 = arith.constant 312 : index
    %c256_334 = arith.constant 256 : index
    %974 = vector.load %arg9[%c312_333, %c256_334] : memref<384x512xf32, #tpu.memory_space<vmem>>, vector<8x256xf32>
    tpu.vector_store %arg9[%c312_333, %c256_334], %973 {strides = array<i32>} : memref<384x512xf32, #tpu.memory_space<vmem>>, vector<8x256xf32>,
    %cst_335 = arith.constant 0.000000e+00 : f32
    %975 = vector.broadcast %cst_335 : f32 to vector<4x68xf32>
    %976 = vector.extract_strided_slice %585 {offsets = [0, 68], sizes = [4, 188], strides = [1, 1]} : vector<4x256xf32> to vector<4x188xf32>
    %977 = tpu.concatenate %976, %975 in 1 : vector<4x188xf32>, vector<4x68xf32> -> vector<4x256xf32>
    %978 = arith.mulf %977, %120 : vector<4x256xf32>
    %979 = tpu.concatenate %978, %586 in 0 : vector<4x256xf32>, vector<4x256xf32> -> vector<8x256xf32>
    %c320_336 = arith.constant 320 : index
    %c256_337 = arith.constant 256 : index
    %980 = vector.load %arg9[%c320_336, %c256_337] : memref<384x512xf32, #tpu.memory_space<vmem>>, vector<8x256xf32>
    tpu.vector_store %arg9[%c320_336, %c256_337], %979 {strides = array<i32>} : memref<384x512xf32, #tpu.memory_space<vmem>>, vector<8x256xf32>,
    %981 = tpu.concatenate %586, %586 in 0 : vector<4x256xf32>, vector<4x256xf32> -> vector<8x256xf32>
    %c328_338 = arith.constant 328 : index
    %c256_339 = arith.constant 256 : index
    %982 = vector.load %arg9[%c328_338, %c256_339] : memref<384x512xf32, #tpu.memory_space<vmem>>, vector<8x256xf32>
    tpu.vector_store %arg9[%c328_338, %c256_339], %981 {strides = array<i32>} : memref<384x512xf32, #tpu.memory_space<vmem>>, vector<8x256xf32>,
    %983 = tpu.concatenate %586, %586 in 0 : vector<4x256xf32>, vector<4x256xf32> -> vector<8x256xf32>
    %c336_340 = arith.constant 336 : index
    %c256_341 = arith.constant 256 : index
    %984 = vector.load %arg9[%c336_340, %c256_341] : memref<384x512xf32, #tpu.memory_space<vmem>>, vector<8x256xf32>
    tpu.vector_store %arg9[%c336_340, %c256_341], %983 {strides = array<i32>} : memref<384x512xf32, #tpu.memory_space<vmem>>, vector<8x256xf32>,
    %985 = tpu.concatenate %586, %586 in 0 : vector<4x256xf32>, vector<4x256xf32> -> vector<8x256xf32>
    %c344_342 = arith.constant 344 : index
    %c256_343 = arith.constant 256 : index
    %986 = vector.load %arg9[%c344_342, %c256_343] : memref<384x512xf32, #tpu.memory_space<vmem>>, vector<8x256xf32>
    tpu.vector_store %arg9[%c344_342, %c256_343], %985 {strides = array<i32>} : memref<384x512xf32, #tpu.memory_space<vmem>>, vector<8x256xf32>,
    %987 = tpu.concatenate %586, %586 in 0 : vector<4x256xf32>, vector<4x256xf32> -> vector<8x256xf32>
    %c352_344 = arith.constant 352 : index
    %c256_345 = arith.constant 256 : index
    %988 = vector.load %arg9[%c352_344, %c256_345] : memref<384x512xf32, #tpu.memory_space<vmem>>, vector<8x256xf32>
    tpu.vector_store %arg9[%c352_344, %c256_345], %987 {strides = array<i32>} : memref<384x512xf32, #tpu.memory_space<vmem>>, vector<8x256xf32>,
    %989 = tpu.concatenate %586, %586 in 0 : vector<4x256xf32>, vector<4x256xf32> -> vector<8x256xf32>
    %c360_346 = arith.constant 360 : index
    %c256_347 = arith.constant 256 : index
    %990 = vector.load %arg9[%c360_346, %c256_347] : memref<384x512xf32, #tpu.memory_space<vmem>>, vector<8x256xf32>
    tpu.vector_store %arg9[%c360_346, %c256_347], %989 {strides = array<i32>} : memref<384x512xf32, #tpu.memory_space<vmem>>, vector<8x256xf32>,
    %991 = tpu.concatenate %586, %586 in 0 : vector<4x256xf32>, vector<4x256xf32> -> vector<8x256xf32>
    %c368_348 = arith.constant 368 : index
    %c256_349 = arith.constant 256 : index
    %992 = vector.load %arg9[%c368_348, %c256_349] : memref<384x512xf32, #tpu.memory_space<vmem>>, vector<8x256xf32>
    tpu.vector_store %arg9[%c368_348, %c256_349], %991 {strides = array<i32>} : memref<384x512xf32, #tpu.memory_space<vmem>>, vector<8x256xf32>,
    %993 = tpu.concatenate %586, %586 in 0 : vector<4x256xf32>, vector<4x256xf32> -> vector<8x256xf32>
    %c376_350 = arith.constant 376 : index
    %c256_351 = arith.constant 256 : index
    %994 = vector.load %arg9[%c376_350, %c256_351] : memref<384x512xf32, #tpu.memory_space<vmem>>, vector<8x256xf32>
    tpu.vector_store %arg9[%c376_350, %c256_351], %993 {strides = array<i32>} : memref<384x512xf32, #tpu.memory_space<vmem>>, vector<8x256xf32>,
    %c0_352 = arith.constant 0 : index
    %c0_353 = arith.constant 0 : index
    %995 = vector.load %arg2[%c0_352, %c0_353] : memref<64x384xf32, #tpu.memory_space<vmem>>, vector<64x384xf32>
    %c0_354 = arith.constant 0 : index
    %c0_355 = arith.constant 0 : index
    %996 = vector.load %arg9[%c0_354, %c0_355] : memref<384x512xf32, #tpu.memory_space<vmem>>, vector<384x512xf32>
    %cst_356 = arith.constant dense<0.000000e+00> : vector<64x512xf32>
    %997 = tpu.matmul %995, %996, %cst_356 {dimension_numbers = #tpu.dot_dimension_numbers<[1], [0], [0], [1], [0, 0, 1, 1], [], []>} : vector<64x384xf32>, vector<384x512xf32>, vector<64x512xf32> -> vector<64x512xf32>
    %c0_357 = arith.constant 0 : index
    %c0_358 = arith.constant 0 : index
    %998 = vector.load %arg3[%c0_357, %c0_358] : memref<64x1xf32, #tpu.memory_space<vmem>>, vector<64x1xf32>
    %999 = vector.broadcast %998 : vector<64x1xf32> to vector<64x512xf32>
    %1000 = arith.addf %997, %999 : vector<64x512xf32>
    %cst_359 = arith.constant 0.000000e+00 : f32
    %1001 = vector.broadcast %cst_359 : f32 to vector<64x512xf32>
    %1002 = arith.maximumf %1000, %1001 : vector<64x512xf32>
    %c0_360 = arith.constant 0 : index
    %c0_361 = arith.constant 0 : index
    %1003 = vector.load %arg4[%c0_360, %c0_361] : memref<32x64xf32, #tpu.memory_space<vmem>>, vector<32x64xf32>
    %cst_362 = arith.constant dense<0.000000e+00> : vector<32x512xf32>
    %1004 = tpu.matmul %1003, %1002, %cst_362 {dimension_numbers = #tpu.dot_dimension_numbers<[1], [0], [0], [1], [0, 0, 1, 1], [], []>} : vector<32x64xf32>, vector<64x512xf32>, vector<32x512xf32> -> vector<32x512xf32>
    %c0_363 = arith.constant 0 : index
    %c0_364 = arith.constant 0 : index
    %1005 = vector.load %arg5[%c0_363, %c0_364] : memref<32x1xf32, #tpu.memory_space<vmem>>, vector<32x1xf32>
    %1006 = vector.broadcast %1005 : vector<32x1xf32> to vector<32x512xf32>
    %1007 = arith.addf %1004, %1006 : vector<32x512xf32>
    %cst_365 = arith.constant 0.000000e+00 : f32
    %1008 = vector.broadcast %cst_365 : f32 to vector<32x512xf32>
    %1009 = arith.maximumf %1007, %1008 : vector<32x512xf32>
    %1010 = vector.extract_strided_slice %1009 {offsets = [0, 0], sizes = [32, 256], strides = [1, 1]} : vector<32x512xf32> to vector<32x256xf32>
    %cst_366 = arith.constant 0.000000e+00 : f32
    %1011 = vector.broadcast %cst_366 : f32 to vector<32x34xf32>
    %1012 = vector.extract_strided_slice %1010 {offsets = [0, 0], sizes = [32, 222], strides = [1, 1]} : vector<32x256xf32> to vector<32x222xf32>
    %1013 = tpu.concatenate %1011, %1012 in 1 : vector<32x34xf32>, vector<32x222xf32> -> vector<32x256xf32>
    %1014 = arith.mulf %1013, %133 : vector<32x256xf32>
    %c0_367 = arith.constant 0 : index
    %c0_368 = arith.constant 0 : index
    %1015 = vector.load %arg10[%c0_367, %c0_368] : memref<800x512xf32, #tpu.memory_space<vmem>>, vector<32x256xf32>
    tpu.vector_store %arg10[%c0_367, %c0_368], %1014 {strides = array<i32>} : memref<800x512xf32, #tpu.memory_space<vmem>>, vector<32x256xf32>,
    %cst_369 = arith.constant 0.000000e+00 : f32
    %1016 = vector.broadcast %cst_369 : f32 to vector<32x33xf32>
    %1017 = vector.extract_strided_slice %1010 {offsets = [0, 0], sizes = [32, 223], strides = [1, 1]} : vector<32x256xf32> to vector<32x223xf32>
    %1018 = tpu.concatenate %1016, %1017 in 1 : vector<32x33xf32>, vector<32x223xf32> -> vector<32x256xf32>
    %1019 = arith.mulf %1018, %146 : vector<32x256xf32>
    %c32_370 = arith.constant 32 : index
    %c0_371 = arith.constant 0 : index
    %1020 = vector.load %arg10[%c32_370, %c0_371] : memref<800x512xf32, #tpu.memory_space<vmem>>, vector<32x256xf32>
    tpu.vector_store %arg10[%c32_370, %c0_371], %1019 {strides = array<i32>} : memref<800x512xf32, #tpu.memory_space<vmem>>, vector<32x256xf32>,
    %cst_372 = arith.constant 0.000000e+00 : f32
    %1021 = vector.broadcast %cst_372 : f32 to vector<32x32xf32>
    %1022 = vector.extract_strided_slice %1010 {offsets = [0, 0], sizes = [32, 224], strides = [1, 1]} : vector<32x256xf32> to vector<32x224xf32>
    %1023 = tpu.concatenate %1021, %1022 in 1 : vector<32x32xf32>, vector<32x224xf32> -> vector<32x256xf32>
    %c64_373 = arith.constant 64 : index
    %c0_374 = arith.constant 0 : index
    %1024 = vector.load %arg10[%c64_373, %c0_374] : memref<800x512xf32, #tpu.memory_space<vmem>>, vector<32x256xf32>
    tpu.vector_store %arg10[%c64_373, %c0_374], %1023 {strides = array<i32>} : memref<800x512xf32, #tpu.memory_space<vmem>>, vector<32x256xf32>,
    %cst_375 = arith.constant 0.000000e+00 : f32
    %1025 = vector.broadcast %cst_375 : f32 to vector<32x31xf32>
    %1026 = vector.extract_strided_slice %1010 {offsets = [0, 0], sizes = [32, 225], strides = [1, 1]} : vector<32x256xf32> to vector<32x225xf32>
    %1027 = tpu.concatenate %1025, %1026 in 1 : vector<32x31xf32>, vector<32x225xf32> -> vector<32x256xf32>
    %1028 = arith.mulf %1027, %159 : vector<32x256xf32>
    %c96_376 = arith.constant 96 : index
    %c0_377 = arith.constant 0 : index
    %1029 = vector.load %arg10[%c96_376, %c0_377] : memref<800x512xf32, #tpu.memory_space<vmem>>, vector<32x256xf32>
    tpu.vector_store %arg10[%c96_376, %c0_377], %1028 {strides = array<i32>} : memref<800x512xf32, #tpu.memory_space<vmem>>, vector<32x256xf32>,
    %cst_378 = arith.constant 0.000000e+00 : f32
    %1030 = vector.broadcast %cst_378 : f32 to vector<32x30xf32>
    %1031 = vector.extract_strided_slice %1010 {offsets = [0, 0], sizes = [32, 226], strides = [1, 1]} : vector<32x256xf32> to vector<32x226xf32>
    %1032 = tpu.concatenate %1030, %1031 in 1 : vector<32x30xf32>, vector<32x226xf32> -> vector<32x256xf32>
    %1033 = arith.mulf %1032, %172 : vector<32x256xf32>
    %c128_379 = arith.constant 128 : index
    %c0_380 = arith.constant 0 : index
    %1034 = vector.load %arg10[%c128_379, %c0_380] : memref<800x512xf32, #tpu.memory_space<vmem>>, vector<32x256xf32>
    tpu.vector_store %arg10[%c128_379, %c0_380], %1033 {strides = array<i32>} : memref<800x512xf32, #tpu.memory_space<vmem>>, vector<32x256xf32>,
    %cst_381 = arith.constant 0.000000e+00 : f32
    %1035 = vector.broadcast %cst_381 : f32 to vector<32x18xf32>
    %1036 = vector.extract_strided_slice %1010 {offsets = [0, 0], sizes = [32, 238], strides = [1, 1]} : vector<32x256xf32> to vector<32x238xf32>
    %1037 = tpu.concatenate %1035, %1036 in 1 : vector<32x18xf32>, vector<32x238xf32> -> vector<32x256xf32>
    %1038 = arith.mulf %1037, %133 : vector<32x256xf32>
    %c160_382 = arith.constant 160 : index
    %c0_383 = arith.constant 0 : index
    %1039 = vector.load %arg10[%c160_382, %c0_383] : memref<800x512xf32, #tpu.memory_space<vmem>>, vector<32x256xf32>
    tpu.vector_store %arg10[%c160_382, %c0_383], %1038 {strides = array<i32>} : memref<800x512xf32, #tpu.memory_space<vmem>>, vector<32x256xf32>,
    %cst_384 = arith.constant 0.000000e+00 : f32
    %1040 = vector.broadcast %cst_384 : f32 to vector<32x17xf32>
    %1041 = vector.extract_strided_slice %1010 {offsets = [0, 0], sizes = [32, 239], strides = [1, 1]} : vector<32x256xf32> to vector<32x239xf32>
    %1042 = tpu.concatenate %1040, %1041 in 1 : vector<32x17xf32>, vector<32x239xf32> -> vector<32x256xf32>
    %1043 = arith.mulf %1042, %146 : vector<32x256xf32>
    %c192_385 = arith.constant 192 : index
    %c0_386 = arith.constant 0 : index
    %1044 = vector.load %arg10[%c192_385, %c0_386] : memref<800x512xf32, #tpu.memory_space<vmem>>, vector<32x256xf32>
    tpu.vector_store %arg10[%c192_385, %c0_386], %1043 {strides = array<i32>} : memref<800x512xf32, #tpu.memory_space<vmem>>, vector<32x256xf32>,
    %cst_387 = arith.constant 0.000000e+00 : f32
    %1045 = vector.broadcast %cst_387 : f32 to vector<32x16xf32>
    %1046 = vector.extract_strided_slice %1010 {offsets = [0, 0], sizes = [32, 240], strides = [1, 1]} : vector<32x256xf32> to vector<32x240xf32>
    %1047 = tpu.concatenate %1045, %1046 in 1 : vector<32x16xf32>, vector<32x240xf32> -> vector<32x256xf32>
    %c224_388 = arith.constant 224 : index
    %c0_389 = arith.constant 0 : index
    %1048 = vector.load %arg10[%c224_388, %c0_389] : memref<800x512xf32, #tpu.memory_space<vmem>>, vector<32x256xf32>
    tpu.vector_store %arg10[%c224_388, %c0_389], %1047 {strides = array<i32>} : memref<800x512xf32, #tpu.memory_space<vmem>>, vector<32x256xf32>,
    %cst_390 = arith.constant 0.000000e+00 : f32
    %1049 = vector.broadcast %cst_390 : f32 to vector<32x15xf32>
    %1050 = vector.extract_strided_slice %1010 {offsets = [0, 0], sizes = [32, 241], strides = [1, 1]} : vector<32x256xf32> to vector<32x241xf32>
    %1051 = tpu.concatenate %1049, %1050 in 1 : vector<32x15xf32>, vector<32x241xf32> -> vector<32x256xf32>
    %1052 = arith.mulf %1051, %159 : vector<32x256xf32>
    %c256_391 = arith.constant 256 : index
    %c0_392 = arith.constant 0 : index
    %1053 = vector.load %arg10[%c256_391, %c0_392] : memref<800x512xf32, #tpu.memory_space<vmem>>, vector<32x256xf32>
    tpu.vector_store %arg10[%c256_391, %c0_392], %1052 {strides = array<i32>} : memref<800x512xf32, #tpu.memory_space<vmem>>, vector<32x256xf32>,
    %cst_393 = arith.constant 0.000000e+00 : f32
    %1054 = vector.broadcast %cst_393 : f32 to vector<32x14xf32>
    %1055 = vector.extract_strided_slice %1010 {offsets = [0, 0], sizes = [32, 242], strides = [1, 1]} : vector<32x256xf32> to vector<32x242xf32>
    %1056 = tpu.concatenate %1054, %1055 in 1 : vector<32x14xf32>, vector<32x242xf32> -> vector<32x256xf32>
    %1057 = arith.mulf %1056, %172 : vector<32x256xf32>
    %c288_394 = arith.constant 288 : index
    %c0_395 = arith.constant 0 : index
    %1058 = vector.load %arg10[%c288_394, %c0_395] : memref<800x512xf32, #tpu.memory_space<vmem>>, vector<32x256xf32>
    tpu.vector_store %arg10[%c288_394, %c0_395], %1057 {strides = array<i32>} : memref<800x512xf32, #tpu.memory_space<vmem>>, vector<32x256xf32>,
    %cst_396 = arith.constant 0.000000e+00 : f32
    %1059 = vector.broadcast %cst_396 : f32 to vector<32x2xf32>
    %1060 = vector.extract_strided_slice %1010 {offsets = [0, 0], sizes = [32, 254], strides = [1, 1]} : vector<32x256xf32> to vector<32x254xf32>
    %1061 = tpu.concatenate %1059, %1060 in 1 : vector<32x2xf32>, vector<32x254xf32> -> vector<32x256xf32>
    %1062 = arith.mulf %1061, %133 : vector<32x256xf32>
    %c320_397 = arith.constant 320 : index
    %c0_398 = arith.constant 0 : index
    %1063 = vector.load %arg10[%c320_397, %c0_398] : memref<800x512xf32, #tpu.memory_space<vmem>>, vector<32x256xf32>
    tpu.vector_store %arg10[%c320_397, %c0_398], %1062 {strides = array<i32>} : memref<800x512xf32, #tpu.memory_space<vmem>>, vector<32x256xf32>,
    %cst_399 = arith.constant 0.000000e+00 : f32
    %1064 = vector.broadcast %cst_399 : f32 to vector<32x1xf32>
    %1065 = vector.extract_strided_slice %1010 {offsets = [0, 0], sizes = [32, 255], strides = [1, 1]} : vector<32x256xf32> to vector<32x255xf32>
    %1066 = tpu.concatenate %1064, %1065 in 1 : vector<32x1xf32>, vector<32x255xf32> -> vector<32x256xf32>
    %1067 = arith.mulf %1066, %146 : vector<32x256xf32>
    %c352_400 = arith.constant 352 : index
    %c0_401 = arith.constant 0 : index
    %1068 = vector.load %arg10[%c352_400, %c0_401] : memref<800x512xf32, #tpu.memory_space<vmem>>, vector<32x256xf32>
    tpu.vector_store %arg10[%c352_400, %c0_401], %1067 {strides = array<i32>} : memref<800x512xf32, #tpu.memory_space<vmem>>, vector<32x256xf32>,
    %c384 = arith.constant 384 : index
    %c0_402 = arith.constant 0 : index
    %1069 = vector.load %arg10[%c384, %c0_402] : memref<800x512xf32, #tpu.memory_space<vmem>>, vector<32x256xf32>
    tpu.vector_store %arg10[%c384, %c0_402], %1010 {strides = array<i32>} : memref<800x512xf32, #tpu.memory_space<vmem>>, vector<32x256xf32>,
    %cst_403 = arith.constant 0.000000e+00 : f32
    %1070 = vector.broadcast %cst_403 : f32 to vector<32x1xf32>
    %1071 = vector.extract_strided_slice %1010 {offsets = [0, 1], sizes = [32, 255], strides = [1, 1]} : vector<32x256xf32> to vector<32x255xf32>
    %1072 = tpu.concatenate %1071, %1070 in 1 : vector<32x255xf32>, vector<32x1xf32> -> vector<32x256xf32>
    %1073 = arith.mulf %1072, %159 : vector<32x256xf32>
    %c416 = arith.constant 416 : index
    %c0_404 = arith.constant 0 : index
    %1074 = vector.load %arg10[%c416, %c0_404] : memref<800x512xf32, #tpu.memory_space<vmem>>, vector<32x256xf32>
    tpu.vector_store %arg10[%c416, %c0_404], %1073 {strides = array<i32>} : memref<800x512xf32, #tpu.memory_space<vmem>>, vector<32x256xf32>,
    %cst_405 = arith.constant 0.000000e+00 : f32
    %1075 = vector.broadcast %cst_405 : f32 to vector<32x2xf32>
    %1076 = vector.extract_strided_slice %1010 {offsets = [0, 2], sizes = [32, 254], strides = [1, 1]} : vector<32x256xf32> to vector<32x254xf32>
    %1077 = tpu.concatenate %1076, %1075 in 1 : vector<32x254xf32>, vector<32x2xf32> -> vector<32x256xf32>
    %1078 = arith.mulf %1077, %172 : vector<32x256xf32>
    %c448 = arith.constant 448 : index
    %c0_406 = arith.constant 0 : index
    %1079 = vector.load %arg10[%c448, %c0_406] : memref<800x512xf32, #tpu.memory_space<vmem>>, vector<32x256xf32>
    tpu.vector_store %arg10[%c448, %c0_406], %1078 {strides = array<i32>} : memref<800x512xf32, #tpu.memory_space<vmem>>, vector<32x256xf32>,
    %cst_407 = arith.constant 0.000000e+00 : f32
    %1080 = vector.broadcast %cst_407 : f32 to vector<32x14xf32>
    %1081 = vector.extract_strided_slice %1010 {offsets = [0, 14], sizes = [32, 242], strides = [1, 1]} : vector<32x256xf32> to vector<32x242xf32>
    %1082 = tpu.concatenate %1081, %1080 in 1 : vector<32x242xf32>, vector<32x14xf32> -> vector<32x256xf32>
    %1083 = arith.mulf %1082, %133 : vector<32x256xf32>
    %c480 = arith.constant 480 : index
    %c0_408 = arith.constant 0 : index
    %1084 = vector.load %arg10[%c480, %c0_408] : memref<800x512xf32, #tpu.memory_space<vmem>>, vector<32x256xf32>
    tpu.vector_store %arg10[%c480, %c0_408], %1083 {strides = array<i32>} : memref<800x512xf32, #tpu.memory_space<vmem>>, vector<32x256xf32>,
    %cst_409 = arith.constant 0.000000e+00 : f32
    %1085 = vector.broadcast %cst_409 : f32 to vector<32x15xf32>
    %1086 = vector.extract_strided_slice %1010 {offsets = [0, 15], sizes = [32, 241], strides = [1, 1]} : vector<32x256xf32> to vector<32x241xf32>
    %1087 = tpu.concatenate %1086, %1085 in 1 : vector<32x241xf32>, vector<32x15xf32> -> vector<32x256xf32>
    %1088 = arith.mulf %1087, %146 : vector<32x256xf32>
    %c512 = arith.constant 512 : index
    %c0_410 = arith.constant 0 : index
    %1089 = vector.load %arg10[%c512, %c0_410] : memref<800x512xf32, #tpu.memory_space<vmem>>, vector<32x256xf32>
    tpu.vector_store %arg10[%c512, %c0_410], %1088 {strides = array<i32>} : memref<800x512xf32, #tpu.memory_space<vmem>>, vector<32x256xf32>,
    %cst_411 = arith.constant 0.000000e+00 : f32
    %1090 = vector.broadcast %cst_411 : f32 to vector<32x16xf32>
    %1091 = vector.extract_strided_slice %1010 {offsets = [0, 16], sizes = [32, 240], strides = [1, 1]} : vector<32x256xf32> to vector<32x240xf32>
    %1092 = tpu.concatenate %1091, %1090 in 1 : vector<32x240xf32>, vector<32x16xf32> -> vector<32x256xf32>
    %c544 = arith.constant 544 : index
    %c0_412 = arith.constant 0 : index
    %1093 = vector.load %arg10[%c544, %c0_412] : memref<800x512xf32, #tpu.memory_space<vmem>>, vector<32x256xf32>
    tpu.vector_store %arg10[%c544, %c0_412], %1092 {strides = array<i32>} : memref<800x512xf32, #tpu.memory_space<vmem>>, vector<32x256xf32>,
    %cst_413 = arith.constant 0.000000e+00 : f32
    %1094 = vector.broadcast %cst_413 : f32 to vector<32x17xf32>
    %1095 = vector.extract_strided_slice %1010 {offsets = [0, 17], sizes = [32, 239], strides = [1, 1]} : vector<32x256xf32> to vector<32x239xf32>
    %1096 = tpu.concatenate %1095, %1094 in 1 : vector<32x239xf32>, vector<32x17xf32> -> vector<32x256xf32>
    %1097 = arith.mulf %1096, %159 : vector<32x256xf32>
    %c576 = arith.constant 576 : index
    %c0_414 = arith.constant 0 : index
    %1098 = vector.load %arg10[%c576, %c0_414] : memref<800x512xf32, #tpu.memory_space<vmem>>, vector<32x256xf32>
    tpu.vector_store %arg10[%c576, %c0_414], %1097 {strides = array<i32>} : memref<800x512xf32, #tpu.memory_space<vmem>>, vector<32x256xf32>,
    %cst_415 = arith.constant 0.000000e+00 : f32
    %1099 = vector.broadcast %cst_415 : f32 to vector<32x18xf32>
    %1100 = vector.extract_strided_slice %1010 {offsets = [0, 18], sizes = [32, 238], strides = [1, 1]} : vector<32x256xf32> to vector<32x238xf32>
    %1101 = tpu.concatenate %1100, %1099 in 1 : vector<32x238xf32>, vector<32x18xf32> -> vector<32x256xf32>
    %1102 = arith.mulf %1101, %172 : vector<32x256xf32>
    %c608 = arith.constant 608 : index
    %c0_416 = arith.constant 0 : index
    %1103 = vector.load %arg10[%c608, %c0_416] : memref<800x512xf32, #tpu.memory_space<vmem>>, vector<32x256xf32>
    tpu.vector_store %arg10[%c608, %c0_416], %1102 {strides = array<i32>} : memref<800x512xf32, #tpu.memory_space<vmem>>, vector<32x256xf32>,
    %cst_417 = arith.constant 0.000000e+00 : f32
    %1104 = vector.broadcast %cst_417 : f32 to vector<32x30xf32>
    %1105 = vector.extract_strided_slice %1010 {offsets = [0, 30], sizes = [32, 226], strides = [1, 1]} : vector<32x256xf32> to vector<32x226xf32>
    %1106 = tpu.concatenate %1105, %1104 in 1 : vector<32x226xf32>, vector<32x30xf32> -> vector<32x256xf32>
    %1107 = arith.mulf %1106, %133 : vector<32x256xf32>
    %c640 = arith.constant 640 : index
    %c0_418 = arith.constant 0 : index
    %1108 = vector.load %arg10[%c640, %c0_418] : memref<800x512xf32, #tpu.memory_space<vmem>>, vector<32x256xf32>
    tpu.vector_store %arg10[%c640, %c0_418], %1107 {strides = array<i32>} : memref<800x512xf32, #tpu.memory_space<vmem>>, vector<32x256xf32>,
    %cst_419 = arith.constant 0.000000e+00 : f32
    %1109 = vector.broadcast %cst_419 : f32 to vector<32x31xf32>
    %1110 = vector.extract_strided_slice %1010 {offsets = [0, 31], sizes = [32, 225], strides = [1, 1]} : vector<32x256xf32> to vector<32x225xf32>
    %1111 = tpu.concatenate %1110, %1109 in 1 : vector<32x225xf32>, vector<32x31xf32> -> vector<32x256xf32>
    %1112 = arith.mulf %1111, %146 : vector<32x256xf32>
    %c672 = arith.constant 672 : index
    %c0_420 = arith.constant 0 : index
    %1113 = vector.load %arg10[%c672, %c0_420] : memref<800x512xf32, #tpu.memory_space<vmem>>, vector<32x256xf32>
    tpu.vector_store %arg10[%c672, %c0_420], %1112 {strides = array<i32>} : memref<800x512xf32, #tpu.memory_space<vmem>>, vector<32x256xf32>,
    %cst_421 = arith.constant 0.000000e+00 : f32
    %1114 = vector.broadcast %cst_421 : f32 to vector<32x32xf32>
    %1115 = vector.extract_strided_slice %1010 {offsets = [0, 32], sizes = [32, 224], strides = [1, 1]} : vector<32x256xf32> to vector<32x224xf32>
    %1116 = tpu.concatenate %1115, %1114 in 1 : vector<32x224xf32>, vector<32x32xf32> -> vector<32x256xf32>
    %c704 = arith.constant 704 : index
    %c0_422 = arith.constant 0 : index
    %1117 = vector.load %arg10[%c704, %c0_422] : memref<800x512xf32, #tpu.memory_space<vmem>>, vector<32x256xf32>
    tpu.vector_store %arg10[%c704, %c0_422], %1116 {strides = array<i32>} : memref<800x512xf32, #tpu.memory_space<vmem>>, vector<32x256xf32>,
    %cst_423 = arith.constant 0.000000e+00 : f32
    %1118 = vector.broadcast %cst_423 : f32 to vector<32x33xf32>
    %1119 = vector.extract_strided_slice %1010 {offsets = [0, 33], sizes = [32, 223], strides = [1, 1]} : vector<32x256xf32> to vector<32x223xf32>
    %1120 = tpu.concatenate %1119, %1118 in 1 : vector<32x223xf32>, vector<32x33xf32> -> vector<32x256xf32>
    %1121 = arith.mulf %1120, %159 : vector<32x256xf32>
    %c736 = arith.constant 736 : index
    %c0_424 = arith.constant 0 : index
    %1122 = vector.load %arg10[%c736, %c0_424] : memref<800x512xf32, #tpu.memory_space<vmem>>, vector<32x256xf32>
    tpu.vector_store %arg10[%c736, %c0_424], %1121 {strides = array<i32>} : memref<800x512xf32, #tpu.memory_space<vmem>>, vector<32x256xf32>,
    %cst_425 = arith.constant 0.000000e+00 : f32
    %1123 = vector.broadcast %cst_425 : f32 to vector<32x34xf32>
    %1124 = vector.extract_strided_slice %1010 {offsets = [0, 34], sizes = [32, 222], strides = [1, 1]} : vector<32x256xf32> to vector<32x222xf32>
    %1125 = tpu.concatenate %1124, %1123 in 1 : vector<32x222xf32>, vector<32x34xf32> -> vector<32x256xf32>
    %1126 = arith.mulf %1125, %172 : vector<32x256xf32>
    %c768 = arith.constant 768 : index
    %c0_426 = arith.constant 0 : index
    %1127 = vector.load %arg10[%c768, %c0_426] : memref<800x512xf32, #tpu.memory_space<vmem>>, vector<32x256xf32>
    tpu.vector_store %arg10[%c768, %c0_426], %1126 {strides = array<i32>} : memref<800x512xf32, #tpu.memory_space<vmem>>, vector<32x256xf32>,
    %1128 = vector.extract_strided_slice %1009 {offsets = [0, 256], sizes = [32, 256], strides = [1, 1]} : vector<32x512xf32> to vector<32x256xf32>
    %cst_427 = arith.constant 0.000000e+00 : f32
    %1129 = vector.broadcast %cst_427 : f32 to vector<32x34xf32>
    %1130 = vector.extract_strided_slice %1128 {offsets = [0, 0], sizes = [32, 222], strides = [1, 1]} : vector<32x256xf32> to vector<32x222xf32>
    %1131 = tpu.concatenate %1129, %1130 in 1 : vector<32x34xf32>, vector<32x222xf32> -> vector<32x256xf32>
    %1132 = arith.mulf %1131, %133 : vector<32x256xf32>
    %c0_428 = arith.constant 0 : index
    %c256_429 = arith.constant 256 : index
    %1133 = vector.load %arg10[%c0_428, %c256_429] : memref<800x512xf32, #tpu.memory_space<vmem>>, vector<32x256xf32>
    tpu.vector_store %arg10[%c0_428, %c256_429], %1132 {strides = array<i32>} : memref<800x512xf32, #tpu.memory_space<vmem>>, vector<32x256xf32>,
    %cst_430 = arith.constant 0.000000e+00 : f32
    %1134 = vector.broadcast %cst_430 : f32 to vector<32x33xf32>
    %1135 = vector.extract_strided_slice %1128 {offsets = [0, 0], sizes = [32, 223], strides = [1, 1]} : vector<32x256xf32> to vector<32x223xf32>
    %1136 = tpu.concatenate %1134, %1135 in 1 : vector<32x33xf32>, vector<32x223xf32> -> vector<32x256xf32>
    %1137 = arith.mulf %1136, %146 : vector<32x256xf32>
    %c32_431 = arith.constant 32 : index
    %c256_432 = arith.constant 256 : index
    %1138 = vector.load %arg10[%c32_431, %c256_432] : memref<800x512xf32, #tpu.memory_space<vmem>>, vector<32x256xf32>
    tpu.vector_store %arg10[%c32_431, %c256_432], %1137 {strides = array<i32>} : memref<800x512xf32, #tpu.memory_space<vmem>>, vector<32x256xf32>,
    %cst_433 = arith.constant 0.000000e+00 : f32
    %1139 = vector.broadcast %cst_433 : f32 to vector<32x32xf32>
    %1140 = vector.extract_strided_slice %1128 {offsets = [0, 0], sizes = [32, 224], strides = [1, 1]} : vector<32x256xf32> to vector<32x224xf32>
    %1141 = tpu.concatenate %1139, %1140 in 1 : vector<32x32xf32>, vector<32x224xf32> -> vector<32x256xf32>
    %c64_434 = arith.constant 64 : index
    %c256_435 = arith.constant 256 : index
    %1142 = vector.load %arg10[%c64_434, %c256_435] : memref<800x512xf32, #tpu.memory_space<vmem>>, vector<32x256xf32>
    tpu.vector_store %arg10[%c64_434, %c256_435], %1141 {strides = array<i32>} : memref<800x512xf32, #tpu.memory_space<vmem>>, vector<32x256xf32>,
    %cst_436 = arith.constant 0.000000e+00 : f32
    %1143 = vector.broadcast %cst_436 : f32 to vector<32x31xf32>
    %1144 = vector.extract_strided_slice %1128 {offsets = [0, 0], sizes = [32, 225], strides = [1, 1]} : vector<32x256xf32> to vector<32x225xf32>
    %1145 = tpu.concatenate %1143, %1144 in 1 : vector<32x31xf32>, vector<32x225xf32> -> vector<32x256xf32>
    %1146 = arith.mulf %1145, %159 : vector<32x256xf32>
    %c96_437 = arith.constant 96 : index
    %c256_438 = arith.constant 256 : index
    %1147 = vector.load %arg10[%c96_437, %c256_438] : memref<800x512xf32, #tpu.memory_space<vmem>>, vector<32x256xf32>
    tpu.vector_store %arg10[%c96_437, %c256_438], %1146 {strides = array<i32>} : memref<800x512xf32, #tpu.memory_space<vmem>>, vector<32x256xf32>,
    %cst_439 = arith.constant 0.000000e+00 : f32
    %1148 = vector.broadcast %cst_439 : f32 to vector<32x30xf32>
    %1149 = vector.extract_strided_slice %1128 {offsets = [0, 0], sizes = [32, 226], strides = [1, 1]} : vector<32x256xf32> to vector<32x226xf32>
    %1150 = tpu.concatenate %1148, %1149 in 1 : vector<32x30xf32>, vector<32x226xf32> -> vector<32x256xf32>
    %1151 = arith.mulf %1150, %172 : vector<32x256xf32>
    %c128_440 = arith.constant 128 : index
    %c256_441 = arith.constant 256 : index
    %1152 = vector.load %arg10[%c128_440, %c256_441] : memref<800x512xf32, #tpu.memory_space<vmem>>, vector<32x256xf32>
    tpu.vector_store %arg10[%c128_440, %c256_441], %1151 {strides = array<i32>} : memref<800x512xf32, #tpu.memory_space<vmem>>, vector<32x256xf32>,
    %cst_442 = arith.constant 0.000000e+00 : f32
    %1153 = vector.broadcast %cst_442 : f32 to vector<32x18xf32>
    %1154 = vector.extract_strided_slice %1128 {offsets = [0, 0], sizes = [32, 238], strides = [1, 1]} : vector<32x256xf32> to vector<32x238xf32>
    %1155 = tpu.concatenate %1153, %1154 in 1 : vector<32x18xf32>, vector<32x238xf32> -> vector<32x256xf32>
    %1156 = arith.mulf %1155, %133 : vector<32x256xf32>
    %c160_443 = arith.constant 160 : index
    %c256_444 = arith.constant 256 : index
    %1157 = vector.load %arg10[%c160_443, %c256_444] : memref<800x512xf32, #tpu.memory_space<vmem>>, vector<32x256xf32>
    tpu.vector_store %arg10[%c160_443, %c256_444], %1156 {strides = array<i32>} : memref<800x512xf32, #tpu.memory_space<vmem>>, vector<32x256xf32>,
    %cst_445 = arith.constant 0.000000e+00 : f32
    %1158 = vector.broadcast %cst_445 : f32 to vector<32x17xf32>
    %1159 = vector.extract_strided_slice %1128 {offsets = [0, 0], sizes = [32, 239], strides = [1, 1]} : vector<32x256xf32> to vector<32x239xf32>
    %1160 = tpu.concatenate %1158, %1159 in 1 : vector<32x17xf32>, vector<32x239xf32> -> vector<32x256xf32>
    %1161 = arith.mulf %1160, %146 : vector<32x256xf32>
    %c192_446 = arith.constant 192 : index
    %c256_447 = arith.constant 256 : index
    %1162 = vector.load %arg10[%c192_446, %c256_447] : memref<800x512xf32, #tpu.memory_space<vmem>>, vector<32x256xf32>
    tpu.vector_store %arg10[%c192_446, %c256_447], %1161 {strides = array<i32>} : memref<800x512xf32, #tpu.memory_space<vmem>>, vector<32x256xf32>,
    %cst_448 = arith.constant 0.000000e+00 : f32
    %1163 = vector.broadcast %cst_448 : f32 to vector<32x16xf32>
    %1164 = vector.extract_strided_slice %1128 {offsets = [0, 0], sizes = [32, 240], strides = [1, 1]} : vector<32x256xf32> to vector<32x240xf32>
    %1165 = tpu.concatenate %1163, %1164 in 1 : vector<32x16xf32>, vector<32x240xf32> -> vector<32x256xf32>
    %c224_449 = arith.constant 224 : index
    %c256_450 = arith.constant 256 : index
    %1166 = vector.load %arg10[%c224_449, %c256_450] : memref<800x512xf32, #tpu.memory_space<vmem>>, vector<32x256xf32>
    tpu.vector_store %arg10[%c224_449, %c256_450], %1165 {strides = array<i32>} : memref<800x512xf32, #tpu.memory_space<vmem>>, vector<32x256xf32>,
    %cst_451 = arith.constant 0.000000e+00 : f32
    %1167 = vector.broadcast %cst_451 : f32 to vector<32x15xf32>
    %1168 = vector.extract_strided_slice %1128 {offsets = [0, 0], sizes = [32, 241], strides = [1, 1]} : vector<32x256xf32> to vector<32x241xf32>
    %1169 = tpu.concatenate %1167, %1168 in 1 : vector<32x15xf32>, vector<32x241xf32> -> vector<32x256xf32>
    %1170 = arith.mulf %1169, %159 : vector<32x256xf32>
    %c256_452 = arith.constant 256 : index
    %c256_453 = arith.constant 256 : index
    %1171 = vector.load %arg10[%c256_452, %c256_453] : memref<800x512xf32, #tpu.memory_space<vmem>>, vector<32x256xf32>
    tpu.vector_store %arg10[%c256_452, %c256_453], %1170 {strides = array<i32>} : memref<800x512xf32, #tpu.memory_space<vmem>>, vector<32x256xf32>,
    %cst_454 = arith.constant 0.000000e+00 : f32
    %1172 = vector.broadcast %cst_454 : f32 to vector<32x14xf32>
    %1173 = vector.extract_strided_slice %1128 {offsets = [0, 0], sizes = [32, 242], strides = [1, 1]} : vector<32x256xf32> to vector<32x242xf32>
    %1174 = tpu.concatenate %1172, %1173 in 1 : vector<32x14xf32>, vector<32x242xf32> -> vector<32x256xf32>
    %1175 = arith.mulf %1174, %172 : vector<32x256xf32>
    %c288_455 = arith.constant 288 : index
    %c256_456 = arith.constant 256 : index
    %1176 = vector.load %arg10[%c288_455, %c256_456] : memref<800x512xf32, #tpu.memory_space<vmem>>, vector<32x256xf32>
    tpu.vector_store %arg10[%c288_455, %c256_456], %1175 {strides = array<i32>} : memref<800x512xf32, #tpu.memory_space<vmem>>, vector<32x256xf32>,
    %cst_457 = arith.constant 0.000000e+00 : f32
    %1177 = vector.broadcast %cst_457 : f32 to vector<32x2xf32>
    %1178 = vector.extract_strided_slice %1128 {offsets = [0, 0], sizes = [32, 254], strides = [1, 1]} : vector<32x256xf32> to vector<32x254xf32>
    %1179 = tpu.concatenate %1177, %1178 in 1 : vector<32x2xf32>, vector<32x254xf32> -> vector<32x256xf32>
    %1180 = arith.mulf %1179, %133 : vector<32x256xf32>
    %c320_458 = arith.constant 320 : index
    %c256_459 = arith.constant 256 : index
    %1181 = vector.load %arg10[%c320_458, %c256_459] : memref<800x512xf32, #tpu.memory_space<vmem>>, vector<32x256xf32>
    tpu.vector_store %arg10[%c320_458, %c256_459], %1180 {strides = array<i32>} : memref<800x512xf32, #tpu.memory_space<vmem>>, vector<32x256xf32>,
    %cst_460 = arith.constant 0.000000e+00 : f32
    %1182 = vector.broadcast %cst_460 : f32 to vector<32x1xf32>
    %1183 = vector.extract_strided_slice %1128 {offsets = [0, 0], sizes = [32, 255], strides = [1, 1]} : vector<32x256xf32> to vector<32x255xf32>
    %1184 = tpu.concatenate %1182, %1183 in 1 : vector<32x1xf32>, vector<32x255xf32> -> vector<32x256xf32>
    %1185 = arith.mulf %1184, %146 : vector<32x256xf32>
    %c352_461 = arith.constant 352 : index
    %c256_462 = arith.constant 256 : index
    %1186 = vector.load %arg10[%c352_461, %c256_462] : memref<800x512xf32, #tpu.memory_space<vmem>>, vector<32x256xf32>
    tpu.vector_store %arg10[%c352_461, %c256_462], %1185 {strides = array<i32>} : memref<800x512xf32, #tpu.memory_space<vmem>>, vector<32x256xf32>,
    %c384_463 = arith.constant 384 : index
    %c256_464 = arith.constant 256 : index
    %1187 = vector.load %arg10[%c384_463, %c256_464] : memref<800x512xf32, #tpu.memory_space<vmem>>, vector<32x256xf32>
    tpu.vector_store %arg10[%c384_463, %c256_464], %1128 {strides = array<i32>} : memref<800x512xf32, #tpu.memory_space<vmem>>, vector<32x256xf32>,
    %cst_465 = arith.constant 0.000000e+00 : f32
    %1188 = vector.broadcast %cst_465 : f32 to vector<32x1xf32>
    %1189 = vector.extract_strided_slice %1128 {offsets = [0, 1], sizes = [32, 255], strides = [1, 1]} : vector<32x256xf32> to vector<32x255xf32>
    %1190 = tpu.concatenate %1189, %1188 in 1 : vector<32x255xf32>, vector<32x1xf32> -> vector<32x256xf32>
    %1191 = arith.mulf %1190, %159 : vector<32x256xf32>
    %c416_466 = arith.constant 416 : index
    %c256_467 = arith.constant 256 : index
    %1192 = vector.load %arg10[%c416_466, %c256_467] : memref<800x512xf32, #tpu.memory_space<vmem>>, vector<32x256xf32>
    tpu.vector_store %arg10[%c416_466, %c256_467], %1191 {strides = array<i32>} : memref<800x512xf32, #tpu.memory_space<vmem>>, vector<32x256xf32>,
    %cst_468 = arith.constant 0.000000e+00 : f32
    %1193 = vector.broadcast %cst_468 : f32 to vector<32x2xf32>
    %1194 = vector.extract_strided_slice %1128 {offsets = [0, 2], sizes = [32, 254], strides = [1, 1]} : vector<32x256xf32> to vector<32x254xf32>
    %1195 = tpu.concatenate %1194, %1193 in 1 : vector<32x254xf32>, vector<32x2xf32> -> vector<32x256xf32>
    %1196 = arith.mulf %1195, %172 : vector<32x256xf32>
    %c448_469 = arith.constant 448 : index
    %c256_470 = arith.constant 256 : index
    %1197 = vector.load %arg10[%c448_469, %c256_470] : memref<800x512xf32, #tpu.memory_space<vmem>>, vector<32x256xf32>
    tpu.vector_store %arg10[%c448_469, %c256_470], %1196 {strides = array<i32>} : memref<800x512xf32, #tpu.memory_space<vmem>>, vector<32x256xf32>,
    %cst_471 = arith.constant 0.000000e+00 : f32
    %1198 = vector.broadcast %cst_471 : f32 to vector<32x14xf32>
    %1199 = vector.extract_strided_slice %1128 {offsets = [0, 14], sizes = [32, 242], strides = [1, 1]} : vector<32x256xf32> to vector<32x242xf32>
    %1200 = tpu.concatenate %1199, %1198 in 1 : vector<32x242xf32>, vector<32x14xf32> -> vector<32x256xf32>
    %1201 = arith.mulf %1200, %133 : vector<32x256xf32>
    %c480_472 = arith.constant 480 : index
    %c256_473 = arith.constant 256 : index
    %1202 = vector.load %arg10[%c480_472, %c256_473] : memref<800x512xf32, #tpu.memory_space<vmem>>, vector<32x256xf32>
    tpu.vector_store %arg10[%c480_472, %c256_473], %1201 {strides = array<i32>} : memref<800x512xf32, #tpu.memory_space<vmem>>, vector<32x256xf32>,
    %cst_474 = arith.constant 0.000000e+00 : f32
    %1203 = vector.broadcast %cst_474 : f32 to vector<32x15xf32>
    %1204 = vector.extract_strided_slice %1128 {offsets = [0, 15], sizes = [32, 241], strides = [1, 1]} : vector<32x256xf32> to vector<32x241xf32>
    %1205 = tpu.concatenate %1204, %1203 in 1 : vector<32x241xf32>, vector<32x15xf32> -> vector<32x256xf32>
    %1206 = arith.mulf %1205, %146 : vector<32x256xf32>
    %c512_475 = arith.constant 512 : index
    %c256_476 = arith.constant 256 : index
    %1207 = vector.load %arg10[%c512_475, %c256_476] : memref<800x512xf32, #tpu.memory_space<vmem>>, vector<32x256xf32>
    tpu.vector_store %arg10[%c512_475, %c256_476], %1206 {strides = array<i32>} : memref<800x512xf32, #tpu.memory_space<vmem>>, vector<32x256xf32>,
    %cst_477 = arith.constant 0.000000e+00 : f32
    %1208 = vector.broadcast %cst_477 : f32 to vector<32x16xf32>
    %1209 = vector.extract_strided_slice %1128 {offsets = [0, 16], sizes = [32, 240], strides = [1, 1]} : vector<32x256xf32> to vector<32x240xf32>
    %1210 = tpu.concatenate %1209, %1208 in 1 : vector<32x240xf32>, vector<32x16xf32> -> vector<32x256xf32>
    %c544_478 = arith.constant 544 : index
    %c256_479 = arith.constant 256 : index
    %1211 = vector.load %arg10[%c544_478, %c256_479] : memref<800x512xf32, #tpu.memory_space<vmem>>, vector<32x256xf32>
    tpu.vector_store %arg10[%c544_478, %c256_479], %1210 {strides = array<i32>} : memref<800x512xf32, #tpu.memory_space<vmem>>, vector<32x256xf32>,
    %cst_480 = arith.constant 0.000000e+00 : f32
    %1212 = vector.broadcast %cst_480 : f32 to vector<32x17xf32>
    %1213 = vector.extract_strided_slice %1128 {offsets = [0, 17], sizes = [32, 239], strides = [1, 1]} : vector<32x256xf32> to vector<32x239xf32>
    %1214 = tpu.concatenate %1213, %1212 in 1 : vector<32x239xf32>, vector<32x17xf32> -> vector<32x256xf32>
    %1215 = arith.mulf %1214, %159 : vector<32x256xf32>
    %c576_481 = arith.constant 576 : index
    %c256_482 = arith.constant 256 : index
    %1216 = vector.load %arg10[%c576_481, %c256_482] : memref<800x512xf32, #tpu.memory_space<vmem>>, vector<32x256xf32>
    tpu.vector_store %arg10[%c576_481, %c256_482], %1215 {strides = array<i32>} : memref<800x512xf32, #tpu.memory_space<vmem>>, vector<32x256xf32>,
    %cst_483 = arith.constant 0.000000e+00 : f32
    %1217 = vector.broadcast %cst_483 : f32 to vector<32x18xf32>
    %1218 = vector.extract_strided_slice %1128 {offsets = [0, 18], sizes = [32, 238], strides = [1, 1]} : vector<32x256xf32> to vector<32x238xf32>
    %1219 = tpu.concatenate %1218, %1217 in 1 : vector<32x238xf32>, vector<32x18xf32> -> vector<32x256xf32>
    %1220 = arith.mulf %1219, %172 : vector<32x256xf32>
    %c608_484 = arith.constant 608 : index
    %c256_485 = arith.constant 256 : index
    %1221 = vector.load %arg10[%c608_484, %c256_485] : memref<800x512xf32, #tpu.memory_space<vmem>>, vector<32x256xf32>
    tpu.vector_store %arg10[%c608_484, %c256_485], %1220 {strides = array<i32>} : memref<800x512xf32, #tpu.memory_space<vmem>>, vector<32x256xf32>,
    %cst_486 = arith.constant 0.000000e+00 : f32
    %1222 = vector.broadcast %cst_486 : f32 to vector<32x30xf32>
    %1223 = vector.extract_strided_slice %1128 {offsets = [0, 30], sizes = [32, 226], strides = [1, 1]} : vector<32x256xf32> to vector<32x226xf32>
    %1224 = tpu.concatenate %1223, %1222 in 1 : vector<32x226xf32>, vector<32x30xf32> -> vector<32x256xf32>
    %1225 = arith.mulf %1224, %133 : vector<32x256xf32>
    %c640_487 = arith.constant 640 : index
    %c256_488 = arith.constant 256 : index
    %1226 = vector.load %arg10[%c640_487, %c256_488] : memref<800x512xf32, #tpu.memory_space<vmem>>, vector<32x256xf32>
    tpu.vector_store %arg10[%c640_487, %c256_488], %1225 {strides = array<i32>} : memref<800x512xf32, #tpu.memory_space<vmem>>, vector<32x256xf32>,
    %cst_489 = arith.constant 0.000000e+00 : f32
    %1227 = vector.broadcast %cst_489 : f32 to vector<32x31xf32>
    %1228 = vector.extract_strided_slice %1128 {offsets = [0, 31], sizes = [32, 225], strides = [1, 1]} : vector<32x256xf32> to vector<32x225xf32>
    %1229 = tpu.concatenate %1228, %1227 in 1 : vector<32x225xf32>, vector<32x31xf32> -> vector<32x256xf32>
    %1230 = arith.mulf %1229, %146 : vector<32x256xf32>
    %c672_490 = arith.constant 672 : index
    %c256_491 = arith.constant 256 : index
    %1231 = vector.load %arg10[%c672_490, %c256_491] : memref<800x512xf32, #tpu.memory_space<vmem>>, vector<32x256xf32>
    tpu.vector_store %arg10[%c672_490, %c256_491], %1230 {strides = array<i32>} : memref<800x512xf32, #tpu.memory_space<vmem>>, vector<32x256xf32>,
    %cst_492 = arith.constant 0.000000e+00 : f32
    %1232 = vector.broadcast %cst_492 : f32 to vector<32x32xf32>
    %1233 = vector.extract_strided_slice %1128 {offsets = [0, 32], sizes = [32, 224], strides = [1, 1]} : vector<32x256xf32> to vector<32x224xf32>
    %1234 = tpu.concatenate %1233, %1232 in 1 : vector<32x224xf32>, vector<32x32xf32> -> vector<32x256xf32>
    %c704_493 = arith.constant 704 : index
    %c256_494 = arith.constant 256 : index
    %1235 = vector.load %arg10[%c704_493, %c256_494] : memref<800x512xf32, #tpu.memory_space<vmem>>, vector<32x256xf32>
    tpu.vector_store %arg10[%c704_493, %c256_494], %1234 {strides = array<i32>} : memref<800x512xf32, #tpu.memory_space<vmem>>, vector<32x256xf32>,
    %cst_495 = arith.constant 0.000000e+00 : f32
    %1236 = vector.broadcast %cst_495 : f32 to vector<32x33xf32>
    %1237 = vector.extract_strided_slice %1128 {offsets = [0, 33], sizes = [32, 223], strides = [1, 1]} : vector<32x256xf32> to vector<32x223xf32>
    %1238 = tpu.concatenate %1237, %1236 in 1 : vector<32x223xf32>, vector<32x33xf32> -> vector<32x256xf32>
    %1239 = arith.mulf %1238, %159 : vector<32x256xf32>
    %c736_496 = arith.constant 736 : index
    %c256_497 = arith.constant 256 : index
    %1240 = vector.load %arg10[%c736_496, %c256_497] : memref<800x512xf32, #tpu.memory_space<vmem>>, vector<32x256xf32>
    tpu.vector_store %arg10[%c736_496, %c256_497], %1239 {strides = array<i32>} : memref<800x512xf32, #tpu.memory_space<vmem>>, vector<32x256xf32>,
    %cst_498 = arith.constant 0.000000e+00 : f32
    %1241 = vector.broadcast %cst_498 : f32 to vector<32x34xf32>
    %1242 = vector.extract_strided_slice %1128 {offsets = [0, 34], sizes = [32, 222], strides = [1, 1]} : vector<32x256xf32> to vector<32x222xf32>
    %1243 = tpu.concatenate %1242, %1241 in 1 : vector<32x222xf32>, vector<32x34xf32> -> vector<32x256xf32>
    %1244 = arith.mulf %1243, %172 : vector<32x256xf32>
    %c768_499 = arith.constant 768 : index
    %c256_500 = arith.constant 256 : index
    %1245 = vector.load %arg10[%c768_499, %c256_500] : memref<800x512xf32, #tpu.memory_space<vmem>>, vector<32x256xf32>
    tpu.vector_store %arg10[%c768_499, %c256_500], %1244 {strides = array<i32>} : memref<800x512xf32, #tpu.memory_space<vmem>>, vector<32x256xf32>,
    %c0_501 = arith.constant 0 : index
    %c0_502 = arith.constant 0 : index
    %1246 = vector.load %arg6[%c0_501, %c0_502] : memref<4x800xf32, #tpu.memory_space<vmem>>, vector<4x800xf32>
    %c0_503 = arith.constant 0 : index
    %c0_504 = arith.constant 0 : index
    %1247 = vector.load %arg10[%c0_503, %c0_504] : memref<800x512xf32, #tpu.memory_space<vmem>>, vector<800x512xf32>
    %cst_505 = arith.constant dense<0.000000e+00> : vector<4x512xf32>
    %1248 = tpu.matmul %1246, %1247, %cst_505 {dimension_numbers = #tpu.dot_dimension_numbers<[1], [0], [0], [1], [0, 0, 1, 1], [], []>} : vector<4x800xf32>, vector<800x512xf32>, vector<4x512xf32> -> vector<4x512xf32>
    %c0_506 = arith.constant 0 : index
    %c0_507 = arith.constant 0 : index
    %1249 = vector.load %arg7[%c0_506, %c0_507] : memref<4x1xf32, #tpu.memory_space<vmem>>, vector<4x1xf32>
    %1250 = vector.broadcast %1249 : vector<4x1xf32> to vector<4x512xf32>
    %1251 = arith.addf %1248, %1250 : vector<4x512xf32>
    %1252 = vector.extract_strided_slice %1251 {offsets = [0, 0], sizes = [4, 256], strides = [1, 1]} : vector<4x512xf32> to vector<4x256xf32>
    %1253 = vector.extract_strided_slice %1251 {offsets = [0, 256], sizes = [4, 256], strides = [1, 1]} : vector<4x512xf32> to vector<4x256xf32>
    %1254 = tpu.concatenate %1252, %1253 in 0 : vector<4x256xf32>, vector<4x256xf32> -> vector<8x256xf32>
    %c0_508 = arith.constant 0 : index
    %c0_509 = arith.constant 0 : index
    %c0_510 = arith.constant 0 : index
    %1255 = vector.load %arg8[%c0_508, %c0_509, %c0_510] : memref<1x8x256xf32, #tpu.memory_space<vmem>>, vector<1x8x256xf32>
    %1256 = vector.shape_cast %1255 : vector<1x8x256xf32> to vector<8x256xf32>
    %1257 = vector.shape_cast %1254 : vector<8x256xf32> to vector<1x8x256xf32>
    tpu.vector_store %arg8[%c0_508, %c0_509, %c0_510], %1257 {strides = array<i32>} : memref<1x8x256xf32, #tpu.memory_space<vmem>>, vector<1x8x256xf32>,
    return
  }
  func.func @transform_0(%arg0: i32) -> (i32, i32, i32) {
    %c0_i32 = arith.constant 0 : i32
    %c0_i32_0 = arith.constant 0 : i32
    %c0_i32_1 = arith.constant 0 : i32
    return %arg0, %c0_i32, %c0_i32_0 : i32, i32, i32
  }
  func.func @transform_1(%arg0: i32) -> (i32, i32) {
    %c0_i32 = arith.constant 0 : i32
    %c0_i32_0 = arith.constant 0 : i32
    %c0_i32_1 = arith.constant 0 : i32
    return %c0_i32, %c0_i32_0 : i32, i32
  }
  func.func @transform_2(%arg0: i32) -> (i32, i32) {
    %c0_i32 = arith.constant 0 : i32
    %c0_i32_0 = arith.constant 0 : i32
    %c0_i32_1 = arith.constant 0 : i32
    return %c0_i32, %c0_i32_0 : i32, i32
  }
  func.func @transform_3(%arg0: i32) -> (i32, i32) {
    %c0_i32 = arith.constant 0 : i32
    %c0_i32_0 = arith.constant 0 : i32
    %c0_i32_1 = arith.constant 0 : i32
    return %c0_i32, %c0_i32_0 : i32, i32
  }
  func.func @transform_4(%arg0: i32) -> (i32, i32) {
    %c0_i32 = arith.constant 0 : i32
    %c0_i32_0 = arith.constant 0 : i32
    %c0_i32_1 = arith.constant 0 : i32
    return %c0_i32, %c0_i32_0 : i32, i32
  }
  func.func @transform_5(%arg0: i32) -> (i32, i32) {
    %c0_i32 = arith.constant 0 : i32
    %c0_i32_0 = arith.constant 0 : i32
    %c0_i32_1 = arith.constant 0 : i32
    return %c0_i32, %c0_i32_0 : i32, i32
  }
  func.func @transform_6(%arg0: i32) -> (i32, i32) {
    %c0_i32 = arith.constant 0 : i32
    %c0_i32_0 = arith.constant 0 : i32
    %c0_i32_1 = arith.constant 0 : i32
    return %c0_i32, %c0_i32_0 : i32, i32
  }
  func.func @transform_7(%arg0: i32) -> (i32, i32, i32) {
    %c0_i32 = arith.constant 0 : i32
    %c0_i32_0 = arith.constant 0 : i32
    %c0_i32_1 = arith.constant 0 : i32
    return %arg0, %c0_i32, %c0_i32_0 : i32, i32, i32
  }
}

</mosaic_0001>

<bundles_post_ra>
// kernel: srcnn_forward.1
= control target key start
LH: loop header
LB: loop body
LE: loop exit
PB: predicated region body
PF: predicated region fallthrough
CT: control target
= control target key end

     0   :  { %s7528_s26 = smov 67   ;;  %s7529_s27 = smov 68   ;;  %v26_v3 = vlaneseq  ;;  %vm200_vm1 = vcmask 547840   ;;  %vm189_vm3 = vcmask 556032   ;;  %v11152_v19 = vmov 0.0   ;;  %s11081_s0 = inlined_call_operand.vmem [shape: f32[1,8,256], index: 0, kind: input, shape index: {}]   ;;  %s11082_s1 = inlined_call_operand.vmem [shape: f32[64,384], index: 1, kind: input, shape index: {}]   ;;  %s11083_s2 = inlined_call_operand.vmem [shape: f32[64,1], index: 2, kind: input, shape index: {}]   ;;  %s11084_s4 = inlined_call_operand.vmem [shape: f32[32,1], index: 4, kind: input, shape index: {}]   ;;  %s11085_s3 = inlined_call_operand.vmem [shape: f32[32,64], index: 3, kind: input, shape index: {}]   ;;  %s11086_s5 = inlined_call_operand.vmem [shape: f32[4,800], index: 5, kind: input, shape index: {}]   ;;  %s11087_s6 = inlined_call_operand.vmem [shape: f32[4,1], index: 6, kind: input, shape index: {}]   ;;  %s11088_s7 = inlined_call_operand.vmem [shape: f32[1,8,256], index: 7, kind: output, shape index: {}]  }
   0x1   :  { %v7644_v0 = vld [vmem:[%s11081_s0] sm:$0xff]  ;;  %v7653_v1 = vld [vmem:[%s11081_s0 + $0x8] sm:$0xff]  ;;  %s7530_s30 = smov 66   ;;  %s7531_s8 = smov 65   ;;  %vm222_vm5 = vcmask 539648   ;;  %vm233_vm11 = vcmask 531456  }
   0x2   :  { %196 = vrot.lane.b32.xlu1 %v7644_v0, %s7528_s26  ;;  %185 = vrot.lane.b32.xlu0 %v7644_v0, %s7529_s27  ;;  %v7669_v2 = vpack.i.bf16 %v7653_v1, %v7644_v0  ;;  %s7532_s9 = smov 63   ;;  %s7533_s10 = smov 64   ;;  %v27_v4 = vand.u32 127, %v26_v3  ;;  %vm213_vm12 = vcmask 1043456   ;;  %vm11140_vm13 = vcmask 515072  }
   0x3   :  { %s7534_s11 = smov 62   ;;  %s7535_s12 = smov 61   ;;  %v7870_v3 = vrot.slane %v7644_v0, 4 }
   0x4   :  { %s7536_s13 = smov 60   ;;  %s7537_s14 = smov 52   ;;  %v28_v5 = vadd.s32 128, %v27_v4  ;;  %v7767_v6 = vand.u32 15, %v27_v4 }
   0x5   :  { %s7538_s15 = smov 51   ;;  %s7539_s16 = smov 50  }
   0x6   :  { %198 = vrot.lane.b32.xlu1 %v7653_v1, %s7528_s26  ;;  %187 = vrot.lane.b32.xlu0 %v7653_v1, %s7529_s27  ;;  %s7540_s17 = smov 49   ;;  %s7541_s18 = smov 48   ;;  %v7769_v7 = vand.u32 15, %v28_v5  ;;  %v69_v8 = vadd.s32 4294967293, %v7767_v6  ;;  %v53_v9 = vadd.s32 4294967292, %v7767_v6  ;;  %v85_v13 = vadd.s32 4294967294, %v7767_v6 }
   0x7   :  { %s7542_s19 = smov 47   ;;  %s7543_s20 = smov 46   ;;  %v101_v14 = vadd.s32 4294967295, %v7767_v6  ;;  %v117_v33 = vadd.s32 1, %v7767_v6  ;;  %v149_v56 = vadd.s32 3, %v7767_v6 }
   0x8   :  { %s11091_s21 = smov 45   ;;  %s7545_s22 = smov 44   ;;  %v70_v12 = vadd.s32 4294967293, %v7769_v7  ;;  %vm71_vm0 = vcmp.ge.s32.totalorder %v69_v8, 0  ;;  %vm55_vm2 = vcmp.ge.s32.totalorder %v53_v9, 0  ;;  %v86_v15 = vadd.s32 4294967294, %v7769_v7 }
   0x9   :  { %s11089_s23 = smov 36   ;;  %s7547_s24 = smov 35   ;;  %v102_v16 = vadd.s32 4294967295, %v7769_v7  ;;  %v7791_v20 = vsel %vm71_vm0, 1.0, %v11152_v19  ;;  %v54_v22 = vadd.s32 4294967292, %v7769_v7  ;;  %v7799_v24 = vsel %vm55_vm2, 1.0, %v11152_v19 }
   0xa   :  { %220 = vrot.lane.b32.xlu1 %v7653_v1, %s7530_s30  ;;  %218 = vrot.lane.b32.xlu0 %v7644_v0, %s7530_s30  ;;  %s11093_s25 = smov 34   ;;  %s11095_s28 = smov 33   ;;  %vm72_vm4 = vcmp.ge.s32.totalorder %v70_v12, 0  ;;  %vm87_vm6 = vcmp.ge.s32.totalorder %v85_v13, 0  ;;  %vm103_vm7 = vcmp.ge.s32.totalorder %v101_v14, 0  ;;  %vm88_vm8 = vcmp.ge.s32.totalorder %v86_v15, 0 }
   0xb   :  { %s11099_s29 = smov 31   ;;  %v7806_v27 = vsel %vm72_vm4, 1.0, %v11152_v19  ;;  %vm104_vm9 = vcmp.ge.s32.totalorder %v102_v16, 0  ;;  %vm56_vm10 = vcmp.ge.s32.totalorder %v54_v22, 0  ;;  %v7820_v36 = vsel %vm87_vm6, 1.0, %v11152_v19 }
   0xc   :  { %v7824_v37 = vsel %vm103_vm7, 1.0, %v11152_v19  ;;  %v7828_v38 = vsel %vm88_vm8, 1.0, %v11152_v19  ;;  %v7832_v39 = vsel %vm104_vm9, 1.0, %v11152_v19  ;;  %v7838_v41 = vsel %vm56_vm10, 1.0, %v11152_v19 }
   0xd   :  { %vm121_vm14 = vcmp.lt.s32.totalorder %v117_v33, 16  ;;  %v118_v63 = vadd.s32 1, %v7769_v7  ;;  %v150_v4 = vadd.s32 3, %v7769_v7  ;;  %vm153_vm15 = vcmp.lt.s32.totalorder %v149_v56, 16 }
   0xe   :  { %231 = vrot.lane.b32.xlu1 %v7653_v1, %s7531_s8  ;;  %229 = vrot.lane.b32.xlu0 %v7644_v0, %s7531_s8  ;;  %v133_v14 = vadd.s32 2, %v7767_v6  ;;  %vm11139_vm0 = vcmask 523264   ;;  %vm11141_vm4 = vcmask 498688   ;;  %vm284_vm8 = vcmask 506880  }
   0xf   :  { %vm122_vm2 = vcmp.lt.s32.totalorder %v118_v63, 16  ;;  %vm154_vm6 = vcmp.lt.s32.totalorder %v150_v4, 16  ;;  %vm327_vm10 = vcmask 424960  }
  0x10   :  { %vm137_vm7 = vcmp.lt.s32.totalorder %v133_v14, 16 }
  0x12   :  { %259 = vrot.lane.b32.xlu1 %v7644_v0, %s7532_s9  ;;  %7305 = vrot.lane.b32.xlu0 %v7669_v2, %s7533_s10 }
  0x16   :  { %280 = vrot.lane.b32.xlu1 %v7644_v0, %s7534_s11  ;;  %261 = vrot.lane.b32.xlu0 %v7653_v1, %s7532_s9 }
  0x1a   :  { %291 = vrot.lane.b32.xlu1 %v7644_v0, %s7535_s12  ;;  %282 = vrot.lane.b32.xlu0 %v7653_v1, %s7534_s11 }
  0x1e   :  { %312 = vrot.lane.b32.xlu1 %v7644_v0, %s7536_s13  ;;  %293 = vrot.lane.b32.xlu0 %v7653_v1, %s7535_s12 }
  0x22   :  { %323 = vrot.lane.b32.xlu1 %v7644_v0, %s7537_s14  ;;  %314 = vrot.lane.b32.xlu0 %v7653_v1, %s7536_s13 }
  0x26   :  { %344 = vrot.lane.b32.xlu1 %v7644_v0, %s7538_s15  ;;  %325 = vrot.lane.b32.xlu0 %v7653_v1, %s7537_s14 }
  0x2a   :  { %355 = vrot.lane.b32.xlu1 %v7644_v0, %s7539_s16  ;;  %346 = vrot.lane.b32.xlu0 %v7653_v1, %s7538_s15 }
  0x2e   :  { %376 = vrot.lane.b32.xlu1 %v7644_v0, %s7540_s17  ;;  %357 = vrot.lane.b32.xlu0 %v7653_v1, %s7539_s16 }
  0x32   :  { %7310 = vrot.lane.b32.xlu1 %v7669_v2, %s7541_s18  ;;  %378 = vrot.lane.b32.xlu0 %v7653_v1, %s7540_s17 }
  0x36   :  { %406 = vrot.lane.b32.xlu1 %v7653_v1, %s7542_s19  ;;  %404 = vrot.lane.b32.xlu0 %v7644_v0, %s7542_s19 }
  0x3a   :  { %417 = vrot.lane.b32.xlu1 %v7653_v1, %s7543_s20  ;;  %415 = vrot.lane.b32.xlu0 %v7644_v0, %s7543_s20 }
  0x3e   :  { %438 = vrot.lane.b32.xlu1 %v7653_v1, %s11091_s21  ;;  %436 = vrot.lane.b32.xlu0 %v7644_v0, %s11091_s21  ;;  %s11101_s21 = smov 30  }
  0x42   :  { %449 = vrot.lane.b32.xlu1 %v7653_v1, %s7545_s22  ;;  %447 = vrot.lane.b32.xlu0 %v7644_v0, %s7545_s22 }
  0x46   :  { %470 = vrot.lane.b32.xlu1 %v7653_v1, %s11089_s23  ;;  %468 = vrot.lane.b32.xlu0 %v7644_v0, %s11089_s23  ;;  %s11097_s23 = smov 32  }
  0x4a   :  { %481 = vrot.lane.b32.xlu1 %v7653_v1, %s7547_s24  ;;  %479 = vrot.lane.b32.xlu0 %v7644_v0, %s7547_s24 }
  0x4e   :  { %502 = vrot.lane.b32.xlu1 %v7653_v1, %s11093_s25  ;;  %500 = vrot.lane.b32.xlu0 %v7644_v0, %s11093_s25  ;;  %s7553_s25 = smov 29  }
  0x52   :  { %513 = vrot.lane.b32.xlu1 %v7653_v1, %s11095_s28  ;;  %511 = vrot.lane.b32.xlu0 %v7644_v0, %s11095_s28  ;;  %s11103_s28 = smov 28  }
  0x56   :  { %541 = vrot.lane.b32.xlu1 %v7644_v0, %s11099_s29  ;;  %7315 = vrot.lane.b32.xlu0 %v7669_v2, %s11097_s23  ;;  %s7555_s23 = smov 20  }
  0x5a   :  { %562 = vrot.lane.b32.xlu1 %v7644_v0, %s11101_s21  ;;  %543 = vrot.lane.b32.xlu0 %v7653_v1, %s11099_s29  ;;  %s11105_s29 = smov 19  }
  0x5e   :  { %573 = vrot.lane.b32.xlu1 %v7644_v0, %s7553_s25  ;;  %564 = vrot.lane.b32.xlu0 %v7653_v1, %s11101_s21  ;;  %s7557_s21 = smov 18  }
  0x62   :  { %594 = vrot.lane.b32.xlu1 %v7644_v0, %s11103_s28  ;;  %575 = vrot.lane.b32.xlu0 %v7653_v1, %s7553_s25 }
  0x66   :  { %605 = vrot.lane.b32.xlu1 %v7644_v0, %s7555_s23  ;;  %596 = vrot.lane.b32.xlu0 %v7653_v1, %s11103_s28  ;;  %s11109_s28 = smov 17  }
  0x6a   :  { %626 = vrot.lane.b32.xlu1 %v7644_v0, %s11105_s29  ;;  %607 = vrot.lane.b32.xlu0 %v7653_v1, %s7555_s23 }
  0x6e   :  { %637 = vrot.lane.b32.xlu1 %v7644_v0, %s7557_s21  ;;  %628 = vrot.lane.b32.xlu0 %v7653_v1, %s11105_s29  ;;  %s11107_s29 = smov 16  }
  0x72   :  { %658 = vrot.lane.b32.xlu1 %v7644_v0, %s11109_s28  ;;  %639 = vrot.lane.b32.xlu0 %v7653_v1, %s7557_s21 }
  0x74   :  { %v197_v10 = vpop.permute.xlu1 %196  ;;  %v186_v11 = vpop.permute.xlu0 %185 }
  0x75   :  { %v204_v26 = vsel %vm200_vm1, 0.0, %v197_v10  ;;  %v193_v40 = vsel %vm189_vm3, 0.0, %v186_v11 }
  0x76   :  { %7320 = vrot.lane.b32.xlu1 %v7669_v2, %s11107_s29  ;;  %660 = vrot.lane.b32.xlu0 %v7653_v1, %s11109_s28  ;;  %s11111_s29 = smov 15   ;;  %v205_v34 = vmul.f32 %v7791_v20, %v204_v26  ;;  %s7562_s28 = smov 14   ;;  %v194_v54 = vmul.f32 %v7799_v24, %v193_v40 }
  0x78   :  { %v7786_v17 = vpop.permute.xlu1 %198  ;;  %v7788_v18 = vpop.permute.xlu0 %187  ;;  %v209_v50 = vrot.slane %v205_v34, 4 }
  0x79   :  { %v201_v21 = vsel %vm200_vm1, %v197_v10, %v7786_v17  ;;  %v190_v23 = vsel %vm189_vm3, %v186_v11, %v7788_v18 }
  0x7a   :  { %v1311_v25 = vmul.f32 %v7791_v20, %v201_v21  ;;  %688 = vrot.lane.b32.xlu1 %v7653_v1, %s11111_s29  ;;  %v1307_v28 = vmul.f32 %v7799_v24, %v190_v23  ;;  %686 = vrot.lane.b32.xlu0 %v7644_v0, %s11111_s29  ;;  %v206_v35 = vmul.f32 %v7806_v27, %v201_v21  ;;  %s11113_s29 = smov 13  }
  0x7b   :  { %v195_v55 = vmul.f32 %v7838_v41, %v190_v23  ;;  %v214_v9 = vsel %vm213_vm12, %v194_v54, %v209_v50  ;;  %v7889_v23 = vsel %vm121_vm14, 1.0, %v11152_v19  ;;  %v7934_v54 = vsel %vm137_vm7, 1.0, %v11152_v19 }
  0x7c   :  { %v7811_v29 = vpop.permute.xlu1 %220  ;;  %v219_v30 = vpop.permute.xlu0 %218  ;;  %v1315_v31 = vrot.slane %v1311_v25, 4  ;;  %v2146_v32 = vrot.slane %v1307_v28, 4  ;;  %v210_v51 = vrot.slane %v206_v35, 4  ;;  %v7910_v35 = vsel %vm122_vm2, 1.0, %v11152_v19 }
  0x7d   :  { %v223_v42 = vsel %vm222_vm5, %v219_v30, %v7811_v29  ;;  %v226_v46 = vsel %vm222_vm5, 0.0, %v219_v30  ;;  %v7895_v30 = vsel %vm153_vm15, 1.0, %v11152_v19  ;;  %vm359_vm14 = vcmask 408576  }
  0x7e   :  { %699 = vrot.lane.b32.xlu1 %v7653_v1, %s7562_s28  ;;  %697 = vrot.lane.b32.xlu0 %v7644_v0, %s7562_s28  ;;  %v7845_v45 = vsel %vm213_vm12, %v2146_v32, %v1311_v25  ;;  %v7852_v49 = vsel %vm213_vm12, %v1307_v28, %v1315_v31  ;;  %v227_v57 = vmul.f32 %v7820_v36, %v226_v46  ;;  %v134_v28 = vadd.s32 2, %v7769_v7 }
  0x7f   :  { %v228_v58 = vmul.f32 %v7828_v38, %v223_v42  ;;  %v1325_v2 = vmul.f32 %v7820_v36, %v223_v42  ;;  %v215_v5 = vsel %vm213_vm12, %v195_v55, %v210_v51  ;;  %v7898_v31 = vrot.slane %v7653_v1, 4 }
  0x80   :  { %v7842_v43 = vpop.permute.xlu1 %231  ;;  %v230_v44 = vpop.permute.xlu0 %229  ;;  %vm138_vm9 = vcmp.lt.s32.totalorder %v134_v28, 16  ;;  %vm11117_vm2 = vcmask 416768  }
  0x81   :  { %v234_v47 = vsel %vm233_vm11, %v230_v44, %v7842_v43  ;;  %v237_v48 = vsel %vm233_vm11, 0.0, %v230_v44  ;;  %v2156_v25 = vrot.slane %v1325_v2, 4 }
  0x82   :  { %v238_v52 = vmul.f32 %v7824_v37, %v237_v48  ;;  %v239_v53 = vmul.f32 %v7832_v39, %v234_v47  ;;  %720 = vrot.lane.b32.xlu1 %v7653_v1, %s11113_s29  ;;  %718 = vrot.lane.b32.xlu0 %v7644_v0, %s11113_s29  ;;  %s11115_s29 = smov 12   ;;  %v1329_v11 = vmul.f32 %v7824_v37, %v234_v47  ;;  %v7923_v48 = vsel %vm154_vm6, 1.0, %v11152_v19 }
  0x83   :  { %vm11138_vm6 = vcmask 490496  }
  0x84   :  { %v242_v59 = vrot.slane %v238_v52, 4  ;;  %v243_v60 = vrot.slane %v239_v53, 4  ;;  %v260_v61 = vpop.permute.xlu1 %259  ;;  %v7865_v62 = vpop.permute.xlu0 %7305  ;;  %v1333_v32 = vrot.slane %v1329_v11, 4  ;;  %v7906_v34 = vsel %vm213_vm12, %v2156_v25, %v1329_v11 }
  0x85   :  { %v11154_v15 = vunpack.i.h.bf16 %v7865_v62  ;;  %v7307_v16 = vunpack.i.l.bf16 %v7865_v62  ;;  %v267_v44 = vsel %vm11140_vm13, 0.0, %v260_v61 }
  0x86   :  { %731 = vrot.lane.b32.xlu1 %v7653_v1, %s11115_s29  ;;  %v247_v8 = vsel %vm213_vm12, %v228_v58, %v243_v60  ;;  %v246_v10 = vsel %vm213_vm12, %v227_v57, %v242_v59  ;;  %729 = vrot.lane.b32.xlu0 %v7644_v0, %s11115_s29  ;;  %s7565_s29 = smov 4   ;;  %v7931_v53 = vsel %vm213_vm12, %v1325_v2, %v1333_v32  ;;  %v7953_v2 = vsel %vm138_vm9, 1.0, %v11152_v19 }
  0x87   :  { %v6543_v12 = vpack.c.bf16 %v247_v8, %v215_v5  ;;  %v6545_v13 = vpack.c.bf16 %v246_v10, %v214_v9  ;;  %v255_v42 = vsel %vm11139_vm0, %v7307_v16, %v11154_v15  ;;  %v268_v55 = vmul.f32 %v7889_v23, %v267_v44 }
  0x88   :  { %v281_v21 = vpop.permute.xlu1 %280  ;;  %v7885_v22 = vpop.permute.xlu0 %261  ;;  %v2165_v52 = vrot.slane %v255_v42, 4  ;;  %v258_v28 = vsel %vm11139_vm0, 0.0, %v7307_v16  ;;  %v166_v16 = vadd.s32 4, %v7769_v7  ;;  %vm11118_vm9 = vcmask 392192  }
  0x89   :  { %v264_v26 = vsel %vm11140_vm13, %v260_v61, %v7885_v22  ;;  %6544 = vmatprep.subr.bf16.mxu0 %v6543_v12  ;;  %v288_v60 = vsel %vm284_vm8, 0.0, %v281_v21  ;;  %v272_v12 = vrot.slane %v268_v55, 4 }
  0x8a   :  { %6546 = vmatpush1.bf16.msra.mxu0 %v6545_v13  ;;  %v1345_v33 = vmul.f32 %v7889_v23, %v264_v26  ;;  %750 = vrot.lane.b32.xlu0 %v7644_v0, %s7565_s29  ;;  %v269_v50 = vmul.f32 %v7910_v35, %v264_v26  ;;  %v289_v13 = vmul.f32 %v7934_v54, %v288_v60  ;;  %vm170_vm15 = vcmp.lt.s32.totalorder %v166_v16, 16 }
  0x8b   :  { %1409 = vrot.lane.b32.xlu1 %v7870_v3, %s7528_s26 }
  0x8c   :  { %v292_v1 = vpop.permute.xlu1 %291  ;;  %v7912_v40 = vpop.permute.xlu0 %282  ;;  %v1349_v51 = vrot.slane %v1345_v33, 4  ;;  %v7949_v63 = vsel %vm213_vm12, %v2165_v52, %v1345_v33  ;;  %v273_v8 = vrot.slane %v269_v50, 4  ;;  %v276_v52 = vsel %vm213_vm12, %v258_v28, %v272_v12 }
  0x8d   :  { %v299_v46 = vsel %vm11141_vm4, 0.0, %v292_v1  ;;  %v285_v56 = vsel %vm284_vm8, %v281_v21, %v7912_v40  ;;  %11234 = vst [vmem:[#allocation4_spill] sm:$0xff] %v7949_v63 }
  0x8e   :  { %v300_v47 = vmul.f32 %v7895_v30, %v299_v46  ;;  %1411 = vrot.lane.b32.xlu0 %v7898_v31, %s7528_s26  ;;  %v1359_v9 = vmul.f32 %v7934_v54, %v285_v56  ;;  %v7963_v11 = vsel %vm213_vm12, %v255_v42, %v1349_v51  ;;  %v290_v26 = vmul.f32 %v7953_v2, %v285_v56  ;;  %s11237_s26 = smov 45  }
  0x8f   :  { %1439 = vrot.lane.b32.xlu1 %v7870_v3, %s7531_s8  ;;  %11235 = vst [vmem:[#allocation5_spill] sm:$0xff] %v7963_v11  ;;  %v277_v44 = vsel %vm213_vm12, %v255_v42, %v273_v8  ;;  %v165_v42 = vadd.s32 4, %v7767_v6 }
  0x90   :  { %v7939_v57 = vpop.permute.xlu1 %312  ;;  %v7941_v58 = vpop.permute.xlu0 %293  ;;  %v304_v4 = vrot.slane %v300_v47, 4  ;;  %v2175_v33 = vrot.slane %v1359_v9, 4 }
  0x91   :  { %v296_v61 = vsel %vm11141_vm4, %v292_v1, %v7941_v58  ;;  %vm169_vm7 = vcmp.lt.s32.totalorder %v165_v42, 16 }
  0x92   :  { %v301_v5 = vmul.f32 %v7923_v48, %v296_v61  ;;  %v1363_v10 = vmul.f32 %v7895_v30, %v296_v61  ;;  %1441 = vrot.lane.b32.xlu0 %v7898_v31, %s7531_s8  ;;  %v308_v32 = vsel %vm213_vm12, %v289_v13, %v304_v4  ;;  %s11240_s8 = smov 31  }
  0x93   :  { %1399 = vrot.lane.b32.xlu1 %v7870_v3, %s7529_s27  ;;  %v6549_v55 = vpack.c.bf16 %v308_v32, %v276_v52 }
  0x94   :  { %v305_v14 = vrot.slane %v301_v5, 4  ;;  %v324_v21 = vpop.permute.xlu1 %323  ;;  %v7966_v25 = vpop.permute.xlu0 %314  ;;  %v1367_v1 = vrot.slane %v1363_v10, 4  ;;  %v7980_v56 = vsel %vm213_vm12, %v2175_v33, %v1363_v10 }
  0x95   :  { %v331_v7 = vsel %vm327_vm10, 0.0, %v324_v21  ;;  %v8011_v32 = vsel %vm11138_vm6, %v7939_v57, %v7966_v25 }
  0x96   :  { %1401 = vrot.lane.b32.xlu0 %v7898_v31, %s7529_s27  ;;  %v309_v46 = vsel %vm213_vm12, %v290_v26, %v305_v14  ;;  %v7989_v4 = vsel %vm213_vm12, %v1359_v9, %v1367_v1  ;;  %v332_v13 = vmul.f32 %v7799_v24, %v331_v7  ;;  %v8003_v14 = vsel %vm170_vm15, 1.0, %v11152_v19  ;;  %s11238_s27 = smov 36  }
  0x97   :  { %1429 = vrot.lane.b32.xlu1 %v7870_v3, %s7530_s30  ;;  %v6547_v51 = vpack.c.bf16 %v309_v46, %v277_v44  ;;  %11236 = vst [vmem:[#allocation6_spill] sm:$0xff] %v7989_v4  ;;  %v8016_v46 = vsel %vm169_vm7, 1.0, %v11152_v19  ;;  %vm11120_vm15 = vcmask 400384   ;;  %vm11119_vm7 = vcmask 384000  }
  0x98   :  { %v345_v47 = vpop.permute.xlu1 %344  ;;  %v326_v50 = vpop.permute.xlu0 %325  ;;  %v336_v16 = vrot.slane %v332_v13, 4 }
  0x99   :  { %6548 = vmatprep.subr.bf16.mxu0 %v6547_v51  ;;  %v328_v61 = vsel %vm327_vm10, %v324_v21, %v326_v50  ;;  %v352_v21 = vsel %vm11117_vm2, 0.0, %v345_v47  ;;  %v320_v50 = vsel %vm11138_vm6, 0.0, %v7939_v57 }
  0x9a   :  { %1431 = vrot.lane.b32.xlu0 %v7898_v31, %s7530_s30  ;;  %6550 = vmatpush1.bf16.msra.mxu0 %v6549_v55  ;;  %v333_v12 = vmul.f32 %v7838_v41, %v328_v61  ;;  %v353_v55 = vmul.f32 %v7791_v20, %v352_v21  ;;  %s11239_s30 = smov 33  }
  0x9b   :  { %1467 = vrot.lane.b32.xlu1 %v7870_v3, %s7532_s9 }
  0x9c   :  { %v356_v5 = vpop.permute.xlu1 %355  ;;  %v347_v8 = vpop.permute.xlu0 %346  ;;  %v337_v51 = vrot.slane %v333_v12, 4 }
  0x9d   :  { %v363_v6 = vsel %vm359_vm14, 0.0, %v356_v5  ;;  %v349_v1 = vsel %vm11117_vm2, %v345_v47, %v347_v8  ;;  %v322_v47 = vmul.f32 %v8003_v14, %v8011_v32  ;;  %v321_v8 = vmul.f32 %v8016_v46, %v320_v50 }
  0x9e   :  { %v364_v9 = vmul.f32 %v7820_v36, %v363_v6  ;;  %1469 = vrot.lane.b32.xlu0 %v7898_v31, %s7532_s9  ;;  %v354_v42 = vmul.f32 %v7806_v27, %v349_v1  ;;  %vm11121_vm2 = vcmask 375808   ;;  %s11241_s9 = smov 34  }
  0x9f   :  { %1497 = vrot.lane.b32.xlu1 %v7870_v3, %s7535_s12  ;;  %v341_v12 = vsel %vm213_vm12, %v322_v47, %v337_v51  ;;  %v340_v1 = vsel %vm213_vm12, %v321_v8, %v336_v16 }
  0xa0   :  { %v377_v26 = vpop.permute.xlu1 %376  ;;  %v358_v28 = vpop.permute.xlu0 %357  ;;  %v368_v33 = vrot.slane %v364_v9, 4 }
  0xa1   :  { %v360_v44 = vsel %vm359_vm14, %v356_v5, %v358_v28  ;;  %v8031_v5 = vpack.i.bf16 %v7898_v31, %v7870_v3  ;;  %v384_v16 = vsel %vm11120_vm15, 0.0, %v377_v26 }
  0xa2   :  { %v365_v52 = vmul.f32 %v7828_v38, %v360_v44  ;;  %1499 = vrot.lane.b32.xlu0 %v7898_v31, %s7535_s12  ;;  %v372_v6 = vsel %vm213_vm12, %v353_v55, %v368_v33  ;;  %s11244_s12 = smov 28  }
  0xa3   :  { %1487 = vrot.lane.b32.xlu1 %v7870_v3, %s7534_s11 }
  0xa4   :  { %v369_v61 = vrot.slane %v365_v52, 4  ;;  %v7311_v7 = vpop.permute.xlu1 %7310  ;;  %v379_v57 = vpop.permute.xlu0 %378  ;;  %v6553_v52 = vpack.c.bf16 %v372_v6, %v340_v1 }
  0xa5   :  { %v7313_v13 = vunpack.i.h.bf16 %v7311_v7  ;;  %v7312_v21 = vunpack.i.l.bf16 %v7311_v7  ;;  %v381_v55 = vsel %vm11120_vm15, %v377_v26, %v379_v57  ;;  %v385_v26 = vmul.f32 %v7824_v37, %v384_v16 }
  0xa6   :  { %v373_v9 = vsel %vm213_vm12, %v354_v42, %v369_v61  ;;  %1489 = vrot.lane.b32.xlu0 %v7898_v31, %s7534_s11  ;;  %v386_v57 = vmul.f32 %v7832_v39, %v381_v55  ;;  %vm11122_vm15 = vcmask 293888   ;;  %s11243_s11 = smov 30  }
  0xa7   :  { %v6551_v28 = vpack.c.bf16 %v373_v9, %v341_v12  ;;  %7325 = vrot.lane.b32.xlu1 %v8031_v5, %s7533_s10  ;;  %v392_v33 = vsel %vm11118_vm9, %v7312_v21, %v7313_v13  ;;  %v394_v51 = vsel %vm11118_vm9, 0.0, %v7312_v21  ;;  %vm11124_vm9 = vcmask 359424   ;;  %s11242_s10 = smov 32  }
  0xa8   :  { %v407_v44 = vpop.permute.xlu1 %406  ;;  %v405_v50 = vpop.permute.xlu0 %404  ;;  %v396_v12 = vrot.slane %v394_v51, 4  ;;  %v397_v9 = vrot.slane %v392_v33, 4 }
  0xa9   :  { %6552 = vmatprep.subr.bf16.mxu0 %v6551_v28  ;;  %v409_v61 = vsel %vm11119_vm7, %v405_v50, %v407_v44  ;;  %v412_v7 = vsel %vm11119_vm7, 0.0, %v405_v50  ;;  %vm11123_vm7 = vcmask 367616  }
  0xaa   :  { %6554 = vmatpush1.bf16.msra.mxu0 %v6553_v52  ;;  %1527 = vrot.lane.b32.xlu0 %v7870_v3, %s7537_s14  ;;  %v413_v28 = vmul.f32 %v7889_v23, %v412_v7  ;;  %v414_v1 = vmul.f32 %v7910_v35, %v409_v61  ;;  %v401_v51 = vsel %vm213_vm12, %v386_v57, %v397_v9 }
  0xab   :  { %1529 = vrot.lane.b32.xlu1 %v7898_v31, %s7537_s14  ;;  %v400_v55 = vsel %vm213_vm12, %v385_v26, %v396_v12  ;;  %s11246_s14 = smov 17  }
  0xac   :  { %v418_v47 = vpop.permute.xlu1 %417  ;;  %v416_v42 = vpop.permute.xlu0 %415 }
  0xad   :  { %v420_v8 = vsel %vm11121_vm2, %v416_v42, %v418_v47  ;;  %v423_v6 = vsel %vm11121_vm2, 0.0, %v416_v42  ;;  %vm11125_vm2 = vcmask 285696  }
  0xae   :  { %v424_v13 = vmul.f32 %v7934_v54, %v423_v6  ;;  %v425_v21 = vmul.f32 %v7953_v2, %v420_v8  ;;  %1557 = vrot.lane.b32.xlu0 %v7870_v3, %s7539_s16 }
  0xaf   :  { %1559 = vrot.lane.b32.xlu1 %v7898_v31, %s7539_s16  ;;  %s11248_s16 = smov 12  }
  0xb0   :  { %v428_v44 = vrot.slane %v424_v13, 4  ;;  %v429_v50 = vrot.slane %v425_v21, 4  ;;  %v439_v52 = vpop.permute.xlu1 %438  ;;  %v437_v33 = vpop.permute.xlu0 %436 }
  0xb1   :  { %v441_v57 = vsel %vm11123_vm7, %v437_v33, %v439_v52 }
  0xb2   :  { %v433_v16 = vsel %vm213_vm12, %v414_v1, %v429_v50  ;;  %v432_v47 = vsel %vm213_vm12, %v413_v28, %v428_v44  ;;  %1517 = vrot.lane.b32.xlu0 %v7870_v3, %s7536_s13  ;;  %v444_v28 = vsel %vm11123_vm7, 0.0, %v437_v33  ;;  %vm11128_vm7 = vcmask 252928  }
  0xb3   :  { %v6555_v42 = vpack.c.bf16 %v433_v16, %v401_v51  ;;  %v6557_v61 = vpack.c.bf16 %v432_v47, %v400_v55  ;;  %1519 = vrot.lane.b32.xlu1 %v7898_v31, %s7536_s13  ;;  %v445_v33 = vmul.f32 %v7895_v30, %v444_v28  ;;  %s11245_s13 = smov 19  }
  0xb4   :  { %v450_v7 = vpop.permute.xlu1 %449  ;;  %v448_v8 = vpop.permute.xlu0 %447 }
  0xb5   :  { %6556 = vmatprep.subr.bf16.mxu0 %v6555_v42  ;;  %v452_v6 = vsel %vm11124_vm9, %v448_v8, %v450_v7  ;;  %v455_v9 = vsel %vm11124_vm9, 0.0, %v448_v8  ;;  %v446_v7 = vmul.f32 %v7923_v48, %v441_v57  ;;  %vm11126_vm9 = vcmask 277504  }
  0xb6   :  { %6558 = vmatpush1.bf16.msra.mxu0 %v6557_v61  ;;  %1547 = vrot.lane.b32.xlu0 %v7870_v3, %s7538_s15  ;;  %v456_v21 = vmul.f32 %v8016_v46, %v455_v9  ;;  %v457_v26 = vmul.f32 %v8003_v14, %v452_v6 }
  0xb7   :  { %1549 = vrot.lane.b32.xlu1 %v7898_v31, %s7538_s15  ;;  %s11247_s15 = smov 16  }
  0xb8   :  { %v471_v12 = vpop.permute.xlu1 %470  ;;  %v469_v13 = vpop.permute.xlu0 %468  ;;  %v460_v47 = vrot.slane %v456_v21, 4  ;;  %v461_v42 = vrot.slane %v457_v26, 4 }
  0xb9   :  { %v473_v50 = vsel %vm11122_vm15, %v469_v13, %v471_v12  ;;  %v476_v51 = vsel %vm11122_vm15, 0.0, %v469_v13  ;;  %vm11129_vm15 = vcmask 269312  }
  0xba   :  { %1613 = vrot.lane.b32.xlu0 %v7870_v3, %s7543_s20  ;;  %v477_v8 = vmul.f32 %v7799_v24, %v476_v51  ;;  %v478_v6 = vmul.f32 %v7838_v41, %v473_v50  ;;  %v465_v26 = vsel %vm213_vm12, %v446_v7, %v461_v42  ;;  %v464_v57 = vsel %vm213_vm12, %v445_v33, %v460_v47 }
  0xbb   :  { %1615 = vrot.lane.b32.xlu1 %v7898_v31, %s7543_s20  ;;  %s7567_s20 = smov 1  }
  0xbc   :  { %v482_v1 = vpop.permute.xlu1 %481  ;;  %v480_v44 = vpop.permute.xlu0 %479 }
  0xbd   :  { %v484_v16 = vsel %vm11125_vm2, %v480_v44, %v482_v1  ;;  %v487_v55 = vsel %vm11125_vm2, 0.0, %v480_v44  ;;  %vm11127_vm2 = vcmask 261120  }
  0xbe   :  { %v488_v61 = vmul.f32 %v7791_v20, %v487_v55  ;;  %v489_v52 = vmul.f32 %v7806_v27, %v484_v16  ;;  %1577 = vrot.lane.b32.xlu0 %v7870_v3, %s7540_s17 }
  0xbf   :  { %1579 = vrot.lane.b32.xlu1 %v7898_v31, %s7540_s17  ;;  %s11249_s17 = smov 15  }
  0xc0   :  { %v492_v9 = vrot.slane %v488_v61, 4  ;;  %v493_v12 = vrot.slane %v489_v52, 4  ;;  %v503_v13 = vpop.permute.xlu1 %502  ;;  %v501_v21 = vpop.permute.xlu0 %500 }
  0xc2   :  { %v497_v28 = vsel %vm213_vm12, %v478_v6, %v493_v12  ;;  %v496_v1 = vsel %vm213_vm12, %v477_v8, %v492_v9  ;;  %7330 = vrot.lane.b32.xlu0 %v8031_v5, %s7541_s18  ;;  %s11250_s18 = smov 13  }
  0xc3   :  { %v6559_v44 = vpack.c.bf16 %v497_v28, %v465_v26  ;;  %v6561_v50 = vpack.c.bf16 %v496_v1, %v464_v57  ;;  %1603 = vrot.lane.b32.xlu1 %v7870_v3, %s7542_s19  ;;  %v505_v26 = vsel %vm11126_vm9, %v501_v21, %v503_v13 }
  0xc4   :  { %v514_v51 = vpop.permute.xlu1 %513  ;;  %v512_v16 = vpop.permute.xlu0 %511 }
  0xc5   :  { %6560 = vmatprep.subr.bf16.mxu0 %v6559_v44  ;;  %v516_v55 = vsel %vm11129_vm15, %v512_v16, %v514_v51  ;;  %v519_v47 = vsel %vm11129_vm15, 0.0, %v512_v16  ;;  %v508_v44 = vsel %vm11126_vm9, 0.0, %v501_v21  ;;  %vm11130_vm9 = vcmask 236544  }
  0xc6   :  { %6562 = vmatpush1.bf16.msra.mxu0 %v6561_v50  ;;  %1605 = vrot.lane.b32.xlu0 %v7898_v31, %s7542_s19  ;;  %v521_v33 = vmul.f32 %v7832_v39, %v516_v55  ;;  %v520_v8 = vmul.f32 %v7824_v37, %v519_v47  ;;  %v510_v55 = vmul.f32 %v7828_v38, %v505_v26  ;;  %vm11132_vm15 = vcmask 244736   ;;  %s7566_s19 = smov 3  }
  0xc7   :  { %1643 = vrot.lane.b32.xlu1 %v7870_v3, %s7545_s22 }
  0xc8   :  { %v542_v42 = vpop.permute.xlu1 %541  ;;  %v7316_v61 = vpop.permute.xlu0 %7315  ;;  %v525_v50 = vrot.slane %v521_v33, 4  ;;  %v524_v16 = vrot.slane %v520_v8, 4 }
  0xc9   :  { %v549_v52 = vsel %vm11128_vm7, 0.0, %v542_v42  ;;  %v7317_v6 = vunpack.i.l.bf16 %v7316_v61  ;;  %v7318_v57 = vunpack.i.h.bf16 %v7316_v61 }
  0xca   :  { %v550_v7 = vmul.f32 %v7889_v23, %v549_v52  ;;  %1645 = vrot.lane.b32.xlu0 %v7898_v31, %s7545_s22  ;;  %s7577_s22 = smov 111  }
  0xcb   :  { %1673 = vrot.lane.b32.xlu1 %v7870_v3, %s7547_s24  ;;  %v540_v47 = vsel %vm11127_vm2, 0.0, %v7317_v6  ;;  %v537_v21 = vsel %vm11127_vm2, %v7317_v6, %v7318_v57  ;;  %vm11133_vm2 = vcmask 162816  }
  0xcc   :  { %v563_v9 = vpop.permute.xlu1 %562  ;;  %v544_v12 = vpop.permute.xlu0 %543  ;;  %v554_v28 = vrot.slane %v550_v7, 4  ;;  %v529_v7 = vsel %vm213_vm12, %v510_v55, %v525_v50 }
  0xcd   :  { %v546_v1 = vsel %vm11128_vm7, %v542_v42, %v544_v12  ;;  %v509_v42 = vmul.f32 %v7820_v36, %v508_v44  ;;  %vm11131_vm7 = vcmask 228352  }
  0xce   :  { %v551_v51 = vmul.f32 %v7910_v35, %v546_v1  ;;  %1675 = vrot.lane.b32.xlu0 %v7898_v31, %s7547_s24  ;;  %v558_v33 = vsel %vm213_vm12, %v540_v47, %v554_v28  ;;  %s7579_s24 = smov 112  }
  0xcf   :  { %1633 = vrot.lane.b32.xlu1 %v7870_v3, %s11237_s26  ;;  %v528_v26 = vsel %vm213_vm12, %v509_v42, %v524_v16 }
  0xd0   :  { %v555_v52 = vrot.slane %v551_v51, 4  ;;  %v574_v13 = vpop.permute.xlu1 %573  ;;  %v565_v61 = vpop.permute.xlu0 %564  ;;  %v6565_v44 = vpack.c.bf16 %v558_v33, %v528_v26  ;;  %v570_v26 = vsel %vm11132_vm15, 0.0, %v563_v9 }
  0xd1   :  { %v581_v28 = vsel %vm11130_vm9, 0.0, %v574_v13  ;;  %v567_v33 = vsel %vm11132_vm15, %v563_v9, %v565_v61  ;;  %vm11135_vm15 = vcmask 138240  }
  0xd2   :  { %v559_v8 = vsel %vm213_vm12, %v537_v21, %v555_v52  ;;  %1635 = vrot.lane.b32.xlu0 %v7898_v31, %s11237_s26  ;;  %v582_v52 = vmul.f32 %v7895_v30, %v581_v28  ;;  %s7570_s26 = smov 127  }
  0xd3   :  { %v6563_v12 = vpack.c.bf16 %v559_v8, %v529_v7  ;;  %1663 = vrot.lane.b32.xlu1 %v7870_v3, %s11238_s27 }
  0xd4   :  { %v595_v1 = vpop.permute.xlu1 %594  ;;  %v576_v51 = vpop.permute.xlu0 %575 }
  0xd5   :  { %6564 = vmatprep.subr.bf16.mxu0 %v6563_v12  ;;  %v578_v6 = vsel %vm11130_vm9, %v574_v13, %v576_v51  ;;  %v602_v13 = vsel %vm11131_vm7, 0.0, %v595_v1  ;;  %vm11137_vm9 = vcmask 146432  }
  0xd6   :  { %6566 = vmatpush1.bf16.msra.mxu0 %v6565_v44  ;;  %1665 = vrot.lane.b32.xlu0 %v7898_v31, %s11238_s27  ;;  %v583_v55 = vmul.f32 %v7923_v48, %v578_v6  ;;  %v586_v6 = vrot.slane %v582_v52, 4  ;;  %v603_v28 = vmul.f32 %v8016_v46, %v602_v13  ;;  %s7571_s27 = smov 125  }
  0xd7   :  { %1703 = vrot.lane.b32.xlu1 %v7870_v3, %s11239_s30 }
  0xd8   :  { %v606_v57 = vpop.permute.xlu1 %605  ;;  %v597_v50 = vpop.permute.xlu0 %596  ;;  %v587_v51 = vrot.slane %v583_v55, 4 }
  0xd9   :  { %v613_v16 = vsel %vm11133_vm2, 0.0, %v606_v57  ;;  %v599_v8 = vsel %vm11131_vm7, %v595_v1, %v597_v50  ;;  %vm11136_vm7 = vcmask 154624  }
  0xda   :  { %v614_v47 = vmul.f32 %v7799_v24, %v613_v16  ;;  %1705 = vrot.lane.b32.xlu0 %v7898_v31, %s11239_s30  ;;  %v572_v16 = vmul.f32 %v7953_v2, %v567_v33  ;;  %v604_v61 = vmul.f32 %v8003_v14, %v599_v8 }
  0xdb   :  { %1731 = vrot.lane.b32.xlu1 %v7870_v3, %s11240_s8 }
  0xdc   :  { %v627_v42 = vpop.permute.xlu1 %626  ;;  %v608_v21 = vpop.permute.xlu0 %607  ;;  %v618_v7 = vrot.slane %v614_v47, 4  ;;  %v591_v55 = vsel %vm213_vm12, %v572_v16, %v587_v51 }
  0xdd   :  { %v610_v12 = vsel %vm11133_vm2, %v606_v57, %v608_v21  ;;  %v571_v57 = vmul.f32 %v7934_v54, %v570_v26  ;;  %vm11134_vm2 = vcmask 130048  }
  0xde   :  { %v615_v44 = vmul.f32 %v7838_v41, %v610_v12  ;;  %1733 = vrot.lane.b32.xlu0 %v7898_v31, %s11240_s8  ;;  %v622_v50 = vsel %vm213_vm12, %v603_v28, %v618_v7 }
  0xdf   :  { %1693 = vrot.lane.b32.xlu1 %v7870_v3, %s11241_s9  ;;  %v590_v33 = vsel %vm213_vm12, %v571_v57, %v586_v6  ;;  %v634_v6 = vsel %vm11136_vm7, 0.0, %v627_v42 }
  0xe0   :  { %v619_v47 = vrot.slane %v615_v44, 4  ;;  %v638_v1 = vpop.permute.xlu1 %637  ;;  %v629_v9 = vpop.permute.xlu0 %628  ;;  %v6569_v26 = vpack.c.bf16 %v622_v50, %v590_v33 }
  0xe1   :  { %v645_v13 = vsel %vm11137_vm9, 0.0, %v638_v1  ;;  %v631_v28 = vsel %vm11136_vm7, %v627_v42, %v629_v9  ;;  %vm722_vm7 = vcmask 105472  }
  0xe2   :  { %v623_v52 = vsel %vm213_vm12, %v604_v61, %v619_v47  ;;  %1695 = vrot.lane.b32.xlu0 %v7898_v31, %s11241_s9  ;;  %v646_v51 = vmul.f32 %v7820_v36, %v645_v13  ;;  %v635_v13 = vmul.f32 %v7791_v20, %v634_v6 }
  0xe3   :  { %v6567_v21 = vpack.c.bf16 %v623_v52, %v591_v55  ;;  %7335 = vrot.lane.b32.xlu1 %v8031_v5, %s11242_s10 }
  0xe4   :  { %v659_v8 = vpop.permute.xlu1 %658  ;;  %v640_v12 = vpop.permute.xlu0 %639  ;;  %v650_v55 = vrot.slane %v646_v51, 4 }
  0xe5   :  { %v642_v7 = vsel %vm11137_vm9, %v638_v1, %v640_v12  ;;  %6568 = vmatprep.subr.bf16.mxu0 %v6567_v21  ;;  %v666_v47 = vsel %vm11135_vm15, 0.0, %v659_v8  ;;  %v636_v21 = vmul.f32 %v7806_v27, %v631_v28  ;;  %vm733_vm9 = vcmask 97280  }
  0xe6   :  { %v647_v44 = vmul.f32 %v7828_v38, %v642_v7  ;;  %6570 = vmatpush1.bf16.msra.mxu0 %v6569_v26  ;;  %1761 = vrot.lane.b32.xlu0 %v7870_v3, %s7553_s25  ;;  %v667_v33 = vmul.f32 %v7824_v37, %v666_v47  ;;  %v654_v28 = vsel %vm213_vm12, %v635_v13, %v650_v55 }
  0xe7   :  { %1763 = vrot.lane.b32.xlu1 %v7898_v31, %s7553_s25  ;;  %s7580_s25 = smov 109  }
  0xe8   :  { %v7321_v16 = vpop.permute.xlu1 %7320  ;;  %v661_v61 = vpop.permute.xlu0 %660  ;;  %v651_v52 = vrot.slane %v647_v44, 4 }
  0xe9   :  { %v7323_v1 = vunpack.i.h.bf16 %v7321_v16  ;;  %v7322_v57 = vunpack.i.l.bf16 %v7321_v16  ;;  %v663_v50 = vsel %vm11135_vm15, %v659_v8, %v661_v61  ;;  %vm690_vm15 = vcmask 121856  }
  0xea   :  { %1791 = vrot.lane.b32.xlu0 %v7870_v3, %s7555_s23  ;;  %v668_v7 = vmul.f32 %v7832_v39, %v663_v50  ;;  %v655_v44 = vsel %vm213_vm12, %v636_v21, %v651_v52 }
  0xeb   :  { %v674_v42 = vsel %vm11134_vm2, %v7322_v57, %v7323_v1  ;;  %v676_v9 = vsel %vm11134_vm2, 0.0, %v7322_v57  ;;  %1793 = vrot.lane.b32.xlu1 %v7898_v31, %s7555_s23  ;;  %vm701_vm2 = vcmask 113664   ;;  %s11161_s23 = smov 110  }
  0xec   :  { %v678_v12 = vrot.slane %v676_v9, 4  ;;  %v679_v26 = vrot.slane %v674_v42, 4  ;;  %v689_v8 = vpop.permute.xlu1 %688  ;;  %v687_v51 = vpop.permute.xlu0 %686 }
  0xee   :  { %v683_v6 = vsel %vm213_vm12, %v668_v7, %v679_v26  ;;  %v682_v16 = vsel %vm213_vm12, %v667_v33, %v678_v12  ;;  %1751 = vrot.lane.b32.xlu0 %v7870_v3, %s11243_s11  ;;  %v691_v33 = vsel %vm690_vm15, %v687_v51, %v689_v8  ;;  %v694_v12 = vsel %vm690_vm15, 0.0, %v687_v51 }
  0xef   :  { %v6571_v61 = vpack.c.bf16 %v683_v6, %v655_v44  ;;  %v6573_v47 = vpack.c.bf16 %v682_v16, %v654_v28  ;;  %1753 = vrot.lane.b32.xlu1 %v7898_v31, %s11243_s11  ;;  %v695_v8 = vmul.f32 %v7889_v23, %v694_v12  ;;  %v696_v51 = vmul.f32 %v7910_v35, %v691_v33 }
  0xf0   :  { %v700_v1 = vpop.permute.xlu1 %699  ;;  %v698_v57 = vpop.permute.xlu0 %697 }
  0xf1   :  { %6572 = vmatprep.subr.bf16.mxu0 %v6571_v61  ;;  %v702_v50 = vsel %vm701_vm2, %v698_v57, %v700_v1  ;;  %v705_v55 = vsel %vm701_vm2, 0.0, %v698_v57 }
  0xf2   :  { %6574 = vmatpush1.bf16.msra.mxu0 %v6573_v47  ;;  %1781 = vrot.lane.b32.xlu0 %v7870_v3, %s11244_s12  ;;  %v706_v21 = vmul.f32 %v7934_v54, %v705_v55  ;;  %v707_v42 = vmul.f32 %v7953_v2, %v702_v50 }
  0xf3   :  { %1783 = vrot.lane.b32.xlu1 %v7898_v31, %s11244_s12  ;;  %s7572_s12 = smov 124  }
  0xf4   :  { %v721_v52 = vpop.permute.xlu1 %720  ;;  %v719_v13 = vpop.permute.xlu0 %718  ;;  %v710_v16 = vrot.slane %v706_v21, 4  ;;  %v711_v61 = vrot.slane %v707_v42, 4 }
  0xf5   :  { %v723_v7 = vsel %vm722_vm7, %v719_v13, %v721_v52  ;;  %v726_v44 = vsel %vm722_vm7, 0.0, %v719_v13 }
  0xf6   :  { %1821 = vrot.lane.b32.xlu0 %v7870_v3, %s7557_s21  ;;  %v727_v57 = vmul.f32 %v7895_v30, %v726_v44  ;;  %v728_v50 = vmul.f32 %v7923_v48, %v723_v7  ;;  %v715_v42 = vsel %vm213_vm12, %v696_v51, %v711_v61  ;;  %v714_v33 = vsel %vm213_vm12, %v695_v8, %v710_v16 }
  0xf7   :  { %1823 = vrot.lane.b32.xlu1 %v7898_v31, %s7557_s21 }
  0xf8   :  { %v732_v9 = vpop.permute.xlu1 %731  ;;  %v730_v26 = vpop.permute.xlu0 %729 }
  0xf9   :  { %v734_v6 = vsel %vm733_vm9, %v730_v26, %v732_v9  ;;  %v737_v28 = vsel %vm733_vm9, 0.0, %v730_v26 }
  0xfa   :  { %v738_v47 = vmul.f32 %v8016_v46, %v737_v28  ;;  %v739_v1 = vmul.f32 %v8003_v14, %v734_v6  ;;  %1811 = vrot.lane.b32.xlu0 %v7870_v3, %s11245_s13 }
  0xfb   :  { %1813 = vrot.lane.b32.xlu1 %v7898_v31, %s11245_s13  ;;  %s7573_s13 = smov 115  }
  0xfc   :  { %v742_v55 = vrot.slane %v738_v47, 4  ;;  %v743_v52 = vrot.slane %v739_v1, 4  ;;  %v8236_v13 = vpop.permute.xlu0 %750 }
  0xfd   :  { %v1410_v21 = vpop.permute.xlu1 %1409 }
  0xfe   :  { %1841 = vrot.lane.b32.xlu0 %v7870_v3, %s11246_s14  ;;  %v747_v9 = vsel %vm213_vm12, %v728_v50, %v743_v52  ;;  %v746_v12 = vsel %vm213_vm12, %v727_v57, %v742_v55  ;;  %v1416_v8 = vsel %vm200_vm1, 0.0, %v1410_v21 }
  0xff   :  { %1843 = vrot.lane.b32.xlu1 %v7898_v31, %s11246_s14  ;;  %v6575_v26 = vpack.c.bf16 %v747_v9, %v715_v42  ;;  %v6577_v7 = vpack.c.bf16 %v746_v12, %v714_v33  ;;  %v1417_v33 = vmul.f32 %v7791_v20, %v1416_v8 }
 0x100   :  { %v1412_v44 = vpop.permute.xlu0 %1411 }
 0x101   :  { %v1440_v6 = vpop.permute.xlu1 %1439  ;;  %6576 = vmatprep.subr.bf16.mxu0 %v6575_v26  ;;  %v1413_v47 = vsel %vm200_vm1, %v1410_v21, %v1412_v44 }
 0x102   :  { %6578 = vmatpush1.bf16.msra.mxu0 %v6577_v7  ;;  %7340 = vrot.lane.b32.xlu0 %v8031_v5, %s11247_s15  ;;  %v1446_v16 = vsel %vm233_vm11, 0.0, %v1440_v6  ;;  %v1418_v52 = vmul.f32 %v7806_v27, %v1413_v47 }
 0x103   :  { %1877 = vrot.lane.b32.xlu1 %v7870_v3, %s7562_s28  ;;  %v1447_v57 = vmul.f32 %v7824_v37, %v1446_v16 }
 0x104   :  { %v1442_v28 = vpop.permute.xlu0 %1441 }
 0x105   :  { %v1400_v61 = vpop.permute.xlu1 %1399  ;;  %v1443_v1 = vsel %vm233_vm11, %v1440_v6, %v1442_v28  ;;  %v1451_v7 = vrot.slane %v1447_v57, 4 }
 0x106   :  { %1879 = vrot.lane.b32.xlu0 %v7898_v31, %s7562_s28  ;;  %v1448_v42 = vmul.f32 %v7832_v39, %v1443_v1  ;;  %v1406_v9 = vsel %vm189_vm3, 0.0, %v1400_v61  ;;  %v1421_v1 = vrot.slane %v1417_v33, 4 }
 0x107   :  { %1907 = vrot.lane.b32.xlu1 %v7870_v3, %s11248_s16  ;;  %v1407_v44 = vmul.f32 %v7799_v24, %v1406_v9 }
 0x108   :  { %v1402_v5 = vpop.permute.xlu0 %1401  ;;  %v1452_v16 = vrot.slane %v1448_v42, 4 }
 0x109   :  { %v1430_v51 = vpop.permute.xlu1 %1429  ;;  %v1403_v50 = vsel %vm189_vm3, %v1400_v61, %v1402_v5  ;;  %v1422_v61 = vrot.slane %v1418_v52, 4  ;;  %v1425_v52 = vsel %vm213_vm12, %v1407_v44, %v1421_v1 }
 0x10a   :  { %v1436_v55 = vsel %vm222_vm5, 0.0, %v1430_v51  ;;  %1909 = vrot.lane.b32.xlu0 %v7898_v31, %s11248_s16  ;;  %v1408_v12 = vmul.f32 %v7838_v41, %v1403_v50  ;;  %s7574_s16 = smov 116  }
 0x10b   :  { %v1437_v21 = vmul.f32 %v7820_v36, %v1436_v55  ;;  %1867 = vrot.lane.b32.xlu1 %v7870_v3, %s11249_s17 }
 0x10c   :  { %v1432_v26 = vpop.permute.xlu0 %1431  ;;  %v1426_v57 = vsel %vm213_vm12, %v1408_v12, %v1422_v61 }
 0x10d   :  { %v1433_v6 = vsel %vm222_vm5, %v1430_v51, %v1432_v26  ;;  %v1468_v28 = vpop.permute.xlu1 %1467  ;;  %v1455_v8 = vsel %vm213_vm12, %v1437_v21, %v1451_v7 }
 0x10e   :  { %v1438_v47 = vmul.f32 %v7828_v38, %v1433_v6  ;;  %1869 = vrot.lane.b32.xlu0 %v7898_v31, %s11249_s17  ;;  %v6625_v9 = vpack.c.bf16 %v1455_v8, %v1425_v52  ;;  %v1474_v33 = vsel %vm11140_vm13, 0.0, %v1468_v28 }
 0x10f   :  { %1897 = vrot.lane.b32.xlu1 %v7870_v3, %s11250_s18 }
 0x110   :  { %v1470_v5 = vpop.permute.xlu0 %1469  ;;  %v1456_v50 = vsel %vm213_vm12, %v1438_v47, %v1452_v16  ;;  %v1475_v16 = vmul.f32 %v7889_v23, %v1474_v33  ;;  %v8307_v33 = vld [vmem:[%s11081_s0] sm:$0xff] }
 0x111   :  { %v1498_v51 = vpop.permute.xlu1 %1497  ;;  %v6623_v55 = vpack.c.bf16 %v1456_v50, %v1426_v57  ;;  %v1471_v21 = vsel %vm11140_vm13, %v1468_v28, %v1470_v5  ;;  %vm11258_vm13 = vcmask 392192  }
 0x112   :  { %v1504_v42 = vsel %vm11141_vm4, 0.0, %v1498_v51  ;;  %1899 = vrot.lane.b32.xlu0 %v7898_v31, %s11250_s18  ;;  %v1476_v47 = vmul.f32 %v7910_v35, %v1471_v21  ;;  %s7575_s18 = smov 114  }
 0x113   :  { %1937 = vrot.lane.b32.xlu1 %v7870_v3, %s7566_s19  ;;  %6624 = vmatprep.subr.bf16.mxu1 %v6623_v55  ;;  %v1505_v26 = vmul.f32 %v7895_v30, %v1504_v42  ;;  %v1479_v42 = vrot.slane %v1475_v16, 4 }
 0x114   :  { %v1500_v12 = vpop.permute.xlu0 %1499  ;;  %6626 = vmatpush1.bf16.msra.mxu1 %v6625_v9  ;;  %v1480_v9 = vrot.slane %v1476_v47, 4  ;;  %v8320_v47 = vld [vmem:[%s11081_s0 + $0x8] sm:$0xff]  ;;  %s7568_s0 = smov 2  }
 0x115   :  { %v1501_v7 = vsel %vm11141_vm4, %v1498_v51, %v1500_v12  ;;  %v1488_v44 = vpop.permute.xlu1 %1487  ;;  %v1509_v1 = vrot.slane %v1505_v26, 4  ;;  %vm11266_vm4 = vcmask 293888  }
 0x116   :  { %v1506_v6 = vmul.f32 %v7923_v48, %v1501_v7  ;;  %v1494_v61 = vsel %vm284_vm8, 0.0, %v1488_v44  ;;  %1939 = vrot.lane.b32.xlu0 %v7898_v31, %s7566_s19 }
 0x117   :  { %1967 = vrot.lane.b32.xlu1 %v7870_v3, %s7567_s20  ;;  %v1495_v8 = vmul.f32 %v7934_v54, %v1494_v61 }
 0x118   :  { %v1490_v28 = vpop.permute.xlu0 %1489  ;;  %v1510_v50 = vrot.slane %v1506_v6, 4 }
 0x119   :  { %v1491_v5 = vsel %vm284_vm8, %v1488_v44, %v1490_v28  ;;  %v7326_v57 = vpop.permute.xlu1 %7325  ;;  %v1513_v16 = vsel %vm213_vm12, %v1495_v8, %v1509_v1 }
 0x11a   :  { %v1496_v51 = vmul.f32 %v7953_v2, %v1491_v5  ;;  %v7328_v55 = vunpack.i.h.bf16 %v7326_v57  ;;  %v7327_v52 = vunpack.i.l.bf16 %v7326_v57  ;;  %1969 = vrot.lane.b32.xlu0 %v7898_v31, %s7567_s20 }
 0x11b   :  { %761 = vrot.lane.b32.xlu1 %v8307_v33, %s7566_s19 }
 0x11c   :  { %v1466_v21 = vsel %vm11139_vm0, 0.0, %v7327_v52  ;;  %v1528_v12 = vpop.permute.xlu0 %1527  ;;  %v1463_v26 = vsel %vm11139_vm0, %v7327_v52, %v7328_v55  ;;  %v1514_v7 = vsel %vm213_vm12, %v1496_v51, %v1510_v50  ;;  %vm11256_vm0 = vcmask 384000  }
 0x11d   :  { %v1530_v44 = vpop.permute.xlu1 %1529  ;;  %v1484_v6 = vsel %vm213_vm12, %v1463_v26, %v1480_v9  ;;  %v1483_v61 = vsel %vm213_vm12, %v1466_v21, %v1479_v42  ;;  %v1534_v1 = vsel %vm327_vm10, 0.0, %v1528_v12 }
 0x11e   :  { %763 = vrot.lane.b32.xlu0 %v8320_v47, %s7566_s19  ;;  %v6627_v28 = vpack.c.bf16 %v1514_v7, %v1484_v6  ;;  %v6629_v5 = vpack.c.bf16 %v1513_v16, %v1483_v61  ;;  %v1531_v51 = vsel %vm327_vm10, %v1528_v12, %v1530_v44  ;;  %v1535_v21 = vmul.f32 %v7799_v24, %v1534_v1  ;;  %s7576_s19 = smov 113  }
 0x11f   :  { %793 = vrot.lane.b32.xlu1 %v8307_v33, %s7567_s20  ;;  %v1536_v6 = vmul.f32 %v7838_v41, %v1531_v51  ;;  %vm11251_vm10 = vcmask 416768  }
 0x120   :  { %6628 = vmatprep.subr.bf16.mxu1 %v6627_v28  ;;  %v1558_v57 = vpop.permute.xlu0 %1557 }
 0x121   :  { %v1560_v50 = vpop.permute.xlu1 %1559  ;;  %6630 = vmatpush1.bf16.msra.mxu1 %v6629_v5  ;;  %v1564_v8 = vsel %vm359_vm14, 0.0, %v1558_v57  ;;  %v1540_v51 = vrot.slane %v1536_v6, 4 }
 0x122   :  { %795 = vrot.lane.b32.xlu0 %v8320_v47, %s7567_s20  ;;  %v1561_v55 = vsel %vm359_vm14, %v1558_v57, %v1560_v50  ;;  %v1565_v26 = vmul.f32 %v7820_v36, %v1564_v8  ;;  %v1539_v57 = vrot.slane %v1535_v21, 4  ;;  %vm11252_vm14 = vmmov %vm11251_vm10 }
 0x123   :  { %1927 = vrot.lane.b32.xlu1 %v7870_v3, %s7565_s29  ;;  %v1566_v61 = vmul.f32 %v7828_v38, %v1561_v55 }
 0x124   :  { %v1518_v52 = vpop.permute.xlu0 %1517  ;;  %v1569_v50 = vrot.slane %v1565_v26, 4 }
 0x125   :  { %v1524_v42 = vsel %vm11138_vm6, 0.0, %v1518_v52  ;;  %v1520_v9 = vpop.permute.xlu1 %1519  ;;  %v1570_v55 = vrot.slane %v1566_v61, 4 }
 0x126   :  { %v1521_v7 = vsel %vm11138_vm6, %v1518_v52, %v1520_v9  ;;  %1929 = vrot.lane.b32.xlu0 %v7898_v31, %s7565_s29  ;;  %v1525_v12 = vmul.f32 %v8016_v46, %v1524_v42  ;;  %vm11255_vm6 = vcmask 400384  }
 0x127   :  { %1957 = vrot.lane.b32.xlu1 %v7870_v3, %s7568_s0  ;;  %v1526_v16 = vmul.f32 %v8003_v14, %v1521_v7 }
 0x128   :  { %v1548_v44 = vpop.permute.xlu0 %1547  ;;  %v1543_v9 = vsel %vm213_vm12, %v1525_v12, %v1539_v57 }
 0x129   :  { %v1554_v28 = vsel %vm11251_vm10, 0.0, %v1548_v44  ;;  %v1550_v5 = vpop.permute.xlu1 %1549  ;;  %v1544_v7 = vsel %vm213_vm12, %v1526_v16, %v1540_v51  ;;  %vm11253_vm10 = vcmask 375808  }
 0x12a   :  { %v1555_v1 = vmul.f32 %v7791_v20, %v1554_v28  ;;  %v1551_v8 = vsel %vm11252_vm14, %v1548_v44, %v1550_v5  ;;  %1959 = vrot.lane.b32.xlu0 %v7898_v31, %s7568_s0  ;;  %vm11254_vm14 = vmmov %vm11253_vm10 }
 0x12b   :  { %v1556_v52 = vmul.f32 %v7806_v27, %v1551_v8  ;;  %752 = vrot.lane.b32.xlu1 %v8320_v47, %s7565_s29  ;;  %s7569_s29 = smov 126  }
 0x12c   :  { %v1614_v42 = vpop.permute.xlu0 %1613  ;;  %v1573_v21 = vsel %vm213_vm12, %v1555_v1, %v1569_v50 }
 0x12d   :  { %v1616_v26 = vpop.permute.xlu1 %1615  ;;  %v1574_v44 = vsel %vm213_vm12, %v1556_v52, %v1570_v55  ;;  %v6633_v28 = vpack.c.bf16 %v1573_v21, %v1543_v9  ;;  %v1620_v16 = vsel %vm11254_vm14, 0.0, %v1614_v42  ;;  %vm11259_vm14 = vmmov %vm11258_vm13 }
 0x12e   :  { %782 = vrot.lane.b32.xlu0 %v8307_v33, %s7568_s0  ;;  %v6631_v6 = vpack.c.bf16 %v1574_v44, %v1544_v7  ;;  %v1617_v12 = vsel %vm11253_vm10, %v1614_v42, %v1616_v26  ;;  %v1621_v9 = vmul.f32 %v7934_v54, %v1620_v16  ;;  %vm11257_vm10 = vmmov %vm11255_vm6 }
 0x12f   :  { %784 = vrot.lane.b32.xlu1 %v8320_v47, %s7568_s0  ;;  %v1622_v51 = vmul.f32 %v7953_v2, %v1617_v12 }
 0x130   :  { %6632 = vmatprep.subr.bf16.mxu1 %v6631_v6  ;;  %v1578_v61 = vpop.permute.xlu0 %1577 }
 0x131   :  { %v1580_v5 = vpop.permute.xlu1 %1579  ;;  %6634 = vmatpush1.bf16.msra.mxu1 %v6633_v28  ;;  %v1584_v55 = vsel %vm11255_vm6, 0.0, %v1578_v61  ;;  %v1626_v16 = vrot.slane %v1622_v51, 4  ;;  %vm11261_vm6 = vcmask 359424  }
 0x132   :  { %837 = vrot.lane.b32.xlu0 %v8320_v47, %s7569_s29  ;;  %v1581_v21 = vsel %vm11257_vm10, %v1578_v61, %v1580_v5  ;;  %v1585_v6 = vmul.f32 %v7824_v37, %v1584_v55 }
 0x133   :  { %835 = vrot.lane.b32.xlu1 %v8307_v33, %s7569_s29  ;;  %v1586_v61 = vmul.f32 %v7832_v39, %v1581_v21 }
 0x134   :  { %v7331_v57 = vpop.permute.xlu0 %7330 }
 0x135   :  { %v7333_v50 = vunpack.i.h.bf16 %v7331_v57  ;;  %v7332_v1 = vunpack.i.l.bf16 %v7331_v57  ;;  %v1604_v8 = vpop.permute.xlu1 %1603 }
 0x136   :  { %v1610_v52 = vsel %vm11256_vm0, 0.0, %v1604_v8  ;;  %816 = vrot.lane.b32.xlu0 %v8320_v47, %s7570_s26 }
 0x137   :  { %v1591_v42 = vsel %vm11258_vm13, %v7332_v1, %v7333_v50  ;;  %v1593_v26 = vsel %vm11259_vm14, 0.0, %v7332_v1  ;;  %848 = vrot.lane.b32.xlu1 %v8320_v47, %s7571_s27  ;;  %v1611_v12 = vmul.f32 %v7889_v23, %v1610_v52  ;;  %v1625_v50 = vrot.slane %v1621_v9, 4  ;;  %vm11263_vm14 = vmmov %vm11261_vm6 }
 0x138   :  { %v1595_v7 = vrot.slane %v1593_v26, 4  ;;  %v1596_v44 = vrot.slane %v1591_v42, 4  ;;  %v1606_v28 = vpop.permute.xlu0 %1605  ;;  %vm11260_vm13 = vcmask 285696  }
 0x139   :  { %v1607_v57 = vsel %vm11256_vm0, %v1604_v8, %v1606_v28  ;;  %v1644_v10 = vpop.permute.xlu1 %1643  ;;  %v1629_v51 = vsel %vm213_vm12, %v1611_v12, %v1625_v50  ;;  %vm11262_vm10 = vmmov %vm11260_vm13  ;;  %vm11264_vm0 = vcmask 367616  }
 0x13a   :  { %v1612_v5 = vmul.f32 %v7910_v35, %v1607_v57  ;;  %814 = vrot.lane.b32.xlu0 %v8307_v33, %s7570_s26  ;;  %v1599_v1 = vsel %vm213_vm12, %v1585_v6, %v1595_v7  ;;  %v1600_v55 = vsel %vm213_vm12, %v1586_v61, %v1596_v44  ;;  %v1650_v12 = vsel %vm11263_vm14, 0.0, %v1644_v10 }
 0x13b   :  { %846 = vrot.lane.b32.xlu1 %v8307_v33, %s7571_s27  ;;  %v6637_v21 = vpack.c.bf16 %v1629_v51, %v1599_v1  ;;  %vm11270_vm14 = vcmask 252928   ;;  %s7581_s27 = smov 100  }
 0x13c   :  { %v1646_v42 = vpop.permute.xlu0 %1645  ;;  %v1630_v52 = vsel %vm213_vm12, %v1612_v5, %v1626_v16 }
 0x13d   :  { %v1674_v8 = vpop.permute.xlu1 %1673  ;;  %v6635_v26 = vpack.c.bf16 %v1630_v52, %v1600_v55  ;;  %v1647_v44 = vsel %vm11261_vm6, %v1644_v10, %v1646_v42  ;;  %v1651_v52 = vmul.f32 %v8016_v46, %v1650_v12  ;;  %vm11267_vm6 = vmmov %vm11266_vm4 }
 0x13e   :  { %869 = vrot.lane.b32.xlu0 %v8320_v47, %s7572_s12  ;;  %v1680_v28 = vsel %vm11260_vm13, 0.0, %v1674_v8  ;;  %v1652_v50 = vmul.f32 %v8003_v14, %v1647_v44  ;;  %vm11265_vm13 = vmmov %vm11264_vm0 }
 0x13f   :  { %901 = vrot.lane.b32.xlu1 %v8320_v47, %s7573_s13  ;;  %6636 = vmatprep.subr.bf16.mxu1 %v6635_v26  ;;  %v1681_v16 = vmul.f32 %v7791_v20, %v1680_v28  ;;  %v1655_v12 = vrot.slane %v1651_v52, 4 }
 0x140   :  { %v1676_v9 = vpop.permute.xlu0 %1675  ;;  %6638 = vmatpush1.bf16.msra.mxu1 %v6637_v21  ;;  %v1656_v28 = vrot.slane %v1652_v50, 4 }
 0x141   :  { %v1634_v7 = vpop.permute.xlu1 %1633  ;;  %v1677_v6 = vsel %vm11262_vm10, %v1674_v8, %v1676_v9  ;;  %v1685_v51 = vrot.slane %v1681_v16, 4 }
 0x142   :  { %867 = vrot.lane.b32.xlu0 %v8307_v33, %s7572_s12  ;;  %v1682_v1 = vmul.f32 %v7806_v27, %v1677_v6  ;;  %v1640_v55 = vsel %vm11265_vm13, 0.0, %v1634_v7  ;;  %vm11272_vm13 = vcmask 277504   ;;  %s7582_s12 = smov 108  }
 0x143   :  { %899 = vrot.lane.b32.xlu1 %v8307_v33, %s7573_s13  ;;  %v1641_v21 = vmul.f32 %v7895_v30, %v1640_v55  ;;  %s7583_s13 = smov 99  }
 0x144   :  { %v1636_v57 = vpop.permute.xlu0 %1635  ;;  %v1686_v44 = vrot.slane %v1682_v1, 4 }
 0x145   :  { %v1637_v61 = vsel %vm11264_vm0, %v1634_v7, %v1636_v57  ;;  %v1664_v5 = vpop.permute.xlu1 %1663  ;;  %v1659_v50 = vsel %vm213_vm12, %v1641_v21, %v1655_v12  ;;  %vm11271_vm0 = vmmov %vm11270_vm14 }
 0x146   :  { %v1670_v42 = vsel %vm11266_vm4, 0.0, %v1664_v5  ;;  %880 = vrot.lane.b32.xlu0 %v8320_v47, %s7574_s16  ;;  %v1642_v8 = vmul.f32 %v7923_v48, %v1637_v61  ;;  %vm11268_vm4 = vcmask 269312  }
 0x147   :  { %v1671_v10 = vmul.f32 %v7799_v24, %v1670_v42  ;;  %912 = vrot.lane.b32.xlu1 %v8320_v47, %s7575_s18  ;;  %vm11269_vm10 = vmmov %vm11268_vm4 }
 0x148   :  { %v1666_v26 = vpop.permute.xlu0 %1665  ;;  %v1660_v16 = vsel %vm213_vm12, %v1642_v8, %v1656_v28 }
 0x149   :  { %v1667_v9 = vsel %vm11267_vm6, %v1664_v5, %v1666_v26  ;;  %v1704_v7 = vpop.permute.xlu1 %1703  ;;  %v1689_v57 = vsel %vm213_vm12, %v1671_v10, %v1685_v51  ;;  %vm11273_vm6 = vmmov %vm11272_vm13 }
 0x14a   :  { %v1672_v6 = vmul.f32 %v7838_v41, %v1667_v9  ;;  %878 = vrot.lane.b32.xlu0 %v8307_v33, %s7574_s16  ;;  %v6641_v1 = vpack.c.bf16 %v1689_v57, %v1659_v50  ;;  %v1710_v10 = vsel %vm11269_vm10, 0.0, %v1704_v7  ;;  %s11150_s16 = smov 98  }
 0x14b   :  { %910 = vrot.lane.b32.xlu1 %v8307_v33, %s7575_s18 }
 0x14c   :  { %v1706_v61 = vpop.permute.xlu0 %1705  ;;  %v1690_v55 = vsel %vm213_vm12, %v1672_v6, %v1686_v44  ;;  %v1711_v44 = vmul.f32 %v7824_v37, %v1710_v10 }
 0x14d   :  { %v1732_v42 = vpop.permute.xlu1 %1731  ;;  %v6639_v5 = vpack.c.bf16 %v1690_v55, %v1660_v16  ;;  %v1707_v52 = vsel %vm11268_vm4, %v1704_v7, %v1706_v61  ;;  %v8441_v55 = vpack.i.bf16 %v8307_v33, %v8320_v47  ;;  %vm11274_vm4 = vcmask 261120  }
 0x14e   :  { %933 = vrot.lane.b32.xlu0 %v8320_v47, %s7576_s19  ;;  %v1738_v8 = vsel %vm11270_vm14, 0.0, %v1732_v42  ;;  %v1712_v9 = vmul.f32 %v7832_v39, %v1707_v52  ;;  %v1715_v52 = vrot.slane %v1711_v44, 4  ;;  %vm11275_vm10 = vmmov %vm11274_vm4  ;;  %vm11276_vm14 = vcmask 236544  }
 0x14f   :  { %961 = vrot.lane.b32.xlu1 %v8320_v47, %s7577_s22  ;;  %6640 = vmatprep.subr.bf16.mxu1 %v6639_v5  ;;  %v1739_v6 = vmul.f32 %v7889_v23, %v1738_v8 }
 0x150   :  { %v1734_v26 = vpop.permute.xlu0 %1733  ;;  %6642 = vmatpush1.bf16.msra.mxu1 %v6641_v1 }
 0x151   :  { %v1735_v51 = vsel %vm11271_vm0, %v1732_v42, %v1734_v26  ;;  %v1694_v21 = vpop.permute.xlu1 %1693  ;;  %v1716_v42 = vrot.slane %v1712_v9, 4  ;;  %v1743_v10 = vrot.slane %v1739_v6, 4  ;;  %vm11277_vm0 = vcmask 162816  }
 0x152   :  { %v1700_v28 = vsel %vm11272_vm13, 0.0, %v1694_v21  ;;  %931 = vrot.lane.b32.xlu0 %v8307_v33, %s7576_s19  ;;  %v1740_v7 = vmul.f32 %v7910_v35, %v1735_v51  ;;  %vm11278_vm13 = vmmov %vm11276_vm14 }
 0x153   :  { %959 = vrot.lane.b32.xlu1 %v8307_v33, %s7577_s22  ;;  %v1701_v57 = vmul.f32 %v7820_v36, %v1700_v28 }
 0x154   :  { %v1696_v12 = vpop.permute.xlu0 %1695  ;;  %v1744_v8 = vrot.slane %v1740_v7, 4 }
 0x155   :  { %v1697_v61 = vsel %vm11273_vm6, %v1694_v21, %v1696_v12  ;;  %v7336_v16 = vpop.permute.xlu1 %7335  ;;  %vm11279_vm6 = vmmov %vm11277_vm0 }
 0x156   :  { %v1702_v5 = vmul.f32 %v7828_v38, %v1697_v61  ;;  %v7338_v50 = vunpack.i.h.bf16 %v7336_v16  ;;  %v7337_v1 = vunpack.i.l.bf16 %v7336_v16  ;;  %972 = vrot.lane.b32.xlu0 %v8320_v47, %s11161_s23  ;;  %v1719_v61 = vsel %vm213_vm12, %v1701_v57, %v1715_v52 }
 0x157   :  { %970 = vrot.lane.b32.xlu1 %v8307_v33, %s11161_s23 }
 0x158   :  { %v1730_v26 = vsel %vm11274_vm4, 0.0, %v7337_v1  ;;  %v1762_v51 = vpop.permute.xlu0 %1761  ;;  %v1720_v21 = vsel %vm213_vm12, %v1702_v5, %v1716_v42  ;;  %v1727_v9 = vsel %vm11275_vm10, %v7337_v1, %v7338_v50  ;;  %vm11280_vm4 = vcmask 244736  }
 0x159   :  { %v1764_v28 = vpop.permute.xlu1 %1763  ;;  %v1748_v12 = vsel %vm213_vm12, %v1727_v9, %v1744_v8  ;;  %v1747_v16 = vsel %vm213_vm12, %v1730_v26, %v1743_v10  ;;  %v1768_v57 = vsel %vm11276_vm14, 0.0, %v1762_v51  ;;  %vm11281_vm10 = vmmov %vm11280_vm4  ;;  %vm11282_vm14 = vcmask 228352  }
 0x15a   :  { %7345 = vrot.lane.b32.xlu0 %v8441_v55, %s7579_s24  ;;  %v6643_v44 = vpack.c.bf16 %v1748_v12, %v1720_v21  ;;  %v6645_v6 = vpack.c.bf16 %v1747_v16, %v1719_v61  ;;  %v1765_v50 = vsel %vm11278_vm13, %v1762_v51, %v1764_v28  ;;  %v1769_v26 = vmul.f32 %v7895_v30, %v1768_v57 }
 0x15b   :  { %993 = vrot.lane.b32.xlu1 %v8320_v47, %s7580_s25  ;;  %v1770_v12 = vmul.f32 %v7923_v48, %v1765_v50  ;;  %vm11284_vm13 = vcmask 146432  }
 0x15c   :  { %6644 = vmatprep.subr.bf16.mxu1 %v6643_v44  ;;  %v1792_v7 = vpop.permute.xlu0 %1791 }
 0x15d   :  { %v1794_v42 = vpop.permute.xlu1 %1793  ;;  %6646 = vmatpush1.bf16.msra.mxu1 %v6645_v6  ;;  %v1798_v5 = vsel %vm11277_vm0, 0.0, %v1792_v7  ;;  %vm11283_vm0 = vmmov %vm11282_vm14  ;;  %v1774_v50 = vrot.slane %v1770_v12, 4 }
 0x15e   :  { %1025 = vrot.lane.b32.xlu0 %v8320_v47, %s7581_s27  ;;  %v1795_v1 = vsel %vm11279_vm6, %v1792_v7, %v1794_v42  ;;  %v1799_v21 = vmul.f32 %v7799_v24, %v1798_v5  ;;  %v1773_v7 = vrot.slane %v1769_v26, 4  ;;  %vm11285_vm6 = vmmov %vm11284_vm13 }
 0x15f   :  { %991 = vrot.lane.b32.xlu1 %v8307_v33, %s7580_s25  ;;  %v1800_v61 = vmul.f32 %v7838_v41, %v1795_v1  ;;  %s11148_s25 = smov 97  }
 0x160   :  { %v1752_v52 = vpop.permute.xlu0 %1751  ;;  %v1803_v42 = vrot.slane %v1799_v21, 4 }
 0x161   :  { %v1758_v10 = vsel %vm11280_vm4, 0.0, %v1752_v52  ;;  %v1754_v8 = vpop.permute.xlu1 %1753  ;;  %v1804_v1 = vrot.slane %v1800_v61, 4  ;;  %vm11286_vm4 = vcmask 154624  }
 0x162   :  { %v1755_v9 = vsel %vm11281_vm10, %v1752_v52, %v1754_v8  ;;  %1023 = vrot.lane.b32.xlu0 %v8307_v33, %s7581_s27  ;;  %v1759_v51 = vmul.f32 %v7934_v54, %v1758_v10  ;;  %s11146_s27 = smov 96   ;;  %vm11287_vm10 = vmmov %vm11286_vm4 }
 0x163   :  { %1004 = vrot.lane.b32.xlu1 %v8320_v47, %s7582_s12  ;;  %v1760_v16 = vmul.f32 %v7953_v2, %v1755_v9 }
 0x164   :  { %v1782_v28 = vpop.permute.xlu0 %1781  ;;  %v1777_v8 = vsel %vm213_vm12, %v1759_v51, %v1773_v7 }
 0x165   :  { %v1788_v44 = vsel %vm11282_vm14, 0.0, %v1782_v28  ;;  %v1784_v6 = vpop.permute.xlu1 %1783  ;;  %v1778_v21 = vsel %vm213_vm12, %v1760_v16, %v1774_v50  ;;  %vm11288_vm14 = vcmask 138240  }
 0x166   :  { %v1789_v57 = vmul.f32 %v8016_v46, %v1788_v44  ;;  %v1785_v5 = vsel %vm11283_vm0, %v1782_v28, %v1784_v6  ;;  %1036 = vrot.lane.b32.xlu0 %v8320_v47, %s7583_s13  ;;  %vm11289_vm0 = vmmov %vm11288_vm14 }
 0x167   :  { %v1790_v52 = vmul.f32 %v8003_v14, %v1785_v5  ;;  %1002 = vrot.lane.b32.xlu1 %v8307_v33, %s7582_s12  ;;  %s11142_s12 = smov 95  }
 0x168   :  { %v1822_v10 = vpop.permute.xlu0 %1821  ;;  %v1807_v9 = vsel %vm213_vm12, %v1789_v57, %v1803_v42 }
 0x169   :  { %v1824_v26 = vpop.permute.xlu1 %1823  ;;  %v1808_v44 = vsel %vm213_vm12, %v1790_v52, %v1804_v1  ;;  %v6649_v28 = vpack.c.bf16 %v1807_v9, %v1777_v8  ;;  %v1828_v51 = vsel %vm11284_vm13, 0.0, %v1822_v10  ;;  %vm11290_vm13 = vcmask 130048  }
 0x16a   :  { %1034 = vrot.lane.b32.xlu0 %v8307_v33, %s7583_s13  ;;  %v6647_v6 = vpack.c.bf16 %v1808_v44, %v1778_v21  ;;  %v1825_v16 = vsel %vm11285_vm6, %v1822_v10, %v1824_v26  ;;  %v1829_v57 = vmul.f32 %v7820_v36, %v1828_v51  ;;  %vm11291_vm6 = vmmov %vm11290_vm13  ;;  %s11144_s13 = smov 94  }
 0x16b   :  { %1057 = vrot.lane.b32.xlu1 %v8320_v47, %s11150_s16  ;;  %v1830_v5 = vmul.f32 %v7828_v38, %v1825_v16 }
 0x16c   :  { %6648 = vmatprep.subr.bf16.mxu1 %v6647_v6  ;;  %v1812_v12 = vpop.permute.xlu0 %1811  ;;  %v1833_v6 = vrot.slane %v1829_v57, 4 }
 0x16d   :  { %v1814_v61 = vpop.permute.xlu1 %1813  ;;  %6650 = vmatpush1.bf16.msra.mxu1 %v6649_v28  ;;  %v1818_v50 = vsel %vm11286_vm4, 0.0, %v1812_v12  ;;  %vm754_vm4 = vcmask 31744  }
 0x16e   :  { %1055 = vrot.lane.b32.xlu0 %v8307_v33, %s11150_s16  ;;  %v1815_v1 = vsel %vm11287_vm10, %v1812_v12, %v1814_v61  ;;  %v1819_v44 = vmul.f32 %v7791_v20, %v1818_v50  ;;  %v1834_v12 = vrot.slane %v1830_v5, 4  ;;  %s7594_s16 = smov 82   ;;  %vm786_vm10 = vcmask 15360  }
 0x16f   :  { %1068 = vrot.lane.b32.xlu1 %v8320_v47, %s11148_s25  ;;  %v1820_v28 = vmul.f32 %v7806_v27, %v1815_v1 }
 0x170   :  { %v1842_v7 = vpop.permute.xlu0 %1841 }
 0x171   :  { %v1844_v42 = vpop.permute.xlu1 %1843  ;;  %v1848_v10 = vsel %vm11288_vm14, 0.0, %v1842_v7  ;;  %v1838_v57 = vsel %vm213_vm12, %v1820_v28, %v1834_v12  ;;  %vm839_vm14 = vcmask 1031168  }
 0x172   :  { %7350 = vrot.lane.b32.xlu0 %v8441_v55, %s11146_s27  ;;  %v1845_v8 = vsel %vm11289_vm0, %v1842_v7, %v1844_v42  ;;  %v1849_v16 = vmul.f32 %v7824_v37, %v1848_v10  ;;  %s7592_s27 = smov 83   ;;  %vm818_vm0 = vcmask 1039360  }
 0x173   :  { %1098 = vrot.lane.b32.xlu1 %v8320_v47, %s11142_s12  ;;  %v1850_v7 = vmul.f32 %v7832_v39, %v1845_v8 }
 0x174   :  { %v7341_v52 = vpop.permute.xlu0 %7340 }
 0x175   :  { %v7343_v9 = vunpack.i.h.bf16 %v7341_v52  ;;  %v7342_v26 = vunpack.i.l.bf16 %v7341_v52  ;;  %v1878_v21 = vpop.permute.xlu1 %1877 }
 0x176   :  { %1066 = vrot.lane.b32.xlu0 %v8307_v33, %s11148_s25  ;;  %s7593_s25 = smov 81  }
 0x177   :  { %v1855_v61 = vsel %vm11290_vm13, %v7342_v26, %v7343_v9  ;;  %v1857_v51 = vsel %vm11291_vm6, 0.0, %v7342_v26  ;;  %1096 = vrot.lane.b32.xlu1 %v8307_v33, %s11142_s12  ;;  %v1837_v9 = vsel %vm213_vm12, %v1819_v44, %v1833_v6  ;;  %s7589_s12 = smov 92   ;;  %v1884_v6 = vsel %vm701_vm2, 0.0, %v1878_v21 }
 0x178   :  { %v1859_v42 = vrot.slane %v1857_v51, 4  ;;  %v1860_v50 = vrot.slane %v1855_v61, 4  ;;  %v1880_v52 = vpop.permute.xlu0 %1879  ;;  %vm850_vm13 = vcmask 1022976   ;;  %vm871_vm6 = vcmask 1014784  }
 0x179   :  { %v1908_v1 = vpop.permute.xlu1 %1907  ;;  %v1881_v28 = vsel %vm701_vm2, %v1878_v21, %v1880_v52 }
 0x17a   :  { %1119 = vrot.lane.b32.xlu0 %v8320_v47, %s11144_s13  ;;  %v1864_v5 = vsel %vm213_vm12, %v1850_v7, %v1860_v50  ;;  %v1863_v26 = vsel %vm213_vm12, %v1849_v16, %v1859_v42  ;;  %v1914_v60 = vsel %vm733_vm9, 0.0, %v1908_v1  ;;  %v1886_v50 = vmul.f32 %v7953_v2, %v1881_v28 }
 0x17b   :  { %1151 = vrot.lane.b32.xlu1 %v8320_v47, %s7589_s12  ;;  %v6651_v10 = vpack.c.bf16 %v1864_v5, %v1838_v57  ;;  %v6653_v8 = vpack.c.bf16 %v1863_v26, %v1837_v9  ;;  %v1915_v16 = vmul.f32 %v8016_v46, %v1914_v60 }
 0x17c   :  { %v1910_v61 = vpop.permute.xlu0 %1909 }
 0x17d   :  { %v1868_v51 = vpop.permute.xlu1 %1867  ;;  %6652 = vmatprep.subr.bf16.mxu1 %v6651_v10  ;;  %v1911_v44 = vsel %vm733_vm9, %v1908_v1, %v1910_v61  ;;  %v1885_v1 = vmul.f32 %v7934_v54, %v1884_v6  ;;  %v1919_v26 = vrot.slane %v1915_v16, 4  ;;  %vm765_vm9 = vcmask 23552  }
 0x17e   :  { %1117 = vrot.lane.b32.xlu0 %v8307_v33, %s11144_s13  ;;  %6654 = vmatpush1.bf16.msra.mxu1 %v6653_v8  ;;  %v1916_v57 = vmul.f32 %v8003_v14, %v1911_v44  ;;  %v1874_v5 = vsel %vm690_vm15, 0.0, %v1868_v51  ;;  %s7590_s13 = smov 93  }
 0x17f   :  { %1149 = vrot.lane.b32.xlu1 %v8307_v33, %s7589_s12  ;;  %s7591_s12 = smov 84   ;;  %v1875_v10 = vmul.f32 %v7889_v23, %v1874_v5  ;;  %v1889_v6 = vrot.slane %v1885_v1, 4 }
 0x180   :  { %v1870_v12 = vpop.permute.xlu0 %1869  ;;  %v1920_v28 = vrot.slane %v1916_v57, 4  ;;  %v2208_v57 = vld [vmem:[%s11082_s1 + $0x8] sm:$0xff] }
 0x181   :  { %v1871_v7 = vsel %vm690_vm15, %v1868_v51, %v1870_v12  ;;  %v1898_v42 = vpop.permute.xlu1 %1897  ;;  %v1890_v51 = vrot.slane %v1886_v50, 4  ;;  %2761 = vmatprep.mubr.f32.mxu1 %v2208_v57  ;;  %2535 = vmatprep.mubr.f32.mxu0 %v2208_v57 }
 0x182   :  { %v1904_v52 = vsel %vm722_vm7, 0.0, %v1898_v42  ;;  %1130 = vrot.lane.b32.xlu0 %v8320_v47, %s7590_s13  ;;  %v1876_v60 = vmul.f32 %v7910_v35, %v1871_v7 }
 0x183   :  { %v1905_v21 = vmul.f32 %v7895_v30, %v1904_v52  ;;  %1162 = vrot.lane.b32.xlu1 %v8320_v47, %s7591_s12 }
 0x184   :  { %v1900_v9 = vpop.permute.xlu0 %1899  ;;  %v1894_v7 = vsel %vm213_vm12, %v1876_v60, %v1890_v51 }
 0x185   :  { %v1901_v8 = vsel %vm722_vm7, %v1898_v42, %v1900_v9  ;;  %v1938_v61 = vpop.permute.xlu1 %1937  ;;  %v1923_v12 = vsel %vm213_vm12, %v1905_v21, %v1919_v26  ;;  %v1893_v42 = vsel %vm213_vm12, %v1875_v10, %v1889_v6  ;;  %vm797_vm7 = vcmask 7168  }
 0x186   :  { %v1906_v44 = vmul.f32 %v7923_v48, %v1901_v8  ;;  %1128 = vrot.lane.b32.xlu0 %v8307_v33, %s7590_s13  ;;  %v6657_v50 = vpack.c.bf16 %v1923_v12, %v1893_v42  ;;  %s7595_s13 = smov 80  }
 0x187   :  { %1160 = vrot.lane.b32.xlu1 %v8307_v33, %s7591_s12  ;;  %s7599_s12 = smov 76  }
 0x188   :  { %v1940_v52 = vpop.permute.xlu0 %1939  ;;  %v1924_v16 = vsel %vm213_vm12, %v1906_v44, %v1920_v28  ;;  %v758_v28 = vsel %vm754_vm4, 0.0, %v8236_v13  ;;  %v1944_v44 = vsel %vm765_vm9, 0.0, %v1938_v61 }
 0x189   :  { %v1968_v5 = vpop.permute.xlu1 %1967  ;;  %v6655_v59 = vpack.c.bf16 %v1924_v16, %v1894_v7  ;;  %v1941_v10 = vsel %vm765_vm9, %v1938_v61, %v1940_v52  ;;  %v759_v61 = vmul.f32 %v7799_v24, %v758_v28  ;;  %v1945_v57 = vmul.f32 %v7791_v20, %v1944_v44 }
 0x18a   :  { %1183 = vrot.lane.b32.xlu0 %v8320_v47, %s7592_s27  ;;  %v1974_v8 = vsel %vm797_vm7, 0.0, %v1968_v5  ;;  %v1946_v12 = vmul.f32 %v7806_v27, %v1941_v10 }
 0x18b   :  { %1215 = vrot.lane.b32.xlu1 %v8320_v47, %s7593_s25  ;;  %6656 = vmatprep.subr.bf16.mxu1 %v6655_v59  ;;  %v1975_v52 = vmul.f32 %v7824_v37, %v1974_v8 }
 0x18c   :  { %v1970_v1 = vpop.permute.xlu0 %1969  ;;  %6658 = vmatpush1.bf16.msra.mxu1 %v6657_v50  ;;  %v1950_v19 = vrot.slane %v1946_v12, 4 }
 0x18d   :  { %v762_v21 = vpop.permute.xlu1 %761  ;;  %v1971_v51 = vsel %vm797_vm7, %v1968_v5, %v1970_v1  ;;  %v1979_v15 = vrot.slane %v1975_v52, 4 }
 0x18e   :  { %1181 = vrot.lane.b32.xlu0 %v8307_v33, %s7592_s27  ;;  %v769_v7 = vsel %vm765_vm9, 0.0, %v762_v21  ;;  %v1976_v5 = vmul.f32 %v7832_v39, %v1971_v51  ;;  %s7598_s27 = smov 78  }
 0x18f   :  { %1213 = vrot.lane.b32.xlu1 %v8307_v33, %s7593_s25  ;;  %s7596_s25 = smov 79   ;;  %v770_v8 = vmul.f32 %v7791_v20, %v769_v7 }
 0x190   :  { %v764_v60 = vpop.permute.xlu0 %763  ;;  %v1980_v4 = vrot.slane %v1976_v5, 4 }
 0x191   :  { %v794_v9 = vpop.permute.xlu1 %793  ;;  %v766_v51 = vsel %vm765_vm9, %v762_v21, %v764_v60  ;;  %v1949_v60 = vrot.slane %v1945_v57, 4  ;;  %v774_v12 = vrot.slane %v770_v8, 4  ;;  %vm903_vm9 = vcmask 941056  }
 0x192   :  { %1194 = vrot.lane.b32.xlu0 %v8320_v47, %s7594_s16  ;;  %v801_v1 = vsel %vm797_vm7, 0.0, %v794_v9 }
 0x193   :  { %1192 = vrot.lane.b32.xlu1 %v8307_v33, %s7594_s16  ;;  %s7597_s16 = smov 77  }
 0x194   :  { %v796_v59 = vpop.permute.xlu0 %795 }
 0x195   :  { %v1928_v26 = vpop.permute.xlu1 %1927 }
 0x196   :  { %7355 = vrot.lane.b32.xlu0 %v8441_v55, %s7595_s13  ;;  %v1934_v42 = vsel %vm754_vm4, 0.0, %v1928_v26 }
 0x197   :  { %1243 = vrot.lane.b32.xlu1 %v8320_v47, %s7596_s25  ;;  %v1935_v28 = vmul.f32 %v7799_v24, %v1934_v42 }
 0x198   :  { %v1930_v6 = vpop.permute.xlu0 %1929 }
 0x199   :  { %v1931_v55 = vsel %vm754_vm4, %v1928_v26, %v1930_v6  ;;  %v1958_v16 = vpop.permute.xlu1 %1957  ;;  %v798_v26 = vsel %vm797_vm7, %v794_v9, %v796_v59  ;;  %v771_v9 = vmul.f32 %v7806_v27, %v766_v51  ;;  %v1953_v42 = vsel %vm213_vm12, %v1935_v28, %v1949_v60 }
 0x19a   :  { %v1964_v50 = vsel %vm786_vm10, 0.0, %v1958_v16  ;;  %1275 = vrot.lane.b32.xlu0 %v8320_v47, %s7597_s16  ;;  %v1936_v6 = vmul.f32 %v7838_v41, %v1931_v55  ;;  %v803_v59 = vmul.f32 %v7832_v39, %v798_v26  ;;  %v778_v51 = vsel %vm213_vm12, %v759_v61, %v774_v12 }
 0x19b   :  { %v1965_v10 = vmul.f32 %v7820_v36, %v1964_v50  ;;  %1241 = vrot.lane.b32.xlu1 %v8307_v33, %s7596_s25  ;;  %v802_v50 = vmul.f32 %v7824_v37, %v801_v1 }
 0x19c   :  { %v1960_v0 = vpop.permute.xlu0 %1959  ;;  %v1954_v7 = vsel %vm213_vm12, %v1936_v6, %v1950_v19 }
 0x19d   :  { %v1961_v44 = vsel %vm786_vm10, %v1958_v16, %v1960_v0  ;;  %v753_v11 = vpop.permute.xlu1 %752  ;;  %v1983_v0 = vsel %vm213_vm12, %v1965_v10, %v1979_v15  ;;  %v806_v57 = vrot.slane %v802_v50, 4  ;;  %v775_v10 = vrot.slane %v771_v9, 4 }
 0x19e   :  { %v1966_v63 = vmul.f32 %v7828_v38, %v1961_v44  ;;  %v755_v21 = vsel %vm754_vm4, %v8236_v13, %v753_v11  ;;  %1273 = vrot.lane.b32.xlu0 %v8307_v33, %s7597_s16  ;;  %v6661_v19 = vpack.c.bf16 %v1983_v0, %v1953_v42  ;;  %vm882_vm4 = vcmask 949248  }
 0x19f   :  { %1254 = vrot.lane.b32.xlu1 %v8320_v47, %s7598_s27  ;;  %v760_v11 = vmul.f32 %v7838_v41, %v755_v21 }
 0x1a0   :  { %v783_v52 = vpop.permute.xlu0 %782  ;;  %v1984_v55 = vsel %vm213_vm12, %v1966_v63, %v1980_v4  ;;  %v807_v63 = vrot.slane %v803_v59, 4 }
 0x1a1   :  { %v790_v13 = vsel %vm786_vm10, 0.0, %v783_v52  ;;  %v785_v16 = vpop.permute.xlu1 %784  ;;  %v6659_v5 = vpack.c.bf16 %v1984_v55, %v1954_v7  ;;  %v779_v44 = vsel %vm213_vm12, %v760_v11, %v775_v10 }
 0x1a2   :  { %v791_v1 = vmul.f32 %v7820_v36, %v790_v13  ;;  %v787_v15 = vsel %vm786_vm10, %v783_v52, %v785_v16  ;;  %1286 = vrot.lane.b32.xlu0 %v8320_v47, %s7599_s12 }
 0x1a3   :  { %v792_v4 = vmul.f32 %v7828_v38, %v787_v15  ;;  %1252 = vrot.lane.b32.xlu1 %v8307_v33, %s7598_s27  ;;  %6660 = vmatprep.subr.bf16.mxu1 %v6659_v5 }
 0x1a4   :  { %v838_v8 = vpop.permute.xlu0 %837  ;;  %6662 = vmatpush1.bf16.msra.mxu1 %v6661_v19  ;;  %v810_v26 = vsel %vm213_vm12, %v791_v1, %v806_v57 }
 0x1a5   :  { %v843_v6 = vsel %vm839_vm14, %v838_v8, 0.0  ;;  %v836_v28 = vpop.permute.xlu1 %835  ;;  %v811_v50 = vsel %vm213_vm12, %v792_v4, %v807_v63  ;;  %v6581_v21 = vpack.c.bf16 %v810_v26, %v778_v51 }
 0x1a6   :  { %1284 = vrot.lane.b32.xlu0 %v8307_v33, %s7599_s12  ;;  %v6579_v60 = vpack.c.bf16 %v811_v50, %v779_v44  ;;  %v845_v9 = vmul.f32 %v7953_v2, %v843_v6  ;;  %v840_v59 = vsel %vm839_vm14, %v836_v28, %v838_v8 }
 0x1a7   :  { %v844_v11 = vmul.f32 %v7934_v54, %v840_v59 }
 0x1a8   :  { %6580 = vmatprep.subr.bf16.mxu0 %v6579_v60  ;;  %v817_v61 = vpop.permute.xlu0 %816  ;;  %v1996_v55 = vrot.slane %v845_v9, 4 }
 0x1a9   :  { %v822_v0 = vsel %vm818_vm0, %v817_v61, 0.0  ;;  %6582 = vmatpush1.bf16.msra.mxu0 %v6581_v21  ;;  %v849_v12 = vpop.permute.xlu1 %848  ;;  %v1995_v51 = vrot.slane %v844_v11, 4 }
 0x1aa   :  { %v824_v52 = vmul.f32 %v7910_v35, %v822_v0  ;;  %v854_v7 = vsel %vm850_vm13, %v849_v12, 0.0 }
 0x1ab   :  { %v856_v13 = vmul.f32 %v7923_v48, %v854_v7 }
 0x1ac   :  { %v828_v16 = vrot.slane %v824_v52, 4  ;;  %v815_v5 = vpop.permute.xlu0 %814  ;;  %v1990_v42 = vsel %vm213_vm12, %v7898_v31, %v824_v52 }
 0x1ad   :  { %v860_v57 = vrot.slane %v856_v13, 4  ;;  %v819_v1 = vsel %vm818_vm0, %v815_v5, %v817_v61  ;;  %v847_v15 = vpop.permute.xlu1 %846  ;;  %v2000_v19 = vsel %vm213_vm12, %v1996_v55, %v856_v13 }
 0x1ae   :  { %v823_v10 = vmul.f32 %v7889_v23, %v819_v1  ;;  %v851_v63 = vsel %vm850_vm13, %v847_v15, %v849_v12  ;;  %v6663_v4 = vpack.c.bf16 %v2000_v19, %v1990_v42  ;;  %v832_v8 = vsel %vm213_vm12, %v8320_v47, %v828_v16 }
 0x1af   :  { %v855_v26 = vmul.f32 %v7895_v30, %v851_v63  ;;  %v864_v6 = vsel %vm213_vm12, %v845_v9, %v860_v57  ;;  %vm11160_vm13 = vcmask 932864  }
 0x1b0   :  { %v827_v31 = vrot.slane %v823_v10, 4  ;;  %6664 = vmatprep.subr.bf16.mxu1 %v6663_v4  ;;  %v870_v28 = vpop.permute.xlu0 %869  ;;  %v6583_v44 = vpack.c.bf16 %v864_v6, %v832_v8  ;;  %v1989_v50 = vsel %vm213_vm12, %v7870_v3, %v823_v10 }
 0x1b1   :  { %v859_v21 = vrot.slane %v855_v26, 4  ;;  %v902_v60 = vpop.permute.xlu1 %901  ;;  %v1999_v59 = vsel %vm213_vm12, %v1995_v51, %v855_v26  ;;  %v875_v9 = vsel %vm871_vm6, %v870_v28, 0.0 }
 0x1b2   :  { %6584 = vmatprep.subr.bf16.mxu0 %v6583_v44  ;;  %v6665_v47 = vpack.c.bf16 %v1999_v59, %v1989_v50  ;;  %v831_v61 = vsel %vm213_vm12, %v8307_v33, %v827_v31  ;;  %v907_v12 = vsel %vm903_vm9, %v902_v60, 0.0  ;;  %v877_v55 = vmul.f32 %v8003_v14, %v875_v9 }
 0x1b3   :  { %v863_v0 = vsel %vm213_vm12, %v844_v11, %v859_v21  ;;  %v909_v16 = vmul.f32 %v7806_v27, %v907_v12 }
 0x1b4   :  { %6666 = vmatpush1.bf16.msra.mxu1 %v6665_v47  ;;  %v868_v52 = vpop.permute.xlu0 %867  ;;  %v6585_v7 = vpack.c.bf16 %v863_v0, %v831_v61  ;;  %v2006_v1 = vrot.slane %v877_v55, 4 }
 0x1b5   :  { %v900_v3 = vpop.permute.xlu1 %899  ;;  %v872_v13 = vsel %vm871_vm6, %v868_v52, %v870_v28  ;;  %v2016_v10 = vrot.slane %v909_v16, 4  ;;  %vm11159_vm6 = vcmask 924672  }
 0x1b6   :  { %6586 = vmatpush1.bf16.msra.mxu0 %v6585_v7  ;;  %v904_v33 = vsel %vm903_vm9, %v900_v3, %v902_v60  ;;  %v876_v11 = vmul.f32 %v8016_v46, %v872_v13  ;;  %vm11158_vm9 = vcmask 908288  }
 0x1b7   :  { %v908_v63 = vmul.f32 %v7791_v20, %v904_v33 }
 0x1b8   :  { %v881_v5 = vpop.permute.xlu0 %880  ;;  %v2005_v6 = vrot.slane %v876_v11, 4 }
 0x1b9   :  { %v886_v42 = vsel %vm882_vm4, %v881_v5, 0.0  ;;  %v913_v57 = vpop.permute.xlu1 %912  ;;  %v2015_v61 = vrot.slane %v908_v63, 4 }
 0x1ba   :  { %v888_v15 = vmul.f32 %v7838_v41, %v886_v42  ;;  %v918_v19 = vsel %vm11160_vm13, %v913_v57, 0.0 }
 0x1bb   :  { %v920_v4 = vmul.f32 %v7828_v38, %v918_v19 }
 0x1bc   :  { %v892_v8 = vrot.slane %v888_v15, 4  ;;  %v879_v51 = vpop.permute.xlu0 %878  ;;  %v2010_v26 = vsel %vm213_vm12, %v2006_v1, %v888_v15 }
 0x1bd   :  { %v924_v31 = vrot.slane %v920_v4, 4  ;;  %v883_v28 = vsel %vm882_vm4, %v879_v51, %v881_v5  ;;  %v911_v44 = vpop.permute.xlu1 %910  ;;  %v2020_v50 = vsel %vm213_vm12, %v2016_v10, %v920_v4  ;;  %vm11163_vm4 = vcmask 900096  }
 0x1be   :  { %v887_v21 = vmul.f32 %v7799_v24, %v883_v28  ;;  %v915_v60 = vsel %vm11160_vm13, %v911_v44, %v913_v57  ;;  %v6667_v59 = vpack.c.bf16 %v2020_v50, %v2010_v26  ;;  %v896_v47 = vsel %vm213_vm12, %v877_v55, %v892_v8 }
 0x1bf   :  { %v919_v9 = vmul.f32 %v7820_v36, %v915_v60  ;;  %v928_v0 = vsel %vm213_vm12, %v909_v16, %v924_v31  ;;  %v7600_v60 = vmov 0   ;;  %vm1027_vm13 = vcmask 818176  }
 0x1c0   :  { %v891_v12 = vrot.slane %v887_v21, 4  ;;  %6668 = vmatprep.subr.bf16.mxu1 %v6667_v59  ;;  %v934_v52 = vpop.permute.xlu0 %933  ;;  %v6587_v7 = vpack.c.bf16 %v928_v0, %v896_v47  ;;  %v2009_v3 = vsel %vm213_vm12, %v2005_v6, %v887_v21  ;;  %7359 = vset.pattern.permute.xlu1 %v7600_v60  ;;  %v2423_v59 = vld [vmem:[%s11083_s2] sm:$0xff]  ;;  %v2424_v47 = vld [vmem:[%s11083_s2 + $0x8] sm:$0xff] }
 0x1c1   :  { %v923_v13 = vrot.slane %v919_v9, 4  ;;  %v962_v33 = vpop.permute.xlu1 %961  ;;  %v2019_v5 = vsel %vm213_vm12, %v2015_v61, %v919_v9  ;;  %v939_v19 = vsel %vm11159_vm6, %v934_v52, 0.0  ;;  %7360 = vset.pattern.permute.xlu0 %v7600_v60  ;;  %2433 = vperm.xlu1 %7359, %v2423_v59  }
 0x1c2   :  { %6588 = vmatprep.subr.bf16.mxu0 %v6587_v7  ;;  %v6669_v42 = vpack.c.bf16 %v2019_v5, %v2009_v3  ;;  %v895_v57 = vsel %vm213_vm12, %v876_v11, %v891_v12  ;;  %v967_v10 = vsel %vm11158_vm9, %v962_v33, 0.0  ;;  %v941_v11 = vmul.f32 %v7832_v39, %v939_v19  ;;  %2438 = vperm.xlu0 %7360, %v2424_v47   ;;  %v2425_v3 = vld [vmem:[%s11083_s2 + $0x10] sm:$0xff] }
 0x1c3   :  { %v927_v55 = vsel %vm213_vm12, %v908_v63, %v923_v13  ;;  %v969_v26 = vmul.f32 %v7910_v35, %v967_v10  ;;  %v2427_v13 = vld [vmem:[%s11083_s2 + $0x20] sm:$0xff] }
 0x1c4   :  { %6670 = vmatpush1.bf16.msra.mxu1 %v6669_v42  ;;  %v932_v16 = vpop.permute.xlu0 %931  ;;  %v6589_v1 = vpack.c.bf16 %v927_v55, %v895_v57 }
 0x1c5   :  { %v960_v15 = vpop.permute.xlu1 %959  ;;  %v936_v8 = vsel %vm11159_vm6, %v932_v16, %v934_v52  ;;  %vm995_vm6 = vcmask 891904   ;;  %v2037_v9 = vrot.slane %v969_v26, 4  ;;  %2443 = vperm.xlu1 %7359, %v2425_v3  }
 0x1c6   :  { %v964_v4 = vsel %vm11158_vm9, %v960_v15, %v962_v33  ;;  %6590 = vmatpush1.bf16.msra.mxu0 %v6589_v1  ;;  %v940_v28 = vmul.f32 %v7824_v37, %v936_v8  ;;  %vm11164_vm9 = vcmask 916480   ;;  %v2027_v33 = vrot.slane %v941_v11, 4  ;;  %2453 = vperm.xlu0 %7360, %v2427_v13  }
 0x1c7   :  { %v968_v63 = vmul.f32 %v7889_v23, %v964_v4 }
 0x1c8   :  { %v973_v51 = vpop.permute.xlu0 %972  ;;  %v2026_v5 = vrot.slane %v940_v28, 4 }
 0x1c9   :  { %v978_v6 = vsel %vm11163_vm4, %v973_v51, 0.0  ;;  %v971_v31 = vpop.permute.xlu1 %970  ;;  %v2036_v0 = vrot.slane %v968_v63, 4 }
 0x1ca   :  { %v980_v44 = vmul.f32 %v7953_v2, %v978_v6  ;;  %v975_v50 = vsel %vm11163_vm4, %v971_v31, %v973_v51  ;;  %vm1006_vm4 = vcmask 883712  }
 0x1cb   :  { %v979_v21 = vmul.f32 %v7934_v54, %v975_v50 }
 0x1cc   :  { %v7346_v61 = vpop.permute.xlu0 %7345  ;;  %v984_v42 = vrot.slane %v980_v44, 4  ;;  %v2041_v16 = vsel %vm213_vm12, %v2037_v9, %v980_v44  ;;  %v2426_v44 = vld [vmem:[%s11083_s2 + $0x18] sm:$0xff] }
 0x1cd   :  { %v7348_v12 = vunpack.i.h.bf16 %v7346_v61  ;;  %v7347_v52 = vunpack.i.l.bf16 %v7346_v61  ;;  %v994_v7 = vpop.permute.xlu1 %993  ;;  %v983_v57 = vrot.slane %v979_v21, 4  ;;  %v2040_v15 = vsel %vm213_vm12, %v2036_v0, %v979_v21  ;;  %v2429_v61 = vld [vmem:[%s11083_s2 + $0x30] sm:$0xff]  ;;  %2448 = vperm.xlu1 %7359, %v2426_v44  }
 0x1ce   :  { %v988_v21 = vsel %vm213_vm12, %v969_v26, %v984_v42  ;;  %v999_v9 = vsel %vm995_vm6, %v994_v7, 0.0  ;;  %2463 = vperm.xlu0 %7360, %v2429_v61  }
 0x1cf   :  { %v949_v55 = vsel %vm11164_vm9, %v7347_v52, 0.0  ;;  %v947_v1 = vsel %vm11164_vm9, %v7348_v12, %v7347_v52  ;;  %v987_v47 = vsel %vm213_vm12, %v968_v63, %v983_v57  ;;  %vm1038_vm9 = vcmask 809984   ;;  %v2428_v63 = vld [vmem:[%s11083_s2 + $0x28] sm:$0xff] }
 0x1d0   :  { %v952_v19 = vrot.slane %v949_v55, 4  ;;  %v1026_v10 = vpop.permute.xlu0 %1025  ;;  %v2031_v4 = vsel %vm213_vm12, %v2027_v33, %v949_v55  ;;  %v951_v8 = vrot.slane %v947_v1, 4  ;;  %v2030_v51 = vsel %vm213_vm12, %v2026_v5, %v947_v1 }
 0x1d1   :  { %v992_v6 = vpop.permute.xlu1 %991  ;;  %v6671_v31 = vpack.c.bf16 %v2041_v16, %v2031_v4  ;;  %v6673_v50 = vpack.c.bf16 %v2040_v15, %v2030_v51  ;;  %v1031_v0 = vsel %vm1027_vm13, %v1026_v10, 0.0  ;;  %2458 = vperm.xlu1 %7359, %v2428_v63  }
 0x1d2   :  { %v956_v60 = vsel %vm213_vm12, %v941_v11, %v952_v19  ;;  %v955_v59 = vsel %vm213_vm12, %v940_v28, %v951_v8  ;;  %v996_v11 = vsel %vm995_vm6, %v992_v6, %v994_v7  ;;  %v1001_v28 = vmul.f32 %v7923_v48, %v999_v9  ;;  %v2959_v7 = vld [vmem:[%s11084_s4] sm:$0xff] }
 0x1d3   :  { %6672 = vmatprep.subr.bf16.mxu1 %v6671_v31  ;;  %v6591_v12 = vpack.c.bf16 %v988_v21, %v956_v60  ;;  %v6593_v52 = vpack.c.bf16 %v987_v47, %v955_v59  ;;  %v1033_v13 = vmul.f32 %v7838_v41, %v1031_v0  ;;  %v1000_v57 = vmul.f32 %v7895_v30, %v996_v11  ;;  %v2961_v31 = vld [vmem:[%s11084_s4 + $0x10] sm:$0xff] }
 0x1d4   :  { %v1024_v3 = vpop.permute.xlu0 %1023  ;;  %6674 = vmatpush1.bf16.msra.mxu1 %v6673_v50  ;;  %2965 = vperm.xlu0 %7360, %v2959_v7   ;;  %v2047_v4 = vrot.slane %v1001_v28, 4  ;;  %vm11166_vm6 = vcmask 793600  }
 0x1d5   :  { %v1005_v26 = vpop.permute.xlu1 %1004  ;;  %6592 = vmatprep.subr.bf16.mxu0 %v6591_v12  ;;  %v1028_v33 = vsel %vm1027_vm13, %v1024_v3, %v1026_v10  ;;  %v2430_v10 = vld [vmem:[%s11083_s2 + $0x38] sm:$0xff]  ;;  %v2057_v8 = vrot.slane %v1033_v13, 4  ;;  %vm11168_vm13 = vcmask 801792   ;;  %v2046_v44 = vrot.slane %v1000_v57, 4  ;;  %v2960_v3 = vld [vmem:[%s11084_s4 + $0x8] sm:$0xff] }
 0x1d6   :  { %v1010_v5 = vsel %vm1006_vm4, %v1005_v26, 0.0  ;;  %6594 = vmatpush1.bf16.msra.mxu0 %v6593_v52  ;;  %v1032_v16 = vmul.f32 %v7799_v24, %v1028_v33  ;;  %2468 = vperm.xlu1 %7359, %v2430_v10   ;;  %v2962_v10 = vld [vmem:[%s11084_s4 + $0x18] sm:$0xff] }
 0x1d7   :  { %v1012_v42 = vmul.f32 %v8003_v14, %v1010_v5 }
 0x1d8   :  { %v1037_v55 = vpop.permute.xlu0 %1036  ;;  %v2056_v61 = vrot.slane %v1032_v16, 4  ;;  %2975 = vperm.xlu0 %7360, %v2961_v31  }
 0x1d9   :  { %v1016_v1 = vrot.slane %v1012_v42, 4  ;;  %v1042_v15 = vsel %vm1038_vm9, %v1037_v55, 0.0  ;;  %v1003_v19 = vpop.permute.xlu1 %1002  ;;  %v2051_v59 = vsel %vm213_vm12, %v2047_v4, %v1012_v42 }
 0x1da   :  { %v1044_v51 = vmul.f32 %v7806_v27, %v1042_v15  ;;  %v1007_v6 = vsel %vm1006_vm4, %v1003_v19, %v1005_v26  ;;  %2970 = vperm.xlu1 %7359, %v2960_v3   ;;  %vm11165_vm4 = vcmask 785408  }
 0x1db   :  { %v1011_v50 = vmul.f32 %v8016_v46, %v1007_v6  ;;  %v1020_v52 = vsel %vm213_vm12, %v1001_v28, %v1016_v1 }
 0x1dc   :  { %v1048_v60 = vrot.slane %v1044_v51, 4  ;;  %v1035_v21 = vpop.permute.xlu0 %1034  ;;  %v2061_v47 = vsel %vm213_vm12, %v2057_v8, %v1044_v51 }
 0x1dd   :  { %v1039_v9 = vsel %vm1038_vm9, %v1035_v21, %v1037_v55  ;;  %v1058_v0 = vpop.permute.xlu1 %1057  ;;  %v6675_v12 = vpack.c.bf16 %v2061_v47, %v2051_v59  ;;  %v1015_v11 = vrot.slane %v1011_v50, 4  ;;  %v2050_v55 = vsel %vm213_vm12, %v2046_v44, %v1011_v50 }
 0x1de   :  { %v1043_v26 = vmul.f32 %v7791_v20, %v1039_v9  ;;  %v1063_v63 = vsel %vm11168_vm13, %v1058_v0, 0.0  ;;  %v1052_v33 = vsel %vm213_vm12, %v1033_v13, %v1048_v60  ;;  %vm11167_vm9 = vcmask 777216   ;;  %2980 = vperm.xlu1 %7359, %v2962_v10  }
 0x1df   :  { %6676 = vmatprep.subr.bf16.mxu1 %v6675_v12  ;;  %v6595_v5 = vpack.c.bf16 %v1052_v33, %v1020_v52  ;;  %v1065_v1 = vmul.f32 %v7828_v38, %v1063_v63  ;;  %v1019_v8 = vsel %vm213_vm12, %v1000_v57, %v1015_v11 }
 0x1e0   :  { %v1047_v7 = vrot.slane %v1043_v26, 4  ;;  %v1056_v42 = vpop.permute.xlu0 %1055  ;;  %v2060_v28 = vsel %vm213_vm12, %v2056_v61, %v1043_v26 }
 0x1e1   :  { %v1069_v15 = vpop.permute.xlu1 %1068  ;;  %6596 = vmatprep.subr.bf16.mxu0 %v6595_v5  ;;  %v6677_v19 = vpack.c.bf16 %v2060_v28, %v2050_v55  ;;  %v1060_v13 = vsel %vm11168_vm13, %v1056_v42, %v1058_v0  ;;  %v2067_v44 = vrot.slane %v1065_v1, 4  ;;  %vm1164_vm13 = vcmask 687104  }
 0x1e2   :  { %v1074_v4 = vsel %vm11166_vm6, %v1069_v15, 0.0  ;;  %v1051_v51 = vsel %vm213_vm12, %v1032_v16, %v1047_v7  ;;  %v1064_v60 = vmul.f32 %v7820_v36, %v1060_v13 }
 0x1e3   :  { %v1076_v6 = vmul.f32 %v7832_v39, %v1074_v4  ;;  %6678 = vmatpush1.bf16.msra.mxu1 %v6677_v19  ;;  %v6597_v31 = vpack.c.bf16 %v1051_v51, %v1019_v8 }
 0x1e4   :  { %v7351_v50 = vpop.permute.xlu0 %7350  ;;  %v2066_v3 = vrot.slane %v1064_v60, 4 }
 0x1e5   :  { %v7353_v21 = vunpack.i.h.bf16 %v7351_v50  ;;  %v7352_v59 = vunpack.i.l.bf16 %v7351_v50  ;;  %v1099_v47 = vpop.permute.xlu1 %1098  ;;  %6598 = vmatpush1.bf16.msra.mxu0 %v6597_v31  ;;  %v1080_v61 = vrot.slane %v1076_v6, 4  ;;  %v2071_v33 = vsel %vm213_vm12, %v2067_v44, %v1076_v6 }
 0x1e6   :  { %v1104_v57 = vsel %vm11167_vm9, %v1099_v47, 0.0 }
 0x1e7   :  { %v1095_v16 = vsel %vm11165_vm4, %v7352_v59, 0.0  ;;  %v1106_v9 = vmul.f32 %v7910_v35, %v1104_v57  ;;  %v1092_v0 = vsel %vm11165_vm4, %v7353_v21, %v7352_v59  ;;  %v1084_v42 = vsel %vm213_vm12, %v1065_v1, %v1080_v61 }
 0x1e8   :  { %v2076_v12 = vrot.slane %v1095_v16, 4  ;;  %v1067_v52 = vpop.permute.xlu0 %1066  ;;  %v2075_v28 = vrot.slane %v1092_v0, 4  ;;  %vm1121_vm4 = vcmask 769024  }
 0x1e9   :  { %v1110_v11 = vrot.slane %v1106_v9, 4  ;;  %v1071_v26 = vsel %vm11166_vm6, %v1067_v52, %v1069_v15  ;;  %v1097_v63 = vpop.permute.xlu1 %1096  ;;  %vm1153_vm6 = vcmask 752640  }
 0x1ea   :  { %v1075_v5 = vmul.f32 %v7824_v37, %v1071_v26  ;;  %v1101_v7 = vsel %vm11167_vm9, %v1097_v63, %v1099_v47  ;;  %v2080_v55 = vsel %vm213_vm12, %v2076_v12, %v1106_v9  ;;  %vm1132_vm9 = vcmask 760832  }
 0x1eb   :  { %v1105_v19 = vmul.f32 %v7889_v23, %v1101_v7  ;;  %v1114_v10 = vsel %vm213_vm12, %v1095_v16, %v1110_v11  ;;  %v6679_v13 = vpack.c.bf16 %v2080_v55, %v2071_v33 }
 0x1ec   :  { %v1079_v4 = vrot.slane %v1075_v5, 4  ;;  %v1120_v15 = vpop.permute.xlu0 %1119  ;;  %v6599_v8 = vpack.c.bf16 %v1114_v10, %v1084_v42  ;;  %v2070_v51 = vsel %vm213_vm12, %v2066_v3, %v1075_v5 }
 0x1ed   :  { %v1109_v6 = vrot.slane %v1105_v19, 4  ;;  %v1152_v31 = vpop.permute.xlu1 %1151  ;;  %6680 = vmatprep.subr.bf16.mxu1 %v6679_v13  ;;  %v2079_v1 = vsel %vm213_vm12, %v2075_v28, %v1105_v19  ;;  %v1125_v21 = vsel %vm1121_vm4, %v1120_v15, 0.0 }
 0x1ee   :  { %6600 = vmatprep.subr.bf16.mxu0 %v6599_v8  ;;  %v6681_v50 = vpack.c.bf16 %v2079_v1, %v2070_v51  ;;  %v1083_v44 = vsel %vm213_vm12, %v1064_v60, %v1079_v4  ;;  %v1157_v47 = vsel %vm1153_vm6, %v1152_v31, 0.0  ;;  %v1127_v9 = vmul.f32 %v7953_v2, %v1125_v21 }
 0x1ef   :  { %v1113_v59 = vsel %vm213_vm12, %v1092_v0, %v1109_v6  ;;  %v1159_v52 = vmul.f32 %v8003_v14, %v1157_v47 }
 0x1f0   :  { %6682 = vmatpush1.bf16.msra.mxu1 %v6681_v50  ;;  %v1118_v61 = vpop.permute.xlu0 %1117  ;;  %v6601_v57 = vpack.c.bf16 %v1113_v59, %v1083_v44  ;;  %v2086_v63 = vrot.slane %v1127_v9, 4 }
 0x1f1   :  { %v1150_v16 = vpop.permute.xlu1 %1149  ;;  %v1122_v12 = vsel %vm1121_vm4, %v1118_v61, %v1120_v15  ;;  %v2096_v7 = vrot.slane %v1159_v52, 4 }
 0x1f2   :  { %6602 = vmatpush1.bf16.msra.mxu0 %v6601_v57  ;;  %v1154_v60 = vsel %vm1153_vm6, %v1150_v16, %v1152_v31  ;;  %v1126_v0 = vmul.f32 %v7934_v54, %v1122_v12  ;;  %vm1217_vm6 = vcmask 662528  }
 0x1f3   :  { %v1158_v42 = vmul.f32 %v8016_v46, %v1154_v60 }
 0x1f4   :  { %v1131_v3 = vpop.permute.xlu0 %1130  ;;  %v2085_v13 = vrot.slane %v1126_v0, 4 }
 0x1f5   :  { %v1136_v11 = vsel %vm1132_vm9, %v1131_v3, 0.0  ;;  %v1163_v26 = vpop.permute.xlu1 %1162  ;;  %v2095_v44 = vrot.slane %v1158_v42, 4 }
 0x1f6   :  { %v1138_v33 = vmul.f32 %v7923_v48, %v1136_v11  ;;  %v1168_v5 = vsel %vm1164_vm13, %v1163_v26, 0.0 }
 0x1f7   :  { %v1170_v55 = vmul.f32 %v7838_v41, %v1168_v5  ;;  %v2211_v5 = vld [vmem:[%s11082_s1 + $0x20] sm:$0xff] }
 0x1f8   :  { %v1142_v28 = vrot.slane %v1138_v33, 4  ;;  %v1129_v19 = vpop.permute.xlu0 %1128  ;;  %v2090_v10 = vsel %vm213_vm12, %v2086_v63, %v1138_v33  ;;  %v2207_v63 = vld [vmem:[%s11082_s1] sm:$0xff] }
 0x1f9   :  { %v1174_v4 = vrot.slane %v1170_v55, 4  ;;  %v1133_v15 = vsel %vm1132_vm9, %v1129_v19, %v1131_v3  ;;  %v1161_v8 = vpop.permute.xlu1 %1160  ;;  %v2100_v51 = vsel %vm213_vm12, %v2096_v7, %v1170_v55  ;;  %vm1196_vm9 = vcmask 670720  }
 0x1fa   :  { %v1137_v6 = vmul.f32 %v7895_v30, %v1133_v15  ;;  %v1165_v31 = vsel %vm1164_vm13, %v1161_v8, %v1163_v26  ;;  %v6683_v1 = vpack.c.bf16 %v2100_v51, %v2090_v10  ;;  %v1146_v50 = vsel %vm213_vm12, %v1127_v9, %v1142_v28  ;;  %v2210_v10 = vld [vmem:[%s11082_s1 + $0x18] sm:$0xff] }
 0x1fb   :  { %v1169_v21 = vmul.f32 %v7799_v24, %v1165_v31  ;;  %v1178_v59 = vsel %vm213_vm12, %v1159_v52, %v1174_v4  ;;  %vm1185_vm13 = vcmask 678912  }
 0x1fc   :  { %v1141_v47 = vrot.slane %v1137_v6, 4  ;;  %6684 = vmatprep.subr.bf16.mxu1 %v6683_v1  ;;  %v1184_v61 = vpop.permute.xlu0 %1183  ;;  %v6603_v57 = vpack.c.bf16 %v1178_v59, %v1146_v50  ;;  %v2089_v16 = vsel %vm213_vm12, %v2085_v13, %v1137_v6  ;;  %v1306_v13 = vsel %vm189_vm3, %v7788_v18, 0.0  ;;  %v2213_v59 = vld [vmem:[%s11082_s1 + $0x30] sm:$0xff] }
 0x1fd   :  { %v1173_v12 = vrot.slane %v1169_v21, 4  ;;  %v1216_v60 = vpop.permute.xlu1 %1215  ;;  %v2099_v3 = vsel %vm213_vm12, %v2095_v44, %v1169_v21  ;;  %v1189_v7 = vsel %vm1185_vm13, %v1184_v61, 0.0  ;;  %v8810_v44 = vmul.f32 %v7838_v41, %v1306_v13  ;;  %v2217_v41 = vld [vmem:[%s11082_s1 + $0x50] sm:$0xff] }
 0x1fe   :  { %6604 = vmatprep.subr.bf16.mxu0 %v6603_v57  ;;  %v6685_v11 = vpack.c.bf16 %v2099_v3, %v2089_v16  ;;  %v1145_v26 = vsel %vm213_vm12, %v1126_v0, %v1141_v47  ;;  %v1221_v0 = vsel %vm1217_vm6, %v1216_v60, 0.0  ;;  %v1191_v4 = vmul.f32 %v7806_v27, %v1189_v7 }
 0x1ff   :  { %v1177_v9 = vsel %vm213_vm12, %v1158_v42, %v1173_v12  ;;  %v1310_v42 = vsel %vm200_vm1, %v7786_v17, 0.0  ;;  %v2214_v17 = vld [vmem:[%s11082_s1 + $0x38] sm:$0xff]  ;;  %v1223_v6 = vmul.f32 %v7832_v39, %v1221_v0  ;;  %vm1228_vm1 = vcmask 654336   ;;  %v2216_v0 = vld [vmem:[%s11082_s1 + $0x48] sm:$0xff] }
 0x200   :  { %6686 = vmatpush1.bf16.msra.mxu1 %v6685_v11  ;;  %v1182_v24 = vpop.permute.xlu0 %1181  ;;  %v6605_v52 = vpack.c.bf16 %v1177_v9, %v1145_v26  ;;  %v8806_v50 = vmul.f32 %v7806_v27, %v1310_v42  ;;  %vm1245_vm3 = vcmask 646144   ;;  %v2106_v47 = vrot.slane %v1191_v4, 4 }
 0x201   :  { %v1214_v33 = vpop.permute.xlu1 %1213  ;;  %v1186_v55 = vsel %vm1185_vm13, %v1182_v24, %v1184_v61  ;;  %vm1277_vm13 = vcmask 629760   ;;  %v2117_v12 = vrot.slane %v1223_v6, 4 }
 0x202   :  { %6606 = vmatpush1.bf16.msra.mxu0 %v6605_v52  ;;  %v1218_v28 = vsel %vm1217_vm6, %v1214_v33, %v1216_v60  ;;  %v1190_v15 = vmul.f32 %v7791_v20, %v1186_v55  ;;  %vm1288_vm6 = vcmask 621568  }
 0x203   :  { %2762 = vmatmul.mubr.f32.vlgmr.msra.gmra.mrb[0].mxu1 %v2207_v63  ;;  %v1222_v31 = vmul.f32 %v7824_v37, %v1218_v28  ;;  %v1324_v28 = vsel %vm222_vm5, %v7811_v29, 0.0  ;;  %vm1256_vm5 = vcmask 637952  }
 0x204   :  { %v1195_v19 = vpop.permute.xlu0 %1194  ;;  %2767 = vmatprep.mubr.f32.mxu1 %v2211_v5  ;;  %v2105_v61 = vrot.slane %v1190_v15, 4 }
 0x205   :  { %v1200_v8 = vsel %vm1196_vm9, %v1195_v19, 0.0  ;;  %v1193_v51 = vpop.permute.xlu1 %1192  ;;  %2536 = vmatmul.mubr.f32.vlgmr.msra.gmra.mrb[0].mxu0 %v2207_v63  ;;  %v2116_v60 = vrot.slane %v1222_v31, 4 }
 0x206   :  { %v1202_v1 = vmul.f32 %v7828_v38, %v1200_v8  ;;  %v1197_v18 = vsel %vm1196_vm9, %v1193_v51, %v1195_v19  ;;  %2541 = vmatprep.mubr.f32.mxu0 %v2211_v5  ;;  %v2220_v8 = vld [vmem:[%s11082_s1 + $0x68] sm:$0xff]  ;;  %vm11295_vm9 = vcmask 523264  }
 0x207   :  { %v1201_v20 = vmul.f32 %v7820_v36, %v1197_v18  ;;  %2768 = vmatmul.mubr.f32.gmra.mrb[2].mxu1 %v2210_v10 }
 0x208   :  { %v7356_v21 = vpop.permute.xlu0 %7355  ;;  %2773 = vmatprep.mubr.f32.mxu1 %v2214_v17  ;;  %v1206_v3 = vrot.slane %v1202_v1, 4  ;;  %v2110_v52 = vsel %vm213_vm12, %v2106_v47, %v1202_v1  ;;  %v8840_v47 = vmul.f32 %v7828_v38, %v1324_v28 }
 0x209   :  { %v7358_v57 = vunpack.i.h.bf16 %v7356_v21  ;;  %v7357_v27 = vunpack.i.l.bf16 %v7356_v21  ;;  %v1244_v16 = vpop.permute.xlu1 %1243  ;;  %2542 = vmatmul.mubr.f32.gmra.mrb[2].mxu0 %v2210_v10  ;;  %v1205_v11 = vrot.slane %v1201_v20, 4  ;;  %v2109_v26 = vsel %vm213_vm12, %v2105_v61, %v1201_v20 }
 0x20a   :  { %2547 = vmatprep.mubr.f32.mxu0 %v2214_v17  ;;  %v1249_v42 = vsel %vm1245_vm3, %v1244_v16, 0.0  ;;  %v1210_v51 = vsel %vm213_vm12, %v1191_v4, %v1206_v3  ;;  %v1328_v4 = vsel %vm233_vm11, %v7842_v43, 0.0  ;;  %vm11292_vm11 = vcmask 498688  }
 0x20b   :  { %v1229_v9 = vsel %vm1228_vm1, %v7358_v57, %v7357_v27  ;;  %v1231_v24 = vsel %vm1228_vm1, %v7357_v27, 0.0  ;;  %2774 = vmatmul.mubr.f32.gmra.mrb[4].mxu1 %v2213_v59  ;;  %v1209_v1 = vsel %vm213_vm12, %v1190_v15, %v1205_v11  ;;  %v2219_v15 = vld [vmem:[%s11082_s1 + $0x60] sm:$0xff]  ;;  %v1330_v3 = vmul.f32 %v7832_v39, %v1328_v4 }
 0x20c   :  { %v1233_v63 = vrot.slane %v1229_v9, 4  ;;  %v1234_v33 = vrot.slane %v1231_v24, 4  ;;  %v1276_v5 = vpop.permute.xlu0 %1275  ;;  %v2121_v7 = vsel %vm213_vm12, %v2117_v12, %v1231_v24  ;;  %v2120_v55 = vsel %vm213_vm12, %v2116_v60, %v1229_v9  ;;  %2779 = vmatprep.mubr.f32.mxu1 %v2217_v41  ;;  %v2223_v57 = vld [vmem:[%s11082_s1 + $0x80] sm:$0xff] }
 0x20d   :  { %v1242_v19 = vpop.permute.xlu1 %1241  ;;  %v6687_v10 = vpack.c.bf16 %v2121_v7, %v2110_v52  ;;  %v6689_v13 = vpack.c.bf16 %v2120_v55, %v2109_v26  ;;  %2548 = vmatmul.mubr.f32.gmra.mrb[4].mxu0 %v2213_v59  ;;  %v1281_v29 = vsel %vm1277_vm13, %v1276_v5, 0.0  ;;  %v2147_v59 = vrot.slane %v8810_v44, 4  ;;  %v2222_v52 = vld [vmem:[%s11082_s1 + $0x78] sm:$0xff] }
 0x20e   :  { %v1238_v17 = vsel %vm213_vm12, %v1223_v6, %v1234_v33  ;;  %v1237_v18 = vsel %vm213_vm12, %v1222_v31, %v1233_v63  ;;  %2553 = vmatprep.mubr.f32.mxu0 %v2217_v41  ;;  %v1251_v31 = vmul.f32 %v7910_v35, %v1249_v42  ;;  %v1283_v27 = vmul.f32 %v7923_v48, %v1281_v29  ;;  %v2225_v29 = vld [vmem:[%s11082_s1 + $0x90] sm:$0xff] }
 0x20f   :  { %6688 = vmatprep.subr.bf16.mxu1 %v6687_v10  ;;  %v6607_v20 = vpack.c.bf16 %v1238_v17, %v1210_v51  ;;  %v6609_v21 = vpack.c.bf16 %v1237_v18, %v1209_v1  ;;  %2780 = vmatmul.mubr.f32.gmra.mrb[6].mxu1 %v2216_v0  ;;  %v1246_v43 = vsel %vm1245_vm3, %v1242_v19, %v1244_v16  ;;  %v1316_v60 = vrot.slane %v8806_v50, 4  ;;  %vm11305_vm3 = vmmov %vm11295_vm9 }
 0x210   :  { %v1274_v6 = vpop.permute.xlu0 %1273  ;;  %6690 = vmatpush1.bf16.msra.mxu1 %v6689_v13  ;;  %2785 = vmatprep.mubr.f32.mxu1 %v2220_v8  ;;  %v2157_v26 = vrot.slane %v8840_v47, 4  ;;  %v1358_v9 = vsel %vm284_vm8, %v7912_v40, 0.0  ;;  %v1362_v16 = vsel %vm11292_vm11, %v7941_v58, 0.0  ;;  %v8868_v63 = vsel %vm213_vm12, %v2147_v59, %v8806_v50  ;;  %v2226_v58 = vld [vmem:[%s11082_s1 + $0x98] sm:$0xff]  ;;  %vm11309_vm11 = vmmov %vm11305_vm3 }
 0x211   :  { %v1255_v61 = vpop.permute.xlu1 %1254  ;;  %6608 = vmatprep.subr.bf16.mxu0 %v6607_v20  ;;  %2554 = vmatmul.mubr.f32.gmra.mrb[6].mxu0 %v2216_v0  ;;  %v1278_v41 = vsel %vm1277_vm13, %v1274_v6, %v1276_v5  ;;  %v2127_v33 = vrot.slane %v1251_v31, 4  ;;  %v1250_v5 = vmul.f32 %v7889_v23, %v1246_v43  ;;  %v2137_v0 = vrot.slane %v1283_v27, 4  ;;  %vm11306_vm13 = vmmov %vm11305_vm3 }
 0x212   :  { %v1260_v12 = vsel %vm1256_vm5, %v1255_v61, 0.0  ;;  %6610 = vmatpush1.bf16.msra.mxu0 %v6609_v21  ;;  %2559 = vmatprep.mubr.f32.mxu0 %v2220_v8  ;;  %v1282_v7 = vmul.f32 %v7895_v30, %v1278_v41  ;;  %v1334_v19 = vrot.slane %v1330_v3, 4  ;;  %vm11293_vm8 = vcmask 515072  }
 0x213   :  { %v1262_v11 = vmul.f32 %v7953_v2, %v1260_v12  ;;  %2786 = vmatmul.mubr.f32.gmra.mrb[8].mxu1 %v2219_v15  ;;  %v1344_v10 = vsel %vm11293_vm8, %v7885_v22, 0.0  ;;  %v1360_v30 = vmul.f32 %v7953_v2, %v1358_v9  ;;  %v1364_v8 = vmul.f32 %v7923_v48, %v1362_v16  ;;  %v2229_v48 = vld [vmem:[%s11082_s1 + $0xb0] sm:$0xff]  ;;  %vm11310_vm8 = vmmov %vm11305_vm3 }
 0x214   :  { %v1287_v24 = vpop.permute.xlu0 %1286  ;;  %2791 = vmatprep.mubr.f32.mxu1 %v2223_v57  ;;  %v2126_v20 = vrot.slane %v1250_v5, 4  ;;  %v2136_v22 = vrot.slane %v1282_v7, 4  ;;  %v1346_v41 = vmul.f32 %v7910_v35, %v1344_v10  ;;  %vm11296_vm1 = vcmask 490496  }
 0x215   :  { %v1292_v40 = vsel %vm1288_vm6, %v1287_v24, 0.0  ;;  %v1253_v55 = vpop.permute.xlu1 %1252  ;;  %2560 = vmatmul.mubr.f32.gmra.mrb[8].mxu0 %v2219_v15  ;;  %v1266_v28 = vrot.slane %v1262_v11, 4  ;;  %v2131_v1 = vsel %vm213_vm12, %v2127_v33, %v1262_v11  ;;  %v2161_v11 = vsel %vm213_vm12, %v2157_v26, %v1330_v3  ;;  %v2228_v3 = vld [vmem:[%s11082_s1 + $0xa8] sm:$0xff] }
 0x216   :  { %v1294_v42 = vmul.f32 %v8003_v14, %v1292_v40  ;;  %v1257_v50 = vsel %vm1256_vm5, %v1253_v55, %v1255_v61  ;;  %2565 = vmatprep.mubr.f32.mxu0 %v2223_v57  ;;  %v11294_v57 = vunpack.i.h.bf16 %v7865_v62  ;;  %v1368_v62 = vrot.slane %v1364_v8, 4  ;;  %vm11307_vm5 = vmmov %vm11305_vm3 }
 0x217   :  { %v1261_v13 = vmul.f32 %v7934_v54, %v1257_v50  ;;  %2792 = vmatmul.mubr.f32.gmra.mrb[10].mxu1 %v2222_v52  ;;  %v1270_v15 = vsel %vm213_vm12, %v1251_v31, %v1266_v28  ;;  %v1320_v31 = vsel %vm213_vm12, %v8810_v44, %v1316_v60  ;;  %v1338_v33 = vsel %vm213_vm12, %v8840_v47, %v1334_v19 }
 0x218   :  { %v1298_v51 = vrot.slane %v1294_v42, 4  ;;  %v1285_v17 = vpop.permute.xlu0 %1284  ;;  %v2141_v18 = vsel %vm213_vm12, %v2137_v0, %v1294_v42  ;;  %2797 = vmatprep.mubr.f32.mxu1 %v2226_v58  ;;  %v1342_v43 = vsel %vm11295_vm9, %v11294_v57, 0.0  ;;  %v6695_v40 = vpack.c.bf16 %v2161_v11, %v8868_v63  ;;  %vm11311_vm9 = vmmov %vm11305_vm3 }
 0x219   :  { %v1289_v21 = vsel %vm1288_vm6, %v1285_v17, %v1287_v24  ;;  %v6691_v59 = vpack.c.bf16 %v2141_v18, %v2131_v1  ;;  %2566 = vmatmul.mubr.f32.gmra.mrb[10].mxu0 %v2222_v52  ;;  %v1265_v4 = vrot.slane %v1261_v13, 4  ;;  %v2130_v9 = vsel %vm213_vm12, %v2126_v20, %v1261_v13  ;;  %v11303_v17 = vld [vmem:[#allocation5_spill] sm:$0xff]  ;;  %v2230_v20 = vld [vmem:[%s11082_s1 + $0xb8] sm:$0xff]  ;;  %vm11308_vm6 = vmmov %vm11305_vm3 }
 0x21a   :  { %v1293_v6 = vmul.f32 %v8016_v46, %v1289_v21  ;;  %v1302_v61 = vsel %vm213_vm12, %v1283_v27, %v1298_v51  ;;  %2571 = vmatprep.mubr.f32.mxu0 %v2226_v58  ;;  %v2176_v27 = vrot.slane %v1360_v30, 4  ;;  %v2166_v26 = vrot.slane %v1342_v43, 4  ;;  %v2224_v18 = vld [vmem:[%s11082_s1 + $0x88] sm:$0xff] }
 0x21b   :  { %6692 = vmatprep.subr.bf16.mxu1 %v6691_v59  ;;  %v6611_v12 = vpack.c.bf16 %v1302_v61, %v1270_v15  ;;  %2798 = vmatmul.mubr.f32.gmra.mrb[12].mxu1 %v2225_v29  ;;  %v1269_v55 = vsel %vm213_vm12, %v1250_v5, %v1265_v4  ;;  %v1350_v60 = vrot.slane %v1346_v41, 4  ;;  %v1376_v58 = vsel %vm11296_vm1, %v7966_v25, 0.0  ;;  %vm11312_vm1 = vmmov %vm11305_vm3 }
 0x21c   :  { %v1297_v16 = vrot.slane %v1293_v6, 4  ;;  %v2140_v24 = vsel %vm213_vm12, %v2136_v22, %v1293_v6  ;;  %2803 = vmatprep.mubr.f32.mxu1 %v2229_v48  ;;  %v2180_v47 = vsel %vm213_vm12, %v2176_v27, %v1364_v8  ;;  %v6615_v28 = vpack.c.bf16 %v1338_v33, %v1320_v31  ;;  %v11300_v8 = vld [vmem:[#allocation4_spill] sm:$0xff] }
 0x21d   :  { %6612 = vmatprep.subr.bf16.mxu0 %v6611_v12  ;;  %v6693_v52 = vpack.c.bf16 %v2140_v24, %v2130_v9  ;;  %2572 = vmatmul.mubr.f32.gmra.mrb[12].mxu0 %v2225_v29  ;;  %v2170_v42 = vsel %vm213_vm12, %v2166_v26, %v1346_v41  ;;  %v1372_v63 = vsel %vm213_vm12, %v1360_v30, %v1368_v62  ;;  %v11297_v5 = vmov 0.0   ;;  %v2227_v29 = vld [vmem:[%s11082_s1 + $0xa0] sm:$0xff] }
 0x21e   :  { %v1301_v44 = vsel %vm213_vm12, %v1282_v7, %v1297_v16  ;;  %2577 = vmatprep.mubr.f32.mxu0 %v2229_v48  ;;  %v1378_v7 = vmul.f32 %v8003_v14, %v1376_v58  ;;  %v6699_v50 = vpack.c.bf16 %v2180_v47, %v2170_v42  ;;  %v11298_v25 = vpack.c.bf16 %v7906_v34, %v7845_v45  ;;  %v11302_v34 = vld [vmem:[#allocation6_spill] sm:$0xff] }
 0x21f   :  { %6694 = vmatpush1.bf16.msra.mxu1 %v6693_v52  ;;  %v6613_v0 = vpack.c.bf16 %v1301_v44, %v1269_v55  ;;  %v1354_v19 = vsel %vm213_vm12, %v1342_v43, %v1350_v60  ;;  %v1377_v30 = vmul.f32 %v8016_v46, %v8011_v32  ;;  %v11299_v13 = vpack.c.bf16 %v7931_v53, %v7852_v49  ;;  %v2209_v32 = vld [vmem:[%s11082_s1 + $0x10] sm:$0xff]  ;;  %v2212_v49 = vld [vmem:[%s11082_s1 + $0x28] sm:$0xff]  ;;  %v2215_v53 = vld [vmem:[%s11082_s1 + $0x40] sm:$0xff] }
 0x220   :  { %6696 = vmatprep.subr.bf16.mxu1 %v6695_v40  ;;  %2804 = vmatmul.mubr.f32.gmra.mrb[14].mxu1 %v2228_v3  ;;  %v6619_v10 = vpack.c.bf16 %v1372_v63, %v1354_v19  ;;  %v2186_v14 = vrot.slane %v1378_v7, 4  ;;  %v11301_v51 = vpack.c.bf16 %v7980_v56, %v11300_v8  ;;  %v11304_v1 = vpack.c.bf16 %v11302_v34, %v11303_v17  ;;  %v2218_v56 = vld [vmem:[%s11082_s1 + $0x58] sm:$0xff]  ;;  %v2221_v46 = vld [vmem:[%s11082_s1 + $0x70] sm:$0xff]  ;;  %s11371_s1 = smov 110  }
 0x221   :  { %6614 = vmatpush1.bf16.msra.mxu0 %v6613_v0  ;;  %2874 = vmatprep.mubr.f32.mxu1 %v11297_v5  ;;  %v2185_v45 = vrot.slane %v1377_v30, 4 }
 0x222   :  { %6616 = vmatprep.subr.bf16.mxu0 %v6615_v28  ;;  %2578 = vmatmul.mubr.f32.gmra.mrb[14].mxu0 %v2228_v3 }
 0x223   :  { %6698 = vmatpush1.bf16.msra.mxu1 %v11298_v25  ;;  %2648 = vmatprep.mubr.f32.mxu0 %v11297_v5 }
 0x224   :  { %6700 = vmatprep.subr.bf16.mxu1 %v6699_v50 }
 0x225   :  { %6618 = vmatpush1.bf16.msra.mxu0 %v11299_v13 }
 0x226   :  { %6620 = vmatprep.subr.bf16.mxu0 %v6619_v10 }
 0x227   :  { %6702 = vmatpush1.bf16.msra.mxu1 %v11301_v51 }
 0x228   :  { %6493 = vmatprep.subr.msk.mxu1 %vm213_vm12, %v2186_v14 }
 0x229   :  { %6622 = vmatpush1.bf16.msra.mxu0 %v11304_v1 }
 0x22a   :  { %6491 = vmatprep.subr.msk.mxu0 %vm213_vm12, %v1378_v7 }
 0x22b   :  { %6494 = vmatpush1.msk.msra.mxu1 %vm213_vm12, %v2185_v45 }
 0x22c   :  { %2875 = vmatmul.mubr.f32.vlgmr.msra.gmra.mrb[0].mxu1 %v2209_v32 }
 0x22d   :  { %6492 = vmatpush1.msk.msra.mxu0 %vm213_vm12, %v1377_v30  ;;  %2880 = vmatprep.mubr.f32.mxu1 %v11297_v5 }
 0x22e   :  { %2649 = vmatmul.mubr.f32.vlgmr.msra.gmra.mrb[0].mxu0 %v2209_v32 }
 0x22f   :  { %2654 = vmatprep.mubr.f32.mxu0 %v11297_v5 }
 0x230   :  { %2881 = vmatmul.mubr.f32.gmra.mrb[2].mxu1 %v2212_v49 }
 0x231   :  { %2886 = vmatprep.mubr.f32.mxu1 %v11297_v5 }
 0x232   :  { %2655 = vmatmul.mubr.f32.gmra.mrb[2].mxu0 %v2212_v49 }
 0x233   :  { %2660 = vmatprep.mubr.f32.mxu0 %v11297_v5 }
 0x234   :  { %2887 = vmatmul.mubr.f32.gmra.mrb[4].mxu1 %v2215_v53 }
 0x235   :  { %2892 = vmatprep.mubr.f32.mxu1 %v11297_v5 }
 0x236   :  { %2661 = vmatmul.mubr.f32.gmra.mrb[4].mxu0 %v2215_v53 }
 0x237   :  { %2666 = vmatprep.mubr.f32.mxu0 %v11297_v5 }
 0x238   :  { %2893 = vmatmul.mubr.f32.gmra.mrb[6].mxu1 %v2218_v56 }
 0x239   :  { %2898 = vmatprep.mubr.f32.mxu1 %v11297_v5 }
 0x23a   :  { %2667 = vmatmul.mubr.f32.gmra.mrb[6].mxu0 %v2218_v56 }
 0x23b   :  { %2672 = vmatprep.mubr.f32.mxu0 %v11297_v5 }
 0x23c   :  { %2899 = vmatmul.mubr.f32.gmra.mrb[8].mxu1 %v2221_v46 }
 0x23d   :  { %2904 = vmatprep.mubr.f32.mxu1 %v11297_v5 }
 0x23e   :  { %2673 = vmatmul.mubr.f32.gmra.mrb[8].mxu0 %v2221_v46 }
 0x23f   :  { %2678 = vmatprep.mubr.f32.mxu0 %v11297_v5 }
 0x240   :  { %2905 = vmatmul.mubr.f32.gmra.mrb[10].mxu1 %v2224_v18  ;;  %v2434_v22 = vpop.permute.xlu1 %2433 }
 0x241   :  { %2910 = vmatprep.mubr.f32.mxu1 %v11297_v5  ;;  %v2439_v61 = vpop.permute.xlu0 %2438 }
 0x242   :  { %2679 = vmatmul.mubr.f32.gmra.mrb[10].mxu0 %v2224_v18 }
 0x243   :  { %2684 = vmatprep.mubr.f32.mxu0 %v11297_v5 }
 0x244   :  { %2911 = vmatmul.mubr.f32.gmra.mrb[12].mxu1 %v2227_v29  ;;  %v2444_v9 = vpop.permute.xlu1 %2443 }
 0x245   :  { %2916 = vmatprep.mubr.f32.mxu1 %v11297_v5  ;;  %v2454_v56 = vpop.permute.xlu0 %2453 }
 0x246   :  { %2685 = vmatmul.mubr.f32.gmra.mrb[12].mxu0 %v2227_v29 }
 0x247   :  { %2690 = vmatprep.mubr.f32.mxu0 %v11297_v5 }
 0x248   :  { %2917 = vmatmul.mubr.f32.gmra.mrb[14].mxu1 %v2230_v20 }
 0x249   :  { %3148 = vmatprep.mubr.f32.mxu1 %v11297_v5 }
 0x24a   :  { %2691 = vmatmul.mubr.f32.gmra.mrb[14].mxu0 %v2230_v20 }
 0x24b   :  { %3059 = vmatprep.mubr.f32.mxu0 %v11297_v5 }
 0x24c   :  { %v2449_v19 = vpop.permute.xlu1 %2448 }
 0x2ff   :  { %v2876_v21 = vpop.f32.mrb[0].mxu1 }
 0x300   :  { %v7167_v59 = vadd.f32 %v2876_v21, %v2434_v22  ;;  %v2878_v48 = vpop.f32.mrb[1].mxu1 }
 0x301   :  { %v2650_v4 = vpop.f32.mrb[0].mxu0  ;;  %v7168_v6 = vadd.f32 %v2878_v48, %v2434_v22 }
 0x302   :  { %v2652_v15 = vpop.f32.mrb[1].mxu0  ;;  %v7151_v43 = vadd.f32 %v2650_v4, %v2434_v22  ;;  %v2925_v41 = vmax.f32 %v7167_v59, 0.0 }
 0x303   :  { %v2882_v57 = vpop.f32.mrb[2].mxu1  ;;  %v7152_v16 = vadd.f32 %v2652_v15, %v2434_v22  ;;  %v2926_v31 = vmax.f32 %v7168_v6, 0.0 }
 0x304   :  { %v7169_v12 = vadd.f32 %v2882_v57, %v2439_v61  ;;  %v2884_v11 = vpop.f32.mrb[3].mxu1  ;;  %v2923_v55 = vmax.f32 %v7151_v43, 0.0 }
 0x305   :  { %v2656_v24 = vpop.f32.mrb[2].mxu0  ;;  %v7170_v27 = vadd.f32 %v2884_v11, %v2439_v61  ;;  %v2924_v47 = vmax.f32 %v7152_v16, 0.0 }
 0x306   :  { %v7153_v62 = vadd.f32 %v2656_v24, %v2439_v61  ;;  %v2658_v52 = vpop.f32.mrb[3].mxu0  ;;  %v2929_v33 = vmax.f32 %v7169_v12, 0.0 }
 0x307   :  { %v7154_v3 = vadd.f32 %v2658_v52, %v2439_v61  ;;  %v2930_v26 = vmax.f32 %v7170_v27, 0.0  ;;  %v2888_v40 = vpop.f32.mrb[4].mxu1 }
 0x308   :  { %v2927_v44 = vmax.f32 %v7153_v62, 0.0  ;;  %v6721_v60 = vpack.c.bf16 %v2929_v33, %v2925_v41  ;;  %v7171_v58 = vadd.f32 %v2888_v40, %v2444_v9  ;;  %v2890_v0 = vpop.f32.mrb[5].mxu1  ;;  %v2459_v41 = vpop.permute.xlu1 %2458 }
 0x309   :  { %v2928_v28 = vmax.f32 %v7154_v3, 0.0  ;;  %v6719_v42 = vpack.c.bf16 %v2930_v26, %v2926_v31  ;;  %v2662_v63 = vpop.f32.mrb[4].mxu0  ;;  %v7172_v7 = vadd.f32 %v2890_v0, %v2444_v9 }
 0x30a   :  { %v6705_v50 = vpack.c.bf16 %v2927_v44, %v2923_v55  ;;  %v2664_v25 = vpop.f32.mrb[5].mxu0  ;;  %v7155_v13 = vadd.f32 %v2662_v63, %v2444_v9  ;;  %v2933_v14 = vmax.f32 %v7171_v58, 0.0  ;;  %v2464_v63 = vpop.permute.xlu0 %2463 }
 0x30b   :  { %v6703_v10 = vpack.c.bf16 %v2928_v28, %v2924_v47  ;;  %v2894_v30 = vpop.f32.mrb[6].mxu1  ;;  %6720 = vmatprep.subr.bf16.mxu1 %v6719_v42  ;;  %v7156_v45 = vadd.f32 %v2664_v25, %v2444_v9  ;;  %v2934_v34 = vmax.f32 %v7172_v7, 0.0 }
 0x30c   :  { %v7173_v8 = vadd.f32 %v2894_v30, %v2449_v19  ;;  %v2896_v51 = vpop.f32.mrb[7].mxu1  ;;  %6722 = vmatpush1.bf16.msra.mxu1 %v6721_v60  ;;  %v2931_v20 = vmax.f32 %v7155_v13, 0.0 }
 0x30d   :  { %v7174_v17 = vadd.f32 %v2896_v51, %v2449_v19  ;;  %v2668_v1 = vpop.f32.mrb[6].mxu0  ;;  %6704 = vmatprep.subr.bf16.mxu0 %v6703_v10  ;;  %v2932_v4 = vmax.f32 %v7156_v45, 0.0 }
 0x30e   :  { %v2937_v32 = vmax.f32 %v7173_v8, 0.0  ;;  %v7157_v49 = vadd.f32 %v2668_v1, %v2449_v19  ;;  %v2670_v53 = vpop.f32.mrb[7].mxu0  ;;  %6706 = vmatpush1.bf16.msra.mxu0 %v6705_v50 }
 0x30f   :  { %v2938_v46 = vmax.f32 %v7174_v17, 0.0  ;;  %v7158_v18 = vadd.f32 %v2670_v53, %v2449_v19  ;;  %v2900_v29 = vpop.f32.mrb[8].mxu1 }
 0x310   :  { %v6725_v22 = vpack.c.bf16 %v2937_v32, %v2933_v14  ;;  %v2935_v21 = vmax.f32 %v7157_v49, 0.0  ;;  %v7175_v59 = vadd.f32 %v2900_v29, %v2454_v56  ;;  %v2902_v48 = vpop.f32.mrb[9].mxu1  ;;  %v2469_v14 = vpop.permute.xlu1 %2468 }
 0x311   :  { %v6723_v6 = vpack.c.bf16 %v2938_v46, %v2934_v34  ;;  %v2936_v15 = vmax.f32 %v7158_v18, 0.0  ;;  %v2674_v61 = vpop.f32.mrb[8].mxu0  ;;  %v7176_v11 = vadd.f32 %v2902_v48, %v2454_v56 }
 0x312   :  { %v6709_v57 = vpack.c.bf16 %v2935_v21, %v2931_v20  ;;  %v2676_v43 = vpop.f32.mrb[9].mxu0  ;;  %v2941_v16 = vmax.f32 %v7175_v59, 0.0  ;;  %v7159_v24 = vadd.f32 %v2674_v61, %v2454_v56 }
 0x313   :  { %v6707_v12 = vpack.c.bf16 %v2936_v15, %v2932_v4  ;;  %v2906_v9 = vpop.f32.mrb[10].mxu1  ;;  %6724 = vmatprep.subr.bf16.mxu1 %v6723_v6  ;;  %v7160_v62 = vadd.f32 %v2676_v43, %v2454_v56  ;;  %v2942_v55 = vmax.f32 %v7176_v11, 0.0  ;;  %v2957_v11 = vld [vmem:[%s11085_s3 + $0x10] sm:$0xff] }
 0x314   :  { %v7177_v31 = vadd.f32 %v2906_v9, %v2459_v41  ;;  %v2908_v27 = vpop.f32.mrb[11].mxu1  ;;  %6726 = vmatpush1.bf16.msra.mxu1 %v6725_v22  ;;  %v2939_v0 = vmax.f32 %v7159_v24, 0.0  ;;  %v2958_v9 = vld [vmem:[%s11085_s3 + $0x18] sm:$0xff] }
 0x315   :  { %v7178_v52 = vadd.f32 %v2908_v27, %v2459_v41  ;;  %v2680_v33 = vpop.f32.mrb[10].mxu0  ;;  %6708 = vmatprep.subr.bf16.mxu0 %v6707_v12  ;;  %v2940_v7 = vmax.f32 %v7160_v62, 0.0  ;;  %v2956_v12 = vld [vmem:[%s11085_s3 + $0x8] sm:$0xff] }
 0x316   :  { %v2945_v3 = vmax.f32 %v7177_v31, 0.0  ;;  %v7161_v26 = vadd.f32 %v2680_v33, %v2459_v41  ;;  %v2682_v40 = vpop.f32.mrb[11].mxu0  ;;  %6710 = vmatpush1.bf16.msra.mxu0 %v6709_v57  ;;  %v9009_v31 = vpop.permute.xlu0 %2965 }
 0x317   :  { %v2946_v44 = vmax.f32 %v7178_v52, 0.0  ;;  %v7162_v60 = vadd.f32 %v2682_v40, %v2459_v41  ;;  %v2912_v58 = vpop.f32.mrb[12].mxu1  ;;  %v2955_v41 = vld [vmem:[%s11085_s3] sm:$0xff] }
 0x318   :  { %v6729_v47 = vpack.c.bf16 %v2945_v3, %v2941_v16  ;;  %v2943_v28 = vmax.f32 %v7161_v26, 0.0  ;;  %v2914_v42 = vpop.f32.mrb[13].mxu1  ;;  %v7179_v30 = vadd.f32 %v2912_v58, %v2464_v63 }
 0x319   :  { %v6727_v50 = vpack.c.bf16 %v2946_v44, %v2942_v55  ;;  %v2944_v25 = vmax.f32 %v7162_v60, 0.0  ;;  %v2686_v19 = vpop.f32.mrb[12].mxu0  ;;  %v7180_v51 = vadd.f32 %v2914_v42, %v2464_v63 }
 0x31a   :  { %v6713_v10 = vpack.c.bf16 %v2943_v28, %v2939_v0  ;;  %v2688_v13 = vpop.f32.mrb[13].mxu0  ;;  %v7163_v34 = vadd.f32 %v2686_v19, %v2464_v63  ;;  %v2949_v56 = vmax.f32 %v7179_v30, 0.0 }
 0x31b   :  { %v6711_v8 = vpack.c.bf16 %v2944_v25, %v2940_v7  ;;  %v2918_v45 = vpop.f32.mrb[14].mxu1  ;;  %6728 = vmatprep.subr.bf16.mxu1 %v6727_v50  ;;  %v7164_v32 = vadd.f32 %v2688_v13, %v2464_v63  ;;  %v2950_v20 = vmax.f32 %v7180_v51, 0.0  ;;  %v9093_v25 = vpop.permute.xlu1 %2970 }
 0x31c   :  { %v7181_v17 = vadd.f32 %v2918_v45, %v2469_v14  ;;  %v2920_v1 = vpop.f32.mrb[15].mxu1  ;;  %6730 = vmatpush1.bf16.msra.mxu1 %v6729_v47  ;;  %v2947_v59 = vmax.f32 %v7163_v34, 0.0  ;;  %v9165_v51 = vpop.permute.xlu0 %2975 }
 0x31d   :  { %v7182_v49 = vadd.f32 %v2920_v1, %v2469_v14  ;;  %v2692_v53 = vpop.f32.mrb[14].mxu0  ;;  %6712 = vmatprep.subr.bf16.mxu0 %v6711_v8  ;;  %v2948_v6 = vmax.f32 %v7164_v32, 0.0 }
 0x31e   :  { %v2953_v46 = vmax.f32 %v7181_v17, 0.0  ;;  %v7165_v18 = vadd.f32 %v2692_v53, %v2469_v14  ;;  %v2694_v29 = vpop.f32.mrb[15].mxu0  ;;  %6714 = vmatpush1.bf16.msra.mxu0 %v6713_v10 }
 0x31f   :  { %v2954_v22 = vmax.f32 %v7182_v49, 0.0  ;;  %v7166_v21 = vadd.f32 %v2694_v29, %v2469_v14  ;;  %v9167_v45 = vpop.permute.xlu1 %2980 }
 0x320   :  { %v6733_v48 = vpack.c.bf16 %v2953_v46, %v2949_v56  ;;  %v2951_v4 = vmax.f32 %v7165_v18, 0.0 }
 0x321   :  { %v6731_v15 = vpack.c.bf16 %v2954_v22, %v2950_v20  ;;  %v2952_v61 = vmax.f32 %v7166_v21, 0.0 }
 0x322   :  { %v6717_v57 = vpack.c.bf16 %v2951_v4, %v2947_v59 }
 0x323   :  { %v6715_v43 = vpack.c.bf16 %v2952_v61, %v2948_v6  ;;  %6732 = vmatprep.subr.bf16.mxu1 %v6731_v15 }
 0x324   :  { %6734 = vmatpush1.bf16.msra.mxu1 %v6733_v48 }
 0x325   :  { %6716 = vmatprep.subr.bf16.mxu0 %v6715_v43 }
 0x326   :  { %6718 = vmatpush1.bf16.msra.mxu0 %v6717_v57 }
 0x327   :  { %6485 = vmatmul.mubr.msk.f32.vlgmr.msra.gmra.mrb[16].mxu1 %vm11305_vm3, %v2955_v41  ;;  %vm11342_vm3 = vcmask 277504  }
 0x328   :  { %3154 = vmatprep.mubr.f32.mxu1 %v11297_v5 }
 0x329   :  { %6481 = vmatmul.mubr.msk.f32.vlgmr.msra.gmra.mrb[16].mxu0 %vm11306_vm13, %v2955_v41  ;;  %vm11343_vm13 = vmmov %vm11342_vm3 }
 0x32a   :  { %3065 = vmatprep.mubr.f32.mxu0 %v11297_v5 }
 0x32b   :  { %6486 = vmatmul.mubr.msk.f32.gmra.mrb[18].mxu1 %vm11307_vm5, %v2956_v12  ;;  %vm11346_vm5 = vmmov %vm11342_vm3 }
 0x32c   :  { %3160 = vmatprep.mubr.f32.mxu1 %v11297_v5 }
 0x32d   :  { %6482 = vmatmul.mubr.msk.f32.gmra.mrb[18].mxu0 %vm11308_vm6, %v2956_v12  ;;  %vm11347_vm6 = vmmov %vm11342_vm3 }
 0x32e   :  { %3071 = vmatprep.mubr.f32.mxu0 %v11297_v5 }
 0x32f   :  { %6487 = vmatmul.mubr.msk.f32.gmra.mrb[20].mxu1 %vm11309_vm11, %v2957_v11  ;;  %vm11396_vm11 = vcmask 269312  }
 0x330   :  { %3166 = vmatprep.mubr.f32.mxu1 %v11297_v5 }
 0x331   :  { %6483 = vmatmul.mubr.msk.f32.gmra.mrb[20].mxu0 %vm11310_vm8, %v2957_v11  ;;  %vm11397_vm8 = vmmov %vm11342_vm3 }
 0x332   :  { %3077 = vmatprep.mubr.f32.mxu0 %v11297_v5 }
 0x333   :  { %6488 = vmatmul.mubr.msk.f32.gmra.mrb[22].mxu1 %vm11311_vm9, %v2958_v9  ;;  %vm11398_vm9 = vmmov %vm11342_vm3 }
 0x335   :  { %6484 = vmatmul.mubr.msk.f32.gmra.mrb[22].mxu0 %vm11312_vm1, %v2958_v9  ;;  %vm11399_vm1 = vmmov %vm11396_vm11 }
 0x3fa   :  { %v9005_v16 = vpop.f32.mrb[16].mxu1 }
 0x3fb   :  { %v9007_v24 = vpop.f32.mrb[17].mxu1 }
 0x3fc   :  { %v3061_v27 = vpop.f32.mrb[16].mxu0 }
 0x3fd   :  { %v3062_v62 = vadd.f32 %v3061_v27, %v9009_v31  ;;  %v3063_v52 = vpop.f32.mrb[17].mxu0 }
 0x3fe   :  { %v3064_v33 = vadd.f32 %v3063_v52, %v9009_v31  ;;  %v9013_v3 = vpop.f32.mrb[18].mxu1 }
 0x3ff   :  { %v9015_v26 = vmax.f32 %v3062_v62, 0.0  ;;  %v9017_v40 = vpop.f32.mrb[19].mxu1 }
 0x400   :  { %v9019_v55 = vmax.f32 %v3064_v33, 0.0  ;;  %v3067_v44 = vpop.f32.mrb[18].mxu0 }
 0x401   :  { %11313 = vst [vmem:[#allocation4_spill] sm:$0xff] %v9015_v26  ;;  %v3069_v60 = vpop.f32.mrb[19].mxu0  ;;  %3197 = vrot.lane.b32.xlu0 %v9015_v26, %s11241_s9  ;;  %v3068_v30 = vadd.f32 %v3067_v44, %v9093_v25 }
 0x402   :  { %11314 = vst [vmem:[#allocation6_spill] sm:$0xff] %v9019_v55  ;;  %3199 = vrot.lane.b32.xlu1 %v9019_v55, %s11241_s9  ;;  %v9025_v58 = vpop.f32.mrb[20].mxu1  ;;  %v3070_v19 = vadd.f32 %v3069_v60, %v9093_v25  ;;  %v9102_v10 = vpack.i.bf16 %v9019_v55, %v9015_v26 }
 0x403   :  { %v9027_v0 = vpop.f32.mrb[21].mxu1  ;;  %v9111_v14 = vmax.f32 %v3068_v30, 0.0 }
 0x404   :  { %v9029_v47 = vpop.f32.mrb[20].mxu0  ;;  %11315 = vst [vmem:[#allocation5_spill] sm:$0xff] %v9102_v10  ;;  %v9105_v13 = vmax.f32 %v3070_v19, 0.0 }
 0x405   :  { %v9031_v28 = vpop.f32.mrb[21].mxu0  ;;  %3245 = vrot.lane.b32.xlu0 %v9015_v26, %s11239_s30  ;;  %11317 = vst [vmem:[#allocation8_spill] sm:$0xff] %v9111_v14  ;;  %v3074_v56 = vadd.f32 %v9029_v47, %v9165_v51 }
 0x406   :  { %3247 = vrot.lane.b32.xlu1 %v9019_v55, %s11239_s30  ;;  %v9037_v42 = vpop.f32.mrb[22].mxu1  ;;  %11316 = vst [vmem:[#allocation7_spill] sm:$0xff] %v9105_v13  ;;  %v9119_v8 = vpack.i.bf16 %v9105_v13, %v9111_v14  ;;  %v3076_v18 = vadd.f32 %v9031_v28, %v9165_v51 }
 0x407   :  { %v9039_v63 = vpop.f32.mrb[23].mxu1  ;;  %v9209_v20 = vmax.f32 %v3074_v56, 0.0 }
 0x408   :  { %v9041_v7 = vpop.f32.mrb[22].mxu0  ;;  %11318 = vst [vmem:[#allocation9_spill] sm:$0xff] %v9119_v8  ;;  %v9213_v21 = vmax.f32 %v3076_v18, 0.0 }
 0x409   :  { %v9043_v50 = vpop.f32.mrb[23].mxu0  ;;  %3333 = vrot.lane.b32.xlu0 %v9015_v26, %s11240_s8  ;;  %11319 = vst [vmem:[#allocation10_spill] sm:$0xff] %v9209_v20 }
 0x40a   :  { %3335 = vrot.lane.b32.xlu1 %v9019_v55, %s11240_s8  ;;  %11320 = vst [vmem:[#allocation11_spill] sm:$0xff] %v9213_v21 }
 0x40d   :  { %3381 = vrot.lane.b32.xlu0 %v9015_v26, %s11243_s11 }
 0x40e   :  { %3383 = vrot.lane.b32.xlu1 %v9019_v55, %s11243_s11 }
 0x411   :  { %3429 = vrot.lane.b32.xlu0 %v9015_v26, %s7557_s21 }
 0x412   :  { %3431 = vrot.lane.b32.xlu1 %v9019_v55, %s7557_s21 }
 0x415   :  { %3477 = vrot.lane.b32.xlu0 %v9015_v26, %s11246_s14 }
 0x416   :  { %3479 = vrot.lane.b32.xlu1 %v9019_v55, %s11246_s14 }
 0x419   :  { %3565 = vrot.lane.b32.xlu0 %v9015_v26, %s11249_s17 }
 0x41a   :  { %3567 = vrot.lane.b32.xlu1 %v9019_v55, %s11249_s17 }
 0x41d   :  { %3613 = vrot.lane.b32.xlu0 %v9015_v26, %s7562_s28 }
 0x41e   :  { %3615 = vrot.lane.b32.xlu1 %v9019_v55, %s7562_s28 }
 0x421   :  { %3661 = vrot.lane.b32.xlu0 %v9015_v26, %s7568_s0 }
 0x422   :  { %3663 = vrot.lane.b32.xlu1 %v9019_v55, %s7568_s0 }
 0x425   :  { %3709 = vrot.lane.b32.xlu0 %v9015_v26, %s7567_s20 }
 0x426   :  { %3711 = vrot.lane.b32.xlu1 %v9019_v55, %s7567_s20 }
 0x429   :  { %3765 = vrot.lane.b32.xlu0 %v9015_v26, %s7570_s26 }
 0x42a   :  { %3767 = vrot.lane.b32.xlu1 %v9019_v55, %s7570_s26 }
 0x42d   :  { %3813 = vrot.lane.b32.xlu0 %v9015_v26, %s7569_s29 }
 0x42e   :  { %3815 = vrot.lane.b32.xlu1 %v9019_v55, %s7569_s29 }
 0x431   :  { %3861 = vrot.lane.b32.xlu0 %v9015_v26, %s7575_s18 }
 0x432   :  { %3863 = vrot.lane.b32.xlu1 %v9019_v55, %s7575_s18 }
 0x435   :  { %3909 = vrot.lane.b32.xlu0 %v9015_v26, %s7576_s19 }
 0x436   :  { %3911 = vrot.lane.b32.xlu1 %v9019_v55, %s7576_s19 }
 0x439   :  { %3997 = vrot.lane.b32.xlu0 %v9015_v26, %s7577_s22 }
 0x43a   :  { %3999 = vrot.lane.b32.xlu1 %v9019_v55, %s7577_s22 }
 0x43d   :  { %7362 = vrot.lane.b32.xlu0 %v9102_v10, %s11242_s10 }
 0x43e   :  { %3203 = vrot.lane.b32.xlu1 %v9105_v13, %s11241_s9 }
 0x441   :  { %7367 = vrot.lane.b32.xlu0 %v9102_v10, %s11247_s15 }
 0x442   :  { %3251 = vrot.lane.b32.xlu1 %v9105_v13, %s11239_s30 }
 0x445   :  { %7372 = vrot.lane.b32.xlu0 %v9102_v10, %s7579_s24  ;;  %v3082_v10 = vadd.f32 %v9043_v50, %v9167_v45  ;;  %v3080_v50 = vadd.f32 %v9041_v7, %v9167_v45 }
 0x446   :  { %7377 = vrot.lane.b32.xlu1 %v9119_v8, %s11242_s10 }
 0x449   :  { %3201 = vrot.lane.b32.xlu0 %v9111_v14, %s11241_s9 }
 0x44a   :  { %3339 = vrot.lane.b32.xlu1 %v9105_v13, %s11240_s8 }
 0x44d   :  { %3249 = vrot.lane.b32.xlu0 %v9111_v14, %s11239_s30 }
 0x44e   :  { %3387 = vrot.lane.b32.xlu1 %v9105_v13, %s11243_s11 }
 0x451   :  { %3337 = vrot.lane.b32.xlu0 %v9111_v14, %s11240_s8 }
 0x452   :  { %3435 = vrot.lane.b32.xlu1 %v9105_v13, %s7557_s21 }
 0x455   :  { %3385 = vrot.lane.b32.xlu0 %v9111_v14, %s11243_s11 }
 0x456   :  { %3483 = vrot.lane.b32.xlu1 %v9105_v13, %s11246_s14 }
 0x459   :  { %3433 = vrot.lane.b32.xlu0 %v9111_v14, %s7557_s21 }
 0x45a   :  { %7382 = vrot.lane.b32.xlu1 %v9119_v8, %s11247_s15 }
 0x45d   :  { %3481 = vrot.lane.b32.xlu0 %v9111_v14, %s11246_s14 }
 0x45e   :  { %3571 = vrot.lane.b32.xlu1 %v9105_v13, %s11249_s17 }
 0x461   :  { %3569 = vrot.lane.b32.xlu0 %v9111_v14, %s11249_s17 }
 0x462   :  { %3619 = vrot.lane.b32.xlu1 %v9105_v13, %s7562_s28 }
 0x465   :  { %3617 = vrot.lane.b32.xlu0 %v9111_v14, %s7562_s28 }
 0x466   :  { %3667 = vrot.lane.b32.xlu1 %v9105_v13, %s7568_s0 }
 0x469   :  { %3665 = vrot.lane.b32.xlu0 %v9111_v14, %s7568_s0 }
 0x46a   :  { %3715 = vrot.lane.b32.xlu1 %v9105_v13, %s7567_s20 }
 0x46d   :  { %3713 = vrot.lane.b32.xlu0 %v9111_v14, %s7567_s20 }
 0x46e   :  { %3771 = vrot.lane.b32.xlu1 %v9105_v13, %s7570_s26 }
 0x471   :  { %3769 = vrot.lane.b32.xlu0 %v9111_v14, %s7570_s26 }
 0x472   :  { %3819 = vrot.lane.b32.xlu1 %v9105_v13, %s7569_s29 }
 0x473   :  { %v9173_v34 = vpop.permute.xlu0 %3197 }
 0x474   :  { %v9175_v17 = vpop.permute.xlu1 %3199 }
 0x475   :  { %3817 = vrot.lane.b32.xlu0 %v9111_v14, %s7569_s29 }
 0x476   :  { %3867 = vrot.lane.b32.xlu1 %v9105_v13, %s7575_s18 }
 0x477   :  { %v9181_v1 = vpop.permute.xlu0 %3245 }
 0x478   :  { %v9183_v32 = vpop.permute.xlu1 %3247 }
 0x479   :  { %3865 = vrot.lane.b32.xlu0 %v9111_v14, %s7575_s18 }
 0x47a   :  { %3915 = vrot.lane.b32.xlu1 %v9105_v13, %s7576_s19 }
 0x47b   :  { %v9189_v49 = vpop.permute.xlu0 %3333 }
 0x47c   :  { %v9191_v53 = vpop.permute.xlu1 %3335 }
 0x47d   :  { %3913 = vrot.lane.b32.xlu0 %v9111_v14, %s7576_s19 }
 0x47e   :  { %7387 = vrot.lane.b32.xlu1 %v9119_v8, %s7579_s24 }
 0x47f   :  { %v9199_v46 = vpop.permute.xlu0 %3381 }
 0x480   :  { %v9203_v29 = vpop.permute.xlu1 %3383 }
 0x481   :  { %4001 = vrot.lane.b32.xlu0 %v9111_v14, %s7577_s22 }
 0x482   :  { %4003 = vrot.lane.b32.xlu1 %v9105_v13, %s7577_s22 }
 0x483   :  { %v9211_v22 = vpop.permute.xlu0 %3429 }
 0x484   :  { %v9215_v59 = vpop.permute.xlu1 %3431 }
 0x485   :  { %3205 = vrot.lane.b32.xlu0 %v9209_v20, %s11241_s9 }
 0x486   :  { %3207 = vrot.lane.b32.xlu1 %v9213_v21, %s11241_s9 }
 0x487   :  { %v9221_v48 = vpop.permute.xlu0 %3477 }
 0x488   :  { %11321 = vst [vmem:[#allocation12_spill] sm:$0xff] %v9221_v48  ;;  %v9223_v4 = vpop.permute.xlu1 %3479 }
 0x489   :  { %3253 = vrot.lane.b32.xlu0 %v9209_v20, %s11239_s30 }
 0x48a   :  { %3255 = vrot.lane.b32.xlu1 %v9213_v21, %s11239_s30 }
 0x48b   :  { %v9229_v6 = vpop.permute.xlu0 %3565 }
 0x48c   :  { %11322 = vst [vmem:[#allocation13_spill] sm:$0xff] %v9229_v6  ;;  %v9231_v15 = vpop.permute.xlu1 %3567 }
 0x48d   :  { %11323 = vst [vmem:[#allocation14_spill] sm:$0xff] %v9231_v15  ;;  %3341 = vrot.lane.b32.xlu0 %v9209_v20, %s11240_s8 }
 0x48e   :  { %3343 = vrot.lane.b32.xlu1 %v9213_v21, %s11240_s8 }
 0x48f   :  { %v9237_v61 = vpop.permute.xlu0 %3613 }
 0x490   :  { %11324 = vst [vmem:[#allocation15_spill] sm:$0xff] %v9237_v61  ;;  %v9239_v57 = vpop.permute.xlu1 %3615  ;;  %v9489_v61 = vld [vmem:[%s11086_s5] sm:$0xff] }
 0x491   :  { %11325 = vst [vmem:[#allocation16_spill] sm:$0xff] %v9239_v57  ;;  %3389 = vrot.lane.b32.xlu0 %v9209_v20, %s11243_s11  ;;  %11370 = vst [vmem:[#allocation57_spill] sm:$0xff] %v9489_v61 }
 0x492   :  { %3391 = vrot.lane.b32.xlu1 %v9213_v21, %s11243_s11 }
 0x493   :  { %v9245_v43 = vpop.permute.xlu0 %3661 }
 0x494   :  { %11326 = vst [vmem:[#allocation17_spill] sm:$0xff] %v9245_v43  ;;  %v9247_v41 = vpop.permute.xlu1 %3663 }
 0x495   :  { %11327 = vst [vmem:[#allocation18_spill] sm:$0xff] %v9247_v41  ;;  %3437 = vrot.lane.b32.xlu0 %v9209_v20, %s7557_s21 }
 0x496   :  { %3439 = vrot.lane.b32.xlu1 %v9213_v21, %s7557_s21 }
 0x497   :  { %v9253_v12 = vpop.permute.xlu0 %3709 }
 0x498   :  { %11328 = vst [vmem:[#allocation19_spill] sm:$0xff] %v9253_v12  ;;  %v9255_v11 = vpop.permute.xlu1 %3711 }
 0x499   :  { %11329 = vst [vmem:[#allocation20_spill] sm:$0xff] %v9255_v11  ;;  %3485 = vrot.lane.b32.xlu0 %v9209_v20, %s11246_s14 }
 0x49a   :  { %3487 = vrot.lane.b32.xlu1 %v9213_v21, %s11246_s14 }
 0x49b   :  { %v9261_v9 = vpop.permute.xlu0 %3765 }
 0x49c   :  { %11330 = vst [vmem:[#allocation21_spill] sm:$0xff] %v9261_v9  ;;  %v9263_v27 = vpop.permute.xlu1 %3767 }
 0x49d   :  { %11331 = vst [vmem:[#allocation22_spill] sm:$0xff] %v9263_v27  ;;  %3573 = vrot.lane.b32.xlu0 %v9209_v20, %s11249_s17 }
 0x49e   :  { %3575 = vrot.lane.b32.xlu1 %v9213_v21, %s11249_s17 }
 0x49f   :  { %v9269_v62 = vpop.permute.xlu0 %3813 }
 0x4a0   :  { %11332 = vst [vmem:[#allocation23_spill] sm:$0xff] %v9269_v62  ;;  %v9271_v52 = vpop.permute.xlu1 %3815 }
 0x4a1   :  { %11333 = vst [vmem:[#allocation24_spill] sm:$0xff] %v9271_v52  ;;  %3621 = vrot.lane.b32.xlu0 %v9209_v20, %s7562_s28 }
 0x4a2   :  { %3623 = vrot.lane.b32.xlu1 %v9213_v21, %s7562_s28 }
 0x4a3   :  { %v9277_v33 = vpop.permute.xlu0 %3861 }
 0x4a4   :  { %11334 = vst [vmem:[#allocation25_spill] sm:$0xff] %v9277_v33  ;;  %v9279_v44 = vpop.permute.xlu1 %3863  ;;  %v9336_v33 = vmax.f32 %v3082_v10, 0.0 }
 0x4a5   :  { %11335 = vst [vmem:[#allocation26_spill] sm:$0xff] %v9279_v44  ;;  %3669 = vrot.lane.b32.xlu0 %v9209_v20, %s7568_s0 }
 0x4a6   :  { %3671 = vrot.lane.b32.xlu1 %v9213_v21, %s7568_s0  ;;  %11345 = vst [vmem:[#allocation34_spill] sm:$0xff] %v9336_v33 }
 0x4a7   :  { %v9285_v60 = vpop.permute.xlu0 %3909 }
 0x4a8   :  { %11336 = vst [vmem:[#allocation27_spill] sm:$0xff] %v9285_v60  ;;  %v9287_v47 = vpop.permute.xlu1 %3911  ;;  %v3213_v60 = vsel %vm11343_vm13, %v9173_v34, %v9175_v17  ;;  %vm11401_vm13 = vmmov %vm11346_vm5 }
 0x4a9   :  { %11337 = vst [vmem:[#allocation28_spill] sm:$0xff] %v9287_v47  ;;  %3717 = vrot.lane.b32.xlu0 %v9209_v20, %s7567_s20  ;;  %v3230_v17 = vmul.f32 %v7828_v38, %v3213_v60 }
 0x4aa   :  { %3719 = vrot.lane.b32.xlu1 %v9213_v21, %s7567_s20 }
 0x4ab   :  { %v9293_v28 = vpop.permute.xlu0 %3997 }
 0x4ac   :  { %11338 = vst [vmem:[#allocation29_spill] sm:$0xff] %v9293_v28  ;;  %v9295_v19 = vpop.permute.xlu1 %3999 }
 0x4ad   :  { %11339 = vst [vmem:[#allocation30_spill] sm:$0xff] %v9295_v19  ;;  %3773 = vrot.lane.b32.xlu0 %v9209_v20, %s7570_s26  ;;  %v3225_v19 = vsel %vm11342_vm3, 0.0, %v9173_v34  ;;  %vm11400_vm3 = vmmov %vm11399_vm1 }
 0x4ae   :  { %3775 = vrot.lane.b32.xlu1 %v9213_v21, %s7570_s26  ;;  %v3229_v34 = vmul.f32 %v7820_v36, %v3225_v19 }
 0x4af   :  { %v9301_v30 = vpop.permute.xlu0 %7362 }
 0x4b0   :  { %v3204_v56 = vpop.permute.xlu1 %3203 }
 0x4b1   :  { %3821 = vrot.lane.b32.xlu0 %v9209_v20, %s7569_s29 }
 0x4b2   :  { %3823 = vrot.lane.b32.xlu1 %v9213_v21, %s7569_s29 }
 0x4b3   :  { %v9307_v18 = vpop.permute.xlu0 %7367 }
 0x4b4   :  { %11340 = vst [vmem:[#allocation31_spill] sm:$0xff] %v9307_v18  ;;  %v9309_v5 = vpop.permute.xlu1 %3251 }
 0x4b5   :  { %3869 = vrot.lane.b32.xlu0 %v9209_v20, %s7575_s18 }
 0x4b6   :  { %3871 = vrot.lane.b32.xlu1 %v9213_v21, %s7575_s18 }
 0x4b7   :  { %v9315_v8 = vpop.permute.xlu0 %7372 }
 0x4b8   :  { %11341 = vst [vmem:[#allocation32_spill] sm:$0xff] %v9315_v8  ;;  %v9319_v28 = vpop.permute.xlu1 %7377  ;;  %v9332_v8 = vpack.i.bf16 %v9213_v21, %v9209_v20 }
 0x4b9   :  { %3917 = vrot.lane.b32.xlu0 %v9209_v20, %s7576_s19 }
 0x4ba   :  { %3919 = vrot.lane.b32.xlu1 %v9213_v21, %s7576_s19  ;;  %11344 = vst [vmem:[#allocation33_spill] sm:$0xff] %v9332_v8 }
 0x4bb   :  { %v3202_v47 = vpop.permute.xlu0 %3201 }
 0x4bc   :  { %v3214_v44 = vsel %vm11346_vm5, %v3202_v47, %v3204_v56  ;;  %v3226_v62 = vsel %vm11347_vm6, 0.0, %v3202_v47  ;;  %v9340_v52 = vpop.permute.xlu1 %3339  ;;  %v9352_v56 = vmax.f32 %v3080_v50, 0.0  ;;  %vm11402_vm6 = vmmov %vm11399_vm1 }
 0x4bd   :  { %v3231_v14 = vmul.f32 %v7820_v36, %v3226_v62  ;;  %v3232_v9 = vmul.f32 %v7828_v38, %v3214_v44  ;;  %7392 = vrot.lane.b32.xlu0 %v9332_v8, %s11242_s10 }
 0x4be   :  { %3211 = vrot.lane.b32.xlu1 %v9336_v33, %s11241_s9  ;;  %11348 = vst [vmem:[#allocation35_spill] sm:$0xff] %v9352_v56 }
 0x4bf   :  { %v6737_v7 = vpack.c.bf16 %v3231_v14, %v3229_v34  ;;  %v9350_v10 = vpop.permute.xlu0 %3249  ;;  %v6735_v47 = vpack.c.bf16 %v3232_v9, %v3230_v17  ;;  %v9366_v14 = vpack.i.bf16 %v9336_v33, %v9352_v56 }
 0x4c0   :  { %v9354_v27 = vpop.permute.xlu1 %3387 }
 0x4c1   :  { %7397 = vrot.lane.b32.xlu0 %v9332_v8, %s11247_s15  ;;  %6736 = vmatprep.subr.bf16.mxu0 %v6735_v47  ;;  %11349 = vst [vmem:[#allocation36_spill] sm:$0xff] %v9366_v14 }
 0x4c2   :  { %3259 = vrot.lane.b32.xlu1 %v9336_v33, %s11239_s30  ;;  %6738 = vmatpush1.bf16.msra.mxu0 %v6737_v7 }
 0x4c3   :  { %v9360_v62 = vpop.permute.xlu0 %3337 }
 0x4c4   :  { %v9362_v44 = vpop.permute.xlu1 %3435 }
 0x4c5   :  { %7402 = vrot.lane.b32.xlu0 %v9332_v8, %s7579_s24 }
 0x4c6   :  { %7407 = vrot.lane.b32.xlu1 %v9366_v14, %s11242_s10 }
 0x4c7   :  { %v9372_v9 = vpop.permute.xlu0 %3385 }
 0x4c8   :  { %v9374_v60 = vpop.permute.xlu1 %3483 }
 0x4c9   :  { %3209 = vrot.lane.b32.xlu0 %v9352_v56, %s11241_s9 }
 0x4ca   :  { %3347 = vrot.lane.b32.xlu1 %v9336_v33, %s11240_s8 }
 0x4cb   :  { %v9380_v19 = vpop.permute.xlu0 %3433 }
 0x4cc   :  { %v9382_v50 = vpop.permute.xlu1 %7382 }
 0x4cd   :  { %11350 = vst [vmem:[#allocation37_spill] sm:$0xff] %v9382_v50  ;;  %3257 = vrot.lane.b32.xlu0 %v9352_v56, %s11239_s30 }
 0x4ce   :  { %3395 = vrot.lane.b32.xlu1 %v9336_v33, %s11243_s11 }
 0x4cf   :  { %v9388_v34 = vpop.permute.xlu0 %3481 }
 0x4d0   :  { %v9390_v17 = vpop.permute.xlu1 %3571 }
 0x4d1   :  { %11351 = vst [vmem:[#allocation38_spill] sm:$0xff] %v9390_v17  ;;  %3345 = vrot.lane.b32.xlu0 %v9352_v56, %s11240_s8 }
 0x4d2   :  { %3443 = vrot.lane.b32.xlu1 %v9336_v33, %s7557_s21 }
 0x4d3   :  { %v9396_v7 = vpop.permute.xlu0 %3569 }
 0x4d4   :  { %11352 = vst [vmem:[#allocation39_spill] sm:$0xff] %v9396_v7  ;;  %v9398_v47 = vpop.permute.xlu1 %3619 }
 0x4d5   :  { %11353 = vst [vmem:[#allocation40_spill] sm:$0xff] %v9398_v47  ;;  %3393 = vrot.lane.b32.xlu0 %v9352_v56, %s11243_s11 }
 0x4d6   :  { %3491 = vrot.lane.b32.xlu1 %v9336_v33, %s11246_s14 }
 0x4d7   :  { %v9404_v8 = vpop.permute.xlu0 %3617 }
 0x4d8   :  { %11354 = vst [vmem:[#allocation41_spill] sm:$0xff] %v9404_v8  ;;  %v9406_v13 = vpop.permute.xlu1 %3667  ;;  %v5875_v8 = vcombine.high %v9489_v61, %v9489_v61  ;;  %v3151_v61 = vadd.f32 %v9005_v16, %v9009_v31 }
 0x4d9   :  { %11355 = vst [vmem:[#allocation42_spill] sm:$0xff] %v9406_v13  ;;  %3441 = vrot.lane.b32.xlu0 %v9352_v56, %s7557_s21 }
 0x4da   :  { %7412 = vrot.lane.b32.xlu1 %v9366_v14, %s11247_s15  ;;  %5947 = vmatprep.mubr.f32.mxu0 %v5875_v8 }
 0x4db   :  { %v9412_v12 = vpop.permute.xlu0 %3665  ;;  %6231 = vmatprep.mubr.f32.mxu1 %v5875_v8  ;;  %v9519_v8 = vmax.f32 %v3151_v61, 0.0 }
 0x4dc   :  { %11356 = vst [vmem:[#allocation43_spill] sm:$0xff] %v9412_v12  ;;  %v9414_v11 = vpop.permute.xlu1 %3715 }
 0x4dd   :  { %11357 = vst [vmem:[#allocation44_spill] sm:$0xff] %v9414_v11  ;;  %3489 = vrot.lane.b32.xlu0 %v9352_v56, %s11246_s14 }
 0x4de   :  { %3579 = vrot.lane.b32.xlu1 %v9336_v33, %s11249_s17 }
 0x4df   :  { %v9420_v43 = vpop.permute.xlu0 %3713 }
 0x4e0   :  { %11358 = vst [vmem:[#allocation45_spill] sm:$0xff] %v9420_v43  ;;  %v9422_v41 = vpop.permute.xlu1 %3771 }
 0x4e1   :  { %11359 = vst [vmem:[#allocation46_spill] sm:$0xff] %v9422_v41  ;;  %3577 = vrot.lane.b32.xlu0 %v9352_v56, %s11249_s17 }
 0x4e2   :  { %3627 = vrot.lane.b32.xlu1 %v9336_v33, %s7562_s28 }
 0x4e3   :  { %v9428_v13 = vpop.permute.xlu0 %3769 }
 0x4e4   :  { %11360 = vst [vmem:[#allocation47_spill] sm:$0xff] %v9428_v13  ;;  %v9430_v12 = vpop.permute.xlu1 %3819 }
 0x4e5   :  { %11361 = vst [vmem:[#allocation48_spill] sm:$0xff] %v9430_v12  ;;  %3625 = vrot.lane.b32.xlu0 %v9352_v56, %s7562_s28 }
 0x4e6   :  { %3675 = vrot.lane.b32.xlu1 %v9336_v33, %s7568_s0 }
 0x4e7   :  { %v9436_v11 = vpop.permute.xlu0 %3817 }
 0x4e8   :  { %11362 = vst [vmem:[#allocation49_spill] sm:$0xff] %v9436_v11  ;;  %v9438_v43 = vpop.permute.xlu1 %3867 }
 0x4e9   :  { %11363 = vst [vmem:[#allocation50_spill] sm:$0xff] %v9438_v43  ;;  %3673 = vrot.lane.b32.xlu0 %v9352_v56, %s7568_s0 }
 0x4ea   :  { %3723 = vrot.lane.b32.xlu1 %v9336_v33, %s7567_s20 }
 0x4eb   :  { %v9444_v41 = vpop.permute.xlu0 %3865 }
 0x4ec   :  { %11364 = vst [vmem:[#allocation51_spill] sm:$0xff] %v9444_v41  ;;  %v9446_v13 = vpop.permute.xlu1 %3915 }
 0x4ed   :  { %11365 = vst [vmem:[#allocation52_spill] sm:$0xff] %v9446_v13  ;;  %3721 = vrot.lane.b32.xlu0 %v9352_v56, %s7567_s20 }
 0x4ee   :  { %3779 = vrot.lane.b32.xlu1 %v9336_v33, %s7570_s26 }
 0x4ef   :  { %v9452_v12 = vpop.permute.xlu0 %3913 }
 0x4f0   :  { %11366 = vst [vmem:[#allocation53_spill] sm:$0xff] %v9452_v12  ;;  %v9454_v11 = vpop.permute.xlu1 %7387 }
 0x4f1   :  { %11367 = vst [vmem:[#allocation54_spill] sm:$0xff] %v9454_v11  ;;  %3777 = vrot.lane.b32.xlu0 %v9352_v56, %s7570_s26 }
 0x4f2   :  { %3827 = vrot.lane.b32.xlu1 %v9336_v33, %s7569_s29 }
 0x4f3   :  { %v9460_v43 = vpop.permute.xlu0 %4001 }
 0x4f4   :  { %11368 = vst [vmem:[#allocation55_spill] sm:$0xff] %v9460_v43  ;;  %v9462_v41 = vpop.permute.xlu1 %4003 }
 0x4f5   :  { %11369 = vst [vmem:[#allocation56_spill] sm:$0xff] %v9462_v41  ;;  %3825 = vrot.lane.b32.xlu0 %v9352_v56, %s7569_s29 }
 0x4f6   :  { %3875 = vrot.lane.b32.xlu1 %v9336_v33, %s7575_s18 }
 0x4f7   :  { %v9468_v13 = vpop.permute.xlu0 %3205 }
 0x4f8   :  { %v9470_v12 = vpop.permute.xlu1 %3207 }
 0x4f9   :  { %3873 = vrot.lane.b32.xlu0 %v9352_v56, %s7575_s18 }
 0x4fa   :  { %3923 = vrot.lane.b32.xlu1 %v9336_v33, %s7576_s19 }
 0x4fb   :  { %v9476_v11 = vpop.permute.xlu0 %3253 }
 0x4fc   :  { %v9478_v43 = vpop.permute.xlu1 %3255 }
 0x4fd   :  { %3921 = vrot.lane.b32.xlu0 %v9352_v56, %s7576_s19 }
 0x4fe   :  { %7417 = vrot.lane.b32.xlu1 %v9366_v14, %s7579_s24 }
 0x4ff   :  { %v9484_v41 = vpop.permute.xlu0 %3341 }
 0x500   :  { %v9491_v57 = vpop.permute.xlu1 %3343 }
 0x501   :  { %4005 = vrot.lane.b32.xlu0 %v9209_v20, %s7577_s22  ;;  %v3153_v20 = vadd.f32 %v9007_v24, %v9009_v31  ;;  %v3159_v24 = vadd.f32 %v9017_v40, %v9093_v25  ;;  %v3165_v40 = vadd.f32 %v9027_v0, %v9165_v51  ;;  %v3171_v0 = vadd.f32 %v9039_v63, %v9167_v45 }
 0x502   :  { %4007 = vrot.lane.b32.xlu1 %v9213_v21, %s7577_s22 }
 0x503   :  { %v9499_v14 = vpop.permute.xlu0 %3389  ;;  %v9525_v16 = vmax.f32 %v3153_v20, 0.0  ;;  %v9541_v20 = vmax.f32 %v3159_v24, 0.0  ;;  %v9557_v24 = vmax.f32 %v3165_v40, 0.0 }
 0x504   :  { %v9501_v47 = vpop.permute.xlu1 %3391 }
 0x505   :  { %4009 = vrot.lane.b32.xlu0 %v9352_v56, %s7577_s22  ;;  %v3157_v56 = vadd.f32 %v9013_v3, %v9093_v25  ;;  %v3163_v3 = vadd.f32 %v9025_v58, %v9165_v51  ;;  %v3169_v58 = vadd.f32 %v9037_v42, %v9167_v45  ;;  %v9571_v42 = vmax.f32 %v3171_v0, 0.0 }
 0x506   :  { %4011 = vrot.lane.b32.xlu1 %v9336_v33, %s7577_s22 }
 0x507   :  { %v9509_v6 = vpop.permute.xlu0 %3437  ;;  %v9535_v61 = vmax.f32 %v3157_v56, 0.0  ;;  %v9551_v56 = vmax.f32 %v3163_v3, 0.0  ;;  %v9567_v3 = vmax.f32 %v3169_v58, 0.0 }
 0x508   :  { %v9513_v21 = vpop.permute.xlu1 %3439 }
 0x509   :  { %4045 = vrot.lane.b32.xlu0 %v9015_v26, %s11371_s1 }
 0x50a   :  { %4047 = vrot.lane.b32.xlu1 %v9019_v55, %s11371_s1 }
 0x50b   :  { %v9523_v33 = vpop.permute.xlu0 %3485 }
 0x50c   :  { %11372 = vst [vmem:[#allocation58_spill] sm:$0xff] %v9523_v33  ;;  %v9529_v31 = vpop.permute.xlu1 %3487 }
 0x50d   :  { %11373 = vst [vmem:[#allocation59_spill] sm:$0xff] %v9529_v31  ;;  %4333 = vrot.lane.b32.xlu0 %v9519_v8, %s11241_s9 }
 0x50e   :  { %4335 = vrot.lane.b32.xlu1 %v9525_v16, %s11241_s9 }
 0x50f   :  { %v9539_v26 = vpop.permute.xlu0 %3573 }
 0x510   :  { %11374 = vst [vmem:[#allocation60_spill] sm:$0xff] %v9539_v26  ;;  %v9545_v25 = vpop.permute.xlu1 %3575 }
 0x511   :  { %11375 = vst [vmem:[#allocation61_spill] sm:$0xff] %v9545_v25  ;;  %4337 = vrot.lane.b32.xlu0 %v9535_v61, %s11241_s9 }
 0x512   :  { %4339 = vrot.lane.b32.xlu1 %v9541_v20, %s11241_s9 }
 0x513   :  { %v9555_v55 = vpop.permute.xlu0 %3621 }
 0x514   :  { %11376 = vst [vmem:[#allocation62_spill] sm:$0xff] %v9555_v55  ;;  %v9561_v51 = vpop.permute.xlu1 %3623 }
 0x515   :  { %11377 = vst [vmem:[#allocation63_spill] sm:$0xff] %v9561_v51  ;;  %4341 = vrot.lane.b32.xlu0 %v9551_v56, %s11241_s9 }
 0x516   :  { %4343 = vrot.lane.b32.xlu1 %v9557_v24, %s11241_s9 }
 0x517   :  { %v9569_v26 = vpop.permute.xlu0 %3669 }
 0x518   :  { %11378 = vst [vmem:[#allocation64_spill] sm:$0xff] %v9569_v26  ;;  %v9573_v55 = vpop.permute.xlu1 %3671  ;;  %v9621_v26 = vpack.i.bf16 %v9541_v20, %v9535_v61 }
 0x519   :  { %11379 = vst [vmem:[#allocation65_spill] sm:$0xff] %v9573_v55  ;;  %4345 = vrot.lane.b32.xlu0 %v9567_v3, %s11241_s9 }
 0x51a   :  { %4347 = vrot.lane.b32.xlu1 %v9571_v42, %s11241_s9  ;;  %11391 = vst [vmem:[#allocation77_spill] sm:$0xff] %v9621_v26  ;;  %s11613_s9 = smov 98  }
 0x51b   :  { %v9579_v63 = vpop.permute.xlu0 %3717 }
 0x51c   :  { %11380 = vst [vmem:[#allocation66_spill] sm:$0xff] %v9579_v63  ;;  %v9581_v45 = vpop.permute.xlu1 %3719 }
 0x51d   :  { %11381 = vst [vmem:[#allocation67_spill] sm:$0xff] %v9581_v45  ;;  %4381 = vrot.lane.b32.xlu0 %v9519_v8, %s11239_s30 }
 0x51e   :  { %4383 = vrot.lane.b32.xlu1 %v9525_v16, %s11239_s30 }
 0x51f   :  { %v9587_v40 = vpop.permute.xlu0 %3773 }
 0x520   :  { %11382 = vst [vmem:[#allocation68_spill] sm:$0xff] %v9587_v40  ;;  %v9589_v58 = vpop.permute.xlu1 %3775 }
 0x521   :  { %11383 = vst [vmem:[#allocation69_spill] sm:$0xff] %v9589_v58  ;;  %4385 = vrot.lane.b32.xlu0 %v9535_v61, %s11239_s30 }
 0x522   :  { %4387 = vrot.lane.b32.xlu1 %v9541_v20, %s11239_s30 }
 0x523   :  { %v9595_v0 = vpop.permute.xlu0 %3821 }
 0x524   :  { %11384 = vst [vmem:[#allocation70_spill] sm:$0xff] %v9595_v0  ;;  %v9597_v63 = vpop.permute.xlu1 %3823  ;;  %v9615_v0 = vpack.i.bf16 %v9525_v16, %v9519_v8 }
 0x525   :  { %11385 = vst [vmem:[#allocation71_spill] sm:$0xff] %v9597_v63  ;;  %4389 = vrot.lane.b32.xlu0 %v9551_v56, %s11239_s30 }
 0x526   :  { %4391 = vrot.lane.b32.xlu1 %v9557_v24, %s11239_s30  ;;  %11389 = vst [vmem:[#allocation75_spill] sm:$0xff] %v9615_v0 }
 0x527   :  { %v9603_v45 = vpop.permute.xlu0 %3869 }
 0x528   :  { %11386 = vst [vmem:[#allocation72_spill] sm:$0xff] %v9603_v45  ;;  %v9605_v40 = vpop.permute.xlu1 %3871 }
 0x529   :  { %11387 = vst [vmem:[#allocation73_spill] sm:$0xff] %v9605_v40  ;;  %4393 = vrot.lane.b32.xlu0 %v9567_v3, %s11239_s30 }
 0x52a   :  { %4395 = vrot.lane.b32.xlu1 %v9571_v42, %s11239_s30 }
 0x52b   :  { %v9611_v58 = vpop.permute.xlu0 %3917 }
 0x52c   :  { %11388 = vst [vmem:[#allocation74_spill] sm:$0xff] %v9611_v58  ;;  %v9617_v63 = vpop.permute.xlu1 %3919  ;;  %v9631_v58 = vpack.i.bf16 %v9557_v24, %v9551_v56 }
 0x52d   :  { %11390 = vst [vmem:[#allocation76_spill] sm:$0xff] %v9617_v63  ;;  %7422 = vrot.lane.b32.xlu0 %v9615_v0, %s11242_s10  ;;  %v9635_v63 = vpack.i.bf16 %v9571_v42, %v9567_v3  ;;  %v3215_v0 = vsel %vm11398_vm9, %v9468_v13, %v9470_v12  ;;  %vm11405_vm9 = vmmov %vm11399_vm1 }
 0x52e   :  { %7427 = vrot.lane.b32.xlu1 %v9621_v26, %s11242_s10  ;;  %11392 = vst [vmem:[#allocation78_spill] sm:$0xff] %v9631_v58  ;;  %v3234_v12 = vmul.f32 %v7828_v38, %v3215_v0 }
 0x52f   :  { %v9627_v45 = vpop.permute.xlu0 %7392  ;;  %11393 = vst [vmem:[#allocation79_spill] sm:$0xff] %v9635_v63 }
 0x530   :  { %v3212_v40 = vpop.permute.xlu1 %3211 }
 0x531   :  { %7432 = vrot.lane.b32.xlu0 %v9631_v58, %s11242_s10  ;;  %v3262_v58 = vsel %vm11396_vm11, %v9350_v10, %v9309_v5  ;;  %v3274_v5 = vsel %vm11400_vm3, 0.0, %v9350_v10  ;;  %v3273_v10 = vsel %vm11402_vm6, 0.0, %v9181_v1  ;;  %vm11403_vm11 = vmmov %vm11399_vm1  ;;  %vm11406_vm3 = vcmask 261120  }
 0x532   :  { %7437 = vrot.lane.b32.xlu1 %v9635_v63, %s11242_s10  ;;  %v3227_v63 = vsel %vm11397_vm8, 0.0, %v9468_v13  ;;  %v3280_v7 = vmul.f32 %v7832_v39, %v3262_v58  ;;  %v3279_v0 = vmul.f32 %v7824_v37, %v3274_v5  ;;  %vm11404_vm8 = vmmov %vm11399_vm1  ;;  %v7379_v5 = vunpack.i.l.bf16 %v9319_v28  ;;  %s11618_s10 = smov 97  }
 0x533   :  { %v9641_v55 = vpop.permute.xlu0 %7397  ;;  %v3233_v13 = vmul.f32 %v7820_v36, %v3227_v63 }
 0x534   :  { %11394 = vst [vmem:[#allocation80_spill] sm:$0xff] %v9641_v55  ;;  %v3260_v51 = vpop.permute.xlu1 %3259 }
 0x535   :  { %4469 = vrot.lane.b32.xlu0 %v9519_v8, %s11240_s8 }
 0x536   :  { %4471 = vrot.lane.b32.xlu1 %v9525_v16, %s11240_s8 }
 0x537   :  { %v9647_v25 = vpop.permute.xlu0 %7402 }
 0x538   :  { %11395 = vst [vmem:[#allocation81_spill] sm:$0xff] %v9647_v25  ;;  %v9649_v26 = vpop.permute.xlu1 %7407  ;;  %v3261_v25 = vsel %vm11399_vm1, %v9181_v1, %v9183_v32 }
 0x539   :  { %4473 = vrot.lane.b32.xlu0 %v9535_v61, %s11240_s8 }
 0x53a   :  { %4475 = vrot.lane.b32.xlu1 %v9541_v20, %s11240_s8 }
 0x53b   :  { %v3210_v15 = vpop.permute.xlu0 %3209 }
 0x53c   :  { %v3216_v17 = vsel %vm11401_vm13, %v3210_v15, %v3212_v40  ;;  %v3228_v55 = vsel %vm11346_vm5, 0.0, %v3210_v15  ;;  %v9671_v18 = vpop.permute.xlu1 %3347  ;;  %v3278_v15 = vmul.f32 %v7832_v39, %v3261_v25  ;;  %v7380_v25 = vunpack.i.h.bf16 %v9319_v28  ;;  %vm11407_vm13 = vmmov %vm11406_vm3 }
 0x53d   :  { %v3235_v50 = vmul.f32 %v7820_v36, %v3228_v55  ;;  %v3236_v32 = vmul.f32 %v7828_v38, %v3216_v17  ;;  %4477 = vrot.lane.b32.xlu0 %v9551_v56, %s11240_s8  ;;  %v3263_v55 = vsel %vm11403_vm11, %v9476_v11, %v9478_v43  ;;  %v3275_v43 = vsel %vm11399_vm1, 0.0, %v9476_v11  ;;  %vm11408_vm5 = vmmov %vm11406_vm3 }
 0x53e   :  { %4479 = vrot.lane.b32.xlu1 %v9557_v24, %s11240_s8  ;;  %v6743_v1 = vpack.c.bf16 %v3280_v7, %v3278_v15  ;;  %v7364_v7 = vunpack.i.l.bf16 %v9301_v30  ;;  %v7410_v11 = vunpack.i.h.bf16 %v9649_v26  ;;  %vm6495_vm6 = vmneg %vm11408_vm5  ;;  %vm11409_vm11 = vcmask 252928  }
 0x53f   :  { %v6741_v40 = vpack.c.bf16 %v3235_v50, %v3233_v13  ;;  %v3258_v58 = vpop.permute.xlu0 %3257  ;;  %v6739_v63 = vpack.c.bf16 %v3236_v32, %v3234_v12  ;;  %v3277_v50 = vmul.f32 %v7824_v37, %v3273_v10  ;;  %v7365_v12 = vunpack.i.h.bf16 %v9301_v30  ;;  %vm11413_vm1 = vmmov %vm11409_vm11 }
 0x540   :  { %v3264_v17 = vsel %vm11404_vm8, %v3258_v58, %v3260_v51  ;;  %v9689_v33 = vpop.permute.xlu1 %3395  ;;  %v3276_v31 = vsel %vm11405_vm9, 0.0, %v3258_v58  ;;  %v3282_v51 = vmul.f32 %v7832_v39, %v3263_v55  ;;  %v7409_v58 = vunpack.i.l.bf16 %v9649_v26  ;;  %vm11410_vm8 = vmmov %vm11406_vm3 }
 0x541   :  { %v3284_v48 = vmul.f32 %v7832_v39, %v3264_v17  ;;  %6740 = vmatprep.subr.bf16.mxu0 %v6739_v63  ;;  %4481 = vrot.lane.b32.xlu0 %v9567_v3, %s11240_s8  ;;  %v6745_v32 = vpack.c.bf16 %v3279_v0, %v3277_v50  ;;  %v3283_v10 = vmul.f32 %v7824_v37, %v3276_v31  ;;  %v7395_v31 = vunpack.i.h.bf16 %v9627_v45  ;;  %vm9734_vm9 = vmpackc.low %vm6495_vm6, %vm6495_vm6 }
 0x542   :  { %6742 = vmatpush1.bf16.msra.mxu0 %v6741_v40  ;;  %4483 = vrot.lane.b32.xlu1 %v9571_v42, %s11240_s8  ;;  %v3281_v40 = vmul.f32 %v7824_v37, %v3275_v43  ;;  %v3310_v30 = vsel %vm11406_vm3, %v7379_v5, %v7380_v25  ;;  %v7394_v0 = vunpack.i.l.bf16 %v9627_v45  ;;  %v3309_v17 = vsel %vm11407_vm13, %v7364_v7, %v7365_v12  ;;  %vm11414_vm13 = vmmov %vm11413_vm1 }
 0x543   :  { %v3346_v13 = vpop.permute.xlu0 %3345  ;;  %6744 = vmatprep.subr.bf16.mxu0 %v6743_v1  ;;  %v6747_v28 = vpack.c.bf16 %v3284_v48, %v3282_v51  ;;  %v6751_v26 = vpack.c.bf16 %v3310_v30, %v3309_v17  ;;  %v3350_v1 = vsel %vm11409_vm11, %v9360_v62, %v9340_v52  ;;  %v3312_v45 = vsel %vm11410_vm8, %v7409_v58, %v7410_v11  ;;  %vm11415_vm5 = vmmov %vm11413_vm1 }
 0x544   :  { %v9706_v15 = vpop.permute.xlu1 %3443  ;;  %v6749_v48 = vpack.c.bf16 %v3283_v10, %v3281_v40  ;;  %v3349_v43 = vsel %vm11413_vm1, %v9189_v49, %v9191_v53  ;;  %v6753_v51 = vpack.c.bf16 %v7379_v5, %v7364_v7  ;;  %v3311_v52 = vsel %vm11406_vm3, %v7394_v0, %v7395_v31  ;;  %vm11416_vm6 = vmmov %vm11413_vm1 }
 0x545   :  { %4517 = vrot.lane.b32.xlu0 %v9519_v8, %s11243_s11  ;;  %v3368_v10 = vmul.f32 %v7910_v35, %v3350_v1  ;;  %v3352_v40 = vsel %vm11415_vm5, %v3346_v13, %v9671_v18  ;;  %v3361_v53 = vsel %vm11416_vm6, 0.0, %v9189_v49  ;;  %vm11417_vm11 = vmmov %vm11413_vm1  ;;  %v6758_v11 = vpack.c.bf16 %v7409_v58, %v7394_v0 }
 0x546   :  { %6746 = vmatpush1.bf16.msra.mxu0 %v6745_v32  ;;  %4519 = vrot.lane.b32.xlu1 %v9525_v16, %s11243_s11  ;;  %v3362_v32 = vsel %vm11414_vm13, 0.0, %v9360_v62  ;;  %v3366_v62 = vmul.f32 %v7910_v35, %v3349_v43  ;;  %v3351_v18 = vsel %vm11417_vm11, %v9484_v41, %v9491_v57  ;;  %vm11418_vm8 = vmmov %vm11413_vm1  ;;  %v3365_v17 = vmul.f32 %v7889_v23, %v3361_v53 }
 0x547   :  { %v9716_v63 = vpop.permute.xlu0 %3393  ;;  %6748 = vmatprep.subr.bf16.mxu0 %v6747_v28  ;;  %v6756_v28 = vpack.c.bf16 %v3312_v45, %v3311_v52  ;;  %v3367_v7 = vmul.f32 %v7889_v23, %v3362_v32  ;;  %v3364_v31 = vsel %vm11418_vm8, 0.0, %v3346_v13  ;;  %vm11419_vm1 = vcmask 244736   ;;  %vm11420_vm3 = vmmov %vm11415_vm5 }
 0x548   :  { %v9720_v55 = vpop.permute.xlu1 %3491  ;;  %v6761_v49 = vpack.c.bf16 %v3368_v10, %v3366_v62  ;;  %v3363_v57 = vsel %vm11420_vm3, 0.0, %v9484_v41  ;;  %v3370_v13 = vmul.f32 %v7910_v35, %v3351_v18  ;;  %vm11421_vm13 = vmmov %vm11419_vm1  ;;  %v3412_v62 = vsel %vm11419_vm1, 0.0, %v9716_v63 }
 0x549   :  { %4521 = vrot.lane.b32.xlu0 %v9535_v61, %s11243_s11  ;;  %v3397_v0 = vsel %vm11421_vm13, %v9199_v46, %v9203_v29  ;;  %v6763_v1 = vpack.c.bf16 %v3367_v7, %v3365_v17  ;;  %vm11422_vm5 = vmmov %vm11419_vm1  ;;  %v3369_v52 = vmul.f32 %v7889_v23, %v3363_v57  ;;  %vm11426_vm3 = vcmask 146432  }
 0x54a   :  { %6750 = vmatpush1.bf16.msra.mxu0 %v6749_v48  ;;  %4523 = vrot.lane.b32.xlu1 %v9541_v20, %s11243_s11  ;;  %v3372_v48 = vmul.f32 %v7910_v35, %v3352_v40  ;;  %v3410_v43 = vsel %vm11422_vm5, 0.0, %v9372_v9  ;;  %vm11423_vm6 = vmmov %vm11419_vm1  ;;  %v3419_v17 = vmul.f32 %v7934_v54, %v3412_v62 }
 0x54b   :  { %v9732_v50 = vpop.permute.xlu0 %3441  ;;  %6752 = vmatprep.subr.bf16.mxu0 %v6751_v26  ;;  %v3398_v26 = vsel %vm11419_vm1, %v9372_v9, %v9354_v27  ;;  %v3371_v27 = vmul.f32 %v7889_v23, %v3364_v31  ;;  %v3400_v29 = vsel %vm11423_vm6, %v9716_v63, %v9689_v33  ;;  %vm11424_vm11 = vmmov %vm11419_vm1  ;;  %v3414_v9 = vmul.f32 %v7953_v2, %v3397_v0 }
 0x54c   :  { %v9741_v12 = vpop.permute.xlu1 %7412  ;;  %v6765_v41 = vpack.c.bf16 %v3372_v48, %v3370_v13  ;;  %v3409_v32 = vsel %vm11424_vm11, 0.0, %v9199_v46  ;;  %vm11425_vm8 = vmmov %vm11419_vm1  ;;  %v3420_v7 = vmul.f32 %v7953_v2, %v3400_v29 }
 0x54d   :  { %4525 = vrot.lane.b32.xlu0 %v9551_v56, %s11243_s11  ;;  %v3399_v40 = vsel %vm11425_vm8, %v9499_v14, %v9501_v47  ;;  %v6767_v53 = vpack.c.bf16 %v3371_v27, %v3369_v52  ;;  %v3413_v18 = vmul.f32 %v7934_v54, %v3409_v32  ;;  %vm11427_vm13 = vmmov %vm11419_vm1 }
 0x54e   :  { %6755 = vmatpush1.bf16.msk.msra.mxu0 %vm9734_vm9, %v6753_v51  ;;  %4527 = vrot.lane.b32.xlu1 %v9557_v24, %s11243_s11  ;;  %v3416_v51 = vmul.f32 %v7953_v2, %v3398_v26  ;;  %v3411_v47 = vsel %vm11427_vm13, 0.0, %v9499_v14  ;;  %v3418_v63 = vmul.f32 %v7953_v2, %v3399_v40  ;;  %vm11428_vm5 = vmmov %vm11426_vm3  ;;  %vm11434_vm13 = vcmask 138240  }
 0x54f   :  { %v9758_v5 = vpop.permute.xlu0 %3489  ;;  %6757 = vmatprep.subr.bf16.mxu0 %v6756_v28  ;;  %v3415_v28 = vmul.f32 %v7934_v54, %v3410_v43  ;;  %v3445_v48 = vsel %vm11428_vm5, %v9211_v22, %v9215_v59  ;;  %vm11429_vm6 = vmmov %vm11426_vm3  ;;  %v3417_v13 = vmul.f32 %v7934_v54, %v3411_v47  ;;  %v3494_v32 = vsel %vm11434_vm13, %v9388_v34, %v9374_v60 }
 0x550   :  { %v9764_v30 = vpop.permute.xlu1 %3579  ;;  %v6769_v46 = vpack.c.bf16 %v3416_v51, %v3414_v9  ;;  %v3458_v26 = vsel %vm11429_vm6, 0.0, %v9380_v19  ;;  %v6773_v14 = vpack.c.bf16 %v3420_v7, %v3418_v63  ;;  %vm11430_vm11 = vmmov %vm11426_vm3 }
 0x551   :  { %4529 = vrot.lane.b32.xlu0 %v9567_v3, %s11243_s11  ;;  %v3448_v59 = vsel %vm11430_vm11, %v9732_v50, %v9706_v15  ;;  %vm11431_vm8 = vmmov %vm11426_vm3  ;;  %v3463_v27 = vmul.f32 %v7820_v36, %v3458_v26  ;;  %v6775_v51 = vpack.c.bf16 %v3419_v17, %v3417_v13 }
 0x552   :  { %6760 = vmatpush1.bf16.msk.msra.mxu0 %vm9734_vm9, %v6758_v11  ;;  %4531 = vrot.lane.b32.xlu1 %v9571_v42, %s11243_s11  ;;  %v3446_v11 = vsel %vm11426_vm3, %v9380_v19, %v9362_v44  ;;  %v3457_v0 = vsel %vm11431_vm8, 0.0, %v9211_v22  ;;  %v3462_v19 = vmul.f32 %v7828_v38, %v3445_v48  ;;  %vm11432_vm1 = vmmov %vm11426_vm3  ;;  %v3468_v52 = vmul.f32 %v7828_v38, %v3448_v59  ;;  %v11441_v48 = vld [vmem:[#allocation59_spill] sm:$0xff] }
 0x553   :  { %v9781_v58 = vpop.permute.xlu0 %3577  ;;  %6762 = vmatprep.subr.bf16.mxu0 %v6761_v49  ;;  %v6771_v49 = vpack.c.bf16 %v3415_v28, %v3413_v18  ;;  %v3464_v57 = vmul.f32 %v7828_v38, %v3446_v11  ;;  %v3447_v43 = vsel %vm11432_vm1, %v9509_v6, %v9513_v21  ;;  %vm11433_vm3 = vmmov %vm11432_vm1  ;;  %v3461_v29 = vmul.f32 %v7820_v36, %v3457_v0  ;;  %v11436_v28 = vld [vmem:[#allocation12_spill] sm:$0xff]  ;;  %v11445_v0 = vld [vmem:[#allocation37_spill] sm:$0xff] }
 0x554   :  { %v9787_v45 = vpop.permute.xlu1 %3627  ;;  %vm11435_vm5 = vmmov %vm11432_vm1 }
 0x555   :  { %4565 = vrot.lane.b32.xlu0 %v9519_v8, %s7557_s21  ;;  %v6777_v22 = vpack.c.bf16 %v3464_v57, %v3462_v19  ;;  %v3459_v21 = vsel %vm11435_vm5, 0.0, %v9509_v6  ;;  %vm11437_vm6 = vmmov %vm11434_vm13  ;;  %v7385_v19 = vunpack.i.h.bf16 %v11445_v0 }
 0x556   :  { %6764 = vmatpush1.bf16.msra.mxu0 %v6763_v1  ;;  %4567 = vrot.lane.b32.xlu1 %v9525_v16, %s7557_s21  ;;  %v3493_v40 = vsel %vm11437_vm6, %v11436_v28, %v9223_v4  ;;  %vm11438_vm11 = vmmov %vm11437_vm6  ;;  %v3465_v18 = vmul.f32 %v7820_v36, %v3459_v21 }
 0x557   :  { %v9803_v10 = vpop.permute.xlu0 %3625  ;;  %6766 = vmatprep.subr.bf16.mxu0 %v6765_v41  ;;  %v3460_v41 = vsel %vm11433_vm3, 0.0, %v9732_v50  ;;  %v3466_v50 = vmul.f32 %v7828_v38, %v3447_v43  ;;  %v3506_v7 = vsel %vm11438_vm11, 0.0, %v9388_v34  ;;  %vm11439_vm8 = vmmov %vm11437_vm6  ;;  %v3510_v34 = vmul.f32 %v7832_v39, %v3493_v40 }
 0x558   :  { %v9809_v33 = vpop.permute.xlu1 %3675  ;;  %v3467_v62 = vmul.f32 %v7820_v36, %v3460_v41  ;;  %v3496_v4 = vsel %vm11439_vm8, %v9758_v5, %v9720_v55  ;;  %vm11440_vm1 = vmmov %vm11437_vm6  ;;  %v3511_v63 = vmul.f32 %v7824_v37, %v3506_v7  ;;  %v11447_v41 = vld [vmem:[#allocation31_spill] sm:$0xff]  ;;  %v7415_v40 = vunpack.i.h.bf16 %v9741_v12 }
 0x559   :  { %4569 = vrot.lane.b32.xlu0 %v9535_v61, %s7557_s21  ;;  %v6781_v6 = vpack.c.bf16 %v3468_v52, %v3466_v50  ;;  %v3505_v11 = vsel %vm11440_vm1, 0.0, %v11436_v28  ;;  %vm11443_vm3 = vmmov %vm11440_vm1  ;;  %v7370_v52 = vunpack.i.h.bf16 %v11447_v41  ;;  %vm11448_vm6 = vcmask 130048  }
 0x55a   :  { %6768 = vmatpush1.bf16.msra.mxu0 %v6767_v53  ;;  %4571 = vrot.lane.b32.xlu1 %v9541_v20, %s7557_s21  ;;  %v6779_v53 = vpack.c.bf16 %v3463_v27, %v3461_v29  ;;  %v6783_v26 = vpack.c.bf16 %v3467_v62, %v3465_v18  ;;  %vm11444_vm13 = vmmov %vm11440_vm1  ;;  %v3509_v59 = vmul.f32 %v7824_v37, %v3505_v11  ;;  %v7384_v27 = vunpack.i.l.bf16 %v11445_v0 }
 0x55b   :  { %v9825_v31 = vpop.permute.xlu0 %3673  ;;  %6770 = vmatprep.subr.bf16.mxu0 %v6769_v46  ;;  %v3512_v46 = vmul.f32 %v7832_v39, %v3494_v32  ;;  %v3508_v57 = vsel %vm11444_vm13, 0.0, %v9758_v5  ;;  %vm11446_vm5 = vmmov %vm11440_vm1 }
 0x55c   :  { %v9831_v44 = vpop.permute.xlu1 %3723  ;;  %v6787_v29 = vpack.c.bf16 %v3511_v63, %v3509_v59  ;;  %v3515_v32 = vmul.f32 %v7824_v37, %v3508_v57  ;;  %v3542_v62 = vsel %vm11448_vm6, %v7384_v27, %v7385_v19  ;;  %vm11450_vm11 = vmmov %vm11448_vm6  ;;  %v11452_v63 = vld [vmem:[#allocation38_spill] sm:$0xff]  ;;  %v7526_v57 = vld [vmem:[%s11086_s5] sm:$0xff] }
 0x55d   :  { %4573 = vrot.lane.b32.xlu0 %v9551_v56, %s7557_s21  ;;  %v6785_v13 = vpack.c.bf16 %v3512_v46, %v3510_v34  ;;  %v11449_v46 = vld [vmem:[#allocation80_spill] sm:$0xff]  ;;  %vm11451_vm8 = vmmov %vm11448_vm6 }
 0x55e   :  { %6772 = vmatpush1.bf16.msra.mxu0 %v6771_v49  ;;  %4575 = vrot.lane.b32.xlu1 %v9557_v24, %s7557_s21  ;;  %v11442_v49 = vld [vmem:[#allocation58_spill] sm:$0xff]  ;;  %v7399_v18 = vunpack.i.l.bf16 %v11449_v46  ;;  %vm6503_vm1 = vmneg %vm11451_vm8 }
 0x55f   :  { %v9847_v1 = vpop.permute.xlu0 %3721  ;;  %6774 = vmatprep.subr.bf16.mxu0 %v6773_v14  ;;  %v3495_v17 = vsel %vm11443_vm3, %v11442_v49, %v11441_v48  ;;  %v3516_v14 = vmul.f32 %v7832_v39, %v3496_v4  ;;  %v3507_v43 = vsel %vm11446_vm5, 0.0, %v11442_v49  ;;  %v11453_v48 = vld [vmem:[#allocation39_spill] sm:$0xff]  ;;  %vm11454_vm3 = vmmov %vm11448_vm6  ;;  %vm11479_vm6 = vcmask 277504  }
 0x560   :  { %v9853_v15 = vpop.permute.xlu1 %3779  ;;  %v3514_v5 = vmul.f32 %v7832_v39, %v3495_v17  ;;  %v3513_v28 = vmul.f32 %v7824_v37, %v3507_v43  ;;  %v3582_v49 = vsel %vm690_vm15, %v11453_v48, %v11452_v63  ;;  %vm9945_vm13 = vmpackc.low %vm6503_vm1, %vm6503_vm1 }
 0x561   :  { %4577 = vrot.lane.b32.xlu0 %v9567_v3, %s7557_s21  ;;  %vm11459_vm5 = vmmov %vm11454_vm3 }
 0x562   :  { %6776 = vmatpush1.bf16.msra.mxu0 %v6775_v51  ;;  %4579 = vrot.lane.b32.xlu1 %v9571_v42, %s7557_s21  ;;  %v6789_v50 = vpack.c.bf16 %v3516_v14, %v3514_v5  ;;  %v6791_v4 = vpack.c.bf16 %v3515_v32, %v3513_v28  ;;  %v11457_v14 = vld [vmem:[#allocation14_spill] sm:$0xff]  ;;  %v3594_v5 = vsel %vm690_vm15, 0.0, %v11453_v48  ;;  %v3584_v32 = vsel %vm690_vm15, %v9781_v58, %v9764_v30  ;;  %vm11481_vm8 = vmmov %vm11479_vm6 }
 0x563   :  { %v9869_v9 = vpop.permute.xlu0 %3777  ;;  %6778 = vmatprep.subr.bf16.mxu0 %v6777_v22  ;;  %v7369_v22 = vunpack.i.l.bf16 %v11447_v41  ;;  %v3600_v41 = vmul.f32 %v7910_v35, %v3582_v49  ;;  %v3604_v63 = vmul.f32 %v7910_v35, %v3584_v32  ;;  %v11464_v48 = vld [vmem:[#allocation78_spill] sm:$0xff]  ;;  %vm11482_vm1 = vmmov %vm11479_vm6 }
 0x564   :  { %v9875_v60 = vpop.permute.xlu1 %3827 }
 0x565   :  { %4613 = vrot.lane.b32.xlu0 %v9519_v8, %s11246_s14  ;;  %v3541_v34 = vsel %vm11450_vm11, %v7369_v22, %v7370_v52  ;;  %v6795_v0 = vpack.c.bf16 %v7384_v27, %v7369_v22  ;;  %v11460_v52 = vld [vmem:[#allocation75_spill] sm:$0xff]  ;;  %v11461_v27 = vld [vmem:[#allocation77_spill] sm:$0xff]  ;;  %vm11480_vm11 = vmmov %vm11479_vm6 }
 0x566   :  { %6780 = vmatpush1.bf16.msra.mxu0 %v6779_v53  ;;  %4615 = vrot.lane.b32.xlu1 %v9525_v16, %s11246_s14  ;;  %v7414_v53 = vunpack.i.l.bf16 %v9741_v12  ;;  %v6793_v12 = vpack.c.bf16 %v3542_v62, %v3541_v34  ;;  %v11462_v62 = vld [vmem:[#allocation61_spill] sm:$0xff] }
 0x567   :  { %v9891_v47 = vpop.permute.xlu0 %3825  ;;  %6782 = vmatprep.subr.bf16.mxu0 %v6781_v6  ;;  %v7400_v6 = vunpack.i.h.bf16 %v11449_v46  ;;  %v11463_v46 = vld [vmem:[#allocation60_spill] sm:$0xff]  ;;  %v9981_v34 = vld [vmem:[%s11086_s5 + $0x8] sm:$0xff] }
 0x568   :  { %v9897_v55 = vpop.permute.xlu1 %3875  ;;  %v3544_v17 = vsel %vm11454_vm3, %v7414_v53, %v7415_v40  ;;  %v3599_v40 = vmul.f32 %v7889_v23, %v3594_v5  ;;  %v3583_v30 = vsel %vm690_vm15, %v11463_v46, %v11462_v62  ;;  %v11469_v5 = vld [vmem:[#allocation16_spill] sm:$0xff]  ;;  %vm11489_vm3 = vmmov %vm11482_vm1 }
 0x569   :  { %4617 = vrot.lane.b32.xlu0 %v9535_v61, %s11246_s14  ;;  %v3543_v43 = vsel %vm11459_vm5, %v7399_v18, %v7400_v6  ;;  %v6800_v6 = vpack.c.bf16 %v7414_v53, %v7399_v18  ;;  %v11466_v53 = vld [vmem:[#allocation41_spill] sm:$0xff]  ;;  %vm11490_vm5 = vmmov %vm11482_vm1 }
 0x56a   :  { %6784 = vmatpush1.bf16.msra.mxu0 %v6783_v26  ;;  %4619 = vrot.lane.b32.xlu1 %v9541_v20, %s11246_s14 }
 0x56b   :  { %v9912_v51 = vpop.permute.xlu0 %3873  ;;  %6786 = vmatprep.subr.bf16.mxu0 %v6785_v13  ;;  %v11458_v13 = vld [vmem:[#allocation13_spill] sm:$0xff] }
 0x56c   :  { %v9917_v21 = vpop.permute.xlu1 %3923  ;;  %v3581_v59 = vsel %vm690_vm15, %v11458_v13, %v11457_v14  ;;  %v3593_v22 = vsel %vm690_vm15, 0.0, %v11458_v13  ;;  %v11465_v14 = vld [vmem:[#allocation40_spill] sm:$0xff]  ;;  %v11467_v13 = vld [vmem:[#allocation79_spill] sm:$0xff] }
 0x56d   :  { %4621 = vrot.lane.b32.xlu0 %v9551_v56, %s11246_s14  ;;  %v3630_v18 = vsel %vm701_vm2, %v11466_v53, %v11465_v14  ;;  %v11473_v14 = vld [vmem:[#allocation18_spill] sm:$0xff] }
 0x56e   :  { %6788 = vmatpush1.bf16.msra.mxu0 %v6787_v29  ;;  %4623 = vrot.lane.b32.xlu1 %v9557_v24, %s11246_s14  ;;  %v6798_v29 = vpack.c.bf16 %v3544_v17, %v3543_v43  ;;  %v3597_v17 = vmul.f32 %v7889_v23, %v3593_v22  ;;  %v10003_v43 = vcombine.high %v9981_v34, %v9981_v34  ;;  %v3642_v22 = vsel %vm701_vm2, 0.0, %v11466_v53  ;;  %v11474_v53 = vld [vmem:[#allocation17_spill] sm:$0xff] }
 0x56f   :  { %v9927_v7 = vpop.permute.xlu0 %3921  ;;  %6790 = vmatprep.subr.bf16.mxu0 %v6789_v50  ;;  %v3598_v50 = vmul.f32 %v7910_v35, %v3581_v59  ;;  %v3602_v59 = vmul.f32 %v7910_v35, %v3583_v30  ;;  %v3648_v30 = vmul.f32 %v7953_v2, %v3630_v18  ;;  %v3677_v18 = vsel %vm786_vm10, %v11474_v53, %v11473_v14 }
 0x570   :  { %v9931_v11 = vpop.permute.xlu1 %7417  ;;  %v6805_v32 = vpack.c.bf16 %v3599_v40, %v3597_v17  ;;  %v3632_v17 = vsel %vm701_vm2, %v9803_v10, %v9787_v45  ;;  %v11476_v45 = vld [vmem:[#allocation43_spill] sm:$0xff] }
 0x571   :  { %4625 = vrot.lane.b32.xlu0 %v9567_v3, %s11246_s14  ;;  %v6803_v49 = vpack.c.bf16 %v3600_v41, %v3598_v50  ;;  %v11470_v41 = vld [vmem:[#allocation15_spill] sm:$0xff] }
 0x572   :  { %6792 = vmatpush1.bf16.msra.mxu0 %v6791_v4  ;;  %4627 = vrot.lane.b32.xlu1 %v9571_v42, %s11246_s14 }
 0x573   :  { %v9943_v26 = vpop.permute.xlu0 %4005  ;;  %6794 = vmatprep.subr.bf16.mxu0 %v6793_v12  ;;  %v3596_v12 = vsel %vm690_vm15, 0.0, %v9781_v58  ;;  %v3595_v58 = vsel %vm690_vm15, 0.0, %v11463_v46  ;;  %v3641_v46 = vsel %vm701_vm2, 0.0, %v11470_v41 }
 0x574   :  { %v9952_v19 = vpop.permute.xlu1 %4007  ;;  %v3603_v50 = vmul.f32 %v7889_v23, %v3596_v12  ;;  %v3601_v40 = vmul.f32 %v7889_v23, %v3595_v58  ;;  %v3645_v58 = vmul.f32 %v7934_v54, %v3641_v46 }
 0x575   :  { %7442 = vrot.lane.b32.xlu0 %v11460_v52, %s11247_s15 }
 0x576   :  { %6797 = vmatpush1.bf16.msk.msra.mxu0 %vm9945_vm13, %v6795_v0  ;;  %7447 = vrot.lane.b32.xlu1 %v11461_v27, %s11247_s15 }
 0x577   :  { %v9970_v28 = vpop.permute.xlu0 %4009  ;;  %6799 = vmatprep.subr.bf16.mxu0 %v6798_v29  ;;  %v3629_v29 = vsel %vm701_vm2, %v11470_v41, %v11469_v5  ;;  %v3647_v5 = vmul.f32 %v7934_v54, %v3642_v22  ;;  %v3644_v22 = vsel %vm701_vm2, 0.0, %v9803_v10 }
 0x578   :  { %v9976_v4 = vpop.permute.xlu1 %4011  ;;  %v3646_v12 = vmul.f32 %v7953_v2, %v3629_v29 }
 0x579   :  { %7452 = vrot.lane.b32.xlu0 %v11464_v48, %s11247_s15 }
 0x57a   :  { %6802 = vmatpush1.bf16.msk.msra.mxu0 %vm9945_vm13, %v6800_v6  ;;  %7457 = vrot.lane.b32.xlu1 %v11467_v13, %s11247_s15  ;;  %v11472_v6 = vld [vmem:[#allocation57_spill] sm:$0xff]  ;;  %v6811_v46 = vpack.c.bf16 %v3648_v30, %v3646_v12  ;;  %v3694_v13 = vmul.f32 %v7828_v38, %v3677_v18  ;;  %v3690_v30 = vsel %vm786_vm10, 0.0, %v11476_v45  ;;  %s11633_s15 = smov 96  }
 0x57b   :  { %v9999_v0 = vpop.permute.xlu0 %4045  ;;  %6804 = vmatprep.subr.bf16.mxu0 %v6803_v49  ;;  %v6807_v49 = vpack.c.bf16 %v3604_v63, %v3602_v59  ;;  %v11475_v59 = vld [vmem:[#allocation42_spill] sm:$0xff] }
 0x57c   :  { %11468 = vst [vmem:[#allocation12_spill] sm:$0xff] %v9999_v0  ;;  %v10011_v62 = vpop.permute.xlu1 %4047  ;;  %v3678_v41 = vsel %vm786_vm10, %v11476_v45, %v11475_v59  ;;  %v6809_v0 = vpack.c.bf16 %v3603_v50, %v3601_v40  ;;  %v3689_v59 = vsel %vm786_vm10, 0.0, %v11474_v53  ;;  %v6813_v50 = vpack.c.bf16 %v3647_v5, %v3645_v58 }
 0x57d   :  { %11471 = vst [vmem:[#allocation59_spill] sm:$0xff] %v10011_v62  ;;  %4701 = vrot.lane.b32.xlu0 %v9519_v8, %s11249_s17  ;;  %5948 = vmatmul.mubr.f32.vlgmr.msra.gmra.mrb[24].mxu0 %v11472_v6  ;;  %v11478_v6 = vld [vmem:[#allocation62_spill] sm:$0xff]  ;;  %v3696_v40 = vmul.f32 %v7828_v38, %v3678_v41  ;;  %v3651_v53 = vmul.f32 %v7934_v54, %v3644_v22 }
 0x57e   :  { %6806 = vmatpush1.bf16.msra.mxu0 %v6805_v32  ;;  %4703 = vrot.lane.b32.xlu1 %v9525_v16, %s11249_s17  ;;  %v11477_v32 = vld [vmem:[#allocation63_spill] sm:$0xff]  ;;  %v3643_v14 = vsel %vm701_vm2, 0.0, %v11478_v6  ;;  %v3680_v5 = vsel %vm786_vm10, %v9825_v31, %v9809_v33  ;;  %v3693_v33 = vmul.f32 %v7820_v36, %v3689_v59 }
 0x57f   :  { %6808 = vmatprep.subr.bf16.mxu0 %v6807_v49  ;;  %v4334_v63 = vpop.permute.xlu0 %4333  ;;  %6018 = vmatprep.mubr.f32.mxu0 %v10003_v43  ;;  %v3631_v29 = vsel %vm701_vm2, %v11478_v6, %v11477_v32  ;;  %v3652_v49 = vmul.f32 %v7953_v2, %v3632_v17  ;;  %v3649_v12 = vmul.f32 %v7934_v54, %v3643_v14 }
 0x580   :  { %v4336_v62 = vpop.permute.xlu1 %4335  ;;  %v3650_v10 = vmul.f32 %v7953_v2, %v3631_v29  ;;  %v4361_v58 = vsel %vm11481_vm8, 0.0, %v4334_v63  ;;  %v6819_v22 = vpack.c.bf16 %v3696_v40, %v3694_v13  ;;  %v3700_v13 = vmul.f32 %v7828_v38, %v3680_v5  ;;  %v11487_v40 = vld [vmem:[#allocation20_spill] sm:$0xff] }
 0x581   :  { %4705 = vrot.lane.b32.xlu0 %v9535_v61, %s11249_s17  ;;  %v4349_v17 = vsel %vm11479_vm6, %v4334_v63, %v4336_v62  ;;  %v3695_v63 = vmul.f32 %v7820_v36, %v3690_v30  ;;  %v3692_v30 = vsel %vm786_vm10, 0.0, %v9825_v31  ;;  %vm11491_vm6 = vmmov %vm11482_vm1  ;;  %vm11495_vm8 = vcmask 269312  }
 0x582   :  { %6810 = vmatpush1.bf16.msra.mxu0 %v6809_v0  ;;  %4707 = vrot.lane.b32.xlu1 %v9541_v20, %s11249_s17  ;;  %v6815_v41 = vpack.c.bf16 %v3652_v49, %v3650_v10  ;;  %v4366_v45 = vmul.f32 %v7828_v38, %v4349_v17  ;;  %v6817_v10 = vpack.c.bf16 %v3651_v53, %v3649_v12  ;;  %v11488_v12 = vld [vmem:[#allocation19_spill] sm:$0xff] }
 0x583   :  { %6812 = vmatprep.subr.bf16.mxu0 %v6811_v46  ;;  %v4338_v32 = vpop.permute.xlu0 %4337  ;;  %v11483_v46 = vld [vmem:[#allocation65_spill] sm:$0xff]  ;;  %v4365_v17 = vmul.f32 %v7820_v36, %v4361_v58  ;;  %v3725_v53 = vsel %vm797_vm7, %v11488_v12, %v11487_v40 }
 0x584   :  { %v4362_v0 = vsel %vm11480_vm11, 0.0, %v4338_v32  ;;  %v4340_v18 = vpop.permute.xlu1 %4339  ;;  %vm11492_vm11 = vmmov %vm11482_vm1 }
 0x585   :  { %v4350_v62 = vsel %vm11482_vm1, %v4338_v32, %v4340_v18  ;;  %4709 = vrot.lane.b32.xlu0 %v9551_v56, %s11249_s17  ;;  %v4367_v6 = vmul.f32 %v7820_v36, %v4362_v0  ;;  %v11484_v32 = vld [vmem:[#allocation64_spill] sm:$0xff]  ;;  %vm11496_vm1 = vmmov %vm11495_vm8 }
 0x586   :  { %v4368_v29 = vmul.f32 %v7828_v38, %v4350_v62  ;;  %6814 = vmatpush1.bf16.msra.mxu0 %v6813_v50  ;;  %4711 = vrot.lane.b32.xlu1 %v9557_v24, %s11249_s17  ;;  %v3679_v49 = vsel %vm786_vm10, %v11484_v32, %v11483_v46  ;;  %v11485_v50 = vld [vmem:[#allocation44_spill] sm:$0xff]  ;;  %v11486_v62 = vld [vmem:[#allocation45_spill] sm:$0xff]  ;;  %v3691_v59 = vsel %vm786_vm10, 0.0, %v11484_v32 }
 0x587   :  { %6816 = vmatprep.subr.bf16.mxu0 %v6815_v41  ;;  %v4342_v14 = vpop.permute.xlu0 %4341  ;;  %v3726_v48 = vsel %vm797_vm7, %v11486_v62, %v11485_v50  ;;  %v6945_v58 = vpack.c.bf16 %v4367_v6, %v4365_v17  ;;  %v6821_v41 = vpack.c.bf16 %v3695_v63, %v3693_v33  ;;  %v3698_v31 = vmul.f32 %v7828_v38, %v3679_v49 }
 0x588   :  { %v4344_v0 = vpop.permute.xlu1 %4343  ;;  %v6943_v18 = vpack.c.bf16 %v4368_v29, %v4366_v45  ;;  %v3738_v45 = vsel %vm797_vm7, 0.0, %v11486_v62  ;;  %v3744_v46 = vmul.f32 %v7832_v39, %v3726_v48  ;;  %v3697_v32 = vmul.f32 %v7820_v36, %v3691_v59  ;;  %v11493_v59 = vld [vmem:[#allocation67_spill] sm:$0xff] }
 0x589   :  { %4713 = vrot.lane.b32.xlu0 %v9567_v3, %s11249_s17  ;;  %v4351_v5 = vsel %vm11489_vm3, %v4342_v14, %v4344_v0  ;;  %v3699_v6 = vmul.f32 %v7820_v36, %v3692_v30  ;;  %v3728_v63 = vsel %vm797_vm7, %v9847_v1, %v9831_v44  ;;  %v4363_v49 = vsel %vm11491_vm6, 0.0, %v4342_v14  ;;  %v11494_v30 = vld [vmem:[#allocation66_spill] sm:$0xff]  ;;  %vm11497_vm3 = vmmov %vm11496_vm1 }
 0x58a   :  { %6818 = vmatpush1.bf16.msra.mxu0 %v6817_v10  ;;  %4715 = vrot.lane.b32.xlu1 %v9571_v42, %s11249_s17  ;;  %v6823_v48 = vpack.c.bf16 %v3700_v13, %v3698_v31  ;;  %v3737_v44 = vsel %vm797_vm7, 0.0, %v11488_v12  ;;  %v3742_v14 = vmul.f32 %v7832_v39, %v3725_v53  ;;  %v3743_v50 = vmul.f32 %v7824_v37, %v3738_v45  ;;  %vm11505_vm6 = vmmov %vm11496_vm1  ;;  %s11644_s17 = smov 95  }
 0x58b   :  { %6944 = vmatprep.subr.bf16.mxu1 %v6943_v18  ;;  %6820 = vmatprep.subr.bf16.mxu0 %v6819_v22  ;;  %v4346_v29 = vpop.permute.xlu0 %4345  ;;  %v4370_v22 = vmul.f32 %v7828_v38, %v4351_v5  ;;  %v3727_v13 = vsel %vm797_vm7, %v11494_v30, %v11493_v59  ;;  %v6825_v40 = vpack.c.bf16 %v3699_v6, %v3697_v32  ;;  %v3740_v5 = vsel %vm797_vm7, 0.0, %v9847_v1 }
 0x58c   :  { %6946 = vmatpush1.bf16.msra.mxu1 %v6945_v58  ;;  %v4364_v10 = vsel %vm11490_vm5, 0.0, %v4346_v29  ;;  %v4348_v33 = vpop.permute.xlu1 %4347  ;;  %v4369_v58 = vmul.f32 %v7820_v36, %v4363_v49  ;;  %v3748_v12 = vmul.f32 %v7832_v39, %v3728_v63  ;;  %v6827_v53 = vpack.c.bf16 %v3744_v46, %v3742_v14  ;;  %vm11498_vm5 = vmmov %vm11496_vm1 }
 0x58d   :  { %v4352_v17 = vsel %vm11492_vm11, %v4346_v29, %v4348_v33  ;;  %4749 = vrot.lane.b32.xlu0 %v9519_v8, %s7562_s28  ;;  %v4371_v0 = vmul.f32 %v7820_v36, %v4364_v10  ;;  %v3741_v45 = vmul.f32 %v7824_v37, %v3737_v44  ;;  %v3739_v29 = vsel %vm797_vm7, 0.0, %v11494_v30  ;;  %v11500_v30 = vld [vmem:[#allocation47_spill] sm:$0xff]  ;;  %vm11506_vm11 = vmmov %vm11496_vm1 }
 0x58e   :  { %v4372_v18 = vmul.f32 %v7828_v38, %v4352_v17  ;;  %6822 = vmatpush1.bf16.msra.mxu0 %v6821_v41  ;;  %4751 = vrot.lane.b32.xlu1 %v9525_v16, %s7562_s28  ;;  %v3746_v32 = vmul.f32 %v7832_v39, %v3727_v13  ;;  %v3747_v46 = vmul.f32 %v7824_v37, %v3740_v5  ;;  %v11501_v5 = vld [vmem:[#allocation6_spill] sm:$0xff] }
 0x58f   :  { %6824 = vmatprep.subr.bf16.mxu0 %v6823_v48  ;;  %v4382_v62 = vpop.permute.xlu0 %4381  ;;  %v6949_v10 = vpack.c.bf16 %v4371_v0, %v4369_v58  ;;  %v6829_v33 = vpack.c.bf16 %v3743_v50, %v3741_v45  ;;  %v3745_v17 = vmul.f32 %v7824_v37, %v3739_v29  ;;  %v11499_v50 = vld [vmem:[#allocation46_spill] sm:$0xff]  ;;  %v11504_v29 = vld [vmem:[#allocation21_spill] sm:$0xff] }
 0x590   :  { %v4384_v41 = vpop.permute.xlu1 %4383  ;;  %v6947_v31 = vpack.c.bf16 %v4372_v18, %v4370_v22  ;;  %v4409_v48 = vsel %vm11497_vm3, 0.0, %v4382_v62  ;;  %v6831_v0 = vpack.c.bf16 %v3748_v12, %v3746_v32  ;;  %v3794_v59 = vsel %vm818_vm0, %v11499_v50, 0.0  ;;  %v11502_v12 = vld [vmem:[#allocation7_spill] sm:$0xff]  ;;  %v11503_v45 = vld [vmem:[#allocation22_spill] sm:$0xff] }
 0x591   :  { %4753 = vrot.lane.b32.xlu0 %v9535_v61, %s7562_s28  ;;  %v4397_v1 = vsel %vm11495_vm8, %v4382_v62, %v4384_v41  ;;  %v3782_v13 = vsel %vm818_vm0, %v11500_v30, %v11499_v50  ;;  %v4413_v58 = vmul.f32 %v7824_v37, %v4409_v48  ;;  %v3793_v32 = vsel %vm818_vm0, %v11503_v45, 0.0  ;;  %v11507_v48 = vld [vmem:[#allocation4_spill] sm:$0xff]  ;;  %v11511_v50 = vld [vmem:[#allocation10_spill] sm:$0xff]  ;;  %vm11513_vm8 = vmmov %vm11496_vm1 }
 0x592   :  { %6826 = vmatpush1.bf16.msra.mxu0 %v6825_v40  ;;  %4755 = vrot.lane.b32.xlu1 %v9541_v20, %s7562_s28  ;;  %v4414_v18 = vmul.f32 %v7832_v39, %v4397_v1  ;;  %v6833_v40 = vpack.c.bf16 %v3747_v46, %v3745_v17  ;;  %vm11519_vm3 = vcmask 261120  }
 0x593   :  { %6948 = vmatprep.subr.bf16.mxu1 %v6947_v31  ;;  %6828 = vmatprep.subr.bf16.mxu0 %v6827_v53  ;;  %v4386_v6 = vpop.permute.xlu0 %4385  ;;  %v6835_v53 = vpack.c.bf16 %v11502_v12, %v11501_v5 }
 0x594   :  { %6950 = vmatpush1.bf16.msra.mxu1 %v6949_v10  ;;  %v4410_v63 = vsel %vm11496_vm1, 0.0, %v4386_v6  ;;  %v4388_v49 = vpop.permute.xlu1 %4387  ;;  %v3781_v10 = vsel %vm818_vm0, %v11504_v29, %v11503_v45 }
 0x595   :  { %v4398_v22 = vsel %vm11498_vm5, %v4386_v6, %v4388_v49  ;;  %4757 = vrot.lane.b32.xlu0 %v9551_v56, %s7562_s28  ;;  %v4415_v44 = vmul.f32 %v7824_v37, %v4410_v63  ;;  %v3800_v6 = vmul.f32 %v7910_v35, %v3794_v59  ;;  %v11512_v59 = vld [vmem:[#allocation35_spill] sm:$0xff]  ;;  %vm11521_vm5 = vmmov %vm11519_vm3 }
 0x596   :  { %v4416_v14 = vmul.f32 %v7832_v39, %v4398_v22  ;;  %6830 = vmatpush1.bf16.msra.mxu0 %v6829_v33  ;;  %4759 = vrot.lane.b32.xlu1 %v9557_v24, %s7562_s28  ;;  %v10162_v33 = vmul.f32 %v7889_v23, %v3782_v13  ;;  %v11508_v22 = vld [vmem:[#allocation8_spill] sm:$0xff]  ;;  %v6841_v30 = vpack.c.bf16 %v11512_v59, %v11511_v50 }
 0x597   :  { %6832 = vmatprep.subr.bf16.mxu0 %v6831_v0  ;;  %v4390_v62 = vpop.permute.xlu0 %4389  ;;  %v6953_v1 = vpack.c.bf16 %v4415_v44, %v4413_v58  ;;  %v6837_v0 = vpack.c.bf16 %v11508_v22, %v11507_v48  ;;  %v11510_v44 = vld [vmem:[#allocation34_spill] sm:$0xff]  ;;  %v3797_v13 = vmul.f32 %v7889_v23, %v3781_v10  ;;  %v11514_v10 = vld [vmem:[#allocation24_spill] sm:$0xff] }
 0x598   :  { %v4392_v41 = vpop.permute.xlu1 %4391  ;;  %v6951_v31 = vpack.c.bf16 %v4416_v14, %v4414_v18  ;;  %v11509_v18 = vld [vmem:[#allocation11_spill] sm:$0xff]  ;;  %v4411_v58 = vsel %vm11513_vm8, 0.0, %v4390_v62  ;;  %vm11525_vm8 = vcmask 932864  }
 0x599   :  { %4761 = vrot.lane.b32.xlu0 %v9567_v3, %s7562_s28  ;;  %v4399_v46 = vsel %vm11505_vm6, %v4390_v62, %v4392_v41  ;;  %v6839_v14 = vpack.c.bf16 %v11510_v44, %v11509_v18  ;;  %v11515_v62 = vld [vmem:[#allocation23_spill] sm:$0xff]  ;;  %vm11522_vm6 = vmmov %vm11519_vm3 }
 0x59a   :  { %6834 = vmatpush1.bf16.msra.mxu0 %v6833_v40  ;;  %4763 = vrot.lane.b32.xlu1 %v9571_v42, %s7562_s28  ;;  %v3798_v40 = vmul.f32 %v7910_v35, %v3793_v32  ;;  %v3829_v32 = vsel %vm839_vm14, %v11515_v62, %v11514_v10  ;;  %v3784_v62 = vsel %vm818_vm0, %v9869_v9, %v9853_v15  ;;  %v11520_v9 = vld [vmem:[#allocation68_spill] sm:$0xff] }
 0x59b   :  { %6952 = vmatprep.subr.bf16.mxu1 %v6951_v31  ;;  %6836 = vmatprep.subr.bf16.mxu0 %v6835_v53  ;;  %v4394_v63 = vpop.permute.xlu0 %4393  ;;  %v3796_v31 = vsel %vm818_vm0, %v9853_v15, 0.0  ;;  %v4418_v53 = vmul.f32 %v7832_v39, %v4399_v46  ;;  %v3841_v15 = vsel %vm839_vm14, %v11514_v10, 0.0 }
 0x59c   :  { %6954 = vmatpush1.bf16.msra.mxu1 %v6953_v1  ;;  %v4412_v49 = vsel %vm11506_vm11, 0.0, %v4394_v63  ;;  %v4396_v17 = vpop.permute.xlu1 %4395  ;;  %v6845_v1 = vpack.c.bf16 %v10162_v33, %v3797_v13  ;;  %v6843_v46 = vpack.c.bf16 %v3800_v6, %v3798_v40  ;;  %v3804_v50 = vmul.f32 %v7910_v35, %v3796_v31  ;;  %v11518_v13 = vld [vmem:[#allocation49_spill] sm:$0xff]  ;;  %vm11523_vm11 = vmmov %vm11519_vm3 }
 0x59d   :  { %v4400_v41 = vsel %vm11496_vm1, %v4394_v63, %v4396_v17  ;;  %4797 = vrot.lane.b32.xlu0 %v9519_v8, %s7568_s0  ;;  %v4419_v45 = vmul.f32 %v7824_v37, %v4412_v49  ;;  %v11516_v63 = vld [vmem:[#allocation69_spill] sm:$0xff]  ;;  %v4417_v49 = vmul.f32 %v7824_v37, %v4411_v58  ;;  %vm11529_vm1 = vmmov %vm11525_vm8 }
 0x59e   :  { %v4420_v29 = vmul.f32 %v7832_v39, %v4400_v41  ;;  %6838 = vmatpush1.bf16.msra.mxu0 %v6837_v0  ;;  %4799 = vrot.lane.b32.xlu1 %v9525_v16, %s7568_s0  ;;  %v3795_v17 = vsel %vm818_vm0, %v11516_v63, 0.0  ;;  %v3783_v31 = vsel %vm818_vm0, %v11520_v9, %v11516_v63 }
 0x59f   :  { %6840 = vmatprep.subr.bf16.mxu0 %v6839_v14  ;;  %v7423_v48 = vpop.permute.xlu0 %7422  ;;  %v11517_v14 = vld [vmem:[#allocation48_spill] sm:$0xff]  ;;  %v6957_v40 = vpack.c.bf16 %v4419_v45, %v4417_v49 }
 0x5a0   :  { %v7425_v5 = vunpack.i.h.bf16 %v7423_v48  ;;  %v7424_v41 = vunpack.i.l.bf16 %v7423_v48  ;;  %v7428_v0 = vpop.permute.xlu1 %7427  ;;  %v6955_v59 = vpack.c.bf16 %v4420_v29, %v4418_v53  ;;  %v3842_v6 = vsel %vm839_vm14, %v11517_v14, 0.0 }
 0x5a1   :  { %v7430_v44 = vunpack.i.h.bf16 %v7428_v0  ;;  %v7429_v33 = vunpack.i.l.bf16 %v7428_v0  ;;  %4801 = vrot.lane.b32.xlu0 %v9535_v61, %s7568_s0  ;;  %v3830_v48 = vsel %vm839_vm14, %v11518_v13, %v11517_v14  ;;  %v3802_v53 = vmul.f32 %v7910_v35, %v3795_v17 }
 0x5a2   :  { %6842 = vmatpush1.bf16.msra.mxu0 %v6841_v30  ;;  %4803 = vrot.lane.b32.xlu1 %v9541_v20, %s7568_s0  ;;  %v4445_v58 = vsel %vm11519_vm3, %v7424_v41, %v7425_v5  ;;  %v3803_v30 = vmul.f32 %v7889_v23, %v3784_v62  ;;  %v3848_v10 = vmul.f32 %v7953_v2, %v3842_v6  ;;  %vm11530_vm3 = vcmask 252928  }
 0x5a3   :  { %6956 = vmatprep.subr.bf16.mxu1 %v6955_v59  ;;  %6844 = vmatprep.subr.bf16.mxu0 %v6843_v46  ;;  %v7433_v29 = vpop.permute.xlu0 %7432  ;;  %v4446_v45 = vsel %vm11521_vm5, %v7429_v33, %v7430_v44  ;;  %v6847_v63 = vpack.c.bf16 %v3804_v50, %v3802_v53  ;;  %v3801_v59 = vmul.f32 %v7889_v23, %v3783_v31  ;;  %v3844_v44 = vsel %vm839_vm14, %v9875_v60, 0.0  ;;  %v11526_v31 = vld [vmem:[#allocation71_spill] sm:$0xff]  ;;  %vm11532_vm5 = vmmov %vm11529_vm1 }
 0x5a4   :  { %6958 = vmatpush1.bf16.msra.mxu1 %v6957_v40  ;;  %v7435_v49 = vunpack.i.h.bf16 %v7433_v29  ;;  %v7434_v0 = vunpack.i.l.bf16 %v7433_v29  ;;  %v7438_v5 = vpop.permute.xlu1 %7437  ;;  %v6959_v14 = vpack.c.bf16 %v4446_v45, %v4445_v58  ;;  %v6961_v17 = vpack.c.bf16 %v7429_v33, %v7424_v41  ;;  %v11524_v58 = vld [vmem:[#allocation50_spill] sm:$0xff] }
 0x5a5   :  { %v7440_v13 = vunpack.i.h.bf16 %v7438_v5  ;;  %v7439_v18 = vunpack.i.l.bf16 %v7438_v5  ;;  %4805 = vrot.lane.b32.xlu0 %v9551_v56, %s7568_s0  ;;  %v3846_v62 = vmul.f32 %v7953_v2, %v3841_v15  ;;  %v3847_v6 = vmul.f32 %v7934_v54, %v3830_v48 }
 0x5a6   :  { %6846 = vmatpush1.bf16.msra.mxu0 %v6845_v1  ;;  %4807 = vrot.lane.b32.xlu1 %v9557_v24, %s7568_s0  ;;  %v4447_v46 = vsel %vm11522_vm6, %v7434_v0, %v7435_v49  ;;  %v3890_v9 = vsel %vm11525_vm8, %v11524_v58, 0.0  ;;  %v3843_v1 = vsel %vm839_vm14, %v11526_v31, 0.0  ;;  %v6849_v41 = vpack.c.bf16 %v3803_v30, %v3801_v59  ;;  %v11527_v49 = vld [vmem:[#allocation70_spill] sm:$0xff]  ;;  %v11531_v59 = vld [vmem:[#allocation51_spill] sm:$0xff]  ;;  %vm11533_vm6 = vmmov %vm11530_vm3 }
 0x5a7   :  { %6960 = vmatprep.subr.bf16.mxu1 %v6959_v14  ;;  %6848 = vmatprep.subr.bf16.mxu0 %v6847_v63  ;;  %v4470_v40 = vpop.permute.xlu0 %4469  ;;  %v4448_v50 = vsel %vm11523_vm11, %v7439_v18, %v7440_v13  ;;  %v3852_v15 = vmul.f32 %v7953_v2, %v3844_v44  ;;  %v3832_v48 = vsel %vm839_vm14, %v9891_v47, %v9875_v60  ;;  %v11528_v14 = vld [vmem:[#allocation26_spill] sm:$0xff]  ;;  %vm11534_vm11 = vmmov %vm11530_vm3 }
 0x5a8   :  { %6963 = vmatpush1.bf16.msk.msra.mxu1 %vm9734_vm9, %v6961_v17  ;;  %v4472_v33 = vpop.permute.xlu1 %4471  ;;  %v6964_v53 = vpack.c.bf16 %v4448_v50, %v4447_v46  ;;  %v6851_v29 = vpack.c.bf16 %v3848_v10, %v3846_v62  ;;  %v3845_v45 = vmul.f32 %v7934_v54, %v3829_v32  ;;  %v3831_v30 = vsel %vm839_vm14, %v11527_v49, %v11526_v31  ;;  %vm11535_vm8 = vmmov %vm11530_vm3 }
 0x5a9   :  { %4809 = vrot.lane.b32.xlu0 %v9567_v3, %s7568_s0  ;;  %v6966_v5 = vpack.c.bf16 %v7439_v18, %v7434_v0  ;;  %v3889_v13 = vsel %vm11529_vm1, %v11528_v14, 0.0  ;;  %v3896_v60 = vmul.f32 %v7828_v38, %v3890_v9  ;;  %v3850_v47 = vmul.f32 %v7953_v2, %v3843_v1 }
 0x5aa   :  { %6850 = vmatpush1.bf16.msra.mxu0 %v6849_v41  ;;  %4811 = vrot.lane.b32.xlu1 %v9571_v42, %s7568_s0  ;;  %v4485_v10 = vsel %vm11530_vm3, %v4470_v40, %v4472_v33  ;;  %v6853_v63 = vpack.c.bf16 %v3847_v6, %v3845_v45  ;;  %v3878_v18 = vsel %vm11532_vm5, %v11531_v59, %v11524_v58  ;;  %v4497_v62 = vsel %vm11534_vm11, 0.0, %v4470_v40  ;;  %v11536_v40 = vld [vmem:[#allocation25_spill] sm:$0xff]  ;;  %vm11541_vm5 = vmmov %vm11529_vm1 }
 0x5ab   :  { %6965 = vmatprep.subr.bf16.mxu1 %v6964_v53  ;;  %6852 = vmatprep.subr.bf16.mxu0 %v6851_v29  ;;  %v4474_v32 = vpop.permute.xlu0 %4473  ;;  %v3851_v0 = vmul.f32 %v7934_v54, %v3832_v48  ;;  %v3849_v46 = vmul.f32 %v7934_v54, %v3831_v30  ;;  %v6855_v6 = vpack.c.bf16 %v3852_v15, %v3850_v47  ;;  %v3892_v58 = vsel %vm11529_vm1, %v9897_v55, 0.0  ;;  %v11538_v53 = vld [vmem:[#allocation52_spill] sm:$0xff]  ;;  %v11540_v29 = vld [vmem:[#allocation73_spill] sm:$0xff]  ;;  %vm11544_vm11 = vmmov %vm11529_vm1 }
 0x5ac   :  { %v4498_v44 = vsel %vm11533_vm6, 0.0, %v4474_v32  ;;  %6968 = vmatpush1.bf16.msk.msra.mxu1 %vm9734_vm9, %v6966_v5  ;;  %v4476_v17 = vpop.permute.xlu1 %4475  ;;  %v4502_v9 = vmul.f32 %v7910_v35, %v4485_v10  ;;  %vm11537_vm9 = vmmov %vm11529_vm1  ;;  %v3894_v41 = vmul.f32 %v7828_v38, %v3889_v13  ;;  %v3895_v33 = vmul.f32 %v7820_v36, %v3878_v18 }
 0x5ad   :  { %v4486_v50 = vsel %vm11535_vm8, %v4474_v32, %v4476_v17  ;;  %4845 = vrot.lane.b32.xlu0 %v9519_v8, %s7567_s20  ;;  %v4503_v31 = vmul.f32 %v7889_v23, %v4498_v44  ;;  %v3877_v1 = vsel %vm11537_vm9, %v11536_v40, %v11528_v14  ;;  %vm11539_vm3 = vcmask 924672   ;;  %vm11542_vm6 = vmmov %vm11529_vm1 }
 0x5ae   :  { %v4504_v25 = vmul.f32 %v7910_v35, %v4486_v50  ;;  %6854 = vmatpush1.bf16.msra.mxu0 %v6853_v63  ;;  %4847 = vrot.lane.b32.xlu1 %v9525_v16, %s7567_s20  ;;  %v3938_v15 = vsel %vm11539_vm3, %v11538_v53, 0.0  ;;  %v3891_v45 = vsel %vm11541_vm5, %v11540_v29, 0.0  ;;  %v6857_v49 = vpack.c.bf16 %v3851_v0, %v3849_v46  ;;  %v11543_v63 = vld [vmem:[#allocation72_spill] sm:$0xff]  ;;  %vm11546_vm8 = vmmov %vm11539_vm3 }
 0x5af   :  { %6856 = vmatprep.subr.bf16.mxu0 %v6855_v6  ;;  %v4478_v48 = vpop.permute.xlu0 %4477  ;;  %v4501_v30 = vmul.f32 %v7889_v23, %v4497_v62  ;;  %v3900_v10 = vmul.f32 %v7828_v38, %v3892_v58  ;;  %v3880_v14 = vsel %vm11542_vm6, %v9912_v51, %v9897_v55  ;;  %v6859_v13 = vpack.c.bf16 %v3896_v60, %v3894_v41  ;;  %v11545_v0 = vld [vmem:[#allocation28_spill] sm:$0xff]  ;;  %v11548_v62 = vld [vmem:[#allocation53_spill] sm:$0xff]  ;;  %vm11549_vm9 = vmmov %vm11539_vm3 }
 0x5b0   :  { %v4480_v5 = vpop.permute.xlu1 %4479  ;;  %v6969_v47 = vpack.c.bf16 %v4504_v25, %v4502_v9  ;;  %v3893_v32 = vmul.f32 %v7820_v36, %v3877_v1  ;;  %v3879_v59 = vsel %vm11544_vm11, %v11543_v63, %v11540_v29  ;;  %v3937_v44 = vsel %vm11546_vm8, %v11545_v0, 0.0  ;;  %vm11553_vm11 = vmmov %vm11546_vm8 }
 0x5b1   :  { %4849 = vrot.lane.b32.xlu0 %v9535_v61, %s7567_s20  ;;  %v6971_v18 = vpack.c.bf16 %v4503_v31, %v4501_v30  ;;  %v3944_v55 = vmul.f32 %v7832_v39, %v3938_v15  ;;  %v3898_v51 = vmul.f32 %v7828_v38, %v3891_v45  ;;  %vm11547_vm1 = vcmask 252928  }
 0x5b2   :  { %6858 = vmatpush1.bf16.msra.mxu0 %v6857_v49  ;;  %4851 = vrot.lane.b32.xlu1 %v9541_v20, %s7567_s20  ;;  %v4487_v60 = vsel %vm11547_vm1, %v4478_v48, %v4480_v5  ;;  %v6861_v46 = vpack.c.bf16 %v3895_v33, %v3893_v32  ;;  %v3926_v50 = vsel %vm11549_vm9, %v11548_v62, %v11538_v53  ;;  %vm11550_vm3 = vmmov %vm11547_vm1  ;;  %v3940_v41 = vsel %vm11553_vm11, %v9917_v21, 0.0  ;;  %v11555_v5 = vld [vmem:[#allocation76_spill] sm:$0xff] }
 0x5b3   :  { %6970 = vmatprep.subr.bf16.mxu1 %v6969_v47  ;;  %6860 = vmatprep.subr.bf16.mxu0 %v6859_v13  ;;  %v4482_v17 = vpop.permute.xlu0 %4481  ;;  %v3899_v6 = vmul.f32 %v7820_v36, %v3880_v14  ;;  %v3897_v31 = vmul.f32 %v7820_v36, %v3879_v59  ;;  %vm11551_vm5 = vmmov %vm11547_vm1  ;;  %v6863_v1 = vpack.c.bf16 %v3900_v10, %v3898_v51 }
 0x5b4   :  { %v4500_v58 = vsel %vm11550_vm3, 0.0, %v4482_v17  ;;  %6972 = vmatpush1.bf16.msra.mxu1 %v6971_v18  ;;  %v4484_v9 = vpop.permute.xlu1 %4483  ;;  %v4499_v25 = vsel %vm11551_vm5, 0.0, %v4478_v48  ;;  %vm11552_vm6 = vmmov %vm11547_vm1  ;;  %v4506_v33 = vmul.f32 %v7910_v35, %v4487_v60  ;;  %v11554_v48 = vld [vmem:[#allocation27_spill] sm:$0xff]  ;;  %v3942_v45 = vmul.f32 %v7832_v39, %v3937_v44  ;;  %v11558_v44 = vld [vmem:[#allocation74_spill] sm:$0xff] }
 0x5b5   :  { %v4488_v40 = vsel %vm11552_vm6, %v4482_v17, %v4484_v9  ;;  %4853 = vrot.lane.b32.xlu0 %v9551_v56, %s7567_s20  ;;  %v4507_v53 = vmul.f32 %v7889_v23, %v4500_v58  ;;  %v3925_v29 = vsel %vm11546_vm8, %v11554_v48, %v11545_v0  ;;  %v3943_v49 = vmul.f32 %v7824_v37, %v3926_v50  ;;  %vm11556_vm1 = vmmov %vm11546_vm8  ;;  %v11560_v17 = vld [vmem:[#allocation54_spill] sm:$0xff] }
 0x5b6   :  { %v4508_v15 = vmul.f32 %v7910_v35, %v4488_v40  ;;  %6862 = vmatpush1.bf16.msra.mxu0 %v6861_v46  ;;  %4855 = vrot.lane.b32.xlu1 %v9557_v24, %s7567_s20  ;;  %v3939_v47 = vsel %vm11556_vm1, %v11555_v5, 0.0  ;;  %v6865_v10 = vpack.c.bf16 %v3899_v6, %v3897_v31  ;;  %v4505_v14 = vmul.f32 %v7889_v23, %v4499_v25  ;;  %vm11557_vm9 = vmmov %vm11556_vm1 }
 0x5b7   :  { %6864 = vmatprep.subr.bf16.mxu0 %v6863_v1  ;;  %v4518_v30 = vpop.permute.xlu0 %4517  ;;  %v3948_v63 = vmul.f32 %v7832_v39, %v3940_v41  ;;  %v3928_v59 = vsel %vm11557_vm9, %v9927_v7, %v9917_v21  ;;  %v6867_v18 = vpack.c.bf16 %v3944_v55, %v3942_v45  ;;  %v3941_v0 = vmul.f32 %v7824_v37, %v3925_v29  ;;  %vm11559_vm3 = vmmov %vm11556_vm1  ;;  %v11565_v41 = vld [vmem:[#allocation32_spill] sm:$0xff] }
 0x5b8   :  { %v4520_v13 = vpop.permute.xlu1 %4519  ;;  %v6973_v32 = vpack.c.bf16 %v4508_v15, %v4506_v33  ;;  %v3927_v51 = vsel %vm11559_vm3, %v11558_v44, %v11555_v5  ;;  %v6975_v60 = vpack.c.bf16 %v4507_v53, %v4505_v14  ;;  %v7390_v46 = vunpack.i.h.bf16 %v11560_v17 }
 0x5b9   :  { %4857 = vrot.lane.b32.xlu0 %v9567_v3, %s7567_s20  ;;  %v3946_v62 = vmul.f32 %v7832_v39, %v3939_v47  ;;  %vm11561_vm5 = vcmask 244736   ;;  %v6869_v55 = vpack.c.bf16 %v3943_v49, %v3941_v0  ;;  %v7389_v50 = vunpack.i.l.bf16 %v11560_v17 }
 0x5ba   :  { %6866 = vmatpush1.bf16.msra.mxu0 %v6865_v10  ;;  %4859 = vrot.lane.b32.xlu1 %v9571_v42, %s7567_s20  ;;  %v4533_v21 = vsel %vm11561_vm5, %v4518_v30, %v4520_v13  ;;  %v3947_v6 = vmul.f32 %v7824_v37, %v3928_v59  ;;  %vm11562_vm6 = vmmov %vm11561_vm5  ;;  %v3945_v31 = vmul.f32 %v7824_v37, %v3927_v51  ;;  %v7375_v33 = vunpack.i.h.bf16 %v11565_v41  ;;  %v11570_v13 = vld [vmem:[#allocation56_spill] sm:$0xff] }
 0x5bb   :  { %6974 = vmatprep.subr.bf16.mxu1 %v6973_v32  ;;  %6868 = vmatprep.subr.bf16.mxu0 %v6867_v18  ;;  %v4522_v7 = vpop.permute.xlu0 %4521  ;;  %vm11563_vm11 = vmmov %vm11561_vm5  ;;  %v6871_v1 = vpack.c.bf16 %v3948_v63, %v3946_v62  ;;  %v4550_v53 = vmul.f32 %v7953_v2, %v4533_v21  ;;  %v7374_v29 = vunpack.i.l.bf16 %v11565_v41  ;;  %vm11566_vm1 = vcmask 916480   ;;  %v11572_v18 = vld [vmem:[#allocation30_spill] sm:$0xff]  ;;  %v11576_v21 = vld [vmem:[#allocation55_spill] sm:$0xff] }
 0x5bc   :  { %v4546_v58 = vsel %vm11562_vm6, 0.0, %v4522_v7  ;;  %6976 = vmatpush1.bf16.msra.mxu1 %v6975_v60  ;;  %v4524_v9 = vpop.permute.xlu1 %4523  ;;  %v4545_v25 = vsel %vm11563_vm11, 0.0, %v4518_v30  ;;  %vm11564_vm8 = vmmov %vm11561_vm5  ;;  %v6875_v49 = vpack.c.bf16 %v7390_v46, %v7375_v33  ;;  %v6873_v30 = vpack.c.bf16 %v3947_v6, %v3945_v31  ;;  %v11575_v60 = vld [vmem:[#allocation81_spill] sm:$0xff] }
 0x5bd   :  { %v4534_v40 = vsel %vm11564_vm8, %v4522_v7, %v4524_v9  ;;  %4903 = vrot.lane.b32.xlu0 %v9525_v16, %s7570_s26  ;;  %6019 = vmatmul.mubr.f32.vlgmr.msra.gmra.mrb[24].mxu0 %v9981_v34  ;;  %v4551_v15 = vmul.f32 %v7934_v54, %v4546_v58  ;;  %v4549_v34 = vmul.f32 %v7934_v54, %v4545_v25  ;;  %vm10354_vm9 = vmpackc.low %vm11566_vm1, %vm11566_vm1  ;;  %vm11571_vm5 = vcmask 908288  }
 0x5be   :  { %v4552_v48 = vmul.f32 %v7953_v2, %v4534_v40  ;;  %6870 = vmatpush1.bf16.msra.mxu0 %v6869_v55  ;;  %4907 = vrot.lane.b32.xlu1 %v9541_v20, %s7570_s26  ;;  %vm11569_vm3 = vmmov %vm11566_vm1  ;;  %v4026_v32 = vsel %vm11571_vm5, %v11570_v13, 0.0  ;;  %v7420_v63 = vunpack.i.h.bf16 %v9931_v11  ;;  %v7419_v59 = vunpack.i.l.bf16 %v9931_v11 }
 0x5bf   :  { %6872 = vmatprep.subr.bf16.mxu0 %v6871_v1  ;;  %v4526_v45 = vpop.permute.xlu0 %4525  ;;  %v3974_v14 = vsel %vm11569_vm3, %v7389_v50, %v7390_v46  ;;  %vm11573_vm6 = vmmov %vm11571_vm5  ;;  %v6979_v44 = vpack.c.bf16 %v4551_v15, %v4549_v34  ;;  %v7405_v17 = vunpack.i.h.bf16 %v11575_v60  ;;  %v7404_v46 = vunpack.i.l.bf16 %v11575_v60  ;;  %v11583_v15 = vld [vmem:[#allocation29_spill] sm:$0xff] }
 0x5c0   :  { %v4528_v5 = vpop.permute.xlu1 %4527  ;;  %v6977_v47 = vpack.c.bf16 %v4552_v48, %v4550_v53  ;;  %v4025_v0 = vsel %vm11573_vm6, %v11572_v18, 0.0  ;;  %vm11574_vm11 = vmmov %vm11566_vm1  ;;  %v4032_v55 = vmul.f32 %v7910_v35, %v4026_v32 }
 0x5c1   :  { %4901 = vrot.lane.b32.xlu0 %v9519_v8, %s7570_s26  ;;  %v3973_v51 = vsel %vm11574_vm11, %v7374_v29, %v7375_v33  ;;  %v4535_v62 = vsel %vm11564_vm8, %v4526_v45, %v4528_v5  ;;  %vm11577_vm1 = vmmov %vm11571_vm5  ;;  %v6880_v9 = vpack.c.bf16 %v7420_v63, %v7405_v17  ;;  %v4030_v29 = vmul.f32 %v7910_v35, %v4025_v0 }
 0x5c2   :  { %6874 = vmatpush1.bf16.msra.mxu0 %v6873_v30  ;;  %4905 = vrot.lane.b32.xlu1 %v9535_v61, %s7570_s26  ;;  %v4014_v7 = vsel %vm11577_vm1, %v11576_v21, %v11570_v13  ;;  %vm11578_vm3 = vmmov %vm11564_vm8  ;;  %v6878_v58 = vpack.c.bf16 %v3974_v14, %v3973_v51  ;;  %v4554_v41 = vmul.f32 %v7953_v2, %v4535_v62 }
 0x5c3   :  { %6978 = vmatprep.subr.bf16.mxu1 %v6977_v47  ;;  %6877 = vmatprep.subr.msk.bf16.mxu0 %vm10354_vm9, %v6875_v49  ;;  %v4530_v11 = vpop.permute.xlu0 %4529  ;;  %vm11579_vm5 = vmmov %vm11574_vm11  ;;  %v4013_v48 = vsel %vm11577_vm1, %v11583_v15, %v11572_v18 }
 0x5c4   :  { %v4548_v50 = vsel %vm11578_vm3, 0.0, %v4530_v11  ;;  %6980 = vmatpush1.bf16.msra.mxu1 %v6979_v44  ;;  %v4532_v6 = vpop.permute.xlu1 %4531  ;;  %v3976_v31 = vsel %vm11579_vm5, %v7419_v59, %v7420_v63  ;;  %vm11580_vm6 = vmmov %vm11578_vm3  ;;  %v6885_v59 = vpack.c.bf16 %v4032_v55, %v4030_v29  ;;  %v4029_v18 = vmul.f32 %v7889_v23, %v4013_v48 }
 0x5c5   :  { %v4547_v25 = vsel %vm11580_vm6, 0.0, %v4526_v45  ;;  %vm11581_vm11 = vmmov %vm11578_vm3  ;;  %4911 = vrot.lane.b32.xlu0 %v9557_v24, %s7570_s26  ;;  %v4555_v33 = vmul.f32 %v7934_v54, %v4548_v50  ;;  %v4031_v45 = vmul.f32 %v7889_v23, %v4014_v7 }
 0x5c6   :  { %v4536_v40 = vsel %vm11581_vm11, %v4530_v11, %v4532_v6  ;;  %vm11582_vm8 = vmmov %vm11577_vm1  ;;  %6879 = vmatpush1.bf16.msra.mxu0 %v6878_v58  ;;  %4915 = vrot.lane.b32.xlu1 %v9571_v42, %s7570_s26  ;;  %v4553_v5 = vmul.f32 %v7934_v54, %v4547_v25 }
 0x5c7   :  { %v4028_v1 = vsel %vm11582_vm8, %v9976_v4, 0.0  ;;  %v4556_v53 = vmul.f32 %v7953_v2, %v4536_v40  ;;  %vm11584_vm3 = vmmov %vm11579_vm5  ;;  %6882 = vmatprep.subr.msk.bf16.mxu0 %vm10354_vm9, %v6880_v9  ;;  %v4566_v30 = vpop.permute.xlu0 %4565  ;;  %vm11588_vm8 = vcmask 146432   ;;  %v6887_v60 = vpack.c.bf16 %v4031_v45, %v4029_v18 }
 0x5c8   :  { %v3975_v49 = vsel %vm11584_vm3, %v7404_v46, %v7405_v17  ;;  %vm11585_vm5 = vmmov %vm11577_vm1  ;;  %v4568_v47 = vpop.permute.xlu1 %4567  ;;  %v4036_v63 = vmul.f32 %v7910_v35, %v4028_v1  ;;  %v6983_v44 = vpack.c.bf16 %v4555_v33, %v4553_v5 }
 0x5c9   :  { %v4027_v34 = vsel %vm11585_vm5, %v9952_v19, 0.0  ;;  %v6883_v14 = vpack.c.bf16 %v3976_v31, %v3975_v49  ;;  %v6981_v13 = vpack.c.bf16 %v4556_v53, %v4554_v41  ;;  %vm11586_vm6 = vmmov %vm11577_vm1  ;;  %4909 = vrot.lane.b32.xlu0 %v9551_v56, %s7570_s26 }
 0x5ca   :  { %v4016_v32 = vsel %vm11586_vm6, %v9970_v28, %v9976_v4  ;;  %vm11587_vm11 = vmmov %vm11577_vm1  ;;  %4913 = vrot.lane.b32.xlu1 %v9567_v3, %s7570_s26  ;;  %v4034_v51 = vmul.f32 %v7910_v35, %v4027_v34  ;;  %v4581_v28 = vsel %vm11588_vm8, %v4566_v30, %v4568_v47 }
 0x5cb   :  { %v4015_v0 = vsel %vm11587_vm11, %v9943_v26, %v9952_v19  ;;  %6884 = vmatpush1.bf16.msra.mxu0 %v6883_v14  ;;  %6982 = vmatprep.subr.bf16.mxu1 %v6981_v13  ;;  %v4570_v4 = vpop.permute.xlu0 %4569  ;;  %v4035_v17 = vmul.f32 %v7889_v23, %v4016_v32  ;;  %vm11589_vm1 = vmmov %vm11588_vm8  ;;  %v4598_v7 = vmul.f32 %v7828_v38, %v4581_v28 }
 0x5cc   :  { %6886 = vmatprep.subr.bf16.mxu0 %v6885_v59  ;;  %v4594_v46 = vsel %vm11589_vm1, 0.0, %v4570_v4  ;;  %6984 = vmatpush1.bf16.msra.mxu1 %v6983_v44  ;;  %v4572_v62 = vpop.permute.xlu1 %4571  ;;  %v4033_v26 = vmul.f32 %v7889_v23, %v4015_v0  ;;  %vm11590_vm3 = vmmov %vm11589_vm1  ;;  %v6889_v21 = vpack.c.bf16 %v4036_v63, %v4034_v51 }
 0x5cd   :  { %v4593_v19 = vsel %vm11590_vm3, 0.0, %v4566_v30  ;;  %vm11591_vm5 = vmmov %vm11589_vm1  ;;  %4951 = vrot.lane.b32.xlu0 %v9525_v16, %s7569_s29  ;;  %v4599_v55 = vmul.f32 %v7820_v36, %v4594_v46  ;;  %vm11595_vm3 = vcmask 138240  }
 0x5ce   :  { %v4582_v11 = vsel %vm11591_vm5, %v4570_v4, %v4572_v62  ;;  %4955 = vrot.lane.b32.xlu1 %v9541_v20, %s7569_s29  ;;  %v6891_v58 = vpack.c.bf16 %v4035_v17, %v4033_v26  ;;  %v4597_v9 = vmul.f32 %v7820_v36, %v4593_v19  ;;  %vm11592_vm6 = vmmov %vm11589_vm1 }
 0x5cf   :  { %v4600_v50 = vmul.f32 %v7828_v38, %v4582_v11  ;;  %6888 = vmatpush1.bf16.msra.mxu0 %v6887_v60  ;;  %v4574_v6 = vpop.permute.xlu0 %4573  ;;  %vm11593_vm11 = vmmov %vm11589_vm1 }
 0x5d0   :  { %6890 = vmatprep.subr.bf16.mxu0 %v6889_v21  ;;  %v4576_v31 = vpop.permute.xlu1 %4575  ;;  %v6987_v40 = vpack.c.bf16 %v4599_v55, %v4597_v9  ;;  %v4595_v33 = vsel %vm11593_vm11, 0.0, %v4574_v6  ;;  %vm11594_vm8 = vmmov %vm11589_vm1 }
 0x5d1   :  { %v6985_v25 = vpack.c.bf16 %v4600_v50, %v4598_v7  ;;  %4949 = vrot.lane.b32.xlu0 %v9519_v8, %s7569_s29  ;;  %v4583_v1 = vsel %vm11592_vm6, %v4574_v6, %v4576_v31  ;;  %v4601_v30 = vmul.f32 %v7820_v36, %v4595_v33  ;;  %vm11596_vm5 = vmmov %vm11595_vm3 }
 0x5d2   :  { %4953 = vrot.lane.b32.xlu1 %v9535_v61, %s7569_s29  ;;  %v4602_v45 = vmul.f32 %v7828_v38, %v4583_v1  ;;  %vm11597_vm6 = vmmov %vm11595_vm3 }
 0x5d3   :  { %6892 = vmatpush1.bf16.msra.mxu0 %v6891_v58  ;;  %6986 = vmatprep.subr.bf16.mxu1 %v6985_v25  ;;  %v4578_v41 = vpop.permute.xlu0 %4577  ;;  %vm11598_vm11 = vmmov %vm11595_vm3 }
 0x5d4   :  { %v4596_v53 = vsel %vm11594_vm8, 0.0, %v4578_v41  ;;  %6988 = vmatpush1.bf16.msra.mxu1 %v6987_v40  ;;  %v4580_v15 = vpop.permute.xlu1 %4579  ;;  %vm11599_vm8 = vmmov %vm11595_vm3 }
 0x5d5   :  { %v4603_v48 = vmul.f32 %v7820_v36, %v4596_v53  ;;  %v4584_v29 = vsel %vm11589_vm1, %v4578_v41, %v4580_v15  ;;  %4959 = vrot.lane.b32.xlu0 %v9557_v24, %s7569_s29  ;;  %vm11600_vm1 = vmmov %vm11595_vm3 }
 0x5d6   :  { %v4604_v49 = vmul.f32 %v7828_v38, %v4584_v29  ;;  %4963 = vrot.lane.b32.xlu1 %v9571_v42, %s7569_s29 }
 0x5d7   :  { %v4614_v34 = vpop.permute.xlu0 %4613  ;;  %v6991_v14 = vpack.c.bf16 %v4603_v48, %v4601_v30 }
 0x5d8   :  { %v4616_v5 = vpop.permute.xlu1 %4615  ;;  %v6989_v47 = vpack.c.bf16 %v4604_v49, %v4602_v45  ;;  %v4641_v63 = vsel %vm11596_vm5, 0.0, %v4614_v34  ;;  %vm11602_vm5 = vmmov %vm11600_vm1 }
 0x5d9   :  { %4957 = vrot.lane.b32.xlu0 %v9551_v56, %s7569_s29  ;;  %v4629_v13 = vsel %vm11595_vm3, %v4614_v34, %v4616_v5  ;;  %v4645_v4 = vmul.f32 %v7824_v37, %v4641_v63  ;;  %vm11601_vm3 = vmmov %vm11600_vm1 }
 0x5da   :  { %4961 = vrot.lane.b32.xlu1 %v9567_v3, %s7569_s29  ;;  %6990 = vmatprep.subr.bf16.mxu1 %v6989_v47  ;;  %v4646_v51 = vmul.f32 %v7832_v39, %v4629_v13  ;;  %s11669_s29 = smov 94  }
 0x5db   :  { %v4618_v32 = vpop.permute.xlu0 %4617  ;;  %6992 = vmatpush1.bf16.msra.mxu1 %v6991_v14 }
 0x5dc   :  { %v4642_v59 = vsel %vm11597_vm6, 0.0, %v4618_v32  ;;  %v4620_v18 = vpop.permute.xlu1 %4619  ;;  %vm11603_vm6 = vcmask 130048  }
 0x5dd   :  { %v4647_v0 = vmul.f32 %v7824_v37, %v4642_v59  ;;  %v4630_v44 = vsel %vm11598_vm11, %v4618_v32, %v4620_v18  ;;  %4999 = vrot.lane.b32.xlu0 %v9525_v16, %s7575_s18  ;;  %vm11604_vm11 = vmmov %vm11603_vm6 }
 0x5de   :  { %v4648_v28 = vmul.f32 %v7832_v39, %v4630_v44  ;;  %5003 = vrot.lane.b32.xlu1 %v9541_v20, %s7575_s18 }
 0x5df   :  { %v4622_v60 = vpop.permute.xlu0 %4621  ;;  %v6995_v62 = vpack.c.bf16 %v4647_v0, %v4645_v4 }
 0x5e0   :  { %v4624_v17 = vpop.permute.xlu1 %4623  ;;  %v6993_v46 = vpack.c.bf16 %v4648_v28, %v4646_v51  ;;  %v4643_v11 = vsel %vm11600_vm1, 0.0, %v4622_v60  ;;  %vm11606_vm1 = vmmov %vm11603_vm6 }
 0x5e1   :  { %4997 = vrot.lane.b32.xlu0 %v9519_v8, %s7575_s18  ;;  %v4631_v26 = vsel %vm11599_vm8, %v4622_v60, %v4624_v17  ;;  %v4649_v9 = vmul.f32 %v7824_v37, %v4643_v11  ;;  %vm11605_vm8 = vmmov %vm11603_vm6 }
 0x5e2   :  { %5001 = vrot.lane.b32.xlu1 %v9535_v61, %s7575_s18  ;;  %6994 = vmatprep.subr.bf16.mxu1 %v6993_v46  ;;  %v4650_v6 = vmul.f32 %v7832_v39, %v4631_v26 }
 0x5e3   :  { %v4626_v19 = vpop.permute.xlu0 %4625  ;;  %6996 = vmatpush1.bf16.msra.mxu1 %v6995_v62 }
 0x5e4   :  { %v4644_v21 = vsel %vm11601_vm3, 0.0, %v4626_v19  ;;  %v4628_v7 = vpop.permute.xlu1 %4627 }
 0x5e5   :  { %v4651_v55 = vmul.f32 %v7824_v37, %v4644_v21  ;;  %v4632_v50 = vsel %vm11602_vm5, %v4626_v19, %v4628_v7  ;;  %5007 = vrot.lane.b32.xlu0 %v9557_v24, %s7575_s18  ;;  %vm11625_vm5 = vcmask 924672  }
 0x5e6   :  { %v4652_v58 = vmul.f32 %v7832_v39, %v4632_v50  ;;  %5011 = vrot.lane.b32.xlu1 %v9571_v42, %s7575_s18 }
 0x5e7   :  { %v7443_v31 = vpop.permute.xlu0 %7442  ;;  %v6999_v33 = vpack.c.bf16 %v4651_v55, %v4649_v9 }
 0x5e8   :  { %v7445_v25 = vunpack.i.h.bf16 %v7443_v31  ;;  %v7444_v40 = vunpack.i.l.bf16 %v7443_v31  ;;  %v7448_v1 = vpop.permute.xlu1 %7447  ;;  %v6997_v41 = vpack.c.bf16 %v4652_v58, %v4650_v6 }
 0x5e9   :  { %v7450_v53 = vunpack.i.h.bf16 %v7448_v1  ;;  %v7449_v15 = vunpack.i.l.bf16 %v7448_v1  ;;  %5005 = vrot.lane.b32.xlu0 %v9551_v56, %s7575_s18 }
 0x5ea   :  { %5009 = vrot.lane.b32.xlu1 %v9567_v3, %s7575_s18  ;;  %6998 = vmatprep.subr.bf16.mxu1 %v6997_v41  ;;  %v4677_v48 = vsel %vm11603_vm6, %v7444_v40, %v7445_v25  ;;  %vm11626_vm6 = vmmov %vm11625_vm5 }
 0x5eb   :  { %v7453_v29 = vpop.permute.xlu0 %7452  ;;  %7000 = vmatpush1.bf16.msra.mxu1 %v6999_v33  ;;  %v4678_v45 = vsel %vm11604_vm11, %v7449_v15, %v7450_v53  ;;  %v7003_v47 = vpack.c.bf16 %v7449_v15, %v7444_v40  ;;  %vm11627_vm11 = vmmov %vm11625_vm5 }
 0x5ec   :  { %v7455_v49 = vunpack.i.h.bf16 %v7453_v29  ;;  %v7454_v30 = vunpack.i.l.bf16 %v7453_v29  ;;  %v7458_v34 = vpop.permute.xlu1 %7457  ;;  %v7001_v5 = vpack.c.bf16 %v4678_v45, %v4677_v48  ;;  %v11607_v45 = vld [vmem:[#allocation78_spill] sm:$0xff] }
 0x5ed   :  { %v7460_v14 = vunpack.i.h.bf16 %v7458_v34  ;;  %v7459_v13 = vunpack.i.l.bf16 %v7458_v34  ;;  %5047 = vrot.lane.b32.xlu0 %v9525_v16, %s7576_s19 }
 0x5ee   :  { %5051 = vrot.lane.b32.xlu1 %v9541_v20, %s7576_s19  ;;  %7002 = vmatprep.subr.bf16.mxu1 %v7001_v5  ;;  %v4679_v32 = vsel %vm11605_vm8, %v7454_v30, %v7455_v49  ;;  %v11608_v49 = vld [vmem:[#allocation79_spill] sm:$0xff]  ;;  %vm11628_vm8 = vmmov %vm11625_vm5 }
 0x5ef   :  { %v4702_v63 = vpop.permute.xlu0 %4701  ;;  %7005 = vmatpush1.bf16.msk.msra.mxu1 %vm9945_vm13, %v7003_v47  ;;  %v4680_v59 = vsel %vm11606_vm1, %v7459_v13, %v7460_v14  ;;  %v7008_v44 = vpack.c.bf16 %v7459_v13, %v7454_v30  ;;  %vm11629_vm1 = vmmov %vm11625_vm5 }
 0x5f0   :  { %v4704_v18 = vpop.permute.xlu1 %4703  ;;  %v7006_v0 = vpack.c.bf16 %v4680_v59, %v4679_v32  ;;  %v4729_v4 = vsel %vm690_vm15, 0.0, %v4702_v63 }
 0x5f1   :  { %5045 = vrot.lane.b32.xlu0 %v9519_v8, %s7576_s19  ;;  %v4717_v51 = vsel %vm690_vm15, %v4702_v63, %v4704_v18  ;;  %v4733_v11 = vmul.f32 %v7889_v23, %v4729_v4 }
 0x5f2   :  { %5049 = vrot.lane.b32.xlu1 %v9535_v61, %s7576_s19  ;;  %7007 = vmatprep.subr.bf16.mxu1 %v7006_v0  ;;  %v4734_v26 = vmul.f32 %v7910_v35, %v4717_v51 }
 0x5f3   :  { %v4706_v28 = vpop.permute.xlu0 %4705  ;;  %7010 = vmatpush1.bf16.msk.msra.mxu1 %vm9945_vm13, %v7008_v44 }
 0x5f4   :  { %v4730_v60 = vsel %vm690_vm15, 0.0, %v4706_v28  ;;  %v4708_v17 = vpop.permute.xlu1 %4707 }
 0x5f5   :  { %v4735_v46 = vmul.f32 %v7889_v23, %v4730_v60  ;;  %v4718_v62 = vsel %vm690_vm15, %v4706_v28, %v4708_v17  ;;  %5055 = vrot.lane.b32.xlu0 %v9557_v24, %s7576_s19 }
 0x5f6   :  { %v4736_v19 = vmul.f32 %v7910_v35, %v4718_v62  ;;  %5059 = vrot.lane.b32.xlu1 %v9571_v42, %s7576_s19  ;;  %6232 = vmatmul.mubr.f32.vlgmr.msra.gmra.mrb[24].mxu1 %v7526_v57 }
 0x5f7   :  { %v4710_v21 = vpop.permute.xlu0 %4709  ;;  %6302 = vmatprep.mubr.f32.mxu1 %v10003_v43  ;;  %v7013_v50 = vpack.c.bf16 %v4735_v46, %v4733_v11 }
 0x5f8   :  { %v4712_v7 = vpop.permute.xlu1 %4711  ;;  %v7011_v55 = vpack.c.bf16 %v4736_v19, %v4734_v26  ;;  %v4731_v9 = vsel %vm690_vm15, 0.0, %v4710_v21 }
 0x5f9   :  { %5053 = vrot.lane.b32.xlu0 %v9551_v56, %s7576_s19  ;;  %v4719_v6 = vsel %vm690_vm15, %v4710_v21, %v4712_v7  ;;  %v4737_v33 = vmul.f32 %v7889_v23, %v4731_v9 }
 0x5fa   :  { %5057 = vrot.lane.b32.xlu1 %v9567_v3, %s7576_s19  ;;  %7012 = vmatprep.subr.bf16.mxu1 %v7011_v55  ;;  %v4738_v1 = vmul.f32 %v7910_v35, %v4719_v6 }
 0x5fb   :  { %v4714_v58 = vpop.permute.xlu0 %4713  ;;  %7014 = vmatpush1.bf16.msra.mxu1 %v7013_v50 }
 0x5fc   :  { %v4732_v31 = vsel %vm690_vm15, 0.0, %v4714_v58  ;;  %v4716_v25 = vpop.permute.xlu1 %4715 }
 0x5fd   :  { %v4739_v43 = vmul.f32 %v7889_v23, %v4732_v31  ;;  %v4720_v40 = vsel %vm690_vm15, %v4714_v58, %v4716_v25  ;;  %7462 = vrot.lane.b32.xlu0 %v11460_v52, %s7579_s24 }
 0x5fe   :  { %v4740_v41 = vmul.f32 %v7910_v35, %v4720_v40  ;;  %7467 = vrot.lane.b32.xlu1 %v11461_v27, %s7579_s24 }
 0x5ff   :  { %v4750_v53 = vpop.permute.xlu0 %4749  ;;  %v7017_v29 = vpack.c.bf16 %v4739_v43, %v4737_v33 }
 0x600   :  { %v4752_v15 = vpop.permute.xlu1 %4751  ;;  %v7015_v48 = vpack.c.bf16 %v4740_v41, %v4738_v1  ;;  %v4777_v5 = vsel %vm701_vm2, 0.0, %v4750_v53 }
 0x601   :  { %7472 = vrot.lane.b32.xlu0 %v11607_v45, %s7579_s24  ;;  %v4765_v30 = vsel %vm701_vm2, %v4750_v53, %v4752_v15  ;;  %v4781_v18 = vmul.f32 %v7934_v54, %v4777_v5 }
 0x602   :  { %7477 = vrot.lane.b32.xlu1 %v11608_v49, %s7579_s24  ;;  %7016 = vmatprep.subr.bf16.mxu1 %v7015_v48  ;;  %v4782_v63 = vmul.f32 %v7953_v2, %v4765_v30 }
 0x603   :  { %v4754_v34 = vpop.permute.xlu0 %4753  ;;  %7018 = vmatpush1.bf16.msra.mxu1 %v7017_v29 }
 0x604   :  { %v4778_v47 = vsel %vm701_vm2, 0.0, %v4754_v34  ;;  %v4756_v14 = vpop.permute.xlu1 %4755 }
 0x605   :  { %v4783_v13 = vmul.f32 %v7934_v54, %v4778_v47  ;;  %v4766_v32 = vsel %vm701_vm2, %v4754_v34, %v4756_v14  ;;  %5135 = vrot.lane.b32.xlu0 %v9525_v16, %s7577_s22 }
 0x606   :  { %v4784_v59 = vmul.f32 %v7953_v2, %v4766_v32  ;;  %5139 = vrot.lane.b32.xlu1 %v9541_v20, %s7577_s22 }
 0x607   :  { %v4758_v0 = vpop.permute.xlu0 %4757  ;;  %v7021_v28 = vpack.c.bf16 %v4783_v13, %v4781_v18 }
 0x608   :  { %v4760_v44 = vpop.permute.xlu1 %4759  ;;  %v7019_v51 = vpack.c.bf16 %v4784_v59, %v4782_v63  ;;  %v4779_v17 = vsel %vm701_vm2, 0.0, %v4758_v0 }
 0x609   :  { %5133 = vrot.lane.b32.xlu0 %v9519_v8, %s7577_s22  ;;  %v4767_v4 = vsel %vm701_vm2, %v4758_v0, %v4760_v44  ;;  %v4785_v21 = vmul.f32 %v7934_v54, %v4779_v17 }
 0x60a   :  { %5137 = vrot.lane.b32.xlu1 %v9535_v61, %s7577_s22  ;;  %7020 = vmatprep.subr.bf16.mxu1 %v7019_v51  ;;  %v4786_v57 = vmul.f32 %v7953_v2, %v4767_v4 }
 0x60b   :  { %v4762_v60 = vpop.permute.xlu0 %4761  ;;  %7022 = vmatpush1.bf16.msra.mxu1 %v7021_v28 }
 0x60c   :  { %v4780_v46 = vsel %vm701_vm2, 0.0, %v4762_v60  ;;  %v4764_v62 = vpop.permute.xlu1 %4763 }
 0x60d   :  { %v4787_v26 = vmul.f32 %v7934_v54, %v4780_v46  ;;  %v4768_v19 = vsel %vm701_vm2, %v4762_v60, %v4764_v62  ;;  %5143 = vrot.lane.b32.xlu0 %v9557_v24, %s7577_s22  ;;  %vm11616_vm2 = vcmask 932864  }
 0x60e   :  { %v4788_v11 = vmul.f32 %v7953_v2, %v4768_v19  ;;  %5147 = vrot.lane.b32.xlu1 %v9571_v42, %s7577_s22  ;;  %vm11617_vm15 = vmmov %vm11616_vm2 }
 0x60f   :  { %v4798_v7 = vpop.permute.xlu0 %4797  ;;  %v7025_v6 = vpack.c.bf16 %v4787_v26, %v4785_v21 }
 0x610   :  { %v4800_v55 = vpop.permute.xlu1 %4799  ;;  %v7023_v50 = vpack.c.bf16 %v4788_v11, %v4786_v57  ;;  %v4825_v31 = vsel %vm786_vm10, 0.0, %v4798_v7 }
 0x611   :  { %5141 = vrot.lane.b32.xlu0 %v9551_v56, %s7577_s22  ;;  %v4813_v58 = vsel %vm786_vm10, %v4798_v7, %v4800_v55  ;;  %v4829_v53 = vmul.f32 %v7820_v36, %v4825_v31  ;;  %v11610_v31 = vld [vmem:[#allocation34_spill] sm:$0xff] }
 0x612   :  { %5145 = vrot.lane.b32.xlu1 %v9567_v3, %s7577_s22  ;;  %7024 = vmatprep.subr.bf16.mxu1 %v7023_v50  ;;  %v4830_v41 = vmul.f32 %v7828_v38, %v4813_v58 }
 0x613   :  { %v4802_v9 = vpop.permute.xlu0 %4801  ;;  %7026 = vmatpush1.bf16.msra.mxu1 %v7025_v6 }
 0x614   :  { %v4826_v25 = vsel %vm786_vm10, 0.0, %v4802_v9  ;;  %v4804_v43 = vpop.permute.xlu1 %4803 }
 0x615   :  { %v4831_v40 = vmul.f32 %v7820_v36, %v4826_v25  ;;  %v4814_v1 = vsel %vm786_vm10, %v4802_v9, %v4804_v43  ;;  %5183 = vrot.lane.b32.xlu0 %v9525_v16, %s11371_s1  ;;  %v11609_v9 = vld [vmem:[#allocation11_spill] sm:$0xff] }
 0x616   :  { %v4832_v33 = vmul.f32 %v7828_v38, %v4814_v1  ;;  %5187 = vrot.lane.b32.xlu1 %v9541_v20, %s11371_s1 }
 0x617   :  { %v4806_v15 = vpop.permute.xlu0 %4805  ;;  %v7029_v30 = vpack.c.bf16 %v4831_v40, %v4829_v53 }
 0x618   :  { %v4808_v48 = vpop.permute.xlu1 %4807  ;;  %v7027_v29 = vpack.c.bf16 %v4832_v33, %v4830_v41  ;;  %v4827_v47 = vsel %vm786_vm10, 0.0, %v4806_v15 }
 0x619   :  { %5181 = vrot.lane.b32.xlu0 %v9519_v8, %s11371_s1  ;;  %v4815_v34 = vsel %vm786_vm10, %v4806_v15, %v4808_v48  ;;  %v4833_v0 = vmul.f32 %v7820_v36, %v4827_v47  ;;  %v11611_v15 = vld [vmem:[#allocation10_spill] sm:$0xff] }
 0x61a   :  { %5185 = vrot.lane.b32.xlu1 %v9535_v61, %s11371_s1  ;;  %7028 = vmatprep.subr.bf16.mxu1 %v7027_v29  ;;  %v4834_v59 = vmul.f32 %v7828_v38, %v4815_v34 }
 0x61b   :  { %v4810_v5 = vpop.permute.xlu0 %4809  ;;  %7030 = vmatpush1.bf16.msra.mxu1 %v7029_v30  ;;  %v11612_v30 = vld [vmem:[#allocation35_spill] sm:$0xff] }
 0x61c   :  { %v4828_v14 = vsel %vm786_vm10, 0.0, %v4810_v5  ;;  %v4812_v13 = vpop.permute.xlu1 %4811 }
 0x61d   :  { %v4835_v32 = vmul.f32 %v7820_v36, %v4828_v14  ;;  %v4816_v63 = vsel %vm786_vm10, %v4810_v5, %v4812_v13  ;;  %4051 = vrot.lane.b32.xlu0 %v11502_v12, %s11371_s1  ;;  %vm11620_vm10 = vmmov %vm11616_vm2 }
 0x61e   :  { %v4836_v18 = vmul.f32 %v7828_v38, %v4816_v63  ;;  %4049 = vrot.lane.b32.xlu1 %v11508_v22, %s11371_s1 }
 0x61f   :  { %v4846_v44 = vpop.permute.xlu0 %4845  ;;  %v7033_v4 = vpack.c.bf16 %v4835_v32, %v4833_v0  ;;  %v7043_v32 = vpack.c.bf16 %v9541_v20, %v9525_v16 }
 0x620   :  { %v4848_v51 = vpop.permute.xlu1 %4847  ;;  %v7031_v28 = vpack.c.bf16 %v4836_v18, %v4834_v59  ;;  %v4873_v46 = vsel %vm797_vm7, 0.0, %v4846_v44 }
 0x621   :  { %5191 = vrot.lane.b32.xlu0 %v9557_v24, %s11371_s1  ;;  %v4861_v60 = vsel %vm797_vm7, %v4846_v44, %v4848_v51  ;;  %v4877_v7 = vmul.f32 %v7824_v37, %v4873_v46  ;;  %v7045_v44 = vpack.c.bf16 %v9535_v61, %v9519_v8  ;;  %v7047_v51 = vpack.c.bf16 %v9571_v42, %v9557_v24 }
 0x622   :  { %5195 = vrot.lane.b32.xlu1 %v9571_v42, %s11371_s1  ;;  %7032 = vmatprep.subr.bf16.mxu1 %v7031_v28  ;;  %v4878_v11 = vmul.f32 %v7832_v39, %v4861_v60 }
 0x623   :  { %v4850_v17 = vpop.permute.xlu0 %4849  ;;  %7034 = vmatpush1.bf16.msra.mxu1 %v7033_v4 }
 0x624   :  { %v4874_v62 = vsel %vm797_vm7, 0.0, %v4850_v17  ;;  %v4852_v26 = vpop.permute.xlu1 %4851 }
 0x625   :  { %v4879_v19 = vmul.f32 %v7824_v37, %v4874_v62  ;;  %v4862_v57 = vsel %vm797_vm7, %v4850_v17, %v4852_v26  ;;  %5189 = vrot.lane.b32.xlu0 %v9551_v56, %s11371_s1 }
 0x626   :  { %v4880_v21 = vmul.f32 %v7832_v39, %v4862_v57  ;;  %5193 = vrot.lane.b32.xlu1 %v9567_v3, %s11371_s1 }
 0x627   :  { %v4854_v55 = vpop.permute.xlu0 %4853  ;;  %v7037_v58 = vpack.c.bf16 %v4879_v19, %v4877_v7  ;;  %v7049_v7 = vpack.c.bf16 %v9567_v3, %v9551_v56 }
 0x628   :  { %v4856_v50 = vpop.permute.xlu1 %4855  ;;  %v7035_v6 = vpack.c.bf16 %v4880_v21, %v4878_v11  ;;  %v4875_v40 = vsel %vm797_vm7, 0.0, %v4854_v55  ;;  %v11614_v21 = vld [vmem:[#allocation6_spill] sm:$0xff] }
 0x629   :  { %4055 = vrot.lane.b32.xlu0 %v11609_v9, %s11371_s1  ;;  %v4863_v25 = vsel %vm797_vm7, %v4854_v55, %v4856_v50  ;;  %v4881_v34 = vmul.f32 %v7824_v37, %v4875_v40 }
 0x62a   :  { %4059 = vrot.lane.b32.xlu1 %v11610_v31, %s11371_s1  ;;  %7036 = vmatprep.subr.bf16.mxu1 %v7035_v6  ;;  %v4882_v48 = vmul.f32 %v7832_v39, %v4863_v25 }
 0x62b   :  { %v4858_v43 = vpop.permute.xlu0 %4857  ;;  %7038 = vmatpush1.bf16.msra.mxu1 %v7037_v58 }
 0x62c   :  { %v4876_v1 = vsel %vm797_vm7, 0.0, %v4858_v43  ;;  %v4860_v41 = vpop.permute.xlu1 %4859 }
 0x62d   :  { %v4883_v33 = vmul.f32 %v7824_v37, %v4876_v1  ;;  %v4864_v53 = vsel %vm797_vm7, %v4858_v43, %v4860_v41  ;;  %4053 = vrot.lane.b32.xlu0 %v11611_v15, %s11371_s1  ;;  %vm11619_vm7 = vmmov %vm11616_vm2 }
 0x62e   :  { %v4884_v29 = vmul.f32 %v7832_v39, %v4864_v53  ;;  %4057 = vrot.lane.b32.xlu1 %v11612_v30, %s11371_s1 }
 0x62f   :  { %v4904_v5 = vpop.permute.xlu0 %4903  ;;  %v7041_v13 = vpack.c.bf16 %v4883_v33, %v4881_v34  ;;  %v11615_v33 = vld [vmem:[#allocation4_spill] sm:$0xff] }
 0x630   :  { %v4908_v47 = vpop.permute.xlu1 %4907  ;;  %v7039_v14 = vpack.c.bf16 %v4884_v29, %v4882_v48  ;;  %v4929_v63 = vsel %vm818_vm0, %v4904_v5, 0.0 }
 0x631   :  { %5231 = vrot.lane.b32.xlu0 %v9525_v16, %s11613_s9  ;;  %v4930_v59 = vsel %vm818_vm0, %v4908_v47, 0.0  ;;  %v4934_v28 = vmul.f32 %v7910_v35, %v4929_v63 }
 0x632   :  { %5235 = vrot.lane.b32.xlu1 %v9541_v20, %s11613_s9  ;;  %7040 = vmatprep.subr.bf16.mxu1 %v7039_v14  ;;  %v4936_v4 = vmul.f32 %v7910_v35, %v4930_v59 }
 0x633   :  { %v4902_v18 = vpop.permute.xlu0 %4901  ;;  %7042 = vmatpush1.bf16.msra.mxu1 %v7041_v13 }
 0x634   :  { %v4906_v0 = vpop.permute.xlu1 %4905  ;;  %7044 = vmatprep.subr.bf16.mxu1 %v7043_v32  ;;  %v4917_v60 = vsel %vm818_vm0, %v4902_v18, %v4904_v5  ;;  %v7051_v6 = vpack.c.bf16 %v4936_v4, %v4934_v28 }
 0x635   :  { %5229 = vrot.lane.b32.xlu0 %v9519_v8, %s11613_s9  ;;  %v4918_v17 = vsel %vm818_vm0, %v4906_v0, %v4908_v47  ;;  %v4933_v19 = vmul.f32 %v7889_v23, %v4917_v60 }
 0x636   :  { %5233 = vrot.lane.b32.xlu1 %v9535_v61, %s11613_s9  ;;  %v4935_v57 = vmul.f32 %v7889_v23, %v4918_v17 }
 0x637   :  { %v4912_v46 = vpop.permute.xlu0 %4911  ;;  %7046 = vmatpush1.bf16.msra.mxu1 %v7045_v44 }
 0x638   :  { %v4931_v62 = vsel %vm818_vm0, %v4912_v46, 0.0  ;;  %v4916_v26 = vpop.permute.xlu1 %4915  ;;  %7048 = vmatprep.subr.bf16.mxu1 %v7047_v51  ;;  %v7053_v40 = vpack.c.bf16 %v4935_v57, %v4933_v19 }
 0x639   :  { %v4932_v11 = vsel %vm818_vm0, %v4916_v26, 0.0  ;;  %4095 = vrot.lane.b32.xlu0 %v11614_v21, %s11613_s9  ;;  %v4938_v55 = vmul.f32 %v7910_v35, %v4931_v62 }
 0x63a   :  { %v4940_v50 = vmul.f32 %v7910_v35, %v4932_v11  ;;  %4099 = vrot.lane.b32.xlu1 %v11502_v12, %s11613_s9 }
 0x63b   :  { %v4910_v58 = vpop.permute.xlu0 %4909  ;;  %7050 = vmatpush1.bf16.msra.mxu1 %v7049_v7 }
 0x63c   :  { %v4919_v25 = vsel %vm818_vm0, %v4910_v58, %v4912_v46  ;;  %v4914_v43 = vpop.permute.xlu1 %4913  ;;  %7052 = vmatprep.subr.bf16.mxu1 %v7051_v6  ;;  %v7055_v48 = vpack.c.bf16 %v4940_v50, %v4938_v55 }
 0x63d   :  { %v4937_v1 = vmul.f32 %v7889_v23, %v4919_v25  ;;  %v4920_v41 = vsel %vm818_vm0, %v4914_v43, %v4916_v26  ;;  %4093 = vrot.lane.b32.xlu0 %v11615_v33, %s11613_s9  ;;  %vm11622_vm0 = vmmov %vm11616_vm2 }
 0x63e   :  { %v4939_v53 = vmul.f32 %v7889_v23, %v4920_v41  ;;  %4097 = vrot.lane.b32.xlu1 %v11508_v22, %s11613_s9  ;;  %vm11623_vm13 = vmmov %vm11622_vm0 }
 0x63f   :  { %v4952_v29 = vpop.permute.xlu0 %4951  ;;  %7054 = vmatpush1.bf16.msra.mxu1 %v7053_v40  ;;  %vm11624_vm3 = vmmov %vm11622_vm0 }
 0x640   :  { %v7057_v34 = vpack.c.bf16 %v4939_v53, %v4937_v1  ;;  %v4977_v5 = vsel %vm839_vm14, %v4952_v29, 0.0  ;;  %v4956_v47 = vpop.permute.xlu1 %4955  ;;  %7056 = vmatprep.subr.bf16.mxu1 %v7055_v48 }
 0x641   :  { %v4982_v14 = vmul.f32 %v7953_v2, %v4977_v5  ;;  %v4978_v13 = vsel %vm839_vm14, %v4956_v47, 0.0  ;;  %5239 = vrot.lane.b32.xlu0 %v9557_v24, %s11613_s9 }
 0x642   :  { %v4984_v32 = vmul.f32 %v7953_v2, %v4978_v13  ;;  %5243 = vrot.lane.b32.xlu1 %v9571_v42, %s11613_s9 }
 0x643   :  { %v4950_v63 = vpop.permute.xlu0 %4949  ;;  %7058 = vmatpush1.bf16.msra.mxu1 %v7057_v34 }
 0x644   :  { %v4965_v59 = vsel %vm839_vm14, %v4950_v63, %v4952_v29  ;;  %v4954_v18 = vpop.permute.xlu1 %4953  ;;  %v7059_v0 = vpack.c.bf16 %v4984_v32, %v4982_v14 }
 0x645   :  { %v4981_v44 = vmul.f32 %v7934_v54, %v4965_v59  ;;  %v4966_v51 = vsel %vm839_vm14, %v4954_v18, %v4956_v47  ;;  %5237 = vrot.lane.b32.xlu0 %v9551_v56, %s11613_s9 }
 0x646   :  { %v4983_v28 = vmul.f32 %v7934_v54, %v4966_v51  ;;  %5241 = vrot.lane.b32.xlu1 %v9567_v3, %s11613_s9  ;;  %7060 = vmatprep.subr.bf16.mxu1 %v7059_v0 }
 0x647   :  { %v4960_v4 = vpop.permute.xlu0 %4959 }
 0x648   :  { %v7061_v60 = vpack.c.bf16 %v4983_v28, %v4981_v44  ;;  %v4979_v17 = vsel %vm839_vm14, %v4960_v4, 0.0  ;;  %v4964_v46 = vpop.permute.xlu1 %4963 }
 0x649   :  { %v4986_v62 = vmul.f32 %v7953_v2, %v4979_v17  ;;  %v4980_v26 = vsel %vm839_vm14, %v4964_v46, 0.0  ;;  %4103 = vrot.lane.b32.xlu0 %v11609_v9, %s11613_s9 }
 0x64a   :  { %v4988_v19 = vmul.f32 %v7953_v2, %v4980_v26  ;;  %4107 = vrot.lane.b32.xlu1 %v11610_v31, %s11613_s9  ;;  %7062 = vmatpush1.bf16.msra.mxu1 %v7061_v60 }
 0x64b   :  { %v4958_v57 = vpop.permute.xlu0 %4957 }
 0x64c   :  { %v4967_v11 = vsel %vm839_vm14, %v4958_v57, %v4960_v4  ;;  %v4962_v7 = vpop.permute.xlu1 %4961  ;;  %v7063_v55 = vpack.c.bf16 %v4988_v19, %v4986_v62 }
 0x64d   :  { %v4985_v50 = vmul.f32 %v7934_v54, %v4967_v11  ;;  %v4968_v6 = vsel %vm839_vm14, %v4962_v7, %v4964_v46  ;;  %4101 = vrot.lane.b32.xlu0 %v11611_v15, %s11613_s9  ;;  %vm11621_vm14 = vmmov %vm11616_vm2 }
 0x64e   :  { %v4987_v58 = vmul.f32 %v7934_v54, %v4968_v6  ;;  %4105 = vrot.lane.b32.xlu1 %v11612_v30, %s11613_s9  ;;  %7064 = vmatprep.subr.bf16.mxu1 %v7063_v55 }
 0x64f   :  { %v5000_v25 = vpop.permute.xlu0 %4999 }
 0x650   :  { %v7065_v43 = vpack.c.bf16 %v4987_v58, %v4985_v50  ;;  %v5025_v40 = vsel %vm11616_vm2, %v5000_v25, 0.0  ;;  %v5004_v1 = vpop.permute.xlu1 %5003  ;;  %vm11630_vm2 = vmmov %vm11629_vm1 }
 0x651   :  { %v5030_v41 = vmul.f32 %v7828_v38, %v5025_v40  ;;  %v5026_v53 = vsel %vm11617_vm15, %v5004_v1, 0.0  ;;  %5279 = vrot.lane.b32.xlu0 %v9525_v16, %s11618_s10  ;;  %vm11631_vm15 = vmmov %vm11629_vm1 }
 0x652   :  { %v5032_v48 = vmul.f32 %v7828_v38, %v5026_v53  ;;  %5283 = vrot.lane.b32.xlu1 %v9541_v20, %s11618_s10  ;;  %7066 = vmatpush1.bf16.msra.mxu1 %v7065_v43 }
 0x653   :  { %v4998_v29 = vpop.permute.xlu0 %4997 }
 0x654   :  { %v5013_v34 = vsel %vm11619_vm7, %v4998_v29, %v5000_v25  ;;  %v5002_v5 = vpop.permute.xlu1 %5001  ;;  %v7067_v47 = vpack.c.bf16 %v5032_v48, %v5030_v41  ;;  %v7527_v48 = vld [vmem:[%s11086_s5 + $0x8] sm:$0xff]  ;;  %vm11632_vm7 = vmmov %vm11629_vm1 }
 0x655   :  { %v5029_v14 = vmul.f32 %v7820_v36, %v5013_v34  ;;  %v5014_v13 = vsel %vm11620_vm10, %v5002_v5, %v5004_v1  ;;  %5277 = vrot.lane.b32.xlu0 %v9519_v8, %s11618_s10  ;;  %vm11634_vm10 = vcmask 916480  }
 0x656   :  { %v5031_v32 = vmul.f32 %v7820_v36, %v5014_v13  ;;  %5281 = vrot.lane.b32.xlu1 %v9535_v61, %s11618_s10  ;;  %7068 = vmatprep.subr.bf16.mxu1 %v7067_v47 }
 0x657   :  { %v5008_v63 = vpop.permute.xlu0 %5007 }
 0x658   :  { %v7069_v59 = vpack.c.bf16 %v5031_v32, %v5029_v14  ;;  %v5027_v18 = vsel %vm11621_vm14, %v5008_v63, 0.0  ;;  %v5012_v0 = vpop.permute.xlu1 %5011  ;;  %vm11635_vm14 = vmmov %vm11634_vm10 }
 0x659   :  { %v5034_v44 = vmul.f32 %v7828_v38, %v5027_v18  ;;  %v5028_v51 = vsel %vm11622_vm0, %v5012_v0, 0.0  ;;  %4143 = vrot.lane.b32.xlu0 %v11614_v21, %s11618_s10  ;;  %vm11637_vm0 = vmmov %vm11634_vm10 }
 0x65a   :  { %v5036_v28 = vmul.f32 %v7828_v38, %v5028_v51  ;;  %4147 = vrot.lane.b32.xlu1 %v11502_v12, %s11618_s10  ;;  %7070 = vmatpush1.bf16.msra.mxu1 %v7069_v59 }
 0x65b   :  { %v5006_v4 = vpop.permute.xlu0 %5005 }
 0x65c   :  { %v5015_v60 = vsel %vm11623_vm13, %v5006_v4, %v5008_v63  ;;  %v5010_v17 = vpop.permute.xlu1 %5009  ;;  %v7071_v46 = vpack.c.bf16 %v5036_v28, %v5034_v44  ;;  %vm11639_vm13 = vmmov %vm11637_vm0 }
 0x65d   :  { %v5033_v62 = vmul.f32 %v7820_v36, %v5015_v60  ;;  %v5016_v26 = vsel %vm11624_vm3, %v5010_v17, %v5012_v0  ;;  %4141 = vrot.lane.b32.xlu0 %v11615_v33, %s11618_s10  ;;  %vm11640_vm3 = vcmask 908288  }
 0x65e   :  { %v5035_v19 = vmul.f32 %v7820_v36, %v5016_v26  ;;  %4145 = vrot.lane.b32.xlu1 %v11508_v22, %s11618_s10  ;;  %7072 = vmatprep.subr.bf16.mxu1 %v7071_v46 }
 0x65f   :  { %v5048_v57 = vpop.permute.xlu0 %5047 }
 0x660   :  { %v7073_v11 = vpack.c.bf16 %v5035_v19, %v5033_v62  ;;  %v5073_v7 = vsel %vm11625_vm5, %v5048_v57, 0.0  ;;  %v5052_v55 = vpop.permute.xlu1 %5051  ;;  %vm11641_vm5 = vmmov %vm11640_vm3 }
 0x661   :  { %v5078_v50 = vmul.f32 %v7832_v39, %v5073_v7  ;;  %v5074_v6 = vsel %vm11626_vm6, %v5052_v55, 0.0  ;;  %5287 = vrot.lane.b32.xlu0 %v9557_v24, %s11618_s10  ;;  %vm11642_vm6 = vmmov %vm11640_vm3 }
 0x662   :  { %v5080_v58 = vmul.f32 %v7832_v39, %v5074_v6  ;;  %5291 = vrot.lane.b32.xlu1 %v9571_v42, %s11618_s10  ;;  %7074 = vmatpush1.bf16.msra.mxu1 %v7073_v11 }
 0x663   :  { %v5046_v25 = vpop.permute.xlu0 %5045 }
 0x664   :  { %v5061_v43 = vsel %vm11627_vm11, %v5046_v25, %v5048_v57  ;;  %v5050_v40 = vpop.permute.xlu1 %5049  ;;  %v7075_v1 = vpack.c.bf16 %v5080_v58, %v5078_v50  ;;  %vm11643_vm11 = vmmov %vm11640_vm3 }
 0x665   :  { %v5077_v41 = vmul.f32 %v7824_v37, %v5061_v43  ;;  %v5062_v53 = vsel %vm11628_vm8, %v5050_v40, %v5052_v55  ;;  %5285 = vrot.lane.b32.xlu0 %v9551_v56, %s11618_s10  ;;  %6303 = vmatmul.mubr.f32.vlgmr.msra.gmra.mrb[24].mxu1 %v7527_v48  ;;  %vm11646_vm8 = vmmov %vm11640_vm3 }
 0x666   :  { %v5079_v29 = vmul.f32 %v7824_v37, %v5062_v53  ;;  %5289 = vrot.lane.b32.xlu1 %v9567_v3, %s11618_s10  ;;  %7076 = vmatprep.subr.bf16.mxu1 %v7075_v1 }
 0x667   :  { %v5056_v34 = vpop.permute.xlu0 %5055 }
 0x668   :  { %v7077_v5 = vpack.c.bf16 %v5079_v29, %v5077_v41  ;;  %v5075_v47 = vsel %vm11629_vm1, %v5056_v34, 0.0  ;;  %v5060_v14 = vpop.permute.xlu1 %5059  ;;  %v11636_v41 = vld [vmem:[#allocation5_spill] sm:$0xff]  ;;  %vm11649_vm1 = vmmov %vm11640_vm3 }
 0x669   :  { %v5082_v13 = vmul.f32 %v7832_v39, %v5075_v47  ;;  %v5076_v32 = vsel %vm11630_vm2, %v5060_v14, 0.0  ;;  %4151 = vrot.lane.b32.xlu0 %v11609_v9, %s11618_s10  ;;  %vm11650_vm2 = vmmov %vm11649_vm1 }
 0x66a   :  { %v5084_v63 = vmul.f32 %v7832_v39, %v5076_v32  ;;  %4155 = vrot.lane.b32.xlu1 %v11610_v31, %s11618_s10  ;;  %7078 = vmatpush1.bf16.msra.mxu1 %v7077_v5 }
 0x66b   :  { %v5054_v59 = vpop.permute.xlu0 %5053 }
 0x66c   :  { %v5063_v18 = vsel %vm11631_vm15, %v5054_v59, %v5056_v34  ;;  %v5058_v0 = vpop.permute.xlu1 %5057  ;;  %v7079_v44 = vpack.c.bf16 %v5084_v63, %v5082_v13  ;;  %vm11651_vm15 = vcmask 900096  }
 0x66d   :  { %v5081_v51 = vmul.f32 %v7824_v37, %v5063_v18  ;;  %v5064_v28 = vsel %vm11632_vm7, %v5058_v0, %v5060_v14  ;;  %4149 = vrot.lane.b32.xlu0 %v11611_v15, %s11618_s10  ;;  %vm11652_vm7 = vmmov %vm11651_vm15 }
 0x66e   :  { %v5083_v4 = vmul.f32 %v7824_v37, %v5064_v28  ;;  %4153 = vrot.lane.b32.xlu1 %v11612_v30, %s11618_s10  ;;  %7080 = vmatprep.subr.bf16.mxu1 %v7079_v44 }
 0x66f   :  { %v7463_v60 = vpop.permute.xlu0 %7462 }
 0x670   :  { %v7081_v17 = vpack.c.bf16 %v5083_v4, %v5081_v51  ;;  %v7465_v46 = vunpack.i.h.bf16 %v7463_v60  ;;  %v7464_v62 = vunpack.i.l.bf16 %v7463_v60  ;;  %v7468_v26 = vpop.permute.xlu1 %7467 }
 0x671   :  { %v7470_v19 = vunpack.i.h.bf16 %v7468_v26  ;;  %v7469_v57 = vunpack.i.l.bf16 %v7468_v26  ;;  %7482 = vrot.lane.b32.xlu0 %v11460_v52, %s11633_s15  ;;  %v11648_v26 = vld [vmem:[#allocation36_spill] sm:$0xff] }
 0x672   :  { %v5109_v11 = vsel %vm11634_vm10, %v7464_v62, %v7465_v46  ;;  %7487 = vrot.lane.b32.xlu1 %v11461_v27, %s11633_s15  ;;  %7082 = vmatpush1.bf16.msra.mxu1 %v7081_v17  ;;  %v11638_v27 = vld [vmem:[#allocation9_spill] sm:$0xff]  ;;  %vm11653_vm10 = vmmov %vm11652_vm7 }
 0x673   :  { %v5110_v7 = vsel %vm11635_vm14, %v7469_v57, %v7470_v19  ;;  %v7083_v55 = vpack.c.bf16 %v7470_v19, %v7465_v46  ;;  %v7473_v50 = vpop.permute.xlu0 %7472  ;;  %v11647_v46 = vld [vmem:[#allocation33_spill] sm:$0xff]  ;;  %vm11654_vm14 = vmmov %vm11652_vm7 }
 0x674   :  { %v7086_v6 = vpack.c.bf16 %v5110_v7, %v5109_v11  ;;  %v7475_v58 = vunpack.i.h.bf16 %v7473_v50  ;;  %v7474_v25 = vunpack.i.l.bf16 %v7473_v50  ;;  %v7478_v43 = vpop.permute.xlu1 %7477 }
 0x675   :  { %v7480_v40 = vunpack.i.h.bf16 %v7478_v43  ;;  %v7479_v1 = vunpack.i.l.bf16 %v7478_v43  ;;  %7492 = vrot.lane.b32.xlu0 %v11636_v41, %s11633_s15  ;;  %7085 = vmatprep.subr.msk.bf16.mxu1 %vm10354_vm9, %v7083_v55 }
 0x676   :  { %v5111_v52 = vsel %vm11637_vm0, %v7474_v25, %v7475_v58  ;;  %7497 = vrot.lane.b32.xlu1 %v11638_v27, %s11633_s15  ;;  %7087 = vmatpush1.bf16.msra.mxu1 %v7086_v6  ;;  %vm11656_vm0 = vmmov %vm11652_vm7 }
 0x677   :  { %v5112_v53 = vsel %vm11639_vm13, %v7479_v1, %v7480_v40  ;;  %v7088_v48 = vpack.c.bf16 %v7480_v40, %v7475_v58  ;;  %v5136_v29 = vpop.permute.xlu0 %5135  ;;  %vm11658_vm13 = vmmov %vm11656_vm0 }
 0x678   :  { %v7091_v34 = vpack.c.bf16 %v5112_v53, %v5111_v52  ;;  %v5161_v5 = vsel %vm11640_vm3, %v5136_v29, 0.0  ;;  %v5140_v47 = vpop.permute.xlu1 %5139 }
 0x679   :  { %v5166_v14 = vmul.f32 %v7910_v35, %v5161_v5  ;;  %v5162_v13 = vsel %vm11641_vm5, %v5140_v47, 0.0  ;;  %7502 = vrot.lane.b32.xlu0 %v11607_v45, %s11633_s15  ;;  %7090 = vmatprep.subr.msk.bf16.mxu1 %vm10354_vm9, %v7088_v48  ;;  %vm11645_vm9 = vmmov %vm11640_vm3 }
 0x67a   :  { %v5168_v32 = vmul.f32 %v7910_v35, %v5162_v13  ;;  %7507 = vrot.lane.b32.xlu1 %v11608_v49, %s11633_s15  ;;  %7092 = vmatpush1.bf16.msra.mxu1 %v7091_v34  ;;  %vm11659_vm3 = vmmov %vm11656_vm0 }
 0x67b   :  { %v5134_v63 = vpop.permute.xlu0 %5133  ;;  %vm11660_vm5 = vmmov %vm11656_vm0 }
 0x67c   :  { %v5149_v59 = vsel %vm11642_vm6, %v5134_v63, %v5136_v29  ;;  %v5138_v18 = vpop.permute.xlu1 %5137  ;;  %v7093_v0 = vpack.c.bf16 %v5168_v32, %v5166_v14  ;;  %v11657_v32 = vld [vmem:[#allocation12_spill] sm:$0xff]  ;;  %vm11661_vm6 = vmmov %vm11656_vm0 }
 0x67d   :  { %v5165_v44 = vmul.f32 %v7889_v23, %v5149_v59  ;;  %v5150_v51 = vsel %vm11643_vm11, %v5138_v18, %v5140_v47  ;;  %5367 = vrot.lane.b32.xlu0 %v9525_v16, %s11644_s17  ;;  %v11655_v47 = vld [vmem:[#allocation59_spill] sm:$0xff]  ;;  %vm11662_vm11 = vmmov %vm11656_vm0 }
 0x67e   :  { %v5167_v10 = vmul.f32 %v7889_v23, %v5150_v51  ;;  %5371 = vrot.lane.b32.xlu1 %v9541_v20, %s11644_s17  ;;  %7094 = vmatprep.subr.bf16.mxu1 %v7093_v0  ;;  %v4073_v14 = vsel %vm11656_vm0, %v11655_v47, 0.0  ;;  %v4061_v63 = vsel %vm11658_vm13, %v11657_v32, %v11655_v47 }
 0x67f   :  { %v5144_v45 = vpop.permute.xlu0 %5143  ;;  %v4078_v51 = vmul.f32 %v7953_v2, %v4073_v14 }
 0x680   :  { %v7095_v49 = vpack.c.bf16 %v5167_v10, %v5165_v44  ;;  %v5163_v28 = vsel %vm11645_vm9, %v5144_v45, 0.0  ;;  %v5148_v4 = vpop.permute.xlu1 %5147  ;;  %vm11663_vm9 = vmmov %vm11656_vm0 }
 0x681   :  { %v5170_v60 = vmul.f32 %v7910_v35, %v5163_v28  ;;  %v5164_v17 = vsel %vm11646_vm8, %v5148_v4, 0.0  ;;  %7512 = vrot.lane.b32.xlu0 %v11647_v46, %s11633_s15  ;;  %vm11664_vm8 = vmmov %vm11656_vm0 }
 0x682   :  { %v5172_v62 = vmul.f32 %v7910_v35, %v5164_v17  ;;  %7517 = vrot.lane.b32.xlu1 %v11648_v26, %s11633_s15  ;;  %7096 = vmatpush1.bf16.msra.mxu1 %v7095_v49  ;;  %v4077_v49 = vmul.f32 %v7934_v54, %v4061_v63 }
 0x683   :  { %v5142_v19 = vpop.permute.xlu0 %5141 }
 0x684   :  { %v5151_v57 = vsel %vm11649_vm1, %v5142_v19, %v5144_v45  ;;  %v5146_v11 = vpop.permute.xlu1 %5145  ;;  %v7097_v7 = vpack.c.bf16 %v5172_v62, %v5170_v60  ;;  %vm11665_vm1 = vmmov %vm11656_vm0 }
 0x685   :  { %v5169_v55 = vmul.f32 %v7889_v23, %v5151_v57  ;;  %v5152_v50 = vsel %vm11650_vm2, %v5146_v11, %v5148_v4  ;;  %5365 = vrot.lane.b32.xlu0 %v9519_v8, %s11644_s17  ;;  %vm11666_vm2 = vmmov %vm11656_vm0 }
 0x686   :  { %v5171_v6 = vmul.f32 %v7889_v23, %v5152_v50  ;;  %5369 = vrot.lane.b32.xlu1 %v9535_v61, %s11644_s17  ;;  %7098 = vmatprep.subr.bf16.mxu1 %v7097_v7 }
 0x687   :  { %v5184_v58 = vpop.permute.xlu0 %5183 }
 0x688   :  { %v7099_v25 = vpack.c.bf16 %v5171_v6, %v5169_v55  ;;  %v5209_v43 = vsel %vm11651_vm15, %v5184_v58, 0.0  ;;  %v5188_v40 = vpop.permute.xlu1 %5187  ;;  %vm11667_vm15 = vmmov %vm11656_vm0 }
 0x689   :  { %v5214_v1 = vmul.f32 %v7953_v2, %v5209_v43  ;;  %v5210_v41 = vsel %vm11652_vm7, %v5188_v40, 0.0  ;;  %4231 = vrot.lane.b32.xlu0 %v11614_v21, %s11644_s17  ;;  %vm11668_vm7 = vmmov %vm11656_vm0 }
 0x68a   :  { %v5216_v52 = vmul.f32 %v7953_v2, %v5210_v41  ;;  %4235 = vrot.lane.b32.xlu1 %v11502_v12, %s11644_s17  ;;  %7100 = vmatpush1.bf16.msra.mxu1 %v7099_v25 }
 0x68b   :  { %v5182_v27 = vpop.permute.xlu0 %5181 }
 0x68c   :  { %v5197_v53 = vsel %vm11653_vm10, %v5182_v27, %v5184_v58  ;;  %v5186_v48 = vpop.permute.xlu1 %5185  ;;  %v7101_v29 = vpack.c.bf16 %v5216_v52, %v5214_v1  ;;  %vm11670_vm10 = vcmask 801792  }
 0x68d   :  { %v5213_v34 = vmul.f32 %v7934_v54, %v5197_v53  ;;  %v5198_v5 = vsel %vm11654_vm14, %v5186_v48, %v5188_v40  ;;  %4229 = vrot.lane.b32.xlu0 %v11615_v33, %s11644_s17  ;;  %v10871_v48 = vld [vmem:[%s11086_s5 + $0x10] sm:$0xff]  ;;  %vm11671_vm14 = vmmov %vm11670_vm10 }
 0x68e   :  { %v5215_v13 = vmul.f32 %v7934_v54, %v5198_v5  ;;  %4233 = vrot.lane.b32.xlu1 %v11508_v22, %s11644_s17  ;;  %7102 = vmatprep.subr.bf16.mxu1 %v7101_v29  ;;  %vm11672_vm0 = vmmov %vm11670_vm10 }
 0x68f   :  { %v4052_v59 = vpop.permute.xlu0 %4051  ;;  %vm11673_vm13 = vmmov %vm11672_vm0 }
 0x690   :  { %v7103_v18 = vpack.c.bf16 %v5215_v13, %v5213_v34  ;;  %v4074_v0 = vsel %vm11659_vm3, %v4052_v59, 0.0  ;;  %v4050_v44 = vpop.permute.xlu1 %4049  ;;  %v5877_v34 = vcombine.high %v10871_v48, %v10871_v48  ;;  %vm11674_vm3 = vmmov %vm11672_vm0 }
 0x691   :  { %v4080_v10 = vmul.f32 %v7953_v2, %v4074_v0  ;;  %v4062_v45 = vsel %vm11660_vm5, %v4050_v44, %v4052_v59  ;;  %5375 = vrot.lane.b32.xlu0 %v9557_v24, %s11644_s17  ;;  %vm11675_vm5 = vmmov %vm11672_vm0 }
 0x692   :  { %v4079_v28 = vmul.f32 %v7934_v54, %v4062_v45  ;;  %5379 = vrot.lane.b32.xlu1 %v9571_v42, %s11644_s17  ;;  %7104 = vmatpush1.bf16.msra.mxu1 %v7103_v18 }
 0x693   :  { %v5192_v4 = vpop.permute.xlu0 %5191  ;;  %v6893_v60 = vpack.c.bf16 %v4080_v10, %v4078_v51  ;;  %6373 = vmatprep.mubr.f32.mxu1 %v5877_v34  ;;  %6089 = vmatprep.mubr.f32.mxu0 %v5877_v34 }
 0x694   :  { %v6895_v17 = vpack.c.bf16 %v4079_v28, %v4077_v49  ;;  %v5211_v46 = vsel %vm11661_vm6, %v5192_v4, 0.0  ;;  %v5196_v62 = vpop.permute.xlu1 %5195  ;;  %vm11676_vm6 = vmmov %vm11672_vm0 }
 0x695   :  { %v5218_v26 = vmul.f32 %v7953_v2, %v5211_v46  ;;  %v5212_v19 = vsel %vm11662_vm11, %v5196_v62, 0.0  ;;  %5373 = vrot.lane.b32.xlu0 %v9551_v56, %s11644_s17  ;;  %6894 = vmatprep.subr.bf16.mxu0 %v6893_v60  ;;  %vm11677_vm11 = vmmov %vm11672_vm0 }
 0x696   :  { %v5220_v57 = vmul.f32 %v7953_v2, %v5212_v19  ;;  %5377 = vrot.lane.b32.xlu1 %v9567_v3, %s11644_s17  ;;  %6896 = vmatpush1.bf16.msra.mxu0 %v6895_v17 }
 0x697   :  { %v5190_v11 = vpop.permute.xlu0 %5189 }
 0x698   :  { %v5199_v7 = vsel %vm11663_vm9, %v5190_v11, %v5192_v4  ;;  %v5194_v55 = vpop.permute.xlu1 %5193  ;;  %v7105_v50 = vpack.c.bf16 %v5220_v57, %v5218_v26  ;;  %vm11678_vm9 = vmmov %vm11672_vm0 }
 0x699   :  { %v5217_v6 = vmul.f32 %v7934_v54, %v5199_v7  ;;  %v5200_v58 = vsel %vm11664_vm8, %v5194_v55, %v5196_v62  ;;  %4239 = vrot.lane.b32.xlu0 %v11609_v9, %s11644_s17  ;;  %vm11679_vm8 = vmmov %vm11672_vm0 }
 0x69a   :  { %v5219_v25 = vmul.f32 %v7934_v54, %v5200_v58  ;;  %4243 = vrot.lane.b32.xlu1 %v11610_v31, %s11644_s17  ;;  %7106 = vmatprep.subr.bf16.mxu1 %v7105_v50 }
 0x69b   :  { %v4056_v43 = vpop.permute.xlu0 %4055 }
 0x69c   :  { %v7107_v40 = vpack.c.bf16 %v5219_v25, %v5217_v6  ;;  %v4075_v1 = vsel %vm11665_vm1, %v4056_v43, 0.0  ;;  %v4060_v41 = vpop.permute.xlu1 %4059  ;;  %vm11680_vm1 = vmmov %vm11672_vm0 }
 0x69d   :  { %v4082_v52 = vmul.f32 %v7953_v2, %v4075_v1  ;;  %v4076_v27 = vsel %vm11666_vm2, %v4060_v41, 0.0  ;;  %4237 = vrot.lane.b32.xlu0 %v11611_v15, %s11644_s17  ;;  %vm11681_vm2 = vmmov %vm11672_vm0 }
 0x69e   :  { %v4084_v53 = vmul.f32 %v7953_v2, %v4076_v27  ;;  %4241 = vrot.lane.b32.xlu1 %v11612_v30, %s11644_s17  ;;  %7108 = vmatpush1.bf16.msra.mxu1 %v7107_v40 }
 0x69f   :  { %v4054_v29 = vpop.permute.xlu0 %4053 }
 0x6a0   :  { %v4063_v5 = vsel %vm11667_vm15, %v4054_v29, %v4056_v43  ;;  %v4058_v47 = vpop.permute.xlu1 %4057  ;;  %v6897_v14 = vpack.c.bf16 %v4084_v53, %v4082_v52  ;;  %vm11682_vm15 = vmmov %vm11672_vm0 }
 0x6a1   :  { %v4081_v13 = vmul.f32 %v7934_v54, %v4063_v5  ;;  %v4064_v32 = vsel %vm11668_vm7, %v4058_v47, %v4060_v41  ;;  %5415 = vrot.lane.b32.xlu0 %v9525_v16, %s11669_s29  ;;  %vm11683_vm7 = vmmov %vm11672_vm0 }
 0x6a2   :  { %v4083_v63 = vmul.f32 %v7934_v54, %v4064_v32  ;;  %5419 = vrot.lane.b32.xlu1 %v9541_v20, %s11669_s29  ;;  %6898 = vmatprep.subr.bf16.mxu0 %v6897_v14 }
 0x6a3   :  { %v5232_v59 = vpop.permute.xlu0 %5231 }
 0x6a4   :  { %v6899_v18 = vpack.c.bf16 %v4083_v63, %v4081_v13  ;;  %v5257_v0 = vsel %vm11670_vm10, %v5232_v59, 0.0  ;;  %v5236_v44 = vpop.permute.xlu1 %5235  ;;  %vm11684_vm10 = vmmov %vm11672_vm0 }
 0x6a5   :  { %v5262_v51 = vmul.f32 %v7828_v38, %v5257_v0  ;;  %v5258_v10 = vsel %vm11671_vm14, %v5236_v44, 0.0  ;;  %5413 = vrot.lane.b32.xlu0 %v9519_v8, %s11669_s29  ;;  %vm11685_vm14 = vmmov %vm11672_vm0 }
 0x6a6   :  { %v5264_v16 = vmul.f32 %v7828_v38, %v5258_v10  ;;  %5417 = vrot.lane.b32.xlu1 %v9535_v61, %s11669_s29  ;;  %6900 = vmatpush1.bf16.msra.mxu0 %v6899_v18 }
 0x6a7   :  { %v5230_v20 = vpop.permute.xlu0 %5229 }
 0x6a8   :  { %v5245_v45 = vsel %vm11672_vm0, %v5230_v20, %v5232_v59  ;;  %v5234_v49 = vpop.permute.xlu1 %5233  ;;  %v7109_v28 = vpack.c.bf16 %v5264_v16, %v5262_v51  ;;  %vm11686_vm0 = vcmask 793600  }
 0x6a9   :  { %v5261_v4 = vmul.f32 %v7820_v36, %v5245_v45  ;;  %v5246_v60 = vsel %vm11673_vm13, %v5234_v49, %v5236_v44  ;;  %4279 = vrot.lane.b32.xlu0 %v11614_v21, %s11669_s29  ;;  %vm11687_vm13 = vmmov %vm11686_vm0 }
 0x6aa   :  { %v5263_v8 = vmul.f32 %v7820_v36, %v5246_v60  ;;  %4283 = vrot.lane.b32.xlu1 %v11502_v12, %s11669_s29  ;;  %7110 = vmatprep.subr.bf16.mxu1 %v7109_v28 }
 0x6ab   :  { %v4096_v61 = vpop.permute.xlu0 %4095 }
 0x6ac   :  { %v7111_v17 = vpack.c.bf16 %v5263_v8, %v5261_v4  ;;  %v4121_v46 = vsel %vm11674_vm3, %v4096_v61, 0.0  ;;  %v4100_v62 = vpop.permute.xlu1 %4099  ;;  %vm11688_vm3 = vmmov %vm11686_vm0 }
 0x6ad   :  { %v4126_v26 = vmul.f32 %v7828_v38, %v4121_v46  ;;  %v4122_v19 = vsel %vm11675_vm5, %v4100_v62, 0.0  ;;  %4277 = vrot.lane.b32.xlu0 %v11615_v33, %s11669_s29  ;;  %vm11689_vm5 = vmmov %vm11686_vm0 }
 0x6ae   :  { %v4128_v21 = vmul.f32 %v7828_v38, %v4122_v19  ;;  %4281 = vrot.lane.b32.xlu1 %v11508_v22, %s11669_s29  ;;  %7112 = vmatpush1.bf16.msra.mxu1 %v7111_v17 }
 0x6af   :  { %v4094_v12 = vpop.permute.xlu0 %4093 }
 0x6b0   :  { %v4109_v57 = vsel %vm11676_vm6, %v4094_v12, %v4096_v61  ;;  %v4098_v11 = vpop.permute.xlu1 %4097  ;;  %v6901_v7 = vpack.c.bf16 %v4128_v21, %v4126_v26  ;;  %vm11690_vm6 = vmmov %vm11686_vm0 }
 0x6b1   :  { %v4125_v55 = vmul.f32 %v7820_v36, %v4109_v57  ;;  %v4110_v50 = vsel %vm11677_vm11, %v4098_v11, %v4100_v62  ;;  %5423 = vrot.lane.b32.xlu0 %v9557_v24, %s11669_s29  ;;  %vm11691_vm11 = vmmov %vm11686_vm0 }
 0x6b2   :  { %v4127_v33 = vmul.f32 %v7820_v36, %v4110_v50  ;;  %5427 = vrot.lane.b32.xlu1 %v9571_v42, %s11669_s29  ;;  %6902 = vmatprep.subr.bf16.mxu0 %v6901_v7 }
 0x6b3   :  { %v5240_v22 = vpop.permute.xlu0 %5239 }
 0x6b4   :  { %v6903_v6 = vpack.c.bf16 %v4127_v33, %v4125_v55  ;;  %v5259_v58 = vsel %vm11678_vm9, %v5240_v22, 0.0  ;;  %v5244_v25 = vpop.permute.xlu1 %5243  ;;  %vm11692_vm9 = vmmov %vm11686_vm0 }
 0x6b5   :  { %v5266_v43 = vmul.f32 %v7828_v38, %v5259_v58  ;;  %v5260_v40 = vsel %vm11679_vm8, %v5244_v25, 0.0  ;;  %5421 = vrot.lane.b32.xlu0 %v9551_v56, %s11669_s29  ;;  %vm11693_vm8 = vmmov %vm11686_vm0 }
 0x6b6   :  { %v5268_v24 = vmul.f32 %v7828_v38, %v5260_v40  ;;  %5425 = vrot.lane.b32.xlu1 %v9567_v3, %s11669_s29  ;;  %6904 = vmatpush1.bf16.msra.mxu0 %v6903_v6 }
 0x6b7   :  { %v5238_v42 = vpop.permute.xlu0 %5237 }
 0x6b8   :  { %v5247_v1 = vsel %vm11680_vm1, %v5238_v42, %v5240_v22  ;;  %v5242_v41 = vpop.permute.xlu1 %5241  ;;  %v7113_v52 = vpack.c.bf16 %v5268_v24, %v5266_v43  ;;  %vm11694_vm1 = vmmov %vm11686_vm0 }
 0x6b9   :  { %v5265_v27 = vmul.f32 %v7820_v36, %v5247_v1  ;;  %v5248_v53 = vsel %vm11681_vm2, %v5242_v41, %v5244_v25  ;;  %4287 = vrot.lane.b32.xlu0 %v11609_v9, %s11669_s29  ;;  %vm11695_vm2 = vmmov %vm11686_vm0 }
 0x6ba   :  { %v5267_v56 = vmul.f32 %v7820_v36, %v5248_v53  ;;  %4291 = vrot.lane.b32.xlu1 %v11610_v31, %s11669_s29  ;;  %7114 = vmatprep.subr.bf16.mxu1 %v7113_v52  ;;  %v5865_v31 = vld [vmem:[%s11087_s6] sm:$0xf] }
 0x6bb   :  { %v4104_v3 = vpop.permute.xlu0 %4103 }
 0x6bc   :  { %v7115_v29 = vpack.c.bf16 %v5267_v56, %v5265_v27  ;;  %v4123_v34 = vsel %vm11682_vm15, %v4104_v3, 0.0  ;;  %v4108_v5 = vpop.permute.xlu1 %4107  ;;  %vm11696_vm15 = vmmov %vm11686_vm0 }
 0x6bd   :  { %v4130_v47 = vmul.f32 %v7828_v38, %v4123_v34  ;;  %v4124_v14 = vsel %vm11683_vm7, %v4108_v5, 0.0  ;;  %4285 = vrot.lane.b32.xlu0 %v11611_v15, %s11669_s29  ;;  %vm11697_vm7 = vmmov %vm11686_vm0 }
 0x6be   :  { %v4132_v9 = vmul.f32 %v7828_v38, %v4124_v14  ;;  %4289 = vrot.lane.b32.xlu1 %v11612_v30, %s11669_s29  ;;  %7116 = vmatpush1.bf16.msra.mxu1 %v7115_v29 }
 0x6bf   :  { %v4102_v13 = vpop.permute.xlu0 %4101 }
 0x6c0   :  { %v4111_v32 = vsel %vm11684_vm10, %v4102_v13, %v4104_v3  ;;  %v4106_v63 = vpop.permute.xlu1 %4105  ;;  %v6905_v59 = vpack.c.bf16 %v4132_v9, %v4130_v47  ;;  %vm11698_vm10 = vmmov %vm11686_vm0 }
 0x6c1   :  { %v4129_v18 = vmul.f32 %v7820_v36, %v4111_v32  ;;  %v4112_v0 = vsel %vm11685_vm14, %v4106_v63, %v4108_v5  ;;  %5868 = vperm.xlu0 %7360, %v5865_v31   ;;  %vm11699_vm14 = vmmov %vm11686_vm0 }
 0x6c2   :  { %v4131_v38 = vmul.f32 %v7820_v36, %v4112_v0  ;;  %6906 = vmatprep.subr.bf16.mxu0 %v6905_v59 }
 0x6c3   :  { %v5280_v15 = vpop.permute.xlu0 %5279 }
 0x6c4   :  { %v6907_v30 = vpack.c.bf16 %v4131_v38, %v4129_v18  ;;  %v5305_v44 = vsel %vm11686_vm0, %v5280_v15, 0.0  ;;  %v5284_v51 = vpop.permute.xlu1 %5283 }
 0x6c5   :  { %v5310_v10 = vmul.f32 %v7832_v39, %v5305_v44  ;;  %v5306_v16 = vsel %vm11687_vm13, %v5284_v51, 0.0  ;;  %vm11700_vm13 = vmmov %vm11686_vm0 }
 0x6c6   :  { %v5312_v20 = vmul.f32 %v7832_v39, %v5306_v16  ;;  %6908 = vmatpush1.bf16.msra.mxu0 %v6907_v30 }
 0x6c7   :  { %v5278_v45 = vpop.permute.xlu0 %5277 }
 0x6c8   :  { %v5293_v49 = vsel %vm11688_vm3, %v5278_v45, %v5280_v15  ;;  %v5282_v28 = vpop.permute.xlu1 %5281  ;;  %v7117_v4 = vpack.c.bf16 %v5312_v20, %v5310_v10  ;;  %vm11701_vm3 = vcmask 785408  }
 0x6c9   :  { %v5309_v36 = vmul.f32 %v7824_v37, %v5293_v49  ;;  %v5294_v60 = vsel %vm11689_vm5, %v5282_v28, %v5284_v51  ;;  %vm11702_vm5 = vmmov %vm11701_vm3 }
 0x6ca   :  { %v5311_v8 = vmul.f32 %v7824_v37, %v5294_v60  ;;  %7118 = vmatprep.subr.bf16.mxu1 %v7117_v4 }
 0x6cb   :  { %v4144_v61 = vpop.permute.xlu0 %4143 }
 0x6cc   :  { %v7119_v17 = vpack.c.bf16 %v5311_v8, %v5309_v36  ;;  %v4169_v46 = vsel %vm11690_vm6, %v4144_v61, 0.0  ;;  %v4148_v62 = vpop.permute.xlu1 %4147  ;;  %vm10981_vm6 = vmpackc.low %vm11702_vm5, %vm11702_vm5 }
 0x6cd   :  { %v4174_v26 = vmul.f32 %v7832_v39, %v4169_v46  ;;  %v4170_v19 = vsel %vm11691_vm11, %v4148_v62, 0.0  ;;  %vm11705_vm11 = vmmov %vm11701_vm3 }
 0x6ce   :  { %v4176_v21 = vmul.f32 %v7832_v39, %v4170_v19  ;;  %7120 = vmatpush1.bf16.msra.mxu1 %v7119_v17 }
 0x6cf   :  { %v4142_v12 = vpop.permute.xlu0 %4141 }
 0x6d0   :  { %v4157_v57 = vsel %vm11692_vm9, %v4142_v12, %v4144_v61  ;;  %v4146_v11 = vpop.permute.xlu1 %4145  ;;  %v6909_v7 = vpack.c.bf16 %v4176_v21, %v4174_v26  ;;  %vm11706_vm9 = vmmov %vm11701_vm3 }
 0x6d1   :  { %v4173_v55 = vmul.f32 %v7824_v37, %v4157_v57  ;;  %v4158_v50 = vsel %vm11693_vm8, %v4146_v11, %v4148_v62  ;;  %vm11707_vm8 = vmmov %vm11701_vm3 }
 0x6d2   :  { %v4175_v33 = vmul.f32 %v7824_v37, %v4158_v50  ;;  %6910 = vmatprep.subr.bf16.mxu0 %v6909_v7 }
 0x6d3   :  { %v5288_v22 = vpop.permute.xlu0 %5287 }
 0x6d4   :  { %v6911_v6 = vpack.c.bf16 %v4175_v33, %v4173_v55  ;;  %v5307_v58 = vsel %vm11694_vm1, %v5288_v22, 0.0  ;;  %v5292_v25 = vpop.permute.xlu1 %5291  ;;  %vm11708_vm1 = vmmov %vm11701_vm3 }
 0x6d5   :  { %v5314_v43 = vmul.f32 %v7832_v39, %v5307_v58  ;;  %v5308_v40 = vsel %vm11695_vm2, %v5292_v25, 0.0  ;;  %vm11709_vm2 = vmmov %vm11708_vm1 }
 0x6d6   :  { %v5316_v24 = vmul.f32 %v7832_v39, %v5308_v40  ;;  %6912 = vmatpush1.bf16.msra.mxu0 %v6911_v6 }
 0x6d7   :  { %v5286_v42 = vpop.permute.xlu0 %5285 }
 0x6d8   :  { %v5295_v1 = vsel %vm11696_vm15, %v5286_v42, %v5288_v22  ;;  %v5290_v41 = vpop.permute.xlu1 %5289  ;;  %v7121_v52 = vpack.c.bf16 %v5316_v24, %v5314_v43  ;;  %vm11710_vm15 = vcmask 777216  }
 0x6d9   :  { %v5313_v27 = vmul.f32 %v7824_v37, %v5295_v1  ;;  %v5296_v53 = vsel %vm11697_vm7, %v5290_v41, %v5292_v25  ;;  %vm11711_vm7 = vmmov %vm11710_vm15 }
 0x6da   :  { %v5315_v56 = vmul.f32 %v7824_v37, %v5296_v53  ;;  %7122 = vmatprep.subr.bf16.mxu1 %v7121_v52 }
 0x6db   :  { %v4152_v3 = vpop.permute.xlu0 %4151 }
 0x6dc   :  { %v7123_v29 = vpack.c.bf16 %v5315_v56, %v5313_v27  ;;  %v4171_v34 = vsel %vm11698_vm10, %v4152_v3, 0.0  ;;  %v4156_v5 = vpop.permute.xlu1 %4155  ;;  %vm11712_vm10 = vmmov %vm11708_vm1 }
 0x6dd   :  { %v4178_v47 = vmul.f32 %v7832_v39, %v4171_v34  ;;  %v4172_v14 = vsel %vm11699_vm14, %v4156_v5, 0.0  ;;  %vm11713_vm14 = vmmov %vm11708_vm1 }
 0x6de   :  { %v4180_v9 = vmul.f32 %v7832_v39, %v4172_v14  ;;  %7124 = vmatpush1.bf16.msra.mxu1 %v7123_v29 }
 0x6df   :  { %v4150_v31 = vpop.permute.xlu0 %4149 }
 0x6e0   :  { %v4159_v13 = vsel %vm11686_vm0, %v4150_v31, %v4152_v3  ;;  %v4154_v32 = vpop.permute.xlu1 %4153  ;;  %v6913_v63 = vpack.c.bf16 %v4180_v9, %v4178_v47  ;;  %vm11714_vm0 = vmmov %vm11711_vm7 }
 0x6e1   :  { %v4177_v59 = vmul.f32 %v7824_v37, %v4159_v13  ;;  %v4160_v18 = vsel %vm11700_vm13, %v4154_v32, %v4156_v5  ;;  %vm11715_vm13 = vmmov %vm11714_vm0 }
 0x6e2   :  { %v4179_v0 = vmul.f32 %v7824_v37, %v4160_v18  ;;  %6914 = vmatprep.subr.bf16.mxu0 %v6913_v63  ;;  %vm11717_vm5 = vmmov %vm11714_vm0 }
 0x6e3   :  { %v7483_v38 = vpop.permute.xlu0 %7482 }
 0x6e4   :  { %v6915_v15 = vpack.c.bf16 %v4179_v0, %v4177_v59  ;;  %v7485_v30 = vunpack.i.h.bf16 %v7483_v38  ;;  %v7484_v44 = vunpack.i.l.bf16 %v7483_v38  ;;  %v7488_v51 = vpop.permute.xlu1 %7487 }
 0x6e5   :  { %v7490_v10 = vunpack.i.h.bf16 %v7488_v51  ;;  %v7489_v39 = vunpack.i.l.bf16 %v7488_v51 }
 0x6e6   :  { %v5341_v16 = vsel %vm11701_vm3, %v7484_v44, %v7485_v30  ;;  %6916 = vmatpush1.bf16.msra.mxu0 %v6915_v15  ;;  %vm11716_vm3 = vmmov %vm11714_vm0 }
 0x6e7   :  { %v5342_v45 = vsel %vm11705_vm11, %v7489_v39, %v7490_v10  ;;  %v7125_v37 = vpack.c.bf16 %v7490_v10, %v7485_v30  ;;  %v7493_v49 = vpop.permute.xlu0 %7492  ;;  %vm11718_vm11 = vmmov %vm11714_vm0 }
 0x6e8   :  { %v7128_v28 = vpack.c.bf16 %v5342_v45, %v5341_v16  ;;  %v7495_v4 = vunpack.i.h.bf16 %v7493_v49  ;;  %v7494_v36 = vunpack.i.l.bf16 %v7493_v49  ;;  %v7498_v60 = vpop.permute.xlu1 %7497 }
 0x6e9   :  { %v7500_v8 = vunpack.i.h.bf16 %v7498_v60  ;;  %v7499_v61 = vunpack.i.l.bf16 %v7498_v60  ;;  %7127 = vmatprep.subr.msk.bf16.mxu1 %vm10981_vm6, %v7125_v37 }
 0x6ea   :  { %v4205_v17 = vsel %vm11706_vm9, %v7494_v36, %v7495_v4  ;;  %7129 = vmatpush1.bf16.msra.mxu1 %v7128_v28  ;;  %vm11720_vm9 = vmmov %vm11714_vm0 }
 0x6eb   :  { %v4206_v46 = vsel %vm11707_vm8, %v7499_v61, %v7500_v8  ;;  %v6917_v62 = vpack.c.bf16 %v7500_v8, %v7495_v4  ;;  %v7503_v26 = vpop.permute.xlu0 %7502  ;;  %vm11721_vm8 = vmmov %vm11714_vm0 }
 0x6ec   :  { %v6920_v19 = vpack.c.bf16 %v4206_v46, %v4205_v17  ;;  %v7505_v21 = vunpack.i.h.bf16 %v7503_v26  ;;  %v7504_v12 = vunpack.i.l.bf16 %v7503_v26  ;;  %v7508_v57 = vpop.permute.xlu1 %7507 }
 0x6ed   :  { %v7510_v11 = vunpack.i.h.bf16 %v7508_v57  ;;  %v7509_v7 = vunpack.i.l.bf16 %v7508_v57  ;;  %6919 = vmatprep.subr.msk.bf16.mxu0 %vm10981_vm6, %v6917_v62 }
 0x6ee   :  { %v5343_v55 = vsel %vm11708_vm1, %v7504_v12, %v7505_v21  ;;  %6921 = vmatpush1.bf16.msra.mxu0 %v6920_v19  ;;  %vm11722_vm1 = vmmov %vm11714_vm0 }
 0x6ef   :  { %v5344_v50 = vsel %vm11709_vm2, %v7509_v7, %v7510_v11  ;;  %v7130_v33 = vpack.c.bf16 %v7510_v11, %v7505_v21  ;;  %v5368_v22 = vpop.permute.xlu0 %5367  ;;  %vm11723_vm2 = vmmov %vm11714_vm0 }
 0x6f0   :  { %v7133_v6 = vpack.c.bf16 %v5344_v50, %v5343_v55  ;;  %v5393_v58 = vsel %vm11710_vm15, %v5368_v22, 0.0  ;;  %v5372_v25 = vpop.permute.xlu1 %5371  ;;  %vm11724_vm15 = vmmov %vm11714_vm0 }
 0x6f1   :  { %v5398_v43 = vmul.f32 %v7910_v35, %v5393_v58  ;;  %v5394_v40 = vsel %vm11711_vm7, %v5372_v25, 0.0  ;;  %7132 = vmatprep.subr.msk.bf16.mxu1 %vm10981_vm6, %v7130_v33  ;;  %vm11725_vm7 = vmmov %vm11714_vm0 }
 0x6f2   :  { %v5400_v24 = vmul.f32 %v7910_v35, %v5394_v40  ;;  %7134 = vmatpush1.bf16.msra.mxu1 %v7133_v6 }
 0x6f3   :  { %v7513_v42 = vpop.permute.xlu0 %7512 }
 0x6f4   :  { %v7515_v1 = vunpack.i.h.bf16 %v7513_v42  ;;  %v7514_v41 = vunpack.i.l.bf16 %v7513_v42  ;;  %v7518_v52 = vpop.permute.xlu1 %7517  ;;  %v7135_v27 = vpack.c.bf16 %v5400_v24, %v5398_v43  ;;  %v11728_v42 = vmov 0.0  }
 0x6f5   :  { %v7520_v53 = vunpack.i.h.bf16 %v7518_v52  ;;  %v7519_v56 = vunpack.i.l.bf16 %v7518_v52 }
 0x6f6   :  { %v4207_v3 = vsel %vm11712_vm10, %v7514_v41, %v7515_v1  ;;  %7136 = vmatprep.subr.bf16.mxu1 %v7135_v27  ;;  %vm11726_vm10 = vmmov %vm11714_vm0 }
 0x6f7   :  { %v4208_v29 = vsel %vm11713_vm14, %v7519_v56, %v7520_v53  ;;  %v6922_v34 = vpack.c.bf16 %v7520_v53, %v7515_v1  ;;  %v5366_v5 = vpop.permute.xlu0 %5365  ;;  %vm11727_vm14 = vmmov %vm11714_vm0 }
 0x6f8   :  { %v6925_v47 = vpack.c.bf16 %v4208_v29, %v4207_v3  ;;  %v5381_v14 = vsel %vm11714_vm0, %v5366_v5, %v5368_v22  ;;  %v5370_v9 = vpop.permute.xlu1 %5369 }
 0x6f9   :  { %v5397_v31 = vmul.f32 %v7889_v23, %v5381_v14  ;;  %v5382_v13 = vsel %vm11715_vm13, %v5370_v9, %v5372_v25  ;;  %6924 = vmatprep.subr.msk.bf16.mxu0 %vm10981_vm6, %v6922_v34  ;;  %vm11719_vm6 = vmmov %vm11714_vm0  ;;  %vm11729_vm0 = vcmask 261120  }
 0x6fa   :  { %v5399_v32 = vmul.f32 %v7889_v23, %v5382_v13  ;;  %6926 = vmatpush1.bf16.msra.mxu0 %v6925_v47  ;;  %vm11730_vm13 = vmmov %vm11729_vm0 }
 0x6fb   :  { %v4232_v63 = vpop.permute.xlu0 %4231 }
 0x6fc   :  { %v7137_v59 = vpack.c.bf16 %v5399_v32, %v5397_v31  ;;  %v4257_v18 = vsel %vm11716_vm3, %v4232_v63, 0.0  ;;  %v4236_v0 = vpop.permute.xlu1 %4235 }
 0x6fd   :  { %v4262_v38 = vmul.f32 %v7910_v35, %v4257_v18  ;;  %v4258_v15 = vsel %vm11717_vm5, %v4236_v0, 0.0 }
 0x6fe   :  { %v4264_v30 = vmul.f32 %v7910_v35, %v4258_v15  ;;  %7138 = vmatpush1.bf16.msra.mxu1 %v7137_v59 }
 0x6ff   :  { %v4230_v44 = vpop.permute.xlu0 %4229 }
 0x700   :  { %v4245_v51 = vsel %vm11718_vm11, %v4230_v44, %v4232_v63  ;;  %v4234_v10 = vpop.permute.xlu1 %4233  ;;  %v6927_v39 = vpack.c.bf16 %v4264_v30, %v4262_v38 }
 0x701   :  { %v4261_v16 = vmul.f32 %v7889_v23, %v4245_v51  ;;  %v4246_v20 = vsel %vm11719_vm6, %v4234_v10, %v4236_v0 }
 0x702   :  { %v4263_v45 = vmul.f32 %v7889_v23, %v4246_v20  ;;  %6928 = vmatprep.subr.bf16.mxu0 %v6927_v39 }
 0x703   :  { %v5376_v37 = vpop.permute.xlu0 %5375 }
 0x704   :  { %v6929_v49 = vpack.c.bf16 %v4263_v45, %v4261_v16  ;;  %v5395_v28 = vsel %vm11720_vm9, %v5376_v37, 0.0  ;;  %v5380_v4 = vpop.permute.xlu1 %5379 }
 0x705   :  { %v5402_v36 = vmul.f32 %v7910_v35, %v5395_v28  ;;  %v5396_v60 = vsel %vm11721_vm8, %v5380_v4, 0.0 }
 0x706   :  { %v5404_v8 = vmul.f32 %v7910_v35, %v5396_v60  ;;  %6930 = vmatpush1.bf16.msra.mxu0 %v6929_v49 }
 0x707   :  { %v5374_v61 = vpop.permute.xlu0 %5373 }
 0x708   :  { %v5383_v17 = vsel %vm11722_vm1, %v5374_v61, %v5376_v37  ;;  %v5378_v46 = vpop.permute.xlu1 %5377  ;;  %v7139_v62 = vpack.c.bf16 %v5404_v8, %v5402_v36 }
 0x709   :  { %v5401_v26 = vmul.f32 %v7889_v23, %v5383_v17  ;;  %v5384_v19 = vsel %vm11723_vm2, %v5378_v46, %v5380_v4 }
 0x70a   :  { %v5403_v21 = vmul.f32 %v7889_v23, %v5384_v19  ;;  %7140 = vmatprep.subr.bf16.mxu1 %v7139_v62 }
 0x70b   :  { %v4240_v12 = vpop.permute.xlu0 %4239 }
 0x70c   :  { %v7141_v57 = vpack.c.bf16 %v5403_v21, %v5401_v26  ;;  %v4259_v11 = vsel %vm11724_vm15, %v4240_v12, 0.0  ;;  %v4244_v7 = vpop.permute.xlu1 %4243 }
 0x70d   :  { %v4266_v55 = vmul.f32 %v7910_v35, %v4259_v11  ;;  %v4260_v50 = vsel %vm11725_vm7, %v4244_v7, 0.0  ;;  %v5464_v11 = vld [vmem:[%s11086_s5 + $0x18] sm:$0xf] }
 0x70e   :  { %v4268_v33 = vmul.f32 %v7910_v35, %v4260_v50  ;;  %7142 = vmatpush1.bf16.msra.mxu1 %v7141_v57 }
 0x70f   :  { %v4238_v22 = vpop.permute.xlu0 %4237 }
 0x710   :  { %v4247_v6 = vsel %vm11726_vm10, %v4238_v22, %v4240_v12  ;;  %v4242_v58 = vpop.permute.xlu1 %4241  ;;  %v6931_v25 = vpack.c.bf16 %v4268_v33, %v4266_v55 }
 0x711   :  { %v4265_v43 = vmul.f32 %v7889_v23, %v4247_v6  ;;  %v4248_v40 = vsel %vm11727_vm14, %v4242_v58, %v4244_v7  ;;  %6374 = vmatmul.mubr.f32.vlgmr.msra.gmra.mrb[24].mxu1 %v10871_v48 }
 0x712   :  { %v4267_v24 = vmul.f32 %v7889_v23, %v4248_v40  ;;  %6932 = vmatprep.subr.bf16.mxu0 %v6931_v25  ;;  %6444 = vmatprep.mubr.f32.mxu1 %v11728_v42 }
 0x713   :  { %v5416_v1 = vpop.permute.xlu0 %5415 }
 0x714   :  { %v6933_v41 = vpack.c.bf16 %v4267_v24, %v4265_v43  ;;  %v5441_v35 = vsel %vm1121_vm4, %v5416_v1, 0.0  ;;  %v5420_v52 = vpop.permute.xlu1 %5419 }
 0x715   :  { %v5446_v27 = vmul.f32 %v7953_v2, %v5441_v35  ;;  %v5442_v53 = vsel %vm1121_vm4, %v5420_v52, 0.0 }
 0x716   :  { %v5448_v56 = vmul.f32 %v7953_v2, %v5442_v53  ;;  %6934 = vmatpush1.bf16.msra.mxu0 %v6933_v41 }
 0x717   :  { %v5414_v3 = vpop.permute.xlu0 %5413 }
 0x718   :  { %v5429_v29 = vsel %vm1121_vm4, %v5414_v3, %v5416_v1  ;;  %v5418_v34 = vpop.permute.xlu1 %5417  ;;  %v7143_v23 = vpack.c.bf16 %v5448_v56, %v5446_v27 }
 0x719   :  { %v5445_v5 = vmul.f32 %v7934_v54, %v5429_v29  ;;  %v5430_v47 = vsel %vm1121_vm4, %v5418_v34, %v5420_v52  ;;  %6090 = vmatmul.mubr.f32.vlgmr.msra.gmra.mrb[24].mxu0 %v10871_v48 }
 0x71a   :  { %v5447_v14 = vmul.f32 %v7934_v54, %v5430_v47  ;;  %7144 = vmatprep.subr.bf16.mxu1 %v7143_v23  ;;  %6160 = vmatprep.mubr.f32.mxu0 %v11728_v42 }
 0x71b   :  { %v4280_v9 = vpop.permute.xlu0 %4279 }
 0x71c   :  { %v7145_v31 = vpack.c.bf16 %v5447_v14, %v5445_v5  ;;  %v4305_v13 = vsel %vm1121_vm4, %v4280_v9, 0.0  ;;  %v4284_v32 = vpop.permute.xlu1 %4283 }
 0x71d   :  { %v4310_v63 = vmul.f32 %v7953_v2, %v4305_v13  ;;  %v4306_v59 = vsel %vm1121_vm4, %v4284_v32, 0.0 }
 0x71e   :  { %v4312_v18 = vmul.f32 %v7953_v2, %v4306_v59  ;;  %7146 = vmatpush1.bf16.msra.mxu1 %v7145_v31 }
 0x71f   :  { %v4278_v0 = vpop.permute.xlu0 %4277 }
 0x720   :  { %v4293_v48 = vsel %vm1121_vm4, %v4278_v0, %v4280_v9  ;;  %v4282_v38 = vpop.permute.xlu1 %4281  ;;  %v6935_v15 = vpack.c.bf16 %v4312_v18, %v4310_v63 }
 0x721   :  { %v4309_v30 = vmul.f32 %v7934_v54, %v4293_v48  ;;  %v4294_v44 = vsel %vm1121_vm4, %v4282_v38, %v4284_v32 }
 0x722   :  { %v4311_v51 = vmul.f32 %v7934_v54, %v4294_v44  ;;  %6936 = vmatprep.subr.bf16.mxu0 %v6935_v15 }
 0x723   :  { %v5424_v10 = vpop.permute.xlu0 %5423 }
 0x724   :  { %v6937_v39 = vpack.c.bf16 %v4311_v51, %v4309_v30  ;;  %v5443_v16 = vsel %vm1121_vm4, %v5424_v10, 0.0  ;;  %v5428_v20 = vpop.permute.xlu1 %5427 }
 0x725   :  { %v5450_v45 = vmul.f32 %v7953_v2, %v5443_v16  ;;  %v5444_v37 = vsel %vm1121_vm4, %v5428_v20, 0.0 }
 0x726   :  { %v5452_v49 = vmul.f32 %v7953_v2, %v5444_v37  ;;  %6938 = vmatpush1.bf16.msra.mxu0 %v6937_v39 }
 0x727   :  { %v5422_v28 = vpop.permute.xlu0 %5421 }
 0x728   :  { %v5431_v4 = vsel %vm1121_vm4, %v5422_v28, %v5424_v10  ;;  %v5426_v36 = vpop.permute.xlu1 %5425  ;;  %v7147_v60 = vpack.c.bf16 %v5452_v49, %v5450_v45 }
 0x729   :  { %v5449_v8 = vmul.f32 %v7934_v54, %v5431_v4  ;;  %v5432_v61 = vsel %vm1121_vm4, %v5426_v36, %v5428_v20 }
 0x72a   :  { %v5451_v17 = vmul.f32 %v7934_v54, %v5432_v61  ;;  %7148 = vmatprep.subr.bf16.mxu1 %v7147_v60 }
 0x72b   :  { %v4288_v46 = vpop.permute.xlu0 %4287 }
 0x72c   :  { %v7149_v62 = vpack.c.bf16 %v5451_v17, %v5449_v8  ;;  %v4307_v26 = vsel %vm1121_vm4, %v4288_v46, 0.0  ;;  %v4292_v19 = vpop.permute.xlu1 %4291 }
 0x72d   :  { %v4314_v21 = vmul.f32 %v7953_v2, %v4307_v26  ;;  %v4308_v12 = vsel %vm1121_vm4, %v4292_v19, 0.0 }
 0x72e   :  { %v4316_v57 = vmul.f32 %v7953_v2, %v4308_v12  ;;  %7150 = vmatpush1.bf16.msra.mxu1 %v7149_v62 }
 0x72f   :  { %v4286_v7 = vpop.permute.xlu0 %4285 }
 0x730   :  { %v4295_v55 = vsel %vm1121_vm4, %v4286_v7, %v4288_v46  ;;  %v4290_v50 = vpop.permute.xlu1 %4289  ;;  %v6939_v33 = vpack.c.bf16 %v4316_v57, %v4314_v21 }
 0x731   :  { %v4313_v22 = vmul.f32 %v7934_v54, %v4295_v55  ;;  %v4296_v6 = vsel %vm1121_vm4, %v4290_v50, %v4292_v19  ;;  %6490 = vmatmul.mubr.msk.f32.vlgmr.msra.gmra.mrb[24].mxu1 %vm11729_vm0, %v5464_v11 }
 0x732   :  { %v4315_v58 = vmul.f32 %v7934_v54, %v4296_v6  ;;  %6940 = vmatprep.subr.bf16.mxu0 %v6939_v33 }
 0x734   :  { %v6941_v2 = vpack.c.bf16 %v4315_v58, %v4313_v22 }
 0x736   :  { %6942 = vmatpush1.bf16.msra.mxu0 %v6941_v2 }
 0x739   :  { %6489 = vmatmul.mubr.msk.f32.vlgmr.msra.gmra.mrb[24].mxu0 %vm11730_vm13, %v5464_v11 }
 0x740   :  { %v5869_v40 = vpop.permute.xlu0 %5868 }
 0x804   :  { %v6446_v25 = vpop.f32.mrb[24].mxu1 }
 0x805   :  { %v6448_v43 = vpop.f32.mrb[25].mxu1  ;;  %v7185_v24 = vadd.f32 %v6446_v25, %v5869_v40 }
 0x806   :  { %v7186_v42 = vadd.f32 %v6448_v43, %v5869_v40 }
 0x807   :  { %v6453_v41 = vrot.slane %v7185_v24, 4 }
 0x808   :  { %v6454_v27 = vrot.slane %v7186_v42, 4 }
 0x80c   :  { %v6162_v1 = vpop.f32.mrb[24].mxu0 }
 0x80d   :  { %v7183_v35 = vadd.f32 %v6162_v1, %v5869_v40  ;;  %v6164_v52 = vpop.f32.mrb[25].mxu0 }
 0x80e   :  { %v7184_v53 = vadd.f32 %v6164_v52, %v5869_v40 }
 0x80f   :  { %v6457_v56 = vsel %vm213_vm12, %v7183_v35, %v6453_v41 }
 0x810   :  { %6459 = vst [vmem:[%s11088_s7] sm:$0xff] %v6457_v56  ;;  %v6458_v54 = vsel %vm213_vm12, %v7184_v53, %v6454_v27 }
 0x811   :  { %6460 = vst [vmem:[%s11088_s7 + $0x8] sm:$0xff] %v6458_v54 }

</bundles_post_ra>
